<compile_context>
chip_gen: v6e
topology: v6e:2x2x1
jax: 0.10.0
libtpu: 0.0.40
codegen_flags: <defaults>
</compile_context>

<pallas_src>
import jax
import jax.numpy as jnp
from jax.experimental import pallas as pl
from jax.experimental.pallas import tpu as pltpu


# ---------------------------------------------------------------------------
# Kernels
# ---------------------------------------------------------------------------

def _ffn_resident_kernel(x_ref, w1_ref, b1_ref, w2_ref, b2_ref, o_ref):
    """Weight-resident path. grid = (row_tiles,).  W1/W2 block indices are
    constant across the grid, so Pallas fetches them from HBM once."""
    x = x_ref[...]                                   # native dtype -> MXU full rate
    h = jnp.dot(x, w1_ref[...], preferred_element_type=jnp.float32)
    h = jnp.maximum(h + b1_ref[...].astype(jnp.float32), 0.0)      # ReLU
    out = jnp.dot(h.astype(w2_ref.dtype), w2_ref[...],
                  preferred_element_type=jnp.float32)
    o_ref[...] = (out + b2_ref[...].astype(jnp.float32)).astype(o_ref.dtype)


def _ffn_stream_kernel(x_ref, w1_ref, b1_ref, w2_ref, b2_ref, o_ref, acc_ref):
    """Streaming path. grid = (row_tiles, d_ff_tiles), d_ff last ("arbitrary").
    The wrapper guarantees num_programs(1) >= 2, so the three branches below
    are disjoint (init-by-write / accumulate / fused finalize)."""
    j = pl.program_id(1)
    nj = pl.num_programs(1)

    x = x_ref[...]
    h = jnp.dot(x, w1_ref[...], preferred_element_type=jnp.float32)
    h = jnp.maximum(h + b1_ref[...].astype(jnp.float32), 0.0)
    part = jnp.dot(h.astype(w2_ref.dtype), w2_ref[...],
                   preferred_element_type=jnp.float32)

    @pl.when(j == 0)
    def _():
        acc_ref[...] = part                          # init by write, no zero pass

    @pl.when(jnp.logical_and(j > 0, j < nj - 1))
    def _():
        acc_ref[...] += part

    @pl.when(j == nj - 1)                            # fused finalize: no extra RMW
    def _():
        o_ref[...] = (acc_ref[...] + part
                      + b2_ref[...].astype(jnp.float32)).astype(o_ref.dtype)


# ---------------------------------------------------------------------------
# Tile selection (VMEM-budget driven)
# ---------------------------------------------------------------------------

def _round_up(x, m):
    return (x + m - 1) // m * m


def _legal_tile_m(tm, M):
    """Largest legal row-tile <= tm: either the full row extent M, or a
    multiple of 8 (multiple of 128 once large enough, MXU-friendly)."""
    tm = int(min(tm, M))
    if tm >= M:
        return int(M)
    if tm >= 128:
        return (tm // 128) * 128
    return max(8, (tm // 8) * 8)


def _vmem_budget():
    """(vmem_limit_bytes, tile_budget_bytes) from the actual chip VMEM.
    ~108 MiB on 128 MiB parts (v5e/v6e), ~54 MiB on v7x's 64 MiB."""
    try:
        info = pltpu.get_tpu_info()
        cap = int(getattr(info, "vmem_capacity_bytes", 0)) or (64 << 20)
    except Exception:
        cap = 64 << 20                       # conservative: v7x physical VMEM
    vmem_limit = int(cap * 0.85)
    tile_budget = vmem_limit - (4 << 20)     # headroom for compiler scratch/sems
    return vmem_limit, tile_budget


def _choose_resident_tile_m(M, d_model, d_ff, x_isz, w_isz, o_isz, budget):
    """Return tile_m for the weight-resident path, or None if W1+W2 don't fit."""
    w_bytes = 2 * 2 * d_model * d_ff * w_isz         # W1 + W2, double-buffered
    b_bytes = 2 * (d_ff + d_model) * w_isz
    per_row = 2 * d_model * (x_isz + o_isz)          # x & out tiles, double-buffered
    avail = budget - w_bytes - b_bytes
    if avail < 8 * per_row:
        return None
    tm = _legal_tile_m(min(avail // per_row, 1024), M)
    # Ensure >= 2 row tiles when there are enough rows so the "parallel" axis
    # can shard across v7x's two TensorCores (free here: weights are fetched
    # once regardless of the number of row tiles; no-op cost on v5e/v6e).
    if M >= 256 and -(-M // tm) < 2:
        tm = _legal_tile_m((M + 1) // 2, M)
    return tm


def _choose_streaming_tiles(M, d_model, d_ff, x_isz, w_isz, o_isz, budget):
    """Return (tile_m, tile_ff) for the streaming path, or None.
    tile_m is maximized first (weight HBM passes scale as ceil(M / tile_m));
    among equal pass counts prefer the larger d_ff slab."""
    divisors = [d for d in range(128, d_ff, 128) if d_ff % d == 0]
    if not divisors:
        return None
    per_row = d_model * (2 * (x_isz + o_isz) + 4)    # x/out (x2 buffers) + f32 acc
    best_key, best = None, None
    for tff in sorted(divisors, reverse=True):
        w_bytes = 2 * 2 * d_model * tff * w_isz      # W1/W2 slabs, double-buffered
        b_bytes = 2 * (tff + d_model) * w_isz
        avail = budget - w_bytes - b_bytes
        if avail < 8 * per_row:
            continue
        tm = _legal_tile_m(min(avail // per_row, 2048), M)
        passes = -(-M // tm)
        key = (passes, -tff)
        if best_key is None or key < best_key:
            best_key, best = key, (tm, tff)
    return best


# ---------------------------------------------------------------------------
# Public wrapper
# ---------------------------------------------------------------------------

def position_wise_feed_forward(x, w1, b1, w2, b2):
    """x: (B, S, d_model) -> (B, S, d_model); out = relu(x @ w1 + b1) @ w2 + b2."""
    B, S, d_model = x.shape
    d_ff = w1.shape[1]
    M = B * S
    x2d = x.reshape(M, d_model)

    x_isz = x.dtype.itemsize
    w_isz = w1.dtype.itemsize
    o_isz = x.dtype.itemsize

    vmem_limit, budget = _vmem_budget()

    tile_m = _choose_resident_tile_m(M, d_model, d_ff, x_isz, w_isz, o_isz, budget)
    resident = tile_m is not None
    tile_ff = d_ff
    if not resident:
        cfg = _choose_streaming_tiles(M, d_model, d_ff, x_isz, w_isz, o_isz, budget)
        if cfg is None and d_ff % 128 != 0:
            # Zero-pad the hidden dim so it has a multiple-of-128 divisor:
            # padded hidden units contribute relu(0 + 0) @ 0 == 0 to the output.
            d_ff_pad = _round_up(d_ff, 128)
            w1 = jnp.pad(w1, ((0, 0), (0, d_ff_pad - d_ff)))
            b1 = jnp.pad(b1, ((0, d_ff_pad - d_ff),))
            w2 = jnp.pad(w2, ((0, d_ff_pad - d_ff), (0, 0)))
            d_ff = d_ff_pad
            cfg = _choose_streaming_tiles(M, d_model, d_ff, x_isz, w_isz, o_isz, budget)
        if cfg is None:
            raise ValueError(
                "PositionWiseFeedForward: d_model/d_ff too large for VMEM budget")
        tile_m, tile_ff = cfg

    b1_2d = b1.reshape(1, d_ff)
    b2_2d = b2.reshape(1, d_model)

    num_row_tiles = -(-M // tile_m)
    weight_passes = 1 if resident else num_row_tiles   # honest HBM traffic estimate
    flops = 4 * M * d_model * d_ff                     # two matmuls, 2*M*K*N each
    bytes_accessed = int(
        M * d_model * (x_isz + o_isz)
        + weight_passes * (int(w1.size) + int(b1.size) + int(w2.size)) * w_isz
        + int(b2.size) * w_isz)
    cost = pl.CostEstimate(flops=int(flops), transcendentals=0,
                           bytes_accessed=bytes_accessed)

    if resident:
        out2d = pl.pallas_call(
            _ffn_resident_kernel,
            out_shape=jax.ShapeDtypeStruct((M, d_model), x.dtype),
            grid_spec=pltpu.PrefetchScalarGridSpec(
                num_scalar_prefetch=0,
                grid=(num_row_tiles,),
                in_specs=[
                    pl.BlockSpec((tile_m, d_model), lambda i: (i, 0)),
                    pl.BlockSpec((d_model, d_ff), lambda i: (0, 0)),   # resident
                    pl.BlockSpec((1, d_ff), lambda i: (0, 0)),
                    pl.BlockSpec((d_ff, d_model), lambda i: (0, 0)),   # resident
                    pl.BlockSpec((1, d_model), lambda i: (0, 0)),
                ],
                out_specs=pl.BlockSpec((tile_m, d_model), lambda i: (i, 0)),
            ),
            compiler_params=pltpu.CompilerParams(
                dimension_semantics=("parallel",),
                vmem_limit_bytes=vmem_limit),
            cost_estimate=cost,
        )(x2d, w1, b1_2d, w2, b2_2d)
    else:
        assert d_ff % tile_ff == 0 and d_ff // tile_ff >= 2
        out2d = pl.pallas_call(
            _ffn_stream_kernel,
            out_shape=jax.ShapeDtypeStruct((M, d_model), x.dtype),
            grid_spec=pltpu.PrefetchScalarGridSpec(
                num_scalar_prefetch=0,
                grid=(num_row_tiles, d_ff // tile_ff),
                in_specs=[
                    pl.BlockSpec((tile_m, d_model), lambda i, j: (i, 0)),
                    pl.BlockSpec((d_model, tile_ff), lambda i, j: (0, j)),
                    pl.BlockSpec((1, tile_ff), lambda i, j: (0, j)),
                    pl.BlockSpec((tile_ff, d_model), lambda i, j: (j, 0)),
                    pl.BlockSpec((1, d_model), lambda i, j: (0, 0)),
                ],
                out_specs=pl.BlockSpec((tile_m, d_model), lambda i, j: (i, 0)),
                scratch_shapes=[pltpu.VMEM((tile_m, d_model), jnp.float32)],
            ),
            compiler_params=pltpu.CompilerParams(
                dimension_semantics=("parallel", "arbitrary"),
                vmem_limit_bytes=vmem_limit),
            cost_estimate=cost,
        )(x2d, w1, b1_2d, w2, b2_2d)

    return out2d.reshape(B, S, d_model)


def init_params(key, d_model, d_ff, dtype=jnp.float32):
    """Deterministic init mimicking nn.Linear default (uniform +-1/sqrt(fan_in)).
    Stored as (in_features, out_features) so the kernel computes x @ W."""
    k1, k2, k3, k4 = jax.random.split(key, 4)
    bound1 = 1.0 / (d_model ** 0.5)
    bound2 = 1.0 / (d_ff ** 0.5)
    w1 = jax.random.uniform(k1, (d_model, d_ff), dtype, -bound1, bound1)
    b1 = jax.random.uniform(k2, (d_ff,), dtype, -bound1, bound1)
    w2 = jax.random.uniform(k3, (d_ff, d_model), dtype, -bound2, bound2)
    b2 = jax.random.uniform(k4, (d_model,), dtype, -bound2, bound2)
    return w1, b1, w2, b2


if __name__ == "__main__":
    # Module-default feature sizes, small batch/seq: d_model=512, d_ff=2048
    B, S, d_model, d_ff = 2, 8, 512, 2048

    key = jax.random.PRNGKey(0)
    kx, kp = jax.random.split(key)
    x = jax.random.normal(kx, (B, S, d_model), jnp.float32)
    w1, b1, w2, b2 = init_params(kp, d_model, d_ff)

    out = position_wise_feed_forward(x, w1, b1, w2, b2)
    out = jax.block_until_ready(out)

    # Pure-JAX reference (highest precision so the comparison is fair for f32)
    with jax.default_matmul_precision("highest"):
        ref = jnp.maximum(x @ w1 + b1, 0.0) @ w2 + b2

    assert out.shape == (B, S, d_model)
    assert jnp.allclose(out, ref, atol=1e-3, rtol=1e-3), "mismatch vs reference"

    print("KERNEL_OK")
</pallas_src>

<mosaic_0001>
module attributes {stable_mosaic.version = 11 : i64} {
  func.func @_ffn_resident_kernel(%arg0: i32, %arg1: memref<16x512xf32, #tpu.memory_space<vmem>>, %arg2: memref<512x2048xf32, #tpu.memory_space<vmem>>, %arg3: memref<1x2048xf32, #tpu.memory_space<vmem>>, %arg4: memref<2048x512xf32, #tpu.memory_space<vmem>>, %arg5: memref<1x512xf32, #tpu.memory_space<vmem>>, %arg6: memref<16x512xf32, #tpu.memory_space<vmem>>) attributes {dimension_semantics = [#tpu.dimension_semantics<parallel>], iteration_bounds = array<i64: 1>, scalar_prefetch = 0 : i64, scratch_operands = 0 : i64, tpu.core_type = #tpu.core_type<tc>, window_params = [{transform_indices = @transform_0, window_bounds = array<i64: 16, 512>}, {pipeline_mode = #tpu.pipeline_mode<synchronous>, transform_indices = @transform_1, window_bounds = array<i64: 512, 2048>}, {pipeline_mode = #tpu.pipeline_mode<synchronous>, transform_indices = @transform_2, window_bounds = array<i64: 1, 2048>}, {pipeline_mode = #tpu.pipeline_mode<synchronous>, transform_indices = @transform_3, window_bounds = array<i64: 2048, 512>}, {pipeline_mode = #tpu.pipeline_mode<synchronous>, transform_indices = @transform_4, window_bounds = array<i64: 1, 512>}, {transform_indices = @transform_5, window_bounds = array<i64: 16, 512>}]} {
    %c0 = arith.constant 0 : index
    %c0_0 = arith.constant 0 : index
    %0 = vector.load %arg1[%c0, %c0_0] : memref<16x512xf32, #tpu.memory_space<vmem>>, vector<16x512xf32>
    %c0_1 = arith.constant 0 : index
    %c0_2 = arith.constant 0 : index
    %1 = vector.load %arg2[%c0_1, %c0_2] : memref<512x2048xf32, #tpu.memory_space<vmem>>, vector<512x2048xf32>
    %cst = arith.constant dense<0.000000e+00> : vector<16x2048xf32>
    %2 = tpu.matmul %0, %1, %cst {dimension_numbers = #tpu.dot_dimension_numbers<[1], [0], [0], [1], [0, 0, 1, 1], [], []>} : vector<16x512xf32>, vector<512x2048xf32>, vector<16x2048xf32> -> vector<16x2048xf32>
    %c0_3 = arith.constant 0 : index
    %c0_4 = arith.constant 0 : index
    %3 = vector.load %arg3[%c0_3, %c0_4] : memref<1x2048xf32, #tpu.memory_space<vmem>>, vector<1x2048xf32>
    %4 = vector.broadcast %3 : vector<1x2048xf32> to vector<16x2048xf32>
    %5 = arith.addf %2, %4 : vector<16x2048xf32>
    %cst_5 = arith.constant 0.000000e+00 : f32
    %6 = vector.broadcast %cst_5 : f32 to vector<16x2048xf32>
    %7 = arith.maximumf %5, %6 : vector<16x2048xf32>
    %c0_6 = arith.constant 0 : index
    %c0_7 = arith.constant 0 : index
    %8 = vector.load %arg4[%c0_6, %c0_7] : memref<2048x512xf32, #tpu.memory_space<vmem>>, vector<2048x512xf32>
    %cst_8 = arith.constant dense<0.000000e+00> : vector<16x512xf32>
    %9 = tpu.matmul %7, %8, %cst_8 {dimension_numbers = #tpu.dot_dimension_numbers<[1], [0], [0], [1], [0, 0, 1, 1], [], []>} : vector<16x2048xf32>, vector<2048x512xf32>, vector<16x512xf32> -> vector<16x512xf32>
    %c0_9 = arith.constant 0 : index
    %c0_10 = arith.constant 0 : index
    %10 = vector.load %arg5[%c0_9, %c0_10] : memref<1x512xf32, #tpu.memory_space<vmem>>, vector<1x512xf32>
    %11 = vector.broadcast %10 : vector<1x512xf32> to vector<16x512xf32>
    %12 = arith.addf %9, %11 : vector<16x512xf32>
    %c0_11 = arith.constant 0 : index
    %c0_12 = arith.constant 0 : index
    %13 = vector.load %arg6[%c0_11, %c0_12] : memref<16x512xf32, #tpu.memory_space<vmem>>, vector<16x512xf32>
    tpu.vector_store %arg6[%c0_11, %c0_12], %12 {strides = array<i32>} : memref<16x512xf32, #tpu.memory_space<vmem>>, vector<16x512xf32>,
    return
  }
  func.func @transform_0(%arg0: i32) -> (i32, i32) {
    %c0_i32 = arith.constant 0 : i32
    %c0_i32_0 = arith.constant 0 : i32
    return %arg0, %c0_i32 : i32, i32
  }
  func.func @transform_1(%arg0: i32) -> (i32, i32) {
    %c0_i32 = arith.constant 0 : i32
    %c0_i32_0 = arith.constant 0 : i32
    %c0_i32_1 = arith.constant 0 : i32
    return %c0_i32, %c0_i32_0 : i32, i32
  }
  func.func @transform_2(%arg0: i32) -> (i32, i32) {
    %c0_i32 = arith.constant 0 : i32
    %c0_i32_0 = arith.constant 0 : i32
    %c0_i32_1 = arith.constant 0 : i32
    return %c0_i32, %c0_i32_0 : i32, i32
  }
  func.func @transform_3(%arg0: i32) -> (i32, i32) {
    %c0_i32 = arith.constant 0 : i32
    %c0_i32_0 = arith.constant 0 : i32
    %c0_i32_1 = arith.constant 0 : i32
    return %c0_i32, %c0_i32_0 : i32, i32
  }
  func.func @transform_4(%arg0: i32) -> (i32, i32) {
    %c0_i32 = arith.constant 0 : i32
    %c0_i32_0 = arith.constant 0 : i32
    %c0_i32_1 = arith.constant 0 : i32
    return %c0_i32, %c0_i32_0 : i32, i32
  }
  func.func @transform_5(%arg0: i32) -> (i32, i32) {
    %c0_i32 = arith.constant 0 : i32
    %c0_i32_0 = arith.constant 0 : i32
    return %arg0, %c0_i32 : i32, i32
  }
}

</mosaic_0001>

<bundles_post_ra>
// kernel: tpu_custom_call.1
= control target key start
LH: loop header
LB: loop body
LE: loop exit
PB: predicated region body
PF: predicated region fallthrough
CT: control target
= control target key end

     0   :  { %10 = vsyncpa [#allocation3], 0  ;;  %s5629_s0 = inlined_call_operand.hbm [shape: f32[16,512], index: 0, kind: input, shape index: {}]   ;;  %s5630_s1 = inlined_call_operand.hbm [shape: f32[512,2048], index: 1, kind: input, shape index: {}]   ;;  %s5631_s2 = inlined_call_operand.hbm [shape: f32[1,2048], index: 2, kind: input, shape index: {}]   ;;  %s5632_s3 = inlined_call_operand.hbm [shape: f32[2048,512], index: 3, kind: input, shape index: {}]   ;;  %s5633_s4 = inlined_call_operand.hbm [shape: f32[1,512], index: 4, kind: input, shape index: {}]   ;;  %s5634_s5 = inlined_call_operand.hbm [shape: f32[16,512], index: 5, kind: output, shape index: {}]  }
   0x1   :  { %11 = vsyncpa [#allocation6], 0 }
   0x2   :  { %12 = vsyncpa [#allocation9], 0 }
   0x3   :  { %13 = vsyncpa [#allocation4], 0  ;;  %s4937_s18 = smov [#allocation5]  }
   0x4   :  { %s31_s19 = sshll.u32 %s4937_s18, 4  ;;  %s32_s19 = int_to_ptr.vmem [resolvable:$true] %s31_s19 }
   0x5   :  { %s4817_s20 = scalar_lea.vmem %s32_s19, 131072  ;;  %p4822_p1 = scmp.lt.s32.totalorder %s32_s19, %s32_s19 }
   0x6   :  { %p4818_p0 = scmp.ne.s32.totalorder %s32_s19, %s4817_s20  ;;  %p4823_p2 = scmp.lt.s32.totalorder %s4817_s20, %s4817_s20 }
   0x8   :  { %p4824_p3 = por %p4823_p2, %p4822_p1 }
   0xa   :  { %p4825_p4 = pnand %p4824_p3, %p4818_p0 }
   0xc   :  { %4828 = shalt.err (!%p4825_p4)
}
   0xd   :  { %s4938_s21 = smov 2048   ;;  %s4939_s22 = smov 128  }
   0xe   :  { %37 = dma.hbm_to_vmem [thread:$0]  %s5630_s1, 131072, %s32_s19, [#allocation6], %s4938_s21, %s4938_s21, %s4939_s22  }
   0xf   :  { %s4940_s25 = smov [#allocation8]   ;;  %s4941_s27 = smov [#allocation2]  }
  0x10   :  { %s53_s26 = sshll.u32 %s4940_s25, 4  ;;  %s19_s28 = sshll.u32 %s4941_s27, 4  ;;  %s54_s26 = int_to_ptr.vmem [resolvable:$true] %s53_s26  ;;  %s20_s28 = int_to_ptr.vmem [resolvable:$true] %s19_s28 }
  0x11   :  { %s4837_s29 = scalar_lea.vmem %s54_s26, 131072  ;;  %p4842_p6 = scmp.lt.s32.totalorder %s54_s26, %s54_s26 }
  0x12   :  { %p4838_p5 = scmp.ne.s32.totalorder %s54_s26, %s4837_s29  ;;  %p4843_p7 = scmp.lt.s32.totalorder %s4837_s29, %s4837_s29 }
  0x14   :  { %p4844_p8 = por %p4843_p7, %p4842_p6 }
  0x16   :  { %p4845_p9 = pnand %p4844_p8, %p4838_p5 }
  0x18   :  { %4848 = shalt.err (!%p4845_p9)
}
  0x19   :  { %s4942_s30 = smov 512   ;;  %s4943_s6 = smov 32  }
  0x1a   :  { %59 = dma.hbm_to_vmem [thread:$0]  %s5632_s3, 131072, %s54_s26, [#allocation9], %s4942_s30, %s4942_s30, %s4943_s6  }
  0x1b   :  { %s4857_s1 = scalar_lea.vmem %s20_s28, 1024  ;;  %p4862_p11 = scmp.lt.s32.totalorder %s20_s28, %s20_s28 }
  0x1c   :  { %p4858_p10 = scmp.ne.s32.totalorder %s20_s28, %s4857_s1  ;;  %p4863_p12 = scmp.lt.s32.totalorder %s4857_s1, %s4857_s1 }
  0x1e   :  { %p4864_p13 = por %p4863_p12, %p4862_p11 }
  0x20   :  { %p4865_p0 = pnand %p4864_p13, %p4858_p10 }
  0x22   :  { %4868 = shalt.err (!%p4865_p0)
}
  0x23   :  { %25 = dma.hbm_to_vmem [thread:$0]  %s5629_s0, 1024, %s20_s28, [#allocation3], %s4942_s30, %s4942_s30, %s4943_s6  }
  0x24   :  { %s4944_s11 = smov [#allocation7]   ;;  %s4945_s13 = smov [#allocation10]  }
  0x25   :  { %s44_s12 = sshll.u32 %s4944_s11, 4  ;;  %s66_s3 = sshll.u32 %s4945_s13, 4  ;;  %s45_s12 = int_to_ptr.vmem [resolvable:$true] %s44_s12  ;;  %s67_s3 = int_to_ptr.vmem [resolvable:$true] %s66_s3 }
  0x26   :  { %s4877_s14 = scalar_lea.vmem %s45_s12, 256  ;;  %p4882_p2 = scmp.lt.s32.totalorder %s45_s12, %s45_s12 }
  0x27   :  { %p4878_p1 = scmp.ne.s32.totalorder %s45_s12, %s4877_s14  ;;  %p4883_p3 = scmp.lt.s32.totalorder %s4877_s14, %s4877_s14 }
  0x29   :  { %p4884_p4 = por %p4883_p3, %p4882_p2 }
  0x2b   :  { %p4885_p5 = pnand %p4884_p4, %p4878_p1 }
  0x2d   :  { %4888 = shalt.err (!%p4885_p5)
}
  0x2e   :  { %47 = dma.hbm_to_vmem [thread:$0]  %s5631_s2, 256, %s45_s12, [#allocation6]  }
  0x2f   :  { %s4897_s17 = scalar_lea.vmem %s67_s3, 64  ;;  %p4902_p7 = scmp.lt.s32.totalorder %s67_s3, %s67_s3 }
  0x30   :  { %p4898_p6 = scmp.ne.s32.totalorder %s67_s3, %s4897_s17  ;;  %p4903_p8 = scmp.lt.s32.totalorder %s4897_s17, %s4897_s17 }
  0x32   :  { %p4904_p9 = por %p4903_p8, %p4902_p7 }
  0x34   :  { %p4905_p10 = pnand %p4904_p9, %p4898_p6 }
  0x36   :  { %4908 = shalt.err (!%p4905_p10)
}
  0x37   :  { %69 = dma.hbm_to_vmem [thread:$0]  %s5633_s4, 64, %s67_s3, [#allocation9]  }
  0x38   :  { %4929 = dma.done.wait [#allocation3], 1024  }
  0x39   :  { %4930 = vsyncadd [#allocation3], 4294966272 }
  0x3a   :  { %4931 = dma.done.wait [#allocation6], 131328  }
  0x3b   :  { %4932 = vsyncadd [#allocation6], 4294835968 }
  0x3c   :  { %4933 = dma.done.wait [#allocation9], 131136  }
  0x3d   :  { %4934 = vsyncadd [#allocation9], 4294836160  ;;  %v334_v0 = vld [vmem:[#allocation5 + $0x788] sm:$0xff]  ;;  %v333_v2 = vld [vmem:[#allocation5 + $0x780] sm:$0xff]  ;;  %s4946_s2 = smov [#allocation11]  }
  0x3e   :  { %v846_v1 = vld [vmem:[#allocation5 + $0x1788] sm:$0xff]  ;;  %1201 = vmatprep.subr.mxu0 %v334_v0  ;;  %v845_v3 = vld [vmem:[#allocation5 + $0x1780] sm:$0xff]  ;;  %s4756_s4 = sshll.u32 %s4946_s2, 4  ;;  %s4757_s4 = int_to_ptr.vmem [resolvable:$true] %s4756_s4 }
  0x3f   :  { %1278 = vmatprep.subr.mxu1 %v846_v1  ;;  %v318_v4 = vld [vmem:[#allocation5 + $0x708] sm:$0xff]  ;;  %1202 = vmatpush1.msra.mxu0 %v333_v2  ;;  %v317_v6 = vld [vmem:[#allocation5 + $0x700] sm:$0xff]  ;;  %s4909_s19 = scalar_lea.vmem %s4757_s4, 1024  ;;  %p4914_p12 = scmp.lt.s32.totalorder %s4757_s4, %s4757_s4 }
  0x40   :  { %v830_v5 = vld [vmem:[#allocation5 + $0x1708] sm:$0xff]  ;;  %1279 = vmatpush1.msra.mxu1 %v845_v3  ;;  %v829_v7 = vld [vmem:[#allocation5 + $0x1700] sm:$0xff]  ;;  %1203 = vmatprep.subr.mxu0 %v318_v4  ;;  %p4910_p11 = scmp.ne.s32.totalorder %s4757_s4, %s4909_s19  ;;  %p4915_p13 = scmp.lt.s32.totalorder %s4909_s19, %s4909_s19 }
  0x41   :  { %v302_v8 = vld [vmem:[#allocation5 + $0x688] sm:$0xff]  ;;  %1280 = vmatprep.subr.mxu1 %v830_v5  ;;  %v301_v10 = vld [vmem:[#allocation5 + $0x680] sm:$0xff]  ;;  %1204 = vmatpush1.msra.mxu0 %v317_v6 }
  0x42   :  { %v814_v9 = vld [vmem:[#allocation5 + $0x1688] sm:$0xff]  ;;  %v813_v11 = vld [vmem:[#allocation5 + $0x1680] sm:$0xff]  ;;  %1281 = vmatpush1.msra.mxu1 %v829_v7  ;;  %1205 = vmatprep.subr.mxu0 %v302_v8  ;;  %p4916_p0 = por %p4915_p13, %p4914_p12 }
  0x43   :  { %v286_v12 = vld [vmem:[#allocation5 + $0x608] sm:$0xff]  ;;  %1282 = vmatprep.subr.mxu1 %v814_v9  ;;  %v285_v14 = vld [vmem:[#allocation5 + $0x600] sm:$0xff]  ;;  %1206 = vmatpush1.msra.mxu0 %v301_v10 }
  0x44   :  { %v798_v13 = vld [vmem:[#allocation5 + $0x1608] sm:$0xff]  ;;  %v797_v15 = vld [vmem:[#allocation5 + $0x1600] sm:$0xff]  ;;  %1283 = vmatpush1.msra.mxu1 %v813_v11  ;;  %1207 = vmatprep.subr.mxu0 %v286_v12  ;;  %p4917_p1 = pnand %p4916_p0, %p4910_p11 }
  0x45   :  { %v270_v16 = vld [vmem:[#allocation5 + $0x588] sm:$0xff]  ;;  %1284 = vmatprep.subr.mxu1 %v798_v13  ;;  %v269_v18 = vld [vmem:[#allocation5 + $0x580] sm:$0xff]  ;;  %1208 = vmatpush1.msra.mxu0 %v285_v14 }
  0x46   :  { %v782_v17 = vld [vmem:[#allocation5 + $0x1588] sm:$0xff]  ;;  %v781_v19 = vld [vmem:[#allocation5 + $0x1580] sm:$0xff]  ;;  %1285 = vmatpush1.msra.mxu1 %v797_v15  ;;  %1209 = vmatprep.subr.mxu0 %v270_v16 }
  0x47   :  { %v254_v20 = vld [vmem:[#allocation5 + $0x508] sm:$0xff]  ;;  %1286 = vmatprep.subr.mxu1 %v782_v17  ;;  %v253_v22 = vld [vmem:[#allocation5 + $0x500] sm:$0xff]  ;;  %1210 = vmatpush1.msra.mxu0 %v269_v18 }
  0x48   :  { %v766_v21 = vld [vmem:[#allocation5 + $0x1508] sm:$0xff]  ;;  %v765_v23 = vld [vmem:[#allocation5 + $0x1500] sm:$0xff]  ;;  %1287 = vmatpush1.msra.mxu1 %v781_v19  ;;  %1211 = vmatprep.subr.mxu0 %v254_v20 }
  0x49   :  { %v238_v24 = vld [vmem:[#allocation5 + $0x488] sm:$0xff]  ;;  %1288 = vmatprep.subr.mxu1 %v766_v21  ;;  %v237_v26 = vld [vmem:[#allocation5 + $0x480] sm:$0xff]  ;;  %1212 = vmatpush1.msra.mxu0 %v253_v22 }
  0x4a   :  { %v750_v25 = vld [vmem:[#allocation5 + $0x1488] sm:$0xff]  ;;  %v749_v27 = vld [vmem:[#allocation5 + $0x1480] sm:$0xff]  ;;  %1289 = vmatpush1.msra.mxu1 %v765_v23  ;;  %1213 = vmatprep.subr.mxu0 %v238_v24 }
  0x4b   :  { %v222_v28 = vld [vmem:[#allocation5 + $0x408] sm:$0xff]  ;;  %1290 = vmatprep.subr.mxu1 %v750_v25  ;;  %v221_v30 = vld [vmem:[#allocation5 + $0x400] sm:$0xff]  ;;  %1214 = vmatpush1.msra.mxu0 %v237_v26 }
  0x4c   :  { %v734_v29 = vld [vmem:[#allocation5 + $0x1408] sm:$0xff]  ;;  %v733_v31 = vld [vmem:[#allocation5 + $0x1400] sm:$0xff]  ;;  %1291 = vmatpush1.msra.mxu1 %v749_v27  ;;  %1215 = vmatprep.subr.mxu0 %v222_v28 }
  0x4d   :  { %v206_v32 = vld [vmem:[#allocation5 + $0x388] sm:$0xff]  ;;  %1292 = vmatprep.subr.mxu1 %v734_v29  ;;  %v205_v34 = vld [vmem:[#allocation5 + $0x380] sm:$0xff]  ;;  %1216 = vmatpush1.msra.mxu0 %v221_v30 }
  0x4e   :  { %v718_v33 = vld [vmem:[#allocation5 + $0x1388] sm:$0xff]  ;;  %v717_v35 = vld [vmem:[#allocation5 + $0x1380] sm:$0xff]  ;;  %1293 = vmatpush1.msra.mxu1 %v733_v31  ;;  %1217 = vmatprep.subr.mxu0 %v206_v32 }
  0x4f   :  { %v190_v36 = vld [vmem:[#allocation5 + $0x308] sm:$0xff]  ;;  %1294 = vmatprep.subr.mxu1 %v718_v33  ;;  %v189_v38 = vld [vmem:[#allocation5 + $0x300] sm:$0xff]  ;;  %1218 = vmatpush1.msra.mxu0 %v205_v34 }
  0x50   :  { %v702_v37 = vld [vmem:[#allocation5 + $0x1308] sm:$0xff]  ;;  %v701_v39 = vld [vmem:[#allocation5 + $0x1300] sm:$0xff]  ;;  %1295 = vmatpush1.msra.mxu1 %v717_v35  ;;  %1219 = vmatprep.subr.mxu0 %v190_v36 }
  0x51   :  { %v174_v40 = vld [vmem:[#allocation5 + $0x288] sm:$0xff]  ;;  %1296 = vmatprep.subr.mxu1 %v702_v37  ;;  %v173_v42 = vld [vmem:[#allocation5 + $0x280] sm:$0xff]  ;;  %1220 = vmatpush1.msra.mxu0 %v189_v38 }
  0x52   :  { %v686_v41 = vld [vmem:[#allocation5 + $0x1288] sm:$0xff]  ;;  %v685_v43 = vld [vmem:[#allocation5 + $0x1280] sm:$0xff]  ;;  %1297 = vmatpush1.msra.mxu1 %v701_v39  ;;  %1221 = vmatprep.subr.mxu0 %v174_v40 }
  0x53   :  { %v158_v44 = vld [vmem:[#allocation5 + $0x208] sm:$0xff]  ;;  %1298 = vmatprep.subr.mxu1 %v686_v41  ;;  %v157_v46 = vld [vmem:[#allocation5 + $0x200] sm:$0xff]  ;;  %1222 = vmatpush1.msra.mxu0 %v173_v42 }
  0x54   :  { %v670_v45 = vld [vmem:[#allocation5 + $0x1208] sm:$0xff]  ;;  %v669_v47 = vld [vmem:[#allocation5 + $0x1200] sm:$0xff]  ;;  %1299 = vmatpush1.msra.mxu1 %v685_v43  ;;  %1223 = vmatprep.subr.mxu0 %v158_v44 }
  0x55   :  { %v142_v48 = vld [vmem:[#allocation5 + $0x188] sm:$0xff]  ;;  %1300 = vmatprep.subr.mxu1 %v670_v45  ;;  %v141_v50 = vld [vmem:[#allocation5 + $0x180] sm:$0xff]  ;;  %1224 = vmatpush1.msra.mxu0 %v157_v46 }
  0x56   :  { %v654_v49 = vld [vmem:[#allocation5 + $0x1188] sm:$0xff]  ;;  %v653_v51 = vld [vmem:[#allocation5 + $0x1180] sm:$0xff]  ;;  %1301 = vmatpush1.msra.mxu1 %v669_v47  ;;  %1225 = vmatprep.subr.mxu0 %v142_v48 }
  0x57   :  { %v126_v52 = vld [vmem:[#allocation5 + $0x108] sm:$0xff]  ;;  %1302 = vmatprep.subr.mxu1 %v654_v49  ;;  %v125_v54 = vld [vmem:[#allocation5 + $0x100] sm:$0xff]  ;;  %1226 = vmatpush1.msra.mxu0 %v141_v50 }
  0x58   :  { %v638_v53 = vld [vmem:[#allocation5 + $0x1108] sm:$0xff]  ;;  %v637_v55 = vld [vmem:[#allocation5 + $0x1100] sm:$0xff]  ;;  %1303 = vmatpush1.msra.mxu1 %v653_v51  ;;  %1227 = vmatprep.subr.mxu0 %v126_v52 }
  0x59   :  { %v110_v56 = vld [vmem:[#allocation5 + $0x88] sm:$0xff]  ;;  %1304 = vmatprep.subr.mxu1 %v638_v53  ;;  %v109_v58 = vld [vmem:[#allocation5 + $0x80] sm:$0xff]  ;;  %1228 = vmatpush1.msra.mxu0 %v125_v54 }
  0x5a   :  { %v622_v57 = vld [vmem:[#allocation5 + $0x1088] sm:$0xff]  ;;  %v621_v59 = vld [vmem:[#allocation5 + $0x1080] sm:$0xff]  ;;  %1305 = vmatpush1.msra.mxu1 %v637_v55  ;;  %1229 = vmatprep.subr.mxu0 %v110_v56 }
  0x5b   :  { %v94_v60 = vld [vmem:[#allocation5 + $0x8] sm:$0xff]  ;;  %1306 = vmatprep.subr.mxu1 %v622_v57  ;;  %v93_v62 = vld [vmem:[#allocation5] sm:$0xff]  ;;  %1230 = vmatpush1.msra.mxu0 %v109_v58 }
  0x5c   :  { %v606_v61 = vld [vmem:[#allocation5 + $0x1008] sm:$0xff]  ;;  %v605_v63 = vld [vmem:[#allocation5 + $0x1000] sm:$0xff]  ;;  %1307 = vmatpush1.msra.mxu1 %v621_v59  ;;  %1231 = vmatprep.subr.mxu0 %v94_v60 }
  0x5d   :  { %v590_v0 = vld [vmem:[#allocation5 + $0xf88] sm:$0xff]  ;;  %1308 = vmatprep.subr.mxu1 %v606_v61  ;;  %v589_v2 = vld [vmem:[#allocation5 + $0xf80] sm:$0xff]  ;;  %1232 = vmatpush1.msra.mxu0 %v93_v62 }
  0x5e   :  { %v1102_v1 = vld [vmem:[#allocation5 + $0x1f88] sm:$0xff]  ;;  %v1101_v3 = vld [vmem:[#allocation5 + $0x1f80] sm:$0xff]  ;;  %1309 = vmatpush1.msra.mxu1 %v605_v63  ;;  %1233 = vmatprep.subr.mxu0 %v590_v0 }
  0x5f   :  { %v574_v4 = vld [vmem:[#allocation5 + $0xf08] sm:$0xff]  ;;  %1310 = vmatprep.subr.mxu1 %v1102_v1  ;;  %v573_v6 = vld [vmem:[#allocation5 + $0xf00] sm:$0xff]  ;;  %1234 = vmatpush2.msra.mxu0 %v589_v2  ;;  %v5002_v2 = vld [vmem:[#allocation2 + $0x18] sm:$0xff] }
  0x60   :  { %v1086_v5 = vld [vmem:[#allocation5 + $0x1f08] sm:$0xff]  ;;  %v1085_v7 = vld [vmem:[#allocation5 + $0x1f00] sm:$0xff]  ;;  %1311 = vmatpush2.msra.mxu1 %v1101_v3  ;;  %1235 = vmatprep.subr.mxu0 %v574_v4  ;;  %v336_v3 = vld [vmem:[#allocation5 + $0x798] sm:$0xff] }
  0x61   :  { %v558_v8 = vld [vmem:[#allocation5 + $0xe88] sm:$0xff]  ;;  %1312 = vmatprep.subr.mxu1 %v1086_v5  ;;  %v557_v10 = vld [vmem:[#allocation5 + $0xe80] sm:$0xff]  ;;  %1236 = vmatpush2.msra.mxu0 %v573_v6  ;;  %v848_v4 = vld [vmem:[#allocation5 + $0x1798] sm:$0xff] }
  0x62   :  { %v1070_v9 = vld [vmem:[#allocation5 + $0x1e88] sm:$0xff]  ;;  %v1069_v11 = vld [vmem:[#allocation5 + $0x1e80] sm:$0xff]  ;;  %1313 = vmatpush2.msra.mxu1 %v1085_v7  ;;  %1237 = vmatprep.subr.mxu0 %v558_v8  ;;  %v5005_v5 = vld [vmem:[#allocation2 + $0x10] sm:$0xff] }
  0x63   :  { %v542_v12 = vld [vmem:[#allocation5 + $0xe08] sm:$0xff]  ;;  %1314 = vmatprep.subr.mxu1 %v1070_v9  ;;  %v541_v14 = vld [vmem:[#allocation5 + $0xe00] sm:$0xff]  ;;  %1238 = vmatpush2.msra.mxu0 %v557_v10  ;;  %v335_v6 = vld [vmem:[#allocation5 + $0x790] sm:$0xff] }
  0x64   :  { %v1054_v13 = vld [vmem:[#allocation5 + $0x1e08] sm:$0xff]  ;;  %v1053_v15 = vld [vmem:[#allocation5 + $0x1e00] sm:$0xff]  ;;  %1315 = vmatpush2.msra.mxu1 %v1069_v11  ;;  %1239 = vmatprep.subr.mxu0 %v542_v12  ;;  %v847_v7 = vld [vmem:[#allocation5 + $0x1790] sm:$0xff] }
  0x65   :  { %v526_v16 = vld [vmem:[#allocation5 + $0xd88] sm:$0xff]  ;;  %1316 = vmatprep.subr.mxu1 %v1054_v13  ;;  %v525_v18 = vld [vmem:[#allocation5 + $0xd80] sm:$0xff]  ;;  %1240 = vmatpush2.msra.mxu0 %v541_v14  ;;  %v320_v8 = vld [vmem:[#allocation5 + $0x718] sm:$0xff] }
  0x66   :  { %v1038_v17 = vld [vmem:[#allocation5 + $0x1d88] sm:$0xff]  ;;  %v1037_v19 = vld [vmem:[#allocation5 + $0x1d80] sm:$0xff]  ;;  %1317 = vmatpush2.msra.mxu1 %v1053_v15  ;;  %1241 = vmatprep.subr.mxu0 %v526_v16  ;;  %v832_v9 = vld [vmem:[#allocation5 + $0x1718] sm:$0xff] }
  0x67   :  { %v510_v20 = vld [vmem:[#allocation5 + $0xd08] sm:$0xff]  ;;  %1318 = vmatprep.subr.mxu1 %v1038_v17  ;;  %v509_v22 = vld [vmem:[#allocation5 + $0xd00] sm:$0xff]  ;;  %1242 = vmatpush2.msra.mxu0 %v525_v18  ;;  %v319_v10 = vld [vmem:[#allocation5 + $0x710] sm:$0xff] }
  0x68   :  { %v1022_v21 = vld [vmem:[#allocation5 + $0x1d08] sm:$0xff]  ;;  %v1021_v23 = vld [vmem:[#allocation5 + $0x1d00] sm:$0xff]  ;;  %1319 = vmatpush2.msra.mxu1 %v1037_v19  ;;  %1243 = vmatprep.subr.mxu0 %v510_v20  ;;  %v831_v11 = vld [vmem:[#allocation5 + $0x1710] sm:$0xff] }
  0x69   :  { %v494_v24 = vld [vmem:[#allocation5 + $0xc88] sm:$0xff]  ;;  %1320 = vmatprep.subr.mxu1 %v1022_v21  ;;  %v493_v26 = vld [vmem:[#allocation5 + $0xc80] sm:$0xff]  ;;  %1244 = vmatpush2.msra.mxu0 %v509_v22  ;;  %v304_v12 = vld [vmem:[#allocation5 + $0x698] sm:$0xff] }
  0x6a   :  { %v1006_v25 = vld [vmem:[#allocation5 + $0x1c88] sm:$0xff]  ;;  %v1005_v27 = vld [vmem:[#allocation5 + $0x1c80] sm:$0xff]  ;;  %1321 = vmatpush2.msra.mxu1 %v1021_v23  ;;  %1245 = vmatprep.subr.mxu0 %v494_v24  ;;  %v816_v13 = vld [vmem:[#allocation5 + $0x1698] sm:$0xff] }
  0x6b   :  { %v478_v28 = vld [vmem:[#allocation5 + $0xc08] sm:$0xff]  ;;  %1322 = vmatprep.subr.mxu1 %v1006_v25  ;;  %v477_v30 = vld [vmem:[#allocation5 + $0xc00] sm:$0xff]  ;;  %1246 = vmatpush2.msra.mxu0 %v493_v26  ;;  %v303_v14 = vld [vmem:[#allocation5 + $0x690] sm:$0xff] }
  0x6c   :  { %v990_v29 = vld [vmem:[#allocation5 + $0x1c08] sm:$0xff]  ;;  %v989_v31 = vld [vmem:[#allocation5 + $0x1c00] sm:$0xff]  ;;  %1323 = vmatpush2.msra.mxu1 %v1005_v27  ;;  %1247 = vmatprep.subr.mxu0 %v478_v28  ;;  %v815_v15 = vld [vmem:[#allocation5 + $0x1690] sm:$0xff] }
  0x6d   :  { %v462_v32 = vld [vmem:[#allocation5 + $0xb88] sm:$0xff]  ;;  %1324 = vmatprep.subr.mxu1 %v990_v29  ;;  %v461_v34 = vld [vmem:[#allocation5 + $0xb80] sm:$0xff]  ;;  %1248 = vmatpush2.msra.mxu0 %v477_v30  ;;  %v288_v16 = vld [vmem:[#allocation5 + $0x618] sm:$0xff] }
  0x6e   :  { %v974_v33 = vld [vmem:[#allocation5 + $0x1b88] sm:$0xff]  ;;  %v973_v35 = vld [vmem:[#allocation5 + $0x1b80] sm:$0xff]  ;;  %1325 = vmatpush2.msra.mxu1 %v989_v31  ;;  %1249 = vmatprep.subr.mxu0 %v462_v32  ;;  %v800_v17 = vld [vmem:[#allocation5 + $0x1618] sm:$0xff] }
  0x6f   :  { %v446_v36 = vld [vmem:[#allocation5 + $0xb08] sm:$0xff]  ;;  %1326 = vmatprep.subr.mxu1 %v974_v33  ;;  %v445_v38 = vld [vmem:[#allocation5 + $0xb00] sm:$0xff]  ;;  %1250 = vmatpush2.msra.mxu0 %v461_v34  ;;  %v287_v18 = vld [vmem:[#allocation5 + $0x610] sm:$0xff] }
  0x70   :  { %v958_v37 = vld [vmem:[#allocation5 + $0x1b08] sm:$0xff]  ;;  %v957_v39 = vld [vmem:[#allocation5 + $0x1b00] sm:$0xff]  ;;  %1327 = vmatpush2.msra.mxu1 %v973_v35  ;;  %1251 = vmatprep.subr.mxu0 %v446_v36  ;;  %v799_v19 = vld [vmem:[#allocation5 + $0x1610] sm:$0xff] }
  0x71   :  { %v430_v40 = vld [vmem:[#allocation5 + $0xa88] sm:$0xff]  ;;  %1328 = vmatprep.subr.mxu1 %v958_v37  ;;  %v429_v42 = vld [vmem:[#allocation5 + $0xa80] sm:$0xff]  ;;  %1252 = vmatpush2.msra.mxu0 %v445_v38  ;;  %v272_v20 = vld [vmem:[#allocation5 + $0x598] sm:$0xff] }
  0x72   :  { %v942_v41 = vld [vmem:[#allocation5 + $0x1a88] sm:$0xff]  ;;  %v941_v43 = vld [vmem:[#allocation5 + $0x1a80] sm:$0xff]  ;;  %1329 = vmatpush2.msra.mxu1 %v957_v39  ;;  %1253 = vmatprep.subr.mxu0 %v430_v40  ;;  %v784_v21 = vld [vmem:[#allocation5 + $0x1598] sm:$0xff] }
  0x73   :  { %v414_v44 = vld [vmem:[#allocation5 + $0xa08] sm:$0xff]  ;;  %1330 = vmatprep.subr.mxu1 %v942_v41  ;;  %v413_v46 = vld [vmem:[#allocation5 + $0xa00] sm:$0xff]  ;;  %1254 = vmatpush2.msra.mxu0 %v429_v42  ;;  %v271_v22 = vld [vmem:[#allocation5 + $0x590] sm:$0xff] }
  0x74   :  { %v926_v45 = vld [vmem:[#allocation5 + $0x1a08] sm:$0xff]  ;;  %v925_v47 = vld [vmem:[#allocation5 + $0x1a00] sm:$0xff]  ;;  %1331 = vmatpush2.msra.mxu1 %v941_v43  ;;  %1255 = vmatprep.subr.mxu0 %v414_v44  ;;  %v783_v23 = vld [vmem:[#allocation5 + $0x1590] sm:$0xff] }
  0x75   :  { %v398_v48 = vld [vmem:[#allocation5 + $0x988] sm:$0xff]  ;;  %1332 = vmatprep.subr.mxu1 %v926_v45  ;;  %v397_v50 = vld [vmem:[#allocation5 + $0x980] sm:$0xff]  ;;  %1256 = vmatpush2.msra.mxu0 %v413_v46  ;;  %v256_v24 = vld [vmem:[#allocation5 + $0x518] sm:$0xff] }
  0x76   :  { %v910_v49 = vld [vmem:[#allocation5 + $0x1988] sm:$0xff]  ;;  %v909_v51 = vld [vmem:[#allocation5 + $0x1980] sm:$0xff]  ;;  %1333 = vmatpush2.msra.mxu1 %v925_v47  ;;  %1257 = vmatprep.subr.mxu0 %v398_v48  ;;  %v768_v25 = vld [vmem:[#allocation5 + $0x1518] sm:$0xff] }
  0x77   :  { %v382_v52 = vld [vmem:[#allocation5 + $0x908] sm:$0xff]  ;;  %1334 = vmatprep.subr.mxu1 %v910_v49  ;;  %v381_v54 = vld [vmem:[#allocation5 + $0x900] sm:$0xff]  ;;  %1258 = vmatpush2.msra.mxu0 %v397_v50  ;;  %v255_v26 = vld [vmem:[#allocation5 + $0x510] sm:$0xff] }
  0x78   :  { %v894_v53 = vld [vmem:[#allocation5 + $0x1908] sm:$0xff]  ;;  %v893_v55 = vld [vmem:[#allocation5 + $0x1900] sm:$0xff]  ;;  %1335 = vmatpush2.msra.mxu1 %v909_v51  ;;  %1259 = vmatprep.subr.mxu0 %v382_v52  ;;  %v767_v27 = vld [vmem:[#allocation5 + $0x1510] sm:$0xff] }
  0x79   :  { %v366_v56 = vld [vmem:[#allocation5 + $0x888] sm:$0xff]  ;;  %1336 = vmatprep.subr.mxu1 %v894_v53  ;;  %v365_v58 = vld [vmem:[#allocation5 + $0x880] sm:$0xff]  ;;  %1260 = vmatpush2.msra.mxu0 %v381_v54  ;;  %v240_v28 = vld [vmem:[#allocation5 + $0x498] sm:$0xff] }
  0x7a   :  { %v878_v57 = vld [vmem:[#allocation5 + $0x1888] sm:$0xff]  ;;  %v877_v59 = vld [vmem:[#allocation5 + $0x1880] sm:$0xff]  ;;  %1337 = vmatpush2.msra.mxu1 %v893_v55  ;;  %1261 = vmatprep.subr.mxu0 %v366_v56  ;;  %v752_v29 = vld [vmem:[#allocation5 + $0x1498] sm:$0xff] }
  0x7b   :  { %v350_v60 = vld [vmem:[#allocation5 + $0x808] sm:$0xff]  ;;  %1338 = vmatprep.subr.mxu1 %v878_v57  ;;  %v349_v62 = vld [vmem:[#allocation5 + $0x800] sm:$0xff]  ;;  %1262 = vmatpush2.msra.mxu0 %v365_v58  ;;  %v239_v30 = vld [vmem:[#allocation5 + $0x490] sm:$0xff] }
  0x7c   :  { %v862_v61 = vld [vmem:[#allocation5 + $0x1808] sm:$0xff]  ;;  %1339 = vmatpush2.msra.mxu1 %v877_v59  ;;  %v861_v0 = vld [vmem:[#allocation5 + $0x1800] sm:$0xff]  ;;  %1263 = vmatprep.subr.mxu0 %v350_v60  ;;  %v751_v31 = vld [vmem:[#allocation5 + $0x1490] sm:$0xff] }
  0x7d   :  { %v4998_v63 = vld [vmem:[#allocation2 + $0x8] sm:$0xff]  ;;  %v5000_v1 = vld [vmem:[#allocation2] sm:$0xff]  ;;  %1340 = vmatprep.subr.mxu1 %v862_v61  ;;  %1264 = vmatpush2.msra.mxu0 %v349_v62  ;;  %v224_v32 = vld [vmem:[#allocation5 + $0x418] sm:$0xff] }
  0x7e   :  { %1265 = vmatprep.mubr.f32.mxu0 %v4998_v63  ;;  %1341 = vmatpush2.msra.mxu1 %v861_v0  ;;  %v736_v33 = vld [vmem:[#allocation5 + $0x1418] sm:$0xff]  ;;  %v223_v34 = vld [vmem:[#allocation5 + $0x410] sm:$0xff] }
  0x7f   :  { %1266 = vmatmul.mubr.f32.vlgmr.msra.gmra.mxu0 %v5000_v1  ;;  %1342 = vmatprep.mubr.f32.mxu1 %v5002_v2  ;;  %v735_v35 = vld [vmem:[#allocation5 + $0x1410] sm:$0xff]  ;;  %v208_v36 = vld [vmem:[#allocation5 + $0x398] sm:$0xff] }
  0x80   :  { %1355 = vmatprep.subr.mxu0 %v336_v3  ;;  %1432 = vmatprep.subr.mxu1 %v848_v4  ;;  %v720_v37 = vld [vmem:[#allocation5 + $0x1398] sm:$0xff]  ;;  %v207_v38 = vld [vmem:[#allocation5 + $0x390] sm:$0xff] }
  0x81   :  { %1343 = vmatmul.mubr.f32.vlgmr.msra.gmra.mxu1 %v5005_v5  ;;  %1356 = vmatpush1.msra.mxu0 %v335_v6  ;;  %v719_v39 = vld [vmem:[#allocation5 + $0x1390] sm:$0xff]  ;;  %v192_v40 = vld [vmem:[#allocation5 + $0x318] sm:$0xff] }
  0x82   :  { %1433 = vmatpush1.msra.mxu1 %v847_v7  ;;  %1357 = vmatprep.subr.mxu0 %v320_v8  ;;  %v704_v41 = vld [vmem:[#allocation5 + $0x1318] sm:$0xff]  ;;  %v191_v42 = vld [vmem:[#allocation5 + $0x310] sm:$0xff] }
  0x83   :  { %1434 = vmatprep.subr.mxu1 %v832_v9  ;;  %1358 = vmatpush1.msra.mxu0 %v319_v10  ;;  %v703_v43 = vld [vmem:[#allocation5 + $0x1310] sm:$0xff]  ;;  %v176_v44 = vld [vmem:[#allocation5 + $0x298] sm:$0xff] }
  0x84   :  { %1435 = vmatpush1.msra.mxu1 %v831_v11  ;;  %1359 = vmatprep.subr.mxu0 %v304_v12  ;;  %v688_v45 = vld [vmem:[#allocation5 + $0x1298] sm:$0xff]  ;;  %v175_v46 = vld [vmem:[#allocation5 + $0x290] sm:$0xff] }
  0x85   :  { %1436 = vmatprep.subr.mxu1 %v816_v13  ;;  %1360 = vmatpush1.msra.mxu0 %v303_v14  ;;  %v687_v47 = vld [vmem:[#allocation5 + $0x1290] sm:$0xff]  ;;  %v160_v48 = vld [vmem:[#allocation5 + $0x218] sm:$0xff] }
  0x86   :  { %1437 = vmatpush1.msra.mxu1 %v815_v15  ;;  %1361 = vmatprep.subr.mxu0 %v288_v16  ;;  %v672_v49 = vld [vmem:[#allocation5 + $0x1218] sm:$0xff]  ;;  %v159_v50 = vld [vmem:[#allocation5 + $0x210] sm:$0xff] }
  0x87   :  { %1438 = vmatprep.subr.mxu1 %v800_v17  ;;  %1362 = vmatpush1.msra.mxu0 %v287_v18  ;;  %v671_v51 = vld [vmem:[#allocation5 + $0x1210] sm:$0xff]  ;;  %v144_v52 = vld [vmem:[#allocation5 + $0x198] sm:$0xff] }
  0x88   :  { %1439 = vmatpush1.msra.mxu1 %v799_v19  ;;  %1363 = vmatprep.subr.mxu0 %v272_v20  ;;  %v656_v53 = vld [vmem:[#allocation5 + $0x1198] sm:$0xff]  ;;  %v143_v54 = vld [vmem:[#allocation5 + $0x190] sm:$0xff] }
  0x89   :  { %1440 = vmatprep.subr.mxu1 %v784_v21  ;;  %1364 = vmatpush1.msra.mxu0 %v271_v22  ;;  %v655_v55 = vld [vmem:[#allocation5 + $0x1190] sm:$0xff]  ;;  %v128_v56 = vld [vmem:[#allocation5 + $0x118] sm:$0xff] }
  0x8a   :  { %1441 = vmatpush1.msra.mxu1 %v783_v23  ;;  %1365 = vmatprep.subr.mxu0 %v256_v24  ;;  %v640_v57 = vld [vmem:[#allocation5 + $0x1118] sm:$0xff]  ;;  %v127_v58 = vld [vmem:[#allocation5 + $0x110] sm:$0xff] }
  0x8b   :  { %1442 = vmatprep.subr.mxu1 %v768_v25  ;;  %1366 = vmatpush1.msra.mxu0 %v255_v26  ;;  %v639_v59 = vld [vmem:[#allocation5 + $0x1110] sm:$0xff]  ;;  %v112_v60 = vld [vmem:[#allocation5 + $0x98] sm:$0xff] }
  0x8c   :  { %1443 = vmatpush1.msra.mxu1 %v767_v27  ;;  %1367 = vmatprep.subr.mxu0 %v240_v28  ;;  %v624_v61 = vld [vmem:[#allocation5 + $0x1098] sm:$0xff]  ;;  %v111_v62 = vld [vmem:[#allocation5 + $0x90] sm:$0xff] }
  0x8d   :  { %1444 = vmatprep.subr.mxu1 %v752_v29  ;;  %1368 = vmatpush1.msra.mxu0 %v239_v30  ;;  %v623_v0 = vld [vmem:[#allocation5 + $0x1090] sm:$0xff]  ;;  %v96_v3 = vld [vmem:[#allocation5 + $0x18] sm:$0xff] }
  0x8e   :  { %1445 = vmatpush1.msra.mxu1 %v751_v31  ;;  %1369 = vmatprep.subr.mxu0 %v224_v32  ;;  %v608_v4 = vld [vmem:[#allocation5 + $0x1018] sm:$0xff]  ;;  %v95_v6 = vld [vmem:[#allocation5 + $0x10] sm:$0xff] }
  0x8f   :  { %1446 = vmatprep.subr.mxu1 %v736_v33  ;;  %1370 = vmatpush1.msra.mxu0 %v223_v34  ;;  %v607_v7 = vld [vmem:[#allocation5 + $0x1010] sm:$0xff]  ;;  %v592_v8 = vld [vmem:[#allocation5 + $0xf98] sm:$0xff] }
  0x90   :  { %1447 = vmatpush1.msra.mxu1 %v735_v35  ;;  %1371 = vmatprep.subr.mxu0 %v208_v36  ;;  %v1104_v9 = vld [vmem:[#allocation5 + $0x1f98] sm:$0xff]  ;;  %v591_v10 = vld [vmem:[#allocation5 + $0xf90] sm:$0xff] }
  0x91   :  { %1448 = vmatprep.subr.mxu1 %v720_v37  ;;  %1372 = vmatpush1.msra.mxu0 %v207_v38  ;;  %v1103_v11 = vld [vmem:[#allocation5 + $0x1f90] sm:$0xff]  ;;  %v576_v12 = vld [vmem:[#allocation5 + $0xf18] sm:$0xff] }
  0x92   :  { %1449 = vmatpush1.msra.mxu1 %v719_v39  ;;  %1373 = vmatprep.subr.mxu0 %v192_v40  ;;  %v1088_v13 = vld [vmem:[#allocation5 + $0x1f18] sm:$0xff]  ;;  %v575_v14 = vld [vmem:[#allocation5 + $0xf10] sm:$0xff] }
  0x93   :  { %1450 = vmatprep.subr.mxu1 %v704_v41  ;;  %1374 = vmatpush1.msra.mxu0 %v191_v42  ;;  %v1087_v15 = vld [vmem:[#allocation5 + $0x1f10] sm:$0xff]  ;;  %v560_v16 = vld [vmem:[#allocation5 + $0xe98] sm:$0xff] }
  0x94   :  { %1451 = vmatpush1.msra.mxu1 %v703_v43  ;;  %1375 = vmatprep.subr.mxu0 %v176_v44  ;;  %v1072_v17 = vld [vmem:[#allocation5 + $0x1e98] sm:$0xff]  ;;  %v559_v18 = vld [vmem:[#allocation5 + $0xe90] sm:$0xff] }
  0x95   :  { %1452 = vmatprep.subr.mxu1 %v688_v45  ;;  %1376 = vmatpush1.msra.mxu0 %v175_v46  ;;  %v1071_v19 = vld [vmem:[#allocation5 + $0x1e90] sm:$0xff]  ;;  %v544_v20 = vld [vmem:[#allocation5 + $0xe18] sm:$0xff] }
  0x96   :  { %1453 = vmatpush1.msra.mxu1 %v687_v47  ;;  %1377 = vmatprep.subr.mxu0 %v160_v48  ;;  %v1056_v21 = vld [vmem:[#allocation5 + $0x1e18] sm:$0xff]  ;;  %v543_v22 = vld [vmem:[#allocation5 + $0xe10] sm:$0xff] }
  0x97   :  { %1454 = vmatprep.subr.mxu1 %v672_v49  ;;  %1378 = vmatpush1.msra.mxu0 %v159_v50  ;;  %v1055_v23 = vld [vmem:[#allocation5 + $0x1e10] sm:$0xff]  ;;  %v528_v24 = vld [vmem:[#allocation5 + $0xd98] sm:$0xff] }
  0x98   :  { %1455 = vmatpush1.msra.mxu1 %v671_v51  ;;  %1379 = vmatprep.subr.mxu0 %v144_v52  ;;  %v1040_v25 = vld [vmem:[#allocation5 + $0x1d98] sm:$0xff]  ;;  %v527_v26 = vld [vmem:[#allocation5 + $0xd90] sm:$0xff] }
  0x99   :  { %1456 = vmatprep.subr.mxu1 %v656_v53  ;;  %1380 = vmatpush1.msra.mxu0 %v143_v54  ;;  %v1039_v27 = vld [vmem:[#allocation5 + $0x1d90] sm:$0xff]  ;;  %v512_v28 = vld [vmem:[#allocation5 + $0xd18] sm:$0xff] }
  0x9a   :  { %1457 = vmatpush1.msra.mxu1 %v655_v55  ;;  %1381 = vmatprep.subr.mxu0 %v128_v56  ;;  %v1024_v29 = vld [vmem:[#allocation5 + $0x1d18] sm:$0xff]  ;;  %v511_v30 = vld [vmem:[#allocation5 + $0xd10] sm:$0xff] }
  0x9b   :  { %1458 = vmatprep.subr.mxu1 %v640_v57  ;;  %1382 = vmatpush1.msra.mxu0 %v127_v58  ;;  %v1023_v31 = vld [vmem:[#allocation5 + $0x1d10] sm:$0xff]  ;;  %v496_v32 = vld [vmem:[#allocation5 + $0xc98] sm:$0xff] }
  0x9c   :  { %1459 = vmatpush1.msra.mxu1 %v639_v59  ;;  %1383 = vmatprep.subr.mxu0 %v112_v60  ;;  %v1008_v33 = vld [vmem:[#allocation5 + $0x1c98] sm:$0xff]  ;;  %v495_v34 = vld [vmem:[#allocation5 + $0xc90] sm:$0xff]  ;;  %v5010_v60 = vld [vmem:[#allocation2 + $0x28] sm:$0xff] }
  0x9d   :  { %1460 = vmatprep.subr.mxu1 %v624_v61  ;;  %1384 = vmatpush1.msra.mxu0 %v111_v62  ;;  %v1007_v35 = vld [vmem:[#allocation5 + $0x1c90] sm:$0xff]  ;;  %v480_v36 = vld [vmem:[#allocation5 + $0xc18] sm:$0xff] }
  0x9e   :  { %1461 = vmatpush1.msra.mxu1 %v623_v0  ;;  %1385 = vmatprep.subr.mxu0 %v96_v3  ;;  %v992_v37 = vld [vmem:[#allocation5 + $0x1c18] sm:$0xff]  ;;  %v479_v38 = vld [vmem:[#allocation5 + $0xc10] sm:$0xff]  ;;  %v5012_v0 = vld [vmem:[#allocation2 + $0x20] sm:$0xff] }
  0x9f   :  { %1462 = vmatprep.subr.mxu1 %v608_v4  ;;  %1386 = vmatpush1.msra.mxu0 %v95_v6  ;;  %v991_v39 = vld [vmem:[#allocation5 + $0x1c10] sm:$0xff]  ;;  %v464_v40 = vld [vmem:[#allocation5 + $0xb98] sm:$0xff] }
  0xa0   :  { %1463 = vmatpush1.msra.mxu1 %v607_v7  ;;  %1387 = vmatprep.subr.mxu0 %v592_v8  ;;  %v976_v41 = vld [vmem:[#allocation5 + $0x1b98] sm:$0xff]  ;;  %v463_v42 = vld [vmem:[#allocation5 + $0xb90] sm:$0xff] }
  0xa1   :  { %1464 = vmatprep.subr.mxu1 %v1104_v9  ;;  %1388 = vmatpush2.msra.mxu0 %v591_v10  ;;  %v975_v43 = vld [vmem:[#allocation5 + $0x1b90] sm:$0xff]  ;;  %v448_v44 = vld [vmem:[#allocation5 + $0xb18] sm:$0xff] }
  0xa2   :  { %1465 = vmatpush2.msra.mxu1 %v1103_v11  ;;  %1389 = vmatprep.subr.mxu0 %v576_v12  ;;  %v960_v45 = vld [vmem:[#allocation5 + $0x1b18] sm:$0xff]  ;;  %v447_v46 = vld [vmem:[#allocation5 + $0xb10] sm:$0xff] }
  0xa3   :  { %1466 = vmatprep.subr.mxu1 %v1088_v13  ;;  %1390 = vmatpush2.msra.mxu0 %v575_v14  ;;  %v959_v47 = vld [vmem:[#allocation5 + $0x1b10] sm:$0xff]  ;;  %v432_v48 = vld [vmem:[#allocation5 + $0xa98] sm:$0xff] }
  0xa4   :  { %1467 = vmatpush2.msra.mxu1 %v1087_v15  ;;  %1391 = vmatprep.subr.mxu0 %v560_v16  ;;  %v944_v49 = vld [vmem:[#allocation5 + $0x1a98] sm:$0xff]  ;;  %v431_v50 = vld [vmem:[#allocation5 + $0xa90] sm:$0xff]  ;;  %v338_v16 = vld [vmem:[#allocation5 + $0x7a8] sm:$0xff] }
  0xa5   :  { %1468 = vmatprep.subr.mxu1 %v1072_v17  ;;  %1392 = vmatpush2.msra.mxu0 %v559_v18  ;;  %v943_v51 = vld [vmem:[#allocation5 + $0x1a90] sm:$0xff]  ;;  %v416_v52 = vld [vmem:[#allocation5 + $0xa18] sm:$0xff]  ;;  %v850_v17 = vld [vmem:[#allocation5 + $0x17a8] sm:$0xff] }
  0xa6   :  { %1469 = vmatpush2.msra.mxu1 %v1071_v19  ;;  %1393 = vmatprep.subr.mxu0 %v544_v20  ;;  %v928_v53 = vld [vmem:[#allocation5 + $0x1a18] sm:$0xff]  ;;  %v415_v54 = vld [vmem:[#allocation5 + $0xa10] sm:$0xff]  ;;  %v337_v18 = vld [vmem:[#allocation5 + $0x7a0] sm:$0xff] }
  0xa7   :  { %1470 = vmatprep.subr.mxu1 %v1056_v21  ;;  %1394 = vmatpush2.msra.mxu0 %v543_v22  ;;  %v927_v55 = vld [vmem:[#allocation5 + $0x1a10] sm:$0xff]  ;;  %v400_v56 = vld [vmem:[#allocation5 + $0x998] sm:$0xff]  ;;  %v849_v19 = vld [vmem:[#allocation5 + $0x17a0] sm:$0xff] }
  0xa8   :  { %1471 = vmatpush2.msra.mxu1 %v1055_v23  ;;  %1395 = vmatprep.subr.mxu0 %v528_v24  ;;  %v912_v57 = vld [vmem:[#allocation5 + $0x1998] sm:$0xff]  ;;  %v399_v58 = vld [vmem:[#allocation5 + $0x990] sm:$0xff]  ;;  %v322_v20 = vld [vmem:[#allocation5 + $0x728] sm:$0xff] }
  0xa9   :  { %1472 = vmatprep.subr.mxu1 %v1040_v25  ;;  %1396 = vmatpush2.msra.mxu0 %v527_v26  ;;  %v911_v59 = vld [vmem:[#allocation5 + $0x1990] sm:$0xff]  ;;  %v384_v61 = vld [vmem:[#allocation5 + $0x918] sm:$0xff]  ;;  %v834_v21 = vld [vmem:[#allocation5 + $0x1728] sm:$0xff] }
  0xaa   :  { %1473 = vmatpush2.msra.mxu1 %v1039_v27  ;;  %1397 = vmatprep.subr.mxu0 %v512_v28  ;;  %v896_v62 = vld [vmem:[#allocation5 + $0x1918] sm:$0xff]  ;;  %v383_v3 = vld [vmem:[#allocation5 + $0x910] sm:$0xff]  ;;  %v321_v22 = vld [vmem:[#allocation5 + $0x720] sm:$0xff] }
  0xab   :  { %1474 = vmatprep.subr.mxu1 %v1024_v29  ;;  %1398 = vmatpush2.msra.mxu0 %v511_v30  ;;  %v895_v4 = vld [vmem:[#allocation5 + $0x1910] sm:$0xff]  ;;  %v5015_v6 = vld [vmem:[#allocation2 + $0x38] sm:$0xff]  ;;  %v833_v23 = vld [vmem:[#allocation5 + $0x1720] sm:$0xff] }
  0xac   :  { %1475 = vmatpush2.msra.mxu1 %v1023_v31  ;;  %1399 = vmatprep.subr.mxu0 %v496_v32  ;;  %v368_v7 = vld [vmem:[#allocation5 + $0x898] sm:$0xff]  ;;  %v5018_v9 = vld [vmem:[#allocation2 + $0x30] sm:$0xff]  ;;  %v306_v24 = vld [vmem:[#allocation5 + $0x6a8] sm:$0xff] }
  0xad   :  { %1476 = vmatprep.subr.mxu1 %v1008_v33  ;;  %1400 = vmatpush2.msra.mxu0 %v495_v34  ;;  %v880_v8 = vld [vmem:[#allocation5 + $0x1898] sm:$0xff]  ;;  %v367_v10 = vld [vmem:[#allocation5 + $0x890] sm:$0xff]  ;;  %v305_v25 = vld [vmem:[#allocation5 + $0x6a0] sm:$0xff] }
  0xae   :  { %1477 = vmatpush2.msra.mxu1 %v1007_v35  ;;  %1401 = vmatprep.subr.mxu0 %v480_v36  ;;  %v879_v11 = vld [vmem:[#allocation5 + $0x1890] sm:$0xff]  ;;  %v352_v12 = vld [vmem:[#allocation5 + $0x818] sm:$0xff]  ;;  %v290_v26 = vld [vmem:[#allocation5 + $0x628] sm:$0xff] }
  0xaf   :  { %1478 = vmatprep.subr.mxu1 %v992_v37  ;;  %1402 = vmatpush2.msra.mxu0 %v479_v38  ;;  %v864_v13 = vld [vmem:[#allocation5 + $0x1818] sm:$0xff]  ;;  %v351_v14 = vld [vmem:[#allocation5 + $0x810] sm:$0xff]  ;;  %v289_v27 = vld [vmem:[#allocation5 + $0x620] sm:$0xff] }
  0xb0   :  { %1479 = vmatpush2.msra.mxu1 %v991_v39  ;;  %1403 = vmatprep.subr.mxu0 %v464_v40  ;;  %v863_v15 = vld [vmem:[#allocation5 + $0x1810] sm:$0xff]  ;;  %v801_v28 = vld [vmem:[#allocation5 + $0x1620] sm:$0xff]  ;;  %v786_v29 = vld [vmem:[#allocation5 + $0x15a8] sm:$0xff] }
  0xb1   :  { %1480 = vmatprep.subr.mxu1 %v976_v41  ;;  %1404 = vmatpush2.msra.mxu0 %v463_v42  ;;  %v273_v30 = vld [vmem:[#allocation5 + $0x5a0] sm:$0xff]  ;;  %v258_v32 = vld [vmem:[#allocation5 + $0x528] sm:$0xff] }
  0xb2   :  { %1481 = vmatpush2.msra.mxu1 %v975_v43  ;;  %1405 = vmatprep.subr.mxu0 %v448_v44  ;;  %v785_v31 = vld [vmem:[#allocation5 + $0x15a0] sm:$0xff]  ;;  %v770_v33 = vld [vmem:[#allocation5 + $0x1528] sm:$0xff] }
  0xb3   :  { %1482 = vmatprep.subr.mxu1 %v960_v45  ;;  %1406 = vmatpush2.msra.mxu0 %v447_v46  ;;  %v257_v34 = vld [vmem:[#allocation5 + $0x520] sm:$0xff]  ;;  %v242_v36 = vld [vmem:[#allocation5 + $0x4a8] sm:$0xff] }
  0xb4   :  { %1483 = vmatpush2.msra.mxu1 %v959_v47  ;;  %1407 = vmatprep.subr.mxu0 %v432_v48  ;;  %v769_v35 = vld [vmem:[#allocation5 + $0x1520] sm:$0xff]  ;;  %v754_v37 = vld [vmem:[#allocation5 + $0x14a8] sm:$0xff] }
  0xb5   :  { %1484 = vmatprep.subr.mxu1 %v944_v49  ;;  %1408 = vmatpush2.msra.mxu0 %v431_v50  ;;  %v241_v38 = vld [vmem:[#allocation5 + $0x4a0] sm:$0xff]  ;;  %v226_v40 = vld [vmem:[#allocation5 + $0x428] sm:$0xff] }
  0xb6   :  { %1485 = vmatpush2.msra.mxu1 %v943_v51  ;;  %1409 = vmatprep.subr.mxu0 %v416_v52  ;;  %v753_v39 = vld [vmem:[#allocation5 + $0x14a0] sm:$0xff]  ;;  %v738_v41 = vld [vmem:[#allocation5 + $0x1428] sm:$0xff] }
  0xb7   :  { %1486 = vmatprep.subr.mxu1 %v928_v53  ;;  %1410 = vmatpush2.msra.mxu0 %v415_v54  ;;  %v225_v42 = vld [vmem:[#allocation5 + $0x420] sm:$0xff]  ;;  %v210_v44 = vld [vmem:[#allocation5 + $0x3a8] sm:$0xff] }
  0xb8   :  { %1487 = vmatpush2.msra.mxu1 %v927_v55  ;;  %1411 = vmatprep.subr.mxu0 %v400_v56  ;;  %v737_v43 = vld [vmem:[#allocation5 + $0x1420] sm:$0xff]  ;;  %v722_v45 = vld [vmem:[#allocation5 + $0x13a8] sm:$0xff] }
  0xb9   :  { %1488 = vmatprep.subr.mxu1 %v912_v57  ;;  %1412 = vmatpush2.msra.mxu0 %v399_v58  ;;  %v209_v46 = vld [vmem:[#allocation5 + $0x3a0] sm:$0xff]  ;;  %v194_v48 = vld [vmem:[#allocation5 + $0x328] sm:$0xff] }
  0xba   :  { %1489 = vmatpush2.msra.mxu1 %v911_v59  ;;  %1271 = vmatprep.mubr.f32.mxu0 %v5010_v60  ;;  %v721_v47 = vld [vmem:[#allocation5 + $0x13a0] sm:$0xff]  ;;  %v706_v49 = vld [vmem:[#allocation5 + $0x1328] sm:$0xff] }
  0xbb   :  { %1413 = vmatprep.subr.mxu0 %v384_v61  ;;  %1490 = vmatprep.subr.mxu1 %v896_v62  ;;  %v193_v50 = vld [vmem:[#allocation5 + $0x320] sm:$0xff]  ;;  %v178_v52 = vld [vmem:[#allocation5 + $0x2a8] sm:$0xff] }
  0xbc   :  { %1272 = vmatmul.mubr.f32.gmra.mxu0 %v5012_v0  ;;  %1491 = vmatpush2.msra.mxu1 %v895_v4  ;;  %v705_v51 = vld [vmem:[#allocation5 + $0x1320] sm:$0xff]  ;;  %v690_v53 = vld [vmem:[#allocation5 + $0x12a8] sm:$0xff] }
  0xbd   :  { %1414 = vmatpush2.msra.mxu0 %v383_v3  ;;  %1348 = vmatprep.mubr.f32.mxu1 %v5015_v6  ;;  %v177_v54 = vld [vmem:[#allocation5 + $0x2a0] sm:$0xff]  ;;  %v162_v56 = vld [vmem:[#allocation5 + $0x228] sm:$0xff] }
  0xbe   :  { %1415 = vmatprep.subr.mxu0 %v368_v7  ;;  %1492 = vmatprep.subr.mxu1 %v880_v8  ;;  %v689_v55 = vld [vmem:[#allocation5 + $0x12a0] sm:$0xff]  ;;  %v674_v57 = vld [vmem:[#allocation5 + $0x1228] sm:$0xff] }
  0xbf   :  { %1349 = vmatmul.mubr.f32.gmra.mxu1 %v5018_v9  ;;  %1416 = vmatpush2.msra.mxu0 %v367_v10  ;;  %v161_v58 = vld [vmem:[#allocation5 + $0x220] sm:$0xff]  ;;  %v146_v61 = vld [vmem:[#allocation5 + $0x1a8] sm:$0xff] }
  0xc0   :  { %1493 = vmatpush2.msra.mxu1 %v879_v11  ;;  %1417 = vmatprep.subr.mxu0 %v352_v12  ;;  %v673_v59 = vld [vmem:[#allocation5 + $0x1220] sm:$0xff]  ;;  %v658_v62 = vld [vmem:[#allocation5 + $0x11a8] sm:$0xff] }
  0xc1   :  { %1494 = vmatprep.subr.mxu1 %v864_v13  ;;  %1418 = vmatpush2.msra.mxu0 %v351_v14  ;;  %v145_v3 = vld [vmem:[#allocation5 + $0x1a0] sm:$0xff]  ;;  %v130_v7 = vld [vmem:[#allocation5 + $0x128] sm:$0xff] }
  0xc2   :  { %1419 = vmatprep.mubr.f32.mxu0 %v4998_v63  ;;  %1495 = vmatpush2.msra.mxu1 %v863_v15  ;;  %v818_v63 = vld [vmem:[#allocation5 + $0x16a8] sm:$0xff]  ;;  %v657_v4 = vld [vmem:[#allocation5 + $0x11a0] sm:$0xff] }
  0xc3   :  { %1420 = vmatmul.mubr.f32.vlgmr.msra.gmra.mxu0 %v5000_v1  ;;  %1496 = vmatprep.mubr.f32.mxu1 %v5002_v2  ;;  %v817_v1 = vld [vmem:[#allocation5 + $0x16a0] sm:$0xff]  ;;  %v802_v2 = vld [vmem:[#allocation5 + $0x1628] sm:$0xff] }
  0xc4   :  { %1509 = vmatprep.subr.mxu0 %v338_v16  ;;  %1586 = vmatprep.subr.mxu1 %v850_v17  ;;  %v642_v8 = vld [vmem:[#allocation5 + $0x1128] sm:$0xff]  ;;  %v129_v10 = vld [vmem:[#allocation5 + $0x120] sm:$0xff] }
  0xc5   :  { %1497 = vmatmul.mubr.f32.vlgmr.msra.gmra.mxu1 %v5005_v5  ;;  %1510 = vmatpush1.msra.mxu0 %v337_v18  ;;  %v274_v5 = vld [vmem:[#allocation5 + $0x5a8] sm:$0xff]  ;;  %v641_v11 = vld [vmem:[#allocation5 + $0x1120] sm:$0xff] }
  0xc6   :  { %1587 = vmatpush1.msra.mxu1 %v849_v19  ;;  %1511 = vmatprep.subr.mxu0 %v322_v20  ;;  %v114_v12 = vld [vmem:[#allocation5 + $0xa8] sm:$0xff]  ;;  %v113_v14 = vld [vmem:[#allocation5 + $0xa0] sm:$0xff] }
  0xc7   :  { %1588 = vmatprep.subr.mxu1 %v834_v21  ;;  %1512 = vmatpush1.msra.mxu0 %v321_v22  ;;  %v626_v13 = vld [vmem:[#allocation5 + $0x10a8] sm:$0xff]  ;;  %v625_v15 = vld [vmem:[#allocation5 + $0x10a0] sm:$0xff] }
  0xc8   :  { %1589 = vmatpush1.msra.mxu1 %v833_v23  ;;  %1513 = vmatprep.subr.mxu0 %v306_v24  ;;  %v98_v16 = vld [vmem:[#allocation5 + $0x28] sm:$0xff]  ;;  %v97_v18 = vld [vmem:[#allocation5 + $0x20] sm:$0xff] }
  0xc9   :  { %1590 = vmatprep.subr.mxu1 %v818_v63  ;;  %1514 = vmatpush1.msra.mxu0 %v305_v25  ;;  %v610_v17 = vld [vmem:[#allocation5 + $0x1028] sm:$0xff]  ;;  %v609_v19 = vld [vmem:[#allocation5 + $0x1020] sm:$0xff] }
  0xca   :  { %1591 = vmatpush1.msra.mxu1 %v817_v1  ;;  %1515 = vmatprep.subr.mxu0 %v290_v26  ;;  %v594_v20 = vld [vmem:[#allocation5 + $0xfa8] sm:$0xff]  ;;  %v593_v22 = vld [vmem:[#allocation5 + $0xfa0] sm:$0xff] }
  0xcb   :  { %1592 = vmatprep.subr.mxu1 %v802_v2  ;;  %1516 = vmatpush1.msra.mxu0 %v289_v27  ;;  %v1106_v21 = vld [vmem:[#allocation5 + $0x1fa8] sm:$0xff]  ;;  %v1105_v23 = vld [vmem:[#allocation5 + $0x1fa0] sm:$0xff] }
  0xcc   :  { %1593 = vmatpush1.msra.mxu1 %v801_v28  ;;  %1517 = vmatprep.subr.mxu0 %v274_v5  ;;  %v578_v24 = vld [vmem:[#allocation5 + $0xf28] sm:$0xff]  ;;  %v577_v25 = vld [vmem:[#allocation5 + $0xf20] sm:$0xff] }
  0xcd   :  { %1594 = vmatprep.subr.mxu1 %v786_v29  ;;  %1518 = vmatpush1.msra.mxu0 %v273_v30  ;;  %v1090_v63 = vld [vmem:[#allocation5 + $0x1f28] sm:$0xff]  ;;  %v1089_v1 = vld [vmem:[#allocation5 + $0x1f20] sm:$0xff] }
  0xce   :  { %1595 = vmatpush1.msra.mxu1 %v785_v31  ;;  %1519 = vmatprep.subr.mxu0 %v258_v32  ;;  %v562_v26 = vld [vmem:[#allocation5 + $0xea8] sm:$0xff]  ;;  %v561_v27 = vld [vmem:[#allocation5 + $0xea0] sm:$0xff] }
  0xcf   :  { %1596 = vmatprep.subr.mxu1 %v770_v33  ;;  %1520 = vmatpush1.msra.mxu0 %v257_v34  ;;  %v1074_v2 = vld [vmem:[#allocation5 + $0x1ea8] sm:$0xff]  ;;  %v1073_v28 = vld [vmem:[#allocation5 + $0x1ea0] sm:$0xff] }
  0xd0   :  { %1597 = vmatpush1.msra.mxu1 %v769_v35  ;;  %1521 = vmatprep.subr.mxu0 %v242_v36  ;;  %v546_v5 = vld [vmem:[#allocation5 + $0xe28] sm:$0xff]  ;;  %v545_v30 = vld [vmem:[#allocation5 + $0xe20] sm:$0xff] }
  0xd1   :  { %1598 = vmatprep.subr.mxu1 %v754_v37  ;;  %1522 = vmatpush1.msra.mxu0 %v241_v38  ;;  %v1058_v29 = vld [vmem:[#allocation5 + $0x1e28] sm:$0xff]  ;;  %v1057_v31 = vld [vmem:[#allocation5 + $0x1e20] sm:$0xff] }
  0xd2   :  { %1599 = vmatpush1.msra.mxu1 %v753_v39  ;;  %1523 = vmatprep.subr.mxu0 %v226_v40  ;;  %v530_v32 = vld [vmem:[#allocation5 + $0xda8] sm:$0xff]  ;;  %v529_v34 = vld [vmem:[#allocation5 + $0xda0] sm:$0xff] }
  0xd3   :  { %1600 = vmatprep.subr.mxu1 %v738_v41  ;;  %1524 = vmatpush1.msra.mxu0 %v225_v42  ;;  %v1042_v33 = vld [vmem:[#allocation5 + $0x1da8] sm:$0xff]  ;;  %v1041_v35 = vld [vmem:[#allocation5 + $0x1da0] sm:$0xff] }
  0xd4   :  { %1601 = vmatpush1.msra.mxu1 %v737_v43  ;;  %1525 = vmatprep.subr.mxu0 %v210_v44  ;;  %v514_v36 = vld [vmem:[#allocation5 + $0xd28] sm:$0xff]  ;;  %v513_v38 = vld [vmem:[#allocation5 + $0xd20] sm:$0xff] }
  0xd5   :  { %1602 = vmatprep.subr.mxu1 %v722_v45  ;;  %1526 = vmatpush1.msra.mxu0 %v209_v46  ;;  %v1026_v37 = vld [vmem:[#allocation5 + $0x1d28] sm:$0xff]  ;;  %v1025_v39 = vld [vmem:[#allocation5 + $0x1d20] sm:$0xff] }
  0xd6   :  { %1603 = vmatpush1.msra.mxu1 %v721_v47  ;;  %1527 = vmatprep.subr.mxu0 %v194_v48  ;;  %v498_v40 = vld [vmem:[#allocation5 + $0xca8] sm:$0xff]  ;;  %v497_v42 = vld [vmem:[#allocation5 + $0xca0] sm:$0xff] }
  0xd7   :  { %1604 = vmatprep.subr.mxu1 %v706_v49  ;;  %1528 = vmatpush1.msra.mxu0 %v193_v50  ;;  %v1010_v41 = vld [vmem:[#allocation5 + $0x1ca8] sm:$0xff]  ;;  %v1009_v43 = vld [vmem:[#allocation5 + $0x1ca0] sm:$0xff] }
  0xd8   :  { %1605 = vmatpush1.msra.mxu1 %v705_v51  ;;  %1529 = vmatprep.subr.mxu0 %v178_v52  ;;  %v482_v44 = vld [vmem:[#allocation5 + $0xc28] sm:$0xff]  ;;  %v481_v46 = vld [vmem:[#allocation5 + $0xc20] sm:$0xff] }
  0xd9   :  { %1606 = vmatprep.subr.mxu1 %v690_v53  ;;  %1530 = vmatpush1.msra.mxu0 %v177_v54  ;;  %v994_v45 = vld [vmem:[#allocation5 + $0x1c28] sm:$0xff]  ;;  %v993_v47 = vld [vmem:[#allocation5 + $0x1c20] sm:$0xff] }
  0xda   :  { %1607 = vmatpush1.msra.mxu1 %v689_v55  ;;  %1531 = vmatprep.subr.mxu0 %v162_v56  ;;  %v466_v48 = vld [vmem:[#allocation5 + $0xba8] sm:$0xff]  ;;  %v465_v50 = vld [vmem:[#allocation5 + $0xba0] sm:$0xff] }
  0xdb   :  { %1608 = vmatprep.subr.mxu1 %v674_v57  ;;  %1532 = vmatpush1.msra.mxu0 %v161_v58  ;;  %v978_v49 = vld [vmem:[#allocation5 + $0x1ba8] sm:$0xff]  ;;  %v977_v51 = vld [vmem:[#allocation5 + $0x1ba0] sm:$0xff] }
  0xdc   :  { %1609 = vmatpush1.msra.mxu1 %v673_v59  ;;  %1533 = vmatprep.subr.mxu0 %v146_v61  ;;  %v450_v52 = vld [vmem:[#allocation5 + $0xb28] sm:$0xff]  ;;  %v449_v54 = vld [vmem:[#allocation5 + $0xb20] sm:$0xff] }
  0xdd   :  { %1610 = vmatprep.subr.mxu1 %v658_v62  ;;  %1534 = vmatpush1.msra.mxu0 %v145_v3  ;;  %v962_v53 = vld [vmem:[#allocation5 + $0x1b28] sm:$0xff]  ;;  %v961_v55 = vld [vmem:[#allocation5 + $0x1b20] sm:$0xff] }
  0xde   :  { %1611 = vmatpush1.msra.mxu1 %v657_v4  ;;  %1535 = vmatprep.subr.mxu0 %v130_v7  ;;  %v434_v56 = vld [vmem:[#allocation5 + $0xaa8] sm:$0xff]  ;;  %v433_v58 = vld [vmem:[#allocation5 + $0xaa0] sm:$0xff] }
  0xdf   :  { %1612 = vmatprep.subr.mxu1 %v642_v8  ;;  %1536 = vmatpush1.msra.mxu0 %v129_v10  ;;  %v946_v57 = vld [vmem:[#allocation5 + $0x1aa8] sm:$0xff]  ;;  %v945_v59 = vld [vmem:[#allocation5 + $0x1aa0] sm:$0xff] }
  0xe0   :  { %1613 = vmatpush1.msra.mxu1 %v641_v11  ;;  %1537 = vmatprep.subr.mxu0 %v114_v12  ;;  %v418_v61 = vld [vmem:[#allocation5 + $0xa28] sm:$0xff]  ;;  %v417_v3 = vld [vmem:[#allocation5 + $0xa20] sm:$0xff] }
  0xe1   :  { %1614 = vmatprep.subr.mxu1 %v626_v13  ;;  %1538 = vmatpush1.msra.mxu0 %v113_v14  ;;  %v930_v62 = vld [vmem:[#allocation5 + $0x1a28] sm:$0xff]  ;;  %v929_v4 = vld [vmem:[#allocation5 + $0x1a20] sm:$0xff] }
  0xe2   :  { %1615 = vmatpush1.msra.mxu1 %v625_v15  ;;  %1539 = vmatprep.subr.mxu0 %v98_v16  ;;  %v402_v7 = vld [vmem:[#allocation5 + $0x9a8] sm:$0xff]  ;;  %v401_v10 = vld [vmem:[#allocation5 + $0x9a0] sm:$0xff] }
  0xe3   :  { %1616 = vmatprep.subr.mxu1 %v610_v17  ;;  %1540 = vmatpush1.msra.mxu0 %v97_v18  ;;  %v914_v8 = vld [vmem:[#allocation5 + $0x19a8] sm:$0xff]  ;;  %v913_v11 = vld [vmem:[#allocation5 + $0x19a0] sm:$0xff] }
  0xe4   :  { %1617 = vmatpush1.msra.mxu1 %v609_v19  ;;  %1541 = vmatprep.subr.mxu0 %v594_v20  ;;  %v386_v12 = vld [vmem:[#allocation5 + $0x928] sm:$0xff]  ;;  %v385_v14 = vld [vmem:[#allocation5 + $0x920] sm:$0xff] }
  0xe5   :  { %1618 = vmatprep.subr.mxu1 %v1106_v21  ;;  %1542 = vmatpush2.msra.mxu0 %v593_v22  ;;  %v898_v13 = vld [vmem:[#allocation5 + $0x1928] sm:$0xff]  ;;  %v897_v15 = vld [vmem:[#allocation5 + $0x1920] sm:$0xff] }
  0xe6   :  { %1619 = vmatpush2.msra.mxu1 %v1105_v23  ;;  %1543 = vmatprep.subr.mxu0 %v578_v24  ;;  %v370_v16 = vld [vmem:[#allocation5 + $0x8a8] sm:$0xff]  ;;  %v369_v18 = vld [vmem:[#allocation5 + $0x8a0] sm:$0xff]  ;;  %v852_v24 = vld [vmem:[#allocation5 + $0x17b8] sm:$0xff] }
  0xe7   :  { %1620 = vmatprep.subr.mxu1 %v1090_v63  ;;  %1544 = vmatpush2.msra.mxu0 %v577_v25  ;;  %v882_v17 = vld [vmem:[#allocation5 + $0x18a8] sm:$0xff]  ;;  %v881_v19 = vld [vmem:[#allocation5 + $0x18a0] sm:$0xff]  ;;  %v339_v63 = vld [vmem:[#allocation5 + $0x7b0] sm:$0xff] }
  0xe8   :  { %1621 = vmatpush2.msra.mxu1 %v1089_v1  ;;  %1545 = vmatprep.subr.mxu0 %v562_v26  ;;  %v354_v20 = vld [vmem:[#allocation5 + $0x828] sm:$0xff]  ;;  %v353_v22 = vld [vmem:[#allocation5 + $0x820] sm:$0xff]  ;;  %v5036_v25 = vld [vmem:[#allocation2 + $0x18] sm:$0xff] }
  0xe9   :  { %1622 = vmatprep.subr.mxu1 %v1074_v2  ;;  %1546 = vmatpush2.msra.mxu0 %v561_v27  ;;  %v866_v21 = vld [vmem:[#allocation5 + $0x1828] sm:$0xff]  ;;  %v324_v1 = vld [vmem:[#allocation5 + $0x738] sm:$0xff]  ;;  %v5039_v2 = vld [vmem:[#allocation2 + $0x10] sm:$0xff] }
  0xea   :  { %1623 = vmatpush2.msra.mxu1 %v1073_v28  ;;  %1547 = vmatprep.subr.mxu0 %v546_v5  ;;  %v5030_v23 = vld [vmem:[#allocation2 + $0x8] sm:$0xff]  ;;  %v836_v26 = vld [vmem:[#allocation5 + $0x1738] sm:$0xff]  ;;  %v323_v27 = vld [vmem:[#allocation5 + $0x730] sm:$0xff] }
  0xeb   :  { %1624 = vmatprep.subr.mxu1 %v1058_v29  ;;  %1548 = vmatpush2.msra.mxu0 %v545_v30  ;;  %v835_v28 = vld [vmem:[#allocation5 + $0x1730] sm:$0xff]  ;;  %v308_v5 = vld [vmem:[#allocation5 + $0x6b8] sm:$0xff] }
  0xec   :  { %1625 = vmatpush2.msra.mxu1 %v1057_v31  ;;  %1549 = vmatprep.subr.mxu0 %v530_v32  ;;  %v820_v29 = vld [vmem:[#allocation5 + $0x16b8] sm:$0xff]  ;;  %v307_v30 = vld [vmem:[#allocation5 + $0x6b0] sm:$0xff] }
  0xed   :  { %1626 = vmatprep.subr.mxu1 %v1042_v33  ;;  %1550 = vmatpush2.msra.mxu0 %v529_v34  ;;  %v819_v31 = vld [vmem:[#allocation5 + $0x16b0] sm:$0xff]  ;;  %v292_v32 = vld [vmem:[#allocation5 + $0x638] sm:$0xff] }
  0xee   :  { %1627 = vmatpush2.msra.mxu1 %v1041_v35  ;;  %1551 = vmatprep.subr.mxu0 %v514_v36  ;;  %v804_v33 = vld [vmem:[#allocation5 + $0x1638] sm:$0xff]  ;;  %v291_v34 = vld [vmem:[#allocation5 + $0x630] sm:$0xff] }
  0xef   :  { %1628 = vmatprep.subr.mxu1 %v1026_v37  ;;  %1552 = vmatpush2.msra.mxu0 %v513_v38  ;;  %v803_v35 = vld [vmem:[#allocation5 + $0x1630] sm:$0xff]  ;;  %v276_v36 = vld [vmem:[#allocation5 + $0x5b8] sm:$0xff] }
  0xf0   :  { %1629 = vmatpush2.msra.mxu1 %v1025_v39  ;;  %1553 = vmatprep.subr.mxu0 %v498_v40  ;;  %v788_v37 = vld [vmem:[#allocation5 + $0x15b8] sm:$0xff]  ;;  %v275_v38 = vld [vmem:[#allocation5 + $0x5b0] sm:$0xff] }
  0xf1   :  { %1630 = vmatprep.subr.mxu1 %v1010_v41  ;;  %1554 = vmatpush2.msra.mxu0 %v497_v42  ;;  %v787_v39 = vld [vmem:[#allocation5 + $0x15b0] sm:$0xff]  ;;  %v260_v40 = vld [vmem:[#allocation5 + $0x538] sm:$0xff] }
  0xf2   :  { %1631 = vmatpush2.msra.mxu1 %v1009_v43  ;;  %1555 = vmatprep.subr.mxu0 %v482_v44  ;;  %v772_v41 = vld [vmem:[#allocation5 + $0x1538] sm:$0xff]  ;;  %v259_v42 = vld [vmem:[#allocation5 + $0x530] sm:$0xff] }
  0xf3   :  { %1632 = vmatprep.subr.mxu1 %v994_v45  ;;  %1556 = vmatpush2.msra.mxu0 %v481_v46  ;;  %v771_v43 = vld [vmem:[#allocation5 + $0x1530] sm:$0xff]  ;;  %v244_v44 = vld [vmem:[#allocation5 + $0x4b8] sm:$0xff] }
  0xf4   :  { %1633 = vmatpush2.msra.mxu1 %v993_v47  ;;  %1557 = vmatprep.subr.mxu0 %v466_v48  ;;  %v756_v45 = vld [vmem:[#allocation5 + $0x14b8] sm:$0xff]  ;;  %v243_v46 = vld [vmem:[#allocation5 + $0x4b0] sm:$0xff] }
  0xf5   :  { %1634 = vmatprep.subr.mxu1 %v978_v49  ;;  %1558 = vmatpush2.msra.mxu0 %v465_v50  ;;  %v755_v47 = vld [vmem:[#allocation5 + $0x14b0] sm:$0xff]  ;;  %v228_v48 = vld [vmem:[#allocation5 + $0x438] sm:$0xff] }
  0xf6   :  { %1635 = vmatpush2.msra.mxu1 %v977_v51  ;;  %1559 = vmatprep.subr.mxu0 %v450_v52  ;;  %v740_v49 = vld [vmem:[#allocation5 + $0x1438] sm:$0xff]  ;;  %v227_v50 = vld [vmem:[#allocation5 + $0x430] sm:$0xff] }
  0xf7   :  { %1636 = vmatprep.subr.mxu1 %v962_v53  ;;  %1560 = vmatpush2.msra.mxu0 %v449_v54  ;;  %v739_v51 = vld [vmem:[#allocation5 + $0x1430] sm:$0xff]  ;;  %v212_v52 = vld [vmem:[#allocation5 + $0x3b8] sm:$0xff] }
  0xf8   :  { %1637 = vmatpush2.msra.mxu1 %v961_v55  ;;  %1561 = vmatprep.subr.mxu0 %v434_v56  ;;  %v724_v53 = vld [vmem:[#allocation5 + $0x13b8] sm:$0xff]  ;;  %v211_v54 = vld [vmem:[#allocation5 + $0x3b0] sm:$0xff] }
  0xf9   :  { %1638 = vmatprep.subr.mxu1 %v946_v57  ;;  %1562 = vmatpush2.msra.mxu0 %v433_v58  ;;  %v723_v55 = vld [vmem:[#allocation5 + $0x13b0] sm:$0xff]  ;;  %v196_v56 = vld [vmem:[#allocation5 + $0x338] sm:$0xff] }
  0xfa   :  { %1639 = vmatpush2.msra.mxu1 %v945_v59  ;;  %1563 = vmatprep.subr.mxu0 %v418_v61  ;;  %v708_v57 = vld [vmem:[#allocation5 + $0x1338] sm:$0xff]  ;;  %v195_v58 = vld [vmem:[#allocation5 + $0x330] sm:$0xff] }
  0xfb   :  { %1640 = vmatprep.subr.mxu1 %v930_v62  ;;  %1564 = vmatpush2.msra.mxu0 %v417_v3  ;;  %v707_v59 = vld [vmem:[#allocation5 + $0x1330] sm:$0xff]  ;;  %v180_v61 = vld [vmem:[#allocation5 + $0x2b8] sm:$0xff] }
  0xfc   :  { %1641 = vmatpush2.msra.mxu1 %v929_v4  ;;  %1565 = vmatprep.subr.mxu0 %v402_v7  ;;  %v692_v62 = vld [vmem:[#allocation5 + $0x12b8] sm:$0xff]  ;;  %v179_v3 = vld [vmem:[#allocation5 + $0x2b0] sm:$0xff] }
  0xfd   :  { %1642 = vmatprep.subr.mxu1 %v914_v8  ;;  %1566 = vmatpush2.msra.mxu0 %v401_v10  ;;  %v691_v4 = vld [vmem:[#allocation5 + $0x12b0] sm:$0xff]  ;;  %v164_v7 = vld [vmem:[#allocation5 + $0x238] sm:$0xff] }
  0xfe   :  { %1643 = vmatpush2.msra.mxu1 %v913_v11  ;;  %1425 = vmatprep.mubr.f32.mxu0 %v5010_v60  ;;  %v865_v60 = vld [vmem:[#allocation5 + $0x1820] sm:$0xff]  ;;  %v676_v8 = vld [vmem:[#allocation5 + $0x1238] sm:$0xff]  ;;  %v163_v10 = vld [vmem:[#allocation5 + $0x230] sm:$0xff] }
  0xff   :  { %1567 = vmatprep.subr.mxu0 %v386_v12  ;;  %1644 = vmatprep.subr.mxu1 %v898_v13  ;;  %v675_v11 = vld [vmem:[#allocation5 + $0x1230] sm:$0xff]  ;;  %v148_v12 = vld [vmem:[#allocation5 + $0x1b8] sm:$0xff] }
 0x100   :  { %1426 = vmatmul.mubr.f32.gmra.mxu0 %v5012_v0  ;;  %1645 = vmatpush2.msra.mxu1 %v897_v15  ;;  %v340_v0 = vld [vmem:[#allocation5 + $0x7b8] sm:$0xff]  ;;  %v659_v15 = vld [vmem:[#allocation5 + $0x11b0] sm:$0xff] }
 0x101   :  { %1568 = vmatpush2.msra.mxu0 %v385_v14  ;;  %1502 = vmatprep.mubr.f32.mxu1 %v5015_v6  ;;  %v5033_v6 = vld [vmem:[#allocation2] sm:$0xff]  ;;  %v660_v13 = vld [vmem:[#allocation5 + $0x11b8] sm:$0xff]  ;;  %v147_v14 = vld [vmem:[#allocation5 + $0x1b0] sm:$0xff] }
 0x102   :  { %1569 = vmatprep.subr.mxu0 %v370_v16  ;;  %1646 = vmatprep.subr.mxu1 %v882_v17  ;;  %v132_v16 = vld [vmem:[#allocation5 + $0x138] sm:$0xff] }
 0x103   :  { %1503 = vmatmul.mubr.f32.gmra.mxu1 %v5018_v9  ;;  %1570 = vmatpush2.msra.mxu0 %v369_v18  ;;  %v851_v9 = vld [vmem:[#allocation5 + $0x17b0] sm:$0xff]  ;;  %v644_v17 = vld [vmem:[#allocation5 + $0x1138] sm:$0xff] }
 0x104   :  { %1647 = vmatpush2.msra.mxu1 %v881_v19  ;;  %1571 = vmatprep.subr.mxu0 %v354_v20  ;;  %v131_v18 = vld [vmem:[#allocation5 + $0x130] sm:$0xff]  ;;  %v116_v20 = vld [vmem:[#allocation5 + $0xb8] sm:$0xff] }
 0x105   :  { %1648 = vmatprep.subr.mxu1 %v866_v21  ;;  %1572 = vmatpush2.msra.mxu0 %v353_v22  ;;  %v643_v19 = vld [vmem:[#allocation5 + $0x1130] sm:$0xff]  ;;  %v628_v21 = vld [vmem:[#allocation5 + $0x10b8] sm:$0xff] }
 0x106   :  { %1573 = vmatprep.mubr.f32.mxu0 %v5030_v23  ;;  %1649 = vmatpush2.msra.mxu1 %v865_v60  ;;  %v115_v22 = vld [vmem:[#allocation5 + $0xb0] sm:$0xff] }
 0x107   :  { %1574 = vmatmul.mubr.f32.vlgmr.msra.gmra.mxu0 %v5033_v6  ;;  %1650 = vmatprep.mubr.f32.mxu1 %v5036_v25  ;;  %v627_v60 = vld [vmem:[#allocation5 + $0x10b0] sm:$0xff] }
 0x108   :  { %1663 = vmatprep.subr.mxu0 %v340_v0  ;;  %1740 = vmatprep.subr.mxu1 %v852_v24  ;;  %v100_v0 = vld [vmem:[#allocation5 + $0x38] sm:$0xff] }
 0x109   :  { %1651 = vmatmul.mubr.f32.vlgmr.msra.gmra.mxu1 %v5039_v2  ;;  %1664 = vmatpush1.msra.mxu0 %v339_v63  ;;  %v612_v24 = vld [vmem:[#allocation5 + $0x1038] sm:$0xff]  ;;  %v99_v63 = vld [vmem:[#allocation5 + $0x30] sm:$0xff] }
 0x10a   :  { %1741 = vmatpush1.msra.mxu1 %v851_v9  ;;  %1665 = vmatprep.subr.mxu0 %v324_v1  ;;  %v611_v9 = vld [vmem:[#allocation5 + $0x1030] sm:$0xff]  ;;  %v596_v1 = vld [vmem:[#allocation5 + $0xfb8] sm:$0xff] }
 0x10b   :  { %1742 = vmatprep.subr.mxu1 %v836_v26  ;;  %1666 = vmatpush1.msra.mxu0 %v323_v27  ;;  %v1108_v26 = vld [vmem:[#allocation5 + $0x1fb8] sm:$0xff]  ;;  %v595_v27 = vld [vmem:[#allocation5 + $0xfb0] sm:$0xff] }
 0x10c   :  { %1743 = vmatpush1.msra.mxu1 %v835_v28  ;;  %1667 = vmatprep.subr.mxu0 %v308_v5  ;;  %v1107_v28 = vld [vmem:[#allocation5 + $0x1fb0] sm:$0xff]  ;;  %v580_v5 = vld [vmem:[#allocation5 + $0xf38] sm:$0xff] }
 0x10d   :  { %1744 = vmatprep.subr.mxu1 %v820_v29  ;;  %1668 = vmatpush1.msra.mxu0 %v307_v30  ;;  %v1092_v29 = vld [vmem:[#allocation5 + $0x1f38] sm:$0xff]  ;;  %v579_v30 = vld [vmem:[#allocation5 + $0xf30] sm:$0xff] }
 0x10e   :  { %1745 = vmatpush1.msra.mxu1 %v819_v31  ;;  %1669 = vmatprep.subr.mxu0 %v292_v32  ;;  %v1091_v31 = vld [vmem:[#allocation5 + $0x1f30] sm:$0xff]  ;;  %v564_v32 = vld [vmem:[#allocation5 + $0xeb8] sm:$0xff] }
 0x10f   :  { %1746 = vmatprep.subr.mxu1 %v804_v33  ;;  %1670 = vmatpush1.msra.mxu0 %v291_v34  ;;  %v1076_v33 = vld [vmem:[#allocation5 + $0x1eb8] sm:$0xff]  ;;  %v563_v34 = vld [vmem:[#allocation5 + $0xeb0] sm:$0xff] }
 0x110   :  { %1747 = vmatpush1.msra.mxu1 %v803_v35  ;;  %1671 = vmatprep.subr.mxu0 %v276_v36  ;;  %v1075_v35 = vld [vmem:[#allocation5 + $0x1eb0] sm:$0xff]  ;;  %v548_v36 = vld [vmem:[#allocation5 + $0xe38] sm:$0xff] }
 0x111   :  { %1748 = vmatprep.subr.mxu1 %v788_v37  ;;  %1672 = vmatpush1.msra.mxu0 %v275_v38  ;;  %v1060_v37 = vld [vmem:[#allocation5 + $0x1e38] sm:$0xff]  ;;  %v547_v38 = vld [vmem:[#allocation5 + $0xe30] sm:$0xff] }
 0x112   :  { %1749 = vmatpush1.msra.mxu1 %v787_v39  ;;  %1673 = vmatprep.subr.mxu0 %v260_v40  ;;  %v1059_v39 = vld [vmem:[#allocation5 + $0x1e30] sm:$0xff]  ;;  %v532_v40 = vld [vmem:[#allocation5 + $0xdb8] sm:$0xff] }
 0x113   :  { %1750 = vmatprep.subr.mxu1 %v772_v41  ;;  %1674 = vmatpush1.msra.mxu0 %v259_v42  ;;  %v1044_v41 = vld [vmem:[#allocation5 + $0x1db8] sm:$0xff]  ;;  %v531_v42 = vld [vmem:[#allocation5 + $0xdb0] sm:$0xff] }
 0x114   :  { %1751 = vmatpush1.msra.mxu1 %v771_v43  ;;  %1675 = vmatprep.subr.mxu0 %v244_v44  ;;  %v1043_v43 = vld [vmem:[#allocation5 + $0x1db0] sm:$0xff]  ;;  %v516_v44 = vld [vmem:[#allocation5 + $0xd38] sm:$0xff] }
 0x115   :  { %1752 = vmatprep.subr.mxu1 %v756_v45  ;;  %1676 = vmatpush1.msra.mxu0 %v243_v46  ;;  %v1028_v45 = vld [vmem:[#allocation5 + $0x1d38] sm:$0xff]  ;;  %v1121_v46 = vlaneseq }
 0x116   :  { %1753 = vmatpush1.msra.mxu1 %v755_v47  ;;  %1677 = vmatprep.subr.mxu0 %v228_v48  ;;  %v515_v47 = vld [vmem:[#allocation5 + $0xd30] sm:$0xff] }
 0x117   :  { %1754 = vmatprep.subr.mxu1 %v740_v49  ;;  %1678 = vmatpush1.msra.mxu0 %v227_v50  ;;  %v1027_v48 = vld [vmem:[#allocation5 + $0x1d30] sm:$0xff]  ;;  %v500_v49 = vld [vmem:[#allocation5 + $0xcb8] sm:$0xff] }
 0x118   :  { %1755 = vmatpush1.msra.mxu1 %v739_v51  ;;  %1679 = vmatprep.subr.mxu0 %v212_v52  ;;  %v1012_v50 = vld [vmem:[#allocation5 + $0x1cb8] sm:$0xff]  ;;  %v499_v51 = vld [vmem:[#allocation5 + $0xcb0] sm:$0xff] }
 0x119   :  { %1756 = vmatprep.subr.mxu1 %v724_v53  ;;  %1680 = vmatpush1.msra.mxu0 %v211_v54  ;;  %v1011_v52 = vld [vmem:[#allocation5 + $0x1cb0] sm:$0xff]  ;;  %v484_v53 = vld [vmem:[#allocation5 + $0xc38] sm:$0xff] }
 0x11a   :  { %1757 = vmatpush1.msra.mxu1 %v723_v55  ;;  %1681 = vmatprep.subr.mxu0 %v196_v56  ;;  %v996_v54 = vld [vmem:[#allocation5 + $0x1c38] sm:$0xff]  ;;  %v5042_v55 = vshrl.u32 %v1121_v46, 7  ;;  %v483_v56 = vld [vmem:[#allocation5 + $0xc30] sm:$0xff]  ;;  %v838_v46 = vld [vmem:[#allocation5 + $0x1748] sm:$0xff] }
 0x11b   :  { %1758 = vmatprep.subr.mxu1 %v708_v57  ;;  %1682 = vmatpush1.msra.mxu0 %v195_v58  ;;  %v995_v57 = vld [vmem:[#allocation5 + $0x1c30] sm:$0xff]  ;;  %v468_v58 = vld [vmem:[#allocation5 + $0xbb8] sm:$0xff] }
 0x11c   :  { %1759 = vmatpush1.msra.mxu1 %v707_v59  ;;  %1683 = vmatprep.subr.mxu0 %v180_v61  ;;  %v980_v59 = vld [vmem:[#allocation5 + $0x1bb8] sm:$0xff]  ;;  %v467_v61 = vld [vmem:[#allocation5 + $0xbb0] sm:$0xff] }
 0x11d   :  { %1760 = vmatprep.subr.mxu1 %v692_v62  ;;  %1684 = vmatpush1.msra.mxu0 %v179_v3  ;;  %v979_v62 = vld [vmem:[#allocation5 + $0x1bb0] sm:$0xff]  ;;  %v452_v3 = vld [vmem:[#allocation5 + $0xb38] sm:$0xff] }
 0x11e   :  { %1761 = vmatpush1.msra.mxu1 %v691_v4  ;;  %1685 = vmatprep.subr.mxu0 %v164_v7  ;;  %v964_v4 = vld [vmem:[#allocation5 + $0x1b38] sm:$0xff]  ;;  %v5045_v7 = vsub.s32 0, %v5042_v55 }
 0x11f   :  { %1762 = vmatprep.subr.mxu1 %v676_v8  ;;  %1686 = vmatpush1.msra.mxu0 %v163_v10  ;;  %v451_v8 = vld [vmem:[#allocation5 + $0xb30] sm:$0xff] }
 0x120   :  { %1763 = vmatpush1.msra.mxu1 %v675_v11  ;;  %1687 = vmatprep.subr.mxu0 %v148_v12  ;;  %v963_v10 = vld [vmem:[#allocation5 + $0x1b30] sm:$0xff]  ;;  %v5047_v11 = vld [vmem:[#allocation7] sm:$0xff]  ;;  %v436_v12 = vld [vmem:[#allocation5 + $0xab8] sm:$0xff] }
 0x121   :  { %1764 = vmatprep.subr.mxu1 %v660_v13  ;;  %1688 = vmatpush1.msra.mxu0 %v147_v14  ;;  %v948_v13 = vld [vmem:[#allocation5 + $0x1ab8] sm:$0xff]  ;;  %v435_v14 = vld [vmem:[#allocation5 + $0xab0] sm:$0xff] }
 0x122   :  { %1765 = vmatpush1.msra.mxu1 %v659_v15  ;;  %1689 = vmatprep.subr.mxu0 %v132_v16  ;;  %v947_v15 = vld [vmem:[#allocation5 + $0x1ab0] sm:$0xff]  ;;  %v420_v16 = vld [vmem:[#allocation5 + $0xa38] sm:$0xff] }
 0x123   :  { %1766 = vmatprep.subr.mxu1 %v644_v17  ;;  %1690 = vmatpush1.msra.mxu0 %v131_v18  ;;  %v932_v17 = vld [vmem:[#allocation5 + $0x1a38] sm:$0xff]  ;;  %v5051_v18 = vrot.slane %v5047_v11, %v5045_v7 }
 0x124   :  { %1767 = vmatpush1.msra.mxu1 %v643_v19  ;;  %1691 = vmatprep.subr.mxu0 %v116_v20  ;;  %v419_v19 = vld [vmem:[#allocation5 + $0xa30] sm:$0xff] }
 0x125   :  { %1768 = vmatprep.subr.mxu1 %v628_v21  ;;  %1692 = vmatpush1.msra.mxu0 %v115_v22  ;;  %v931_v20 = vld [vmem:[#allocation5 + $0x1a30] sm:$0xff]  ;;  %v404_v21 = vld [vmem:[#allocation5 + $0x9b8] sm:$0xff] }
 0x126   :  { %1769 = vmatpush1.msra.mxu1 %v627_v60  ;;  %1693 = vmatprep.subr.mxu0 %v100_v0  ;;  %v916_v22 = vld [vmem:[#allocation5 + $0x19b8] sm:$0xff]  ;;  %v403_v60 = vld [vmem:[#allocation5 + $0x9b0] sm:$0xff] }
 0x127   :  { %1770 = vmatprep.subr.mxu1 %v612_v24  ;;  %1694 = vmatpush1.msra.mxu0 %v99_v63  ;;  %v915_v0 = vld [vmem:[#allocation5 + $0x19b0] sm:$0xff]  ;;  %v388_v63 = vld [vmem:[#allocation5 + $0x938] sm:$0xff] }
 0x128   :  { %1771 = vmatpush1.msra.mxu1 %v611_v9  ;;  %1695 = vmatprep.subr.mxu0 %v596_v1  ;;  %v900_v1 = vld [vmem:[#allocation5 + $0x1938] sm:$0xff] }
 0x129   :  { %1772 = vmatprep.subr.mxu1 %v1108_v26  ;;  %1696 = vmatpush2.msra.mxu0 %v595_v27  ;;  %v387_v27 = vld [vmem:[#allocation5 + $0x930] sm:$0xff] }
 0x12a   :  { %1773 = vmatpush2.msra.mxu1 %v1107_v28  ;;  %1697 = vmatprep.subr.mxu0 %v580_v5  ;;  %v899_v28 = vld [vmem:[#allocation5 + $0x1930] sm:$0xff] }
 0x12b   :  { %1774 = vmatprep.subr.mxu1 %v1092_v29  ;;  %1698 = vmatpush2.msra.mxu0 %v579_v30  ;;  %v5056_v29 = vld [vmem:[#allocation2 + $0x28] sm:$0xff]  ;;  %v372_v30 = vld [vmem:[#allocation5 + $0x8b8] sm:$0xff] }
 0x12c   :  { %1775 = vmatpush2.msra.mxu1 %v1091_v31  ;;  %1699 = vmatprep.subr.mxu0 %v564_v32  ;;  %v5059_v31 = vld [vmem:[#allocation2 + $0x20] sm:$0xff]  ;;  %v884_v32 = vld [vmem:[#allocation5 + $0x18b8] sm:$0xff] }
 0x12d   :  { %1776 = vmatprep.subr.mxu1 %v1076_v33  ;;  %1700 = vmatpush2.msra.mxu0 %v563_v34  ;;  %v371_v33 = vld [vmem:[#allocation5 + $0x8b0] sm:$0xff] }
 0x12e   :  { %1777 = vmatpush2.msra.mxu1 %v1075_v35  ;;  %1701 = vmatprep.subr.mxu0 %v548_v36  ;;  %v883_v34 = vld [vmem:[#allocation5 + $0x18b0] sm:$0xff]  ;;  %v5062_v35 = vld [vmem:[#allocation2 + $0x38] sm:$0xff] }
 0x12f   :  { %1778 = vmatprep.subr.mxu1 %v1060_v37  ;;  %1702 = vmatpush2.msra.mxu0 %v547_v38  ;;  %v356_v36 = vld [vmem:[#allocation5 + $0x838] sm:$0xff]  ;;  %v5065_v38 = vld [vmem:[#allocation2 + $0x30] sm:$0xff] }
 0x130   :  { %1779 = vmatpush2.msra.mxu1 %v1059_v39  ;;  %1703 = vmatprep.subr.mxu0 %v532_v40  ;;  %v868_v37 = vld [vmem:[#allocation5 + $0x1838] sm:$0xff]  ;;  %v355_v39 = vld [vmem:[#allocation5 + $0x830] sm:$0xff] }
 0x131   :  { %1780 = vmatprep.subr.mxu1 %v1044_v41  ;;  %1704 = vmatpush2.msra.mxu0 %v531_v42  ;;  %v867_v40 = vld [vmem:[#allocation5 + $0x1830] sm:$0xff]  ;;  %v342_v41 = vld [vmem:[#allocation5 + $0x7c8] sm:$0xff] }
 0x132   :  { %1781 = vmatpush2.msra.mxu1 %v1043_v43  ;;  %1705 = vmatprep.subr.mxu0 %v516_v44  ;;  %v854_v42 = vld [vmem:[#allocation5 + $0x17c8] sm:$0xff]  ;;  %v341_v43 = vld [vmem:[#allocation5 + $0x7c0] sm:$0xff] }
 0x133   :  { %1782 = vmatprep.subr.mxu1 %v1028_v45  ;;  %1706 = vmatpush2.msra.mxu0 %v515_v47  ;;  %v853_v44 = vld [vmem:[#allocation5 + $0x17c0] sm:$0xff]  ;;  %v326_v45 = vld [vmem:[#allocation5 + $0x748] sm:$0xff] }
 0x134   :  { %1783 = vmatpush2.msra.mxu1 %v1027_v48  ;;  %1707 = vmatprep.subr.mxu0 %v500_v49  ;;  %v325_v47 = vld [vmem:[#allocation5 + $0x740] sm:$0xff]  ;;  %v310_v49 = vld [vmem:[#allocation5 + $0x6c8] sm:$0xff] }
 0x135   :  { %1784 = vmatprep.subr.mxu1 %v1012_v50  ;;  %1708 = vmatpush2.msra.mxu0 %v499_v51  ;;  %v837_v48 = vld [vmem:[#allocation5 + $0x1740] sm:$0xff]  ;;  %v294_v51 = vld [vmem:[#allocation5 + $0x648] sm:$0xff] }
 0x136   :  { %1785 = vmatpush2.msra.mxu1 %v1011_v52  ;;  %1709 = vmatprep.subr.mxu0 %v484_v53  ;;  %v309_v50 = vld [vmem:[#allocation5 + $0x6c0] sm:$0xff] }
 0x137   :  { %1786 = vmatprep.subr.mxu1 %v996_v54  ;;  %1710 = vmatpush2.msra.mxu0 %v483_v56  ;;  %v293_v52 = vld [vmem:[#allocation5 + $0x640] sm:$0xff]  ;;  %v790_v54 = vld [vmem:[#allocation5 + $0x15c8] sm:$0xff] }
 0x138   :  { %1787 = vmatpush2.msra.mxu1 %v995_v57  ;;  %1711 = vmatprep.subr.mxu0 %v468_v58  ;;  %v805_v53 = vld [vmem:[#allocation5 + $0x1640] sm:$0xff]  ;;  %v262_v58 = vld [vmem:[#allocation5 + $0x548] sm:$0xff] }
 0x139   :  { %1788 = vmatprep.subr.mxu1 %v980_v59  ;;  %1712 = vmatpush2.msra.mxu0 %v467_v61  ;;  %v277_v56 = vld [vmem:[#allocation5 + $0x5c0] sm:$0xff]  ;;  %v774_v59 = vld [vmem:[#allocation5 + $0x1548] sm:$0xff] }
 0x13a   :  { %1789 = vmatpush2.msra.mxu1 %v979_v62  ;;  %1713 = vmatprep.subr.mxu0 %v452_v3  ;;  %v789_v57 = vld [vmem:[#allocation5 + $0x15c0] sm:$0xff]  ;;  %v246_v3 = vld [vmem:[#allocation5 + $0x4c8] sm:$0xff] }
 0x13b   :  { %1790 = vmatprep.subr.mxu1 %v964_v4  ;;  %1714 = vmatpush2.msra.mxu0 %v451_v8  ;;  %v261_v61 = vld [vmem:[#allocation5 + $0x540] sm:$0xff]  ;;  %v758_v4 = vld [vmem:[#allocation5 + $0x14c8] sm:$0xff] }
 0x13c   :  { %1791 = vmatpush2.msra.mxu1 %v963_v10  ;;  %1715 = vmatprep.subr.mxu0 %v436_v12  ;;  %v773_v62 = vld [vmem:[#allocation5 + $0x1540] sm:$0xff]  ;;  %v230_v12 = vld [vmem:[#allocation5 + $0x448] sm:$0xff] }
 0x13d   :  { %1792 = vmatprep.subr.mxu1 %v948_v13  ;;  %1716 = vmatpush2.msra.mxu0 %v435_v14  ;;  %v245_v8 = vld [vmem:[#allocation5 + $0x4c0] sm:$0xff]  ;;  %v742_v13 = vld [vmem:[#allocation5 + $0x1448] sm:$0xff] }
 0x13e   :  { %1793 = vmatpush2.msra.mxu1 %v947_v15  ;;  %1717 = vmatprep.subr.mxu0 %v420_v16  ;;  %v757_v10 = vld [vmem:[#allocation5 + $0x14c0] sm:$0xff]  ;;  %v214_v16 = vld [vmem:[#allocation5 + $0x3c8] sm:$0xff] }
 0x13f   :  { %1794 = vmatprep.subr.mxu1 %v932_v17  ;;  %v1267_v24 = vpop.f32.mrf.mxu0  ;;  %1718 = vmatpush2.msra.mxu0 %v419_v19  ;;  %v229_v14 = vld [vmem:[#allocation5 + $0x440] sm:$0xff]  ;;  %v726_v17 = vld [vmem:[#allocation5 + $0x13c8] sm:$0xff] }
 0x140   :  { %1795 = vmatpush2.msra.mxu1 %v931_v20  ;;  %v1268_v9 = vadd.f32 %v1267_v24, %v5051_v18  ;;  %1719 = vmatprep.subr.mxu0 %v404_v21  ;;  %v741_v15 = vld [vmem:[#allocation5 + $0x1440] sm:$0xff]  ;;  %v198_v21 = vld [vmem:[#allocation5 + $0x348] sm:$0xff] }
 0x141   :  { %1796 = vmatprep.subr.mxu1 %v916_v22  ;;  %v1344_v26 = vpop.f32.mrf.mxu1  ;;  %1720 = vmatpush2.msra.mxu0 %v403_v60  ;;  %v213_v19 = vld [vmem:[#allocation5 + $0x3c0] sm:$0xff]  ;;  %v710_v22 = vld [vmem:[#allocation5 + $0x1348] sm:$0xff] }
 0x142   :  { %1797 = vmatpush2.msra.mxu1 %v915_v0  ;;  %v5054_v5 = vadd.f32 %v1344_v26, %v1268_v9  ;;  %1579 = vmatprep.mubr.f32.mxu0 %v5056_v29  ;;  %v725_v20 = vld [vmem:[#allocation5 + $0x13c0] sm:$0xff]  ;;  %v182_v24 = vld [vmem:[#allocation5 + $0x2c8] sm:$0xff] }
 0x143   :  { %1721 = vmatprep.subr.mxu0 %v388_v63  ;;  %1798 = vmatprep.subr.mxu1 %v900_v1  ;;  %v197_v60 = vld [vmem:[#allocation5 + $0x340] sm:$0xff]  ;;  %v694_v63 = vld [vmem:[#allocation5 + $0x12c8] sm:$0xff] }
 0x144   :  { %1580 = vmatmul.mubr.f32.gmra.mxu0 %v5059_v31  ;;  %1799 = vmatpush2.msra.mxu1 %v899_v28  ;;  %v709_v0 = vld [vmem:[#allocation5 + $0x1340] sm:$0xff]  ;;  %v166_v26 = vld [vmem:[#allocation5 + $0x248] sm:$0xff] }
 0x145   :  { %1722 = vmatpush2.msra.mxu0 %v387_v27  ;;  %1656 = vmatprep.mubr.f32.mxu1 %v5062_v35  ;;  %v181_v9 = vld [vmem:[#allocation5 + $0x2c0] sm:$0xff]  ;;  %v678_v27 = vld [vmem:[#allocation5 + $0x1248] sm:$0xff] }
 0x146   :  { %1723 = vmatprep.subr.mxu0 %v372_v30  ;;  %1800 = vmatprep.subr.mxu1 %v884_v32  ;;  %v693_v1 = vld [vmem:[#allocation5 + $0x12c0] sm:$0xff]  ;;  %v150_v32 = vld [vmem:[#allocation5 + $0x1c8] sm:$0xff] }
 0x147   :  { %1657 = vmatmul.mubr.f32.gmra.mxu1 %v5065_v38  ;;  %1724 = vmatpush2.msra.mxu0 %v371_v33  ;;  %v165_v28 = vld [vmem:[#allocation5 + $0x240] sm:$0xff]  ;;  %v662_v33 = vld [vmem:[#allocation5 + $0x11c8] sm:$0xff] }
 0x148   :  { %1801 = vmatpush2.msra.mxu1 %v883_v34  ;;  %1725 = vmatprep.subr.mxu0 %v356_v36  ;;  %v677_v30 = vld [vmem:[#allocation5 + $0x1240] sm:$0xff] }
 0x149   :  { %1802 = vmatprep.subr.mxu1 %v868_v37  ;;  %1726 = vmatpush2.msra.mxu0 %v355_v39  ;;  %v149_v34 = vld [vmem:[#allocation5 + $0x1c0] sm:$0xff]  ;;  %v134_v37 = vld [vmem:[#allocation5 + $0x148] sm:$0xff] }
 0x14a   :  { %1727 = vmatprep.mubr.f32.mxu0 %v5030_v23  ;;  %1803 = vmatpush2.msra.mxu1 %v867_v40  ;;  %v822_v23 = vld [vmem:[#allocation5 + $0x16c8] sm:$0xff]  ;;  %v661_v36 = vld [vmem:[#allocation5 + $0x11c0] sm:$0xff] }
 0x14b   :  { %1728 = vmatmul.mubr.f32.vlgmr.msra.gmra.mxu0 %v5033_v6  ;;  %1804 = vmatprep.mubr.f32.mxu1 %v5036_v25  ;;  %v821_v6 = vld [vmem:[#allocation5 + $0x16c0] sm:$0xff]  ;;  %v806_v25 = vld [vmem:[#allocation5 + $0x1648] sm:$0xff] }
 0x14c   :  { %1817 = vmatprep.subr.mxu0 %v342_v41  ;;  %1894 = vmatprep.subr.mxu1 %v854_v42  ;;  %v646_v39 = vld [vmem:[#allocation5 + $0x1148] sm:$0xff]  ;;  %v133_v40 = vld [vmem:[#allocation5 + $0x140] sm:$0xff] }
 0x14d   :  { %1805 = vmatmul.mubr.f32.vlgmr.msra.gmra.mxu1 %v5039_v2  ;;  %1818 = vmatpush1.msra.mxu0 %v341_v43  ;;  %v278_v2 = vld [vmem:[#allocation5 + $0x5c8] sm:$0xff]  ;;  %v645_v41 = vld [vmem:[#allocation5 + $0x1140] sm:$0xff] }
 0x14e   :  { %1895 = vmatpush1.msra.mxu1 %v853_v44  ;;  %1819 = vmatprep.subr.mxu0 %v326_v45  ;;  %v118_v42 = vld [vmem:[#allocation5 + $0xc8] sm:$0xff]  ;;  %v117_v44 = vld [vmem:[#allocation5 + $0xc0] sm:$0xff] }
 0x14f   :  { %1896 = vmatprep.subr.mxu1 %v838_v46  ;;  %1820 = vmatpush1.msra.mxu0 %v325_v47  ;;  %v630_v43 = vld [vmem:[#allocation5 + $0x10c8] sm:$0xff]  ;;  %v629_v45 = vld [vmem:[#allocation5 + $0x10c0] sm:$0xff] }
 0x150   :  { %1897 = vmatpush1.msra.mxu1 %v837_v48  ;;  %1821 = vmatprep.subr.mxu0 %v310_v49  ;;  %v102_v46 = vld [vmem:[#allocation5 + $0x48] sm:$0xff]  ;;  %v101_v48 = vld [vmem:[#allocation5 + $0x40] sm:$0xff] }
 0x151   :  { %1898 = vmatprep.subr.mxu1 %v822_v23  ;;  %1822 = vmatpush1.msra.mxu0 %v309_v50  ;;  %v614_v47 = vld [vmem:[#allocation5 + $0x1048] sm:$0xff]  ;;  %v613_v49 = vld [vmem:[#allocation5 + $0x1040] sm:$0xff] }
 0x152   :  { %1899 = vmatpush1.msra.mxu1 %v821_v6  ;;  %1823 = vmatprep.subr.mxu0 %v294_v51  ;;  %v598_v23 = vld [vmem:[#allocation5 + $0xfc8] sm:$0xff]  ;;  %v597_v6 = vld [vmem:[#allocation5 + $0xfc0] sm:$0xff] }
 0x153   :  { %1900 = vmatprep.subr.mxu1 %v806_v25  ;;  %1824 = vmatpush1.msra.mxu0 %v293_v52  ;;  %v1110_v50 = vld [vmem:[#allocation5 + $0x1fc8] sm:$0xff]  ;;  %v1109_v51 = vld [vmem:[#allocation5 + $0x1fc0] sm:$0xff] }
 0x154   :  { %1901 = vmatpush1.msra.mxu1 %v805_v53  ;;  %1825 = vmatprep.subr.mxu0 %v278_v2  ;;  %v582_v25 = vld [vmem:[#allocation5 + $0xf48] sm:$0xff]  ;;  %v581_v53 = vld [vmem:[#allocation5 + $0xf40] sm:$0xff] }
 0x155   :  { %1902 = vmatprep.subr.mxu1 %v790_v54  ;;  %1826 = vmatpush1.msra.mxu0 %v277_v56  ;;  %v1094_v52 = vld [vmem:[#allocation5 + $0x1f48] sm:$0xff]  ;;  %v1093_v2 = vld [vmem:[#allocation5 + $0x1f40] sm:$0xff] }
 0x156   :  { %1903 = vmatpush1.msra.mxu1 %v789_v57  ;;  %1827 = vmatprep.subr.mxu0 %v262_v58  ;;  %v566_v54 = vld [vmem:[#allocation5 + $0xec8] sm:$0xff]  ;;  %v565_v57 = vld [vmem:[#allocation5 + $0xec0] sm:$0xff] }
 0x157   :  { %1904 = vmatprep.subr.mxu1 %v774_v59  ;;  %1828 = vmatpush1.msra.mxu0 %v261_v61  ;;  %v1078_v56 = vld [vmem:[#allocation5 + $0x1ec8] sm:$0xff]  ;;  %v1077_v58 = vld [vmem:[#allocation5 + $0x1ec0] sm:$0xff] }
 0x158   :  { %1905 = vmatpush1.msra.mxu1 %v773_v62  ;;  %1829 = vmatprep.subr.mxu0 %v246_v3  ;;  %v550_v59 = vld [vmem:[#allocation5 + $0xe48] sm:$0xff]  ;;  %v549_v62 = vld [vmem:[#allocation5 + $0xe40] sm:$0xff] }
 0x159   :  { %1906 = vmatprep.subr.mxu1 %v758_v4  ;;  %1830 = vmatpush1.msra.mxu0 %v245_v8  ;;  %v1062_v61 = vld [vmem:[#allocation5 + $0x1e48] sm:$0xff]  ;;  %v1061_v3 = vld [vmem:[#allocation5 + $0x1e40] sm:$0xff] }
 0x15a   :  { %1907 = vmatpush1.msra.mxu1 %v757_v10  ;;  %1831 = vmatprep.subr.mxu0 %v230_v12  ;;  %v534_v4 = vld [vmem:[#allocation5 + $0xdc8] sm:$0xff]  ;;  %v533_v10 = vld [vmem:[#allocation5 + $0xdc0] sm:$0xff] }
 0x15b   :  { %1908 = vmatprep.subr.mxu1 %v742_v13  ;;  %1832 = vmatpush1.msra.mxu0 %v229_v14  ;;  %v1046_v8 = vld [vmem:[#allocation5 + $0x1dc8] sm:$0xff]  ;;  %v1045_v12 = vld [vmem:[#allocation5 + $0x1dc0] sm:$0xff] }
 0x15c   :  { %1909 = vmatpush1.msra.mxu1 %v741_v15  ;;  %1833 = vmatprep.subr.mxu0 %v214_v16  ;;  %v518_v13 = vld [vmem:[#allocation5 + $0xd48] sm:$0xff]  ;;  %v517_v15 = vld [vmem:[#allocation5 + $0xd40] sm:$0xff] }
 0x15d   :  { %1910 = vmatprep.subr.mxu1 %v726_v17  ;;  %1834 = vmatpush1.msra.mxu0 %v213_v19  ;;  %v1030_v14 = vld [vmem:[#allocation5 + $0x1d48] sm:$0xff]  ;;  %v1029_v16 = vld [vmem:[#allocation5 + $0x1d40] sm:$0xff] }
 0x15e   :  { %1911 = vmatpush1.msra.mxu1 %v725_v20  ;;  %1835 = vmatprep.subr.mxu0 %v198_v21  ;;  %v502_v17 = vld [vmem:[#allocation5 + $0xcc8] sm:$0xff]  ;;  %v501_v20 = vld [vmem:[#allocation5 + $0xcc0] sm:$0xff] }
 0x15f   :  { %1912 = vmatprep.subr.mxu1 %v710_v22  ;;  %1836 = vmatpush1.msra.mxu0 %v197_v60  ;;  %v1014_v19 = vld [vmem:[#allocation5 + $0x1cc8] sm:$0xff]  ;;  %v1013_v21 = vld [vmem:[#allocation5 + $0x1cc0] sm:$0xff] }
 0x160   :  { %1913 = vmatpush1.msra.mxu1 %v709_v0  ;;  %1837 = vmatprep.subr.mxu0 %v182_v24  ;;  %v486_v22 = vld [vmem:[#allocation5 + $0xc48] sm:$0xff]  ;;  %v5073_v0 = vsub.s32 1, %v5042_v55  ;;  %v485_v24 = vld [vmem:[#allocation5 + $0xc40] sm:$0xff] }
 0x161   :  { %1914 = vmatprep.subr.mxu1 %v694_v63  ;;  %1838 = vmatpush1.msra.mxu0 %v181_v9  ;;  %v998_v60 = vld [vmem:[#allocation5 + $0x1c48] sm:$0xff]  ;;  %v997_v63 = vld [vmem:[#allocation5 + $0x1c40] sm:$0xff]  ;;  %v5075_v9 = vpop.f32.mrf.mxu0 }
 0x162   :  { %1915 = vmatpush1.msra.mxu1 %v693_v1  ;;  %1839 = vmatprep.subr.mxu0 %v166_v26  ;;  %v470_v1 = vld [vmem:[#allocation5 + $0xbc8] sm:$0xff] }
 0x163   :  { %1916 = vmatprep.subr.mxu1 %v678_v27  ;;  %1840 = vmatpush1.msra.mxu0 %v165_v28  ;;  %v982_v26 = vld [vmem:[#allocation5 + $0x1bc8] sm:$0xff]  ;;  %v469_v27 = vld [vmem:[#allocation5 + $0xbc0] sm:$0xff] }
 0x164   :  { %1917 = vmatpush1.msra.mxu1 %v677_v30  ;;  %1841 = vmatprep.subr.mxu0 %v150_v32  ;;  %v981_v28 = vld [vmem:[#allocation5 + $0x1bc0] sm:$0xff]  ;;  %v454_v30 = vld [vmem:[#allocation5 + $0xb48] sm:$0xff] }
 0x165   :  { %1918 = vmatprep.subr.mxu1 %v662_v33  ;;  %1842 = vmatpush1.msra.mxu0 %v149_v34  ;;  %v966_v32 = vld [vmem:[#allocation5 + $0x1b48] sm:$0xff]  ;;  %v5079_v34 = vrot.slane %v5047_v11, %v5073_v0 }
 0x166   :  { %1919 = vmatpush1.msra.mxu1 %v661_v36  ;;  %1843 = vmatprep.subr.mxu0 %v134_v37  ;;  %v5081_v36 = vpop.f32.mrf.mxu1  ;;  %v453_v37 = vld [vmem:[#allocation5 + $0xb40] sm:$0xff] }
 0x167   :  { %1920 = vmatprep.subr.mxu1 %v646_v39  ;;  %1844 = vmatpush1.msra.mxu0 %v133_v40  ;;  %v965_v39 = vld [vmem:[#allocation5 + $0x1b40] sm:$0xff] }
 0x168   :  { %1921 = vmatpush1.msra.mxu1 %v645_v41  ;;  %1845 = vmatprep.subr.mxu0 %v118_v42  ;;  %v438_v41 = vld [vmem:[#allocation5 + $0xac8] sm:$0xff] }
 0x169   :  { %1922 = vmatprep.subr.mxu1 %v630_v43  ;;  %1846 = vmatpush1.msra.mxu0 %v117_v44  ;;  %v950_v42 = vld [vmem:[#allocation5 + $0x1ac8] sm:$0xff]  ;;  %v437_v44 = vld [vmem:[#allocation5 + $0xac0] sm:$0xff] }
 0x16a   :  { %1923 = vmatpush1.msra.mxu1 %v629_v45  ;;  %1847 = vmatprep.subr.mxu0 %v102_v46  ;;  %v949_v45 = vld [vmem:[#allocation5 + $0x1ac0] sm:$0xff] }
 0x16b   :  { %1924 = vmatprep.subr.mxu1 %v614_v47  ;;  %1848 = vmatpush1.msra.mxu0 %v101_v48  ;;  %v422_v47 = vld [vmem:[#allocation5 + $0xa48] sm:$0xff] }
 0x16c   :  { %1925 = vmatpush1.msra.mxu1 %v613_v49  ;;  %1849 = vmatprep.subr.mxu0 %v598_v23  ;;  %v934_v48 = vld [vmem:[#allocation5 + $0x1a48] sm:$0xff]  ;;  %v933_v23 = vld [vmem:[#allocation5 + $0x1a40] sm:$0xff] }
 0x16d   :  { %1926 = vmatprep.subr.mxu1 %v1110_v50  ;;  %1850 = vmatpush2.msra.mxu0 %v597_v6  ;;  %v406_v6 = vld [vmem:[#allocation5 + $0x9c8] sm:$0xff] }
 0x16e   :  { %1927 = vmatpush2.msra.mxu1 %v1109_v51  ;;  %1851 = vmatprep.subr.mxu0 %v582_v25  ;;  %v918_v51 = vld [vmem:[#allocation5 + $0x19c8] sm:$0xff] }
 0x16f   :  { %1928 = vmatprep.subr.mxu1 %v1094_v52  ;;  %1852 = vmatpush2.msra.mxu0 %v581_v53  ;;  %v405_v52 = vld [vmem:[#allocation5 + $0x9c0] sm:$0xff] }
 0x170   :  { %1929 = vmatpush2.msra.mxu1 %v1093_v2  ;;  %1853 = vmatprep.subr.mxu0 %v566_v54  ;;  %v917_v53 = vld [vmem:[#allocation5 + $0x19c0] sm:$0xff]  ;;  %v390_v2 = vld [vmem:[#allocation5 + $0x948] sm:$0xff] }
 0x171   :  { %1930 = vmatprep.subr.mxu1 %v1078_v56  ;;  %1854 = vmatpush2.msra.mxu0 %v565_v57  ;;  %v902_v54 = vld [vmem:[#allocation5 + $0x1948] sm:$0xff]  ;;  %v389_v56 = vld [vmem:[#allocation5 + $0x940] sm:$0xff] }
 0x172   :  { %1931 = vmatpush2.msra.mxu1 %v1077_v58  ;;  %1855 = vmatprep.subr.mxu0 %v550_v59  ;;  %v901_v57 = vld [vmem:[#allocation5 + $0x1940] sm:$0xff]  ;;  %v374_v58 = vld [vmem:[#allocation5 + $0x8c8] sm:$0xff] }
 0x173   :  { %1932 = vmatprep.subr.mxu1 %v1062_v61  ;;  %1856 = vmatpush2.msra.mxu0 %v549_v62  ;;  %v886_v59 = vld [vmem:[#allocation5 + $0x18c8] sm:$0xff]  ;;  %v373_v61 = vld [vmem:[#allocation5 + $0x8c0] sm:$0xff] }
 0x174   :  { %1933 = vmatpush2.msra.mxu1 %v1061_v3  ;;  %1857 = vmatprep.subr.mxu0 %v534_v4  ;;  %v885_v62 = vld [vmem:[#allocation5 + $0x18c0] sm:$0xff]  ;;  %v358_v3 = vld [vmem:[#allocation5 + $0x848] sm:$0xff] }
 0x175   :  { %1934 = vmatprep.subr.mxu1 %v1046_v8  ;;  %1858 = vmatpush2.msra.mxu0 %v533_v10  ;;  %v870_v4 = vld [vmem:[#allocation5 + $0x1848] sm:$0xff]  ;;  %v357_v8 = vld [vmem:[#allocation5 + $0x840] sm:$0xff] }
 0x176   :  { %1935 = vmatpush2.msra.mxu1 %v1045_v12  ;;  %1859 = vmatprep.subr.mxu0 %v518_v13  ;;  %v5093_v10 = vld [vmem:[#allocation2 + $0x8] sm:$0xff]  ;;  %v856_v12 = vld [vmem:[#allocation5 + $0x17d8] sm:$0xff]  ;;  %v343_v13 = vld [vmem:[#allocation5 + $0x7d0] sm:$0xff] }
 0x177   :  { %1936 = vmatprep.subr.mxu1 %v1030_v14  ;;  %1860 = vmatpush2.msra.mxu0 %v517_v15  ;;  %v5099_v14 = vld [vmem:[#allocation2 + $0x18] sm:$0xff] }
 0x178   :  { %1937 = vmatpush2.msra.mxu1 %v1029_v16  ;;  %1861 = vmatprep.subr.mxu0 %v502_v17  ;;  %v328_v15 = vld [vmem:[#allocation5 + $0x758] sm:$0xff]  ;;  %v5102_v17 = vld [vmem:[#allocation2 + $0x10] sm:$0xff] }
 0x179   :  { %1938 = vmatprep.subr.mxu1 %v1014_v19  ;;  %1862 = vmatpush2.msra.mxu0 %v501_v20  ;;  %v840_v16 = vld [vmem:[#allocation5 + $0x1758] sm:$0xff]  ;;  %v327_v19 = vld [vmem:[#allocation5 + $0x750] sm:$0xff] }
 0x17a   :  { %1939 = vmatpush2.msra.mxu1 %v1013_v21  ;;  %1863 = vmatprep.subr.mxu0 %v486_v22  ;;  %v839_v20 = vld [vmem:[#allocation5 + $0x1750] sm:$0xff]  ;;  %v312_v21 = vld [vmem:[#allocation5 + $0x6d8] sm:$0xff] }
 0x17b   :  { %1940 = vmatprep.subr.mxu1 %v998_v60  ;;  %1864 = vmatpush2.msra.mxu0 %v485_v24  ;;  %v824_v22 = vld [vmem:[#allocation5 + $0x16d8] sm:$0xff]  ;;  %v311_v60 = vld [vmem:[#allocation5 + $0x6d0] sm:$0xff] }
 0x17c   :  { %1941 = vmatpush2.msra.mxu1 %v997_v63  ;;  %v1273_v33 = vpop.f32.mrf.mxu0  ;;  %1865 = vmatprep.subr.mxu0 %v470_v1  ;;  %v823_v24 = vld [vmem:[#allocation5 + $0x16d0] sm:$0xff]  ;;  %v296_v63 = vld [vmem:[#allocation5 + $0x658] sm:$0xff] }
 0x17d   :  { %1942 = vmatprep.subr.mxu1 %v982_v26  ;;  %v1274_v40 = vadd.f32 %v1273_v33, %v5051_v18  ;;  %1866 = vmatpush2.msra.mxu0 %v469_v27  ;;  %v421_v18 = vld [vmem:[#allocation5 + $0xa40] sm:$0xff]  ;;  %v808_v1 = vld [vmem:[#allocation5 + $0x1658] sm:$0xff]  ;;  %v295_v26 = vld [vmem:[#allocation5 + $0x650] sm:$0xff] }
 0x17e   :  { %1943 = vmatpush2.msra.mxu1 %v981_v28  ;;  %v1275_v43 = vpop.f32.mrf.mxu0  ;;  %1867 = vmatprep.subr.mxu0 %v454_v30  ;;  %v807_v27 = vld [vmem:[#allocation5 + $0x1650] sm:$0xff]  ;;  %v280_v28 = vld [vmem:[#allocation5 + $0x5d8] sm:$0xff] }
 0x17f   :  { %1944 = vmatprep.subr.mxu1 %v966_v32  ;;  %v1276_v11 = vadd.f32 %v1275_v43, %v5079_v34  ;;  %v1350_v46 = vpop.f32.mrf.mxu1  ;;  %1868 = vmatpush2.msra.mxu0 %v453_v37  ;;  %v792_v30 = vld [vmem:[#allocation5 + $0x15d8] sm:$0xff]  ;;  %v279_v32 = vld [vmem:[#allocation5 + $0x5d0] sm:$0xff] }
 0x180   :  { %1945 = vmatpush2.msra.mxu1 %v965_v39  ;;  %v5085_v49 = vadd.f32 %v1350_v46, %v1274_v40  ;;  %1869 = vmatprep.subr.mxu0 %v438_v41  ;;  %v791_v33 = vld [vmem:[#allocation5 + $0x15d0] sm:$0xff]  ;;  %v264_v37 = vld [vmem:[#allocation5 + $0x558] sm:$0xff] }
 0x181   :  { %1946 = vmatprep.subr.mxu1 %v950_v42  ;;  %v1352_v50 = vpop.f32.mrf.mxu1  ;;  %1870 = vmatpush2.msra.mxu0 %v437_v44  ;;  %v776_v39 = vld [vmem:[#allocation5 + $0x1558] sm:$0xff]  ;;  %v263_v40 = vld [vmem:[#allocation5 + $0x550] sm:$0xff] }
 0x182   :  { %1947 = vmatpush2.msra.mxu1 %v949_v45  ;;  %v5087_v25 = vadd.f32 %v1352_v50, %v1276_v11  ;;  %1871 = vmatprep.subr.mxu0 %v422_v47  ;;  %v775_v41 = vld [vmem:[#allocation5 + $0x1550] sm:$0xff]  ;;  %v248_v42 = vld [vmem:[#allocation5 + $0x4d8] sm:$0xff] }
 0x183   :  { %1948 = vmatprep.subr.mxu1 %v934_v48  ;;  %1872 = vmatpush2.msra.mxu0 %v421_v18  ;;  %v760_v43 = vld [vmem:[#allocation5 + $0x14d8] sm:$0xff]  ;;  %v247_v44 = vld [vmem:[#allocation5 + $0x4d0] sm:$0xff] }
 0x184   :  { %1949 = vmatpush2.msra.mxu1 %v933_v23  ;;  %1873 = vmatprep.subr.mxu0 %v406_v6  ;;  %v759_v45 = vld [vmem:[#allocation5 + $0x14d0] sm:$0xff]  ;;  %v232_v11 = vld [vmem:[#allocation5 + $0x458] sm:$0xff] }
 0x185   :  { %1950 = vmatprep.subr.mxu1 %v918_v51  ;;  %1874 = vmatpush2.msra.mxu0 %v405_v52  ;;  %v744_v46 = vld [vmem:[#allocation5 + $0x1458] sm:$0xff]  ;;  %v231_v47 = vld [vmem:[#allocation5 + $0x450] sm:$0xff] }
 0x186   :  { %1951 = vmatpush2.msra.mxu1 %v917_v53  ;;  %1733 = vmatprep.mubr.f32.mxu0 %v5056_v29  ;;  %v869_v29 = vld [vmem:[#allocation5 + $0x1840] sm:$0xff]  ;;  %v743_v48 = vld [vmem:[#allocation5 + $0x1450] sm:$0xff]  ;;  %v216_v18 = vld [vmem:[#allocation5 + $0x3d8] sm:$0xff] }
 0x187   :  { %1875 = vmatprep.subr.mxu0 %v390_v2  ;;  %1952 = vmatprep.subr.mxu1 %v902_v54  ;;  %v728_v23 = vld [vmem:[#allocation5 + $0x13d8] sm:$0xff]  ;;  %v215_v50 = vld [vmem:[#allocation5 + $0x3d0] sm:$0xff] }
 0x188   :  { %1734 = vmatmul.mubr.f32.gmra.mxu0 %v5059_v31  ;;  %1953 = vmatpush2.msra.mxu1 %v901_v57  ;;  %v344_v31 = vld [vmem:[#allocation5 + $0x7d8] sm:$0xff]  ;;  %v727_v6 = vld [vmem:[#allocation5 + $0x13d0] sm:$0xff] }
 0x189   :  { %1876 = vmatpush2.msra.mxu0 %v389_v56  ;;  %1810 = vmatprep.mubr.f32.mxu1 %v5062_v35  ;;  %v5096_v35 = vld [vmem:[#allocation2] sm:$0xff]  ;;  %v200_v51 = vld [vmem:[#allocation5 + $0x358] sm:$0xff]  ;;  %v199_v53 = vld [vmem:[#allocation5 + $0x350] sm:$0xff] }
 0x18a   :  { %1877 = vmatprep.subr.mxu0 %v374_v58  ;;  %1954 = vmatprep.subr.mxu1 %v886_v59  ;;  %v712_v52 = vld [vmem:[#allocation5 + $0x1358] sm:$0xff]  ;;  %v711_v2 = vld [vmem:[#allocation5 + $0x1350] sm:$0xff] }
 0x18b   :  { %1811 = vmatmul.mubr.f32.gmra.mxu1 %v5065_v38  ;;  %1878 = vmatpush2.msra.mxu0 %v373_v61  ;;  %v855_v38 = vld [vmem:[#allocation5 + $0x17d0] sm:$0xff]  ;;  %v184_v54 = vld [vmem:[#allocation5 + $0x2d8] sm:$0xff] }
 0x18c   :  { %1955 = vmatpush2.msra.mxu1 %v885_v62  ;;  %1879 = vmatprep.subr.mxu0 %v358_v3  ;;  %v696_v56 = vld [vmem:[#allocation5 + $0x12d8] sm:$0xff]  ;;  %v183_v57 = vld [vmem:[#allocation5 + $0x2d0] sm:$0xff] }
 0x18d   :  { %1956 = vmatprep.subr.mxu1 %v870_v4  ;;  %1880 = vmatpush2.msra.mxu0 %v357_v8  ;;  %v695_v58 = vld [vmem:[#allocation5 + $0x12d0] sm:$0xff]  ;;  %v168_v59 = vld [vmem:[#allocation5 + $0x258] sm:$0xff] }
 0x18e   :  { %1881 = vmatprep.mubr.f32.mxu0 %v5093_v10  ;;  %1957 = vmatpush2.msra.mxu1 %v869_v29  ;;  %v680_v61 = vld [vmem:[#allocation5 + $0x1258] sm:$0xff]  ;;  %v167_v62 = vld [vmem:[#allocation5 + $0x250] sm:$0xff] }
 0x18f   :  { %1882 = vmatmul.mubr.f32.vlgmr.msra.gmra.mxu0 %v5096_v35  ;;  %1958 = vmatprep.mubr.f32.mxu1 %v5099_v14  ;;  %v679_v3 = vld [vmem:[#allocation5 + $0x1250] sm:$0xff]  ;;  %v152_v4 = vld [vmem:[#allocation5 + $0x1d8] sm:$0xff] }
 0x190   :  { %1971 = vmatprep.subr.mxu0 %v344_v31  ;;  %2048 = vmatprep.subr.mxu1 %v856_v12  ;;  %v664_v8 = vld [vmem:[#allocation5 + $0x11d8] sm:$0xff]  ;;  %v151_v29 = vld [vmem:[#allocation5 + $0x1d0] sm:$0xff] }
 0x191   :  { %1959 = vmatmul.mubr.f32.vlgmr.msra.gmra.mxu1 %v5102_v17  ;;  %1972 = vmatpush1.msra.mxu0 %v343_v13  ;;  %v663_v31 = vld [vmem:[#allocation5 + $0x11d0] sm:$0xff]  ;;  %v136_v12 = vld [vmem:[#allocation5 + $0x158] sm:$0xff] }
 0x192   :  { %2049 = vmatpush1.msra.mxu1 %v855_v38  ;;  %1973 = vmatprep.subr.mxu0 %v328_v15  ;;  %v648_v13 = vld [vmem:[#allocation5 + $0x1158] sm:$0xff]  ;;  %v135_v38 = vld [vmem:[#allocation5 + $0x150] sm:$0xff] }
 0x193   :  { %2050 = vmatprep.subr.mxu1 %v840_v16  ;;  %1974 = vmatpush1.msra.mxu0 %v327_v19  ;;  %v647_v15 = vld [vmem:[#allocation5 + $0x1150] sm:$0xff]  ;;  %v120_v16 = vld [vmem:[#allocation5 + $0xd8] sm:$0xff] }
 0x194   :  { %2051 = vmatpush1.msra.mxu1 %v839_v20  ;;  %1975 = vmatprep.subr.mxu0 %v312_v21  ;;  %v632_v19 = vld [vmem:[#allocation5 + $0x10d8] sm:$0xff]  ;;  %v119_v20 = vld [vmem:[#allocation5 + $0xd0] sm:$0xff] }
 0x195   :  { %2052 = vmatprep.subr.mxu1 %v824_v22  ;;  %1976 = vmatpush1.msra.mxu0 %v311_v60  ;;  %v631_v21 = vld [vmem:[#allocation5 + $0x10d0] sm:$0xff]  ;;  %v104_v22 = vld [vmem:[#allocation5 + $0x58] sm:$0xff] }
 0x196   :  { %2053 = vmatpush1.msra.mxu1 %v823_v24  ;;  %1977 = vmatprep.subr.mxu0 %v296_v63  ;;  %v616_v60 = vld [vmem:[#allocation5 + $0x1058] sm:$0xff]  ;;  %v103_v24 = vld [vmem:[#allocation5 + $0x50] sm:$0xff] }
 0x197   :  { %2054 = vmatprep.subr.mxu1 %v808_v1  ;;  %1978 = vmatpush1.msra.mxu0 %v295_v26  ;;  %v615_v63 = vld [vmem:[#allocation5 + $0x1050] sm:$0xff]  ;;  %v600_v1 = vld [vmem:[#allocation5 + $0xfd8] sm:$0xff] }
 0x198   :  { %2055 = vmatpush1.msra.mxu1 %v807_v27  ;;  %1979 = vmatprep.subr.mxu0 %v280_v28  ;;  %v1112_v26 = vld [vmem:[#allocation5 + $0x1fd8] sm:$0xff]  ;;  %v599_v27 = vld [vmem:[#allocation5 + $0xfd0] sm:$0xff] }
 0x199   :  { %2056 = vmatprep.subr.mxu1 %v792_v30  ;;  %1980 = vmatpush1.msra.mxu0 %v279_v32  ;;  %v1111_v28 = vld [vmem:[#allocation5 + $0x1fd0] sm:$0xff]  ;;  %v584_v30 = vld [vmem:[#allocation5 + $0xf58] sm:$0xff] }
 0x19a   :  { %2057 = vmatpush1.msra.mxu1 %v791_v33  ;;  %1981 = vmatprep.subr.mxu0 %v264_v37  ;;  %v1096_v32 = vld [vmem:[#allocation5 + $0x1f58] sm:$0xff]  ;;  %v583_v33 = vld [vmem:[#allocation5 + $0xf50] sm:$0xff] }
 0x19b   :  { %2058 = vmatprep.subr.mxu1 %v776_v39  ;;  %1982 = vmatpush1.msra.mxu0 %v263_v40  ;;  %v1095_v37 = vld [vmem:[#allocation5 + $0x1f50] sm:$0xff]  ;;  %v568_v39 = vld [vmem:[#allocation5 + $0xed8] sm:$0xff] }
 0x19c   :  { %2059 = vmatpush1.msra.mxu1 %v775_v41  ;;  %1983 = vmatprep.subr.mxu0 %v248_v42  ;;  %v1080_v40 = vld [vmem:[#allocation5 + $0x1ed8] sm:$0xff]  ;;  %v567_v41 = vld [vmem:[#allocation5 + $0xed0] sm:$0xff] }
 0x19d   :  { %2060 = vmatprep.subr.mxu1 %v760_v43  ;;  %1984 = vmatpush1.msra.mxu0 %v247_v44  ;;  %v1079_v42 = vld [vmem:[#allocation5 + $0x1ed0] sm:$0xff]  ;;  %v552_v43 = vld [vmem:[#allocation5 + $0xe58] sm:$0xff] }
 0x19e   :  { %2061 = vmatpush1.msra.mxu1 %v759_v45  ;;  %1985 = vmatprep.subr.mxu0 %v232_v11  ;;  %v1064_v44 = vld [vmem:[#allocation5 + $0x1e58] sm:$0xff]  ;;  %v551_v45 = vld [vmem:[#allocation5 + $0xe50] sm:$0xff] }
 0x19f   :  { %2062 = vmatprep.subr.mxu1 %v744_v46  ;;  %1986 = vmatpush1.msra.mxu0 %v231_v47  ;;  %v1063_v11 = vld [vmem:[#allocation5 + $0x1e50] sm:$0xff]  ;;  %v536_v46 = vld [vmem:[#allocation5 + $0xdd8] sm:$0xff] }
 0x1a0   :  { %2063 = vmatpush1.msra.mxu1 %v743_v48  ;;  %1987 = vmatprep.subr.mxu0 %v216_v18  ;;  %v1048_v47 = vld [vmem:[#allocation5 + $0x1dd8] sm:$0xff]  ;;  %v535_v48 = vld [vmem:[#allocation5 + $0xdd0] sm:$0xff] }
 0x1a1   :  { %2064 = vmatprep.subr.mxu1 %v728_v23  ;;  %1988 = vmatpush1.msra.mxu0 %v215_v50  ;;  %v1047_v18 = vld [vmem:[#allocation5 + $0x1dd0] sm:$0xff]  ;;  %v520_v23 = vld [vmem:[#allocation5 + $0xd58] sm:$0xff] }
 0x1a2   :  { %2065 = vmatpush1.msra.mxu1 %v727_v6  ;;  %1989 = vmatprep.subr.mxu0 %v200_v51  ;;  %v1032_v50 = vld [vmem:[#allocation5 + $0x1d58] sm:$0xff]  ;;  %v519_v6 = vld [vmem:[#allocation5 + $0xd50] sm:$0xff] }
 0x1a3   :  { %2066 = vmatprep.subr.mxu1 %v712_v52  ;;  %1990 = vmatpush1.msra.mxu0 %v199_v53  ;;  %v1031_v51 = vld [vmem:[#allocation5 + $0x1d50] sm:$0xff]  ;;  %v5105_v52 = vpop.f32.mrf.mxu0  ;;  %v504_v53 = vld [vmem:[#allocation5 + $0xcd8] sm:$0xff] }
 0x1a4   :  { %2067 = vmatpush1.msra.mxu1 %v711_v2  ;;  %1991 = vmatprep.subr.mxu0 %v184_v54  ;;  %v1016_v2 = vld [vmem:[#allocation5 + $0x1cd8] sm:$0xff]  ;;  %v503_v54 = vld [vmem:[#allocation5 + $0xcd0] sm:$0xff] }
 0x1a5   :  { %2068 = vmatprep.subr.mxu1 %v696_v56  ;;  %1992 = vmatpush1.msra.mxu0 %v183_v57  ;;  %v1015_v56 = vld [vmem:[#allocation5 + $0x1cd0] sm:$0xff]  ;;  %v488_v57 = vld [vmem:[#allocation5 + $0xc58] sm:$0xff] }
 0x1a6   :  { %2069 = vmatpush1.msra.mxu1 %v695_v58  ;;  %1993 = vmatprep.subr.mxu0 %v168_v59  ;;  %v1000_v58 = vld [vmem:[#allocation5 + $0x1c58] sm:$0xff]  ;;  %v5107_v59 = vpop.f32.mrf.mxu1 }
 0x1a7   :  { %2070 = vmatprep.subr.mxu1 %v680_v61  ;;  %1994 = vmatpush1.msra.mxu0 %v167_v62  ;;  %v487_v61 = vld [vmem:[#allocation5 + $0xc50] sm:$0xff] }
 0x1a8   :  { %2071 = vmatpush1.msra.mxu1 %v679_v3  ;;  %1995 = vmatprep.subr.mxu0 %v152_v4  ;;  %v999_v62 = vld [vmem:[#allocation5 + $0x1c50] sm:$0xff]  ;;  %v5109_v3 = vpop.f32.mrf.mxu0  ;;  %v472_v4 = vld [vmem:[#allocation5 + $0xbd8] sm:$0xff] }
 0x1a9   :  { %2072 = vmatprep.subr.mxu1 %v664_v8  ;;  %1996 = vmatpush1.msra.mxu0 %v151_v29  ;;  %v984_v8 = vld [vmem:[#allocation5 + $0x1bd8] sm:$0xff]  ;;  %v471_v29 = vld [vmem:[#allocation5 + $0xbd0] sm:$0xff] }
 0x1aa   :  { %2073 = vmatpush1.msra.mxu1 %v663_v31  ;;  %1997 = vmatprep.subr.mxu0 %v136_v12  ;;  %v983_v31 = vld [vmem:[#allocation5 + $0x1bd0] sm:$0xff]  ;;  %v456_v12 = vld [vmem:[#allocation5 + $0xb58] sm:$0xff] }
 0x1ab   :  { %2074 = vmatprep.subr.mxu1 %v648_v13  ;;  %1998 = vmatpush1.msra.mxu0 %v135_v38  ;;  %v968_v13 = vld [vmem:[#allocation5 + $0x1b58] sm:$0xff] }
 0x1ac   :  { %2075 = vmatpush1.msra.mxu1 %v647_v15  ;;  %1999 = vmatprep.subr.mxu0 %v120_v16  ;;  %v1139_v15 = vsub.s32 4, %v5042_v55  ;;  %v5114_v16 = vpop.f32.mrf.mxu1 }
 0x1ad   :  { %2076 = vmatprep.subr.mxu1 %v632_v19  ;;  %2000 = vmatpush1.msra.mxu0 %v119_v20  ;;  %v455_v19 = vld [vmem:[#allocation5 + $0xb50] sm:$0xff] }
 0x1ae   :  { %2077 = vmatpush1.msra.mxu1 %v631_v21  ;;  %2001 = vmatprep.subr.mxu0 %v104_v22  ;;  %v967_v20 = vld [vmem:[#allocation5 + $0x1b50] sm:$0xff]  ;;  %v440_v21 = vld [vmem:[#allocation5 + $0xad8] sm:$0xff] }
 0x1af   :  { %2078 = vmatprep.subr.mxu1 %v616_v60  ;;  %2002 = vmatpush1.msra.mxu0 %v103_v24  ;;  %v952_v22 = vld [vmem:[#allocation5 + $0x1ad8] sm:$0xff]  ;;  %v439_v60 = vld [vmem:[#allocation5 + $0xad0] sm:$0xff] }
 0x1b0   :  { %2079 = vmatpush1.msra.mxu1 %v615_v63  ;;  %2003 = vmatprep.subr.mxu0 %v600_v1  ;;  %v951_v24 = vld [vmem:[#allocation5 + $0x1ad0] sm:$0xff] }
 0x1b1   :  { %2080 = vmatprep.subr.mxu1 %v1112_v26  ;;  %2004 = vmatpush2.msra.mxu0 %v599_v27  ;;  %v424_v26 = vld [vmem:[#allocation5 + $0xa58] sm:$0xff] }
 0x1b2   :  { %2081 = vmatpush2.msra.mxu1 %v1111_v28  ;;  %2005 = vmatprep.subr.mxu0 %v584_v30  ;;  %v936_v27 = vld [vmem:[#allocation5 + $0x1a58] sm:$0xff]  ;;  %v5120_v28 = vld [vmem:[#allocation7] sm:$0xff] }
 0x1b3   :  { %2082 = vmatprep.subr.mxu1 %v1096_v32  ;;  %2006 = vmatpush2.msra.mxu0 %v583_v33  ;;  %v5125_v30 = vrot.slane %v5120_v28, %v1139_v15  ;;  %v423_v32 = vld [vmem:[#allocation5 + $0xa50] sm:$0xff] }
 0x1b4   :  { %2083 = vmatpush2.msra.mxu1 %v1095_v37  ;;  %2007 = vmatprep.subr.mxu0 %v568_v39  ;;  %v935_v33 = vld [vmem:[#allocation5 + $0x1a50] sm:$0xff]  ;;  %v408_v39 = vld [vmem:[#allocation5 + $0x9d8] sm:$0xff] }
 0x1b5   :  { %2084 = vmatprep.subr.mxu1 %v1080_v40  ;;  %2008 = vmatpush2.msra.mxu0 %v567_v41  ;;  %v920_v40 = vld [vmem:[#allocation5 + $0x19d8] sm:$0xff]  ;;  %v407_v41 = vld [vmem:[#allocation5 + $0x9d0] sm:$0xff] }
 0x1b6   :  { %2085 = vmatpush2.msra.mxu1 %v1079_v42  ;;  %2009 = vmatprep.subr.mxu0 %v552_v43  ;;  %v919_v42 = vld [vmem:[#allocation5 + $0x19d0] sm:$0xff] }
 0x1b7   :  { %2086 = vmatprep.subr.mxu1 %v1064_v44  ;;  %2010 = vmatpush2.msra.mxu0 %v551_v45  ;;  %v392_v44 = vld [vmem:[#allocation5 + $0x958] sm:$0xff] }
 0x1b8   :  { %2087 = vmatpush2.msra.mxu1 %v1063_v11  ;;  %2011 = vmatprep.subr.mxu0 %v536_v46  ;;  %v904_v11 = vld [vmem:[#allocation5 + $0x1958] sm:$0xff] }
 0x1b9   :  { %2088 = vmatprep.subr.mxu1 %v1048_v47  ;;  %2012 = vmatpush2.msra.mxu0 %v535_v48  ;;  %v391_v47 = vld [vmem:[#allocation5 + $0x950] sm:$0xff] }
 0x1ba   :  { %2089 = vmatpush2.msra.mxu1 %v1047_v18  ;;  %2013 = vmatprep.subr.mxu0 %v520_v23  ;;  %v903_v48 = vld [vmem:[#allocation5 + $0x1950] sm:$0xff]  ;;  %v5132_v23 = vld [vmem:[#allocation2 + $0x28] sm:$0xff] }
 0x1bb   :  { %2090 = vmatprep.subr.mxu1 %v1032_v50  ;;  %2014 = vmatpush2.msra.mxu0 %v519_v6  ;;  %v376_v50 = vld [vmem:[#allocation5 + $0x8d8] sm:$0xff]  ;;  %v5135_v6 = vld [vmem:[#allocation2 + $0x20] sm:$0xff] }
 0x1bc   :  { %2091 = vmatpush2.msra.mxu1 %v1031_v51  ;;  %2015 = vmatprep.subr.mxu0 %v504_v53  ;;  %v888_v51 = vld [vmem:[#allocation5 + $0x18d8] sm:$0xff]  ;;  %v375_v53 = vld [vmem:[#allocation5 + $0x8d0] sm:$0xff] }
 0x1bd   :  { %2092 = vmatprep.subr.mxu1 %v1016_v2  ;;  %2016 = vmatpush2.msra.mxu0 %v503_v54  ;;  %v887_v2 = vld [vmem:[#allocation5 + $0x18d0] sm:$0xff]  ;;  %v5138_v54 = vld [vmem:[#allocation2 + $0x38] sm:$0xff] }
 0x1be   :  { %2093 = vmatpush2.msra.mxu1 %v1015_v56  ;;  %2017 = vmatprep.subr.mxu0 %v488_v57  ;;  %v360_v56 = vld [vmem:[#allocation5 + $0x858] sm:$0xff] }
 0x1bf   :  { %2094 = vmatprep.subr.mxu1 %v1000_v58  ;;  %2018 = vmatpush2.msra.mxu0 %v487_v61  ;;  %v872_v57 = vld [vmem:[#allocation5 + $0x1858] sm:$0xff]  ;;  %v5141_v58 = vld [vmem:[#allocation2 + $0x30] sm:$0xff] }
 0x1c0   :  { %2095 = vmatpush2.msra.mxu1 %v999_v62  ;;  %v5111_v38 = vpop.f32.mrf.mxu0  ;;  %2019 = vmatprep.subr.mxu0 %v472_v4  ;;  %v359_v61 = vld [vmem:[#allocation5 + $0x850] sm:$0xff]  ;;  %v346_v4 = vld [vmem:[#allocation5 + $0x7e8] sm:$0xff] }
 0x1c1   :  { %2096 = vmatprep.subr.mxu1 %v984_v8  ;;  %2020 = vmatpush2.msra.mxu0 %v471_v29  ;;  %v871_v62 = vld [vmem:[#allocation5 + $0x1850] sm:$0xff]  ;;  %v858_v8 = vld [vmem:[#allocation5 + $0x17e8] sm:$0xff]  ;;  %v345_v29 = vld [vmem:[#allocation5 + $0x7e0] sm:$0xff] }
 0x1c2   :  { %2097 = vmatpush2.msra.mxu1 %v983_v31  ;;  %2021 = vmatprep.subr.mxu0 %v456_v12  ;;  %v5116_v63 = vpop.f32.mrf.mxu0  ;;  %v857_v31 = vld [vmem:[#allocation5 + $0x17e0] sm:$0xff]  ;;  %v330_v12 = vld [vmem:[#allocation5 + $0x768] sm:$0xff] }
 0x1c3   :  { %2098 = vmatprep.subr.mxu1 %v968_v13  ;;  %v5118_v1 = vpop.f32.mrf.mxu1  ;;  %2022 = vmatpush2.msra.mxu0 %v455_v19  ;;  %v842_v13 = vld [vmem:[#allocation5 + $0x1768] sm:$0xff]  ;;  %v329_v19 = vld [vmem:[#allocation5 + $0x760] sm:$0xff] }
 0x1c4   :  { %2099 = vmatpush2.msra.mxu1 %v967_v20  ;;  %2023 = vmatprep.subr.mxu0 %v440_v21  ;;  %v841_v20 = vld [vmem:[#allocation5 + $0x1760] sm:$0xff]  ;;  %v314_v21 = vld [vmem:[#allocation5 + $0x6e8] sm:$0xff] }
 0x1c5   :  { %2100 = vmatprep.subr.mxu1 %v952_v22  ;;  %v5127_v37 = vpop.f32.mrf.mxu1  ;;  %2024 = vmatpush2.msra.mxu0 %v439_v60  ;;  %v313_v22 = vld [vmem:[#allocation5 + $0x6e0] sm:$0xff]  ;;  %v298_v60 = vld [vmem:[#allocation5 + $0x668] sm:$0xff] }
 0x1c6   :  { %2101 = vmatpush2.msra.mxu1 %v951_v24  ;;  %2025 = vmatprep.subr.mxu0 %v424_v26  ;;  %v297_v24 = vld [vmem:[#allocation5 + $0x660] sm:$0xff] }
 0x1c7   :  { %2102 = vmatprep.subr.mxu1 %v936_v27  ;;  %v1575_v43 = vpop.f32.mrf.mxu0  ;;  %2026 = vmatpush2.msra.mxu0 %v423_v32  ;;  %v809_v26 = vld [vmem:[#allocation5 + $0x1660] sm:$0xff]  ;;  %v794_v27 = vld [vmem:[#allocation5 + $0x15e8] sm:$0xff] }
 0x1c8   :  { %2103 = vmatpush2.msra.mxu1 %v935_v33  ;;  %v1576_v45 = vadd.f32 %v1575_v43, %v5125_v30  ;;  %2027 = vmatprep.subr.mxu0 %v408_v39  ;;  %v281_v32 = vld [vmem:[#allocation5 + $0x5e0] sm:$0xff]  ;;  %v266_v39 = vld [vmem:[#allocation5 + $0x568] sm:$0xff] }
 0x1c9   :  { %2104 = vmatprep.subr.mxu1 %v920_v40  ;;  %v1652_v46 = vpop.f32.mrf.mxu1  ;;  %2028 = vmatpush2.msra.mxu0 %v407_v41  ;;  %v793_v33 = vld [vmem:[#allocation5 + $0x15e0] sm:$0xff]  ;;  %v778_v40 = vld [vmem:[#allocation5 + $0x1568] sm:$0xff] }
 0x1ca   :  { %2105 = vmatpush2.msra.mxu1 %v919_v42  ;;  %v5130_v18 = vadd.f32 %v1652_v46, %v1576_v45  ;;  %1887 = vmatprep.mubr.f32.mxu0 %v5132_v23  ;;  %v265_v41 = vld [vmem:[#allocation5 + $0x560] sm:$0xff]  ;;  %v250_v43 = vld [vmem:[#allocation5 + $0x4e8] sm:$0xff] }
 0x1cb   :  { %2029 = vmatprep.subr.mxu0 %v392_v44  ;;  %2106 = vmatprep.subr.mxu1 %v904_v11  ;;  %v777_v42 = vld [vmem:[#allocation5 + $0x1560] sm:$0xff]  ;;  %v762_v44 = vld [vmem:[#allocation5 + $0x14e8] sm:$0xff] }
 0x1cc   :  { %1888 = vmatmul.mubr.f32.gmra.mxu0 %v5135_v6  ;;  %2107 = vmatpush2.msra.mxu1 %v903_v48  ;;  %v249_v45 = vld [vmem:[#allocation5 + $0x4e0] sm:$0xff]  ;;  %v234_v46 = vld [vmem:[#allocation5 + $0x468] sm:$0xff] }
 0x1cd   :  { %2030 = vmatpush2.msra.mxu0 %v391_v47  ;;  %1964 = vmatprep.mubr.f32.mxu1 %v5138_v54  ;;  %v761_v11 = vld [vmem:[#allocation5 + $0x14e0] sm:$0xff]  ;;  %v746_v47 = vld [vmem:[#allocation5 + $0x1468] sm:$0xff] }
 0x1ce   :  { %2031 = vmatprep.subr.mxu0 %v376_v50  ;;  %2108 = vmatprep.subr.mxu1 %v888_v51  ;;  %v233_v48 = vld [vmem:[#allocation5 + $0x460] sm:$0xff]  ;;  %v218_v51 = vld [vmem:[#allocation5 + $0x3e8] sm:$0xff] }
 0x1cf   :  { %1965 = vmatmul.mubr.f32.gmra.mxu1 %v5141_v58  ;;  %2032 = vmatpush2.msra.mxu0 %v375_v53  ;;  %v745_v50 = vld [vmem:[#allocation5 + $0x1460] sm:$0xff]  ;;  %v730_v53 = vld [vmem:[#allocation5 + $0x13e8] sm:$0xff] }
 0x1d0   :  { %2109 = vmatpush2.msra.mxu1 %v887_v2  ;;  %2033 = vmatprep.subr.mxu0 %v360_v56  ;;  %v217_v2 = vld [vmem:[#allocation5 + $0x3e0] sm:$0xff] }
 0x1d1   :  { %2110 = vmatprep.subr.mxu1 %v872_v57  ;;  %2034 = vmatpush2.msra.mxu0 %v359_v61  ;;  %v729_v56 = vld [vmem:[#allocation5 + $0x13e0] sm:$0xff]  ;;  %v202_v57 = vld [vmem:[#allocation5 + $0x368] sm:$0xff] }
 0x1d2   :  { %2035 = vmatprep.mubr.f32.mxu0 %v5093_v10  ;;  %2111 = vmatpush2.msra.mxu1 %v871_v62  ;;  %v826_v10 = vld [vmem:[#allocation5 + $0x16e8] sm:$0xff]  ;;  %v201_v62 = vld [vmem:[#allocation5 + $0x360] sm:$0xff] }
 0x1d3   :  { %2036 = vmatmul.mubr.f32.vlgmr.msra.gmra.mxu0 %v5096_v35  ;;  %2112 = vmatprep.mubr.f32.mxu1 %v5099_v14  ;;  %v825_v35 = vld [vmem:[#allocation5 + $0x16e0] sm:$0xff]  ;;  %v810_v14 = vld [vmem:[#allocation5 + $0x1668] sm:$0xff] }
 0x1d4   :  { %2125 = vmatprep.subr.mxu0 %v346_v4  ;;  %2202 = vmatprep.subr.mxu1 %v858_v8  ;;  %v714_v61 = vld [vmem:[#allocation5 + $0x1368] sm:$0xff]  ;;  %v713_v4 = vld [vmem:[#allocation5 + $0x1360] sm:$0xff] }
 0x1d5   :  { %2113 = vmatmul.mubr.f32.vlgmr.msra.gmra.mxu1 %v5102_v17  ;;  %2126 = vmatpush1.msra.mxu0 %v345_v29  ;;  %v282_v17 = vld [vmem:[#allocation5 + $0x5e8] sm:$0xff] }
 0x1d6   :  { %2203 = vmatpush1.msra.mxu1 %v857_v31  ;;  %2127 = vmatprep.subr.mxu0 %v330_v12  ;;  %v186_v8 = vld [vmem:[#allocation5 + $0x2e8] sm:$0xff]  ;;  %v185_v31 = vld [vmem:[#allocation5 + $0x2e0] sm:$0xff] }
 0x1d7   :  { %2204 = vmatprep.subr.mxu1 %v842_v13  ;;  %2128 = vmatpush1.msra.mxu0 %v329_v19  ;;  %v698_v29 = vld [vmem:[#allocation5 + $0x12e8] sm:$0xff]  ;;  %v697_v12 = vld [vmem:[#allocation5 + $0x12e0] sm:$0xff] }
 0x1d8   :  { %2205 = vmatpush1.msra.mxu1 %v841_v20  ;;  %2129 = vmatprep.subr.mxu0 %v314_v21  ;;  %v170_v13 = vld [vmem:[#allocation5 + $0x268] sm:$0xff]  ;;  %v169_v20 = vld [vmem:[#allocation5 + $0x260] sm:$0xff] }
 0x1d9   :  { %2206 = vmatprep.subr.mxu1 %v826_v10  ;;  %2130 = vmatpush1.msra.mxu0 %v313_v22  ;;  %v682_v19 = vld [vmem:[#allocation5 + $0x1268] sm:$0xff]  ;;  %v681_v21 = vld [vmem:[#allocation5 + $0x1260] sm:$0xff] }
 0x1da   :  { %2207 = vmatpush1.msra.mxu1 %v825_v35  ;;  %2131 = vmatprep.subr.mxu0 %v298_v60  ;;  %v154_v10 = vld [vmem:[#allocation5 + $0x1e8] sm:$0xff]  ;;  %v153_v35 = vld [vmem:[#allocation5 + $0x1e0] sm:$0xff] }
 0x1db   :  { %2208 = vmatprep.subr.mxu1 %v810_v14  ;;  %2132 = vmatpush1.msra.mxu0 %v297_v24  ;;  %v666_v22 = vld [vmem:[#allocation5 + $0x11e8] sm:$0xff]  ;;  %v665_v60 = vld [vmem:[#allocation5 + $0x11e0] sm:$0xff] }
 0x1dc   :  { %2209 = vmatpush1.msra.mxu1 %v809_v26  ;;  %2133 = vmatprep.subr.mxu0 %v282_v17  ;;  %v138_v14 = vld [vmem:[#allocation5 + $0x168] sm:$0xff]  ;;  %v137_v26 = vld [vmem:[#allocation5 + $0x160] sm:$0xff] }
 0x1dd   :  { %2210 = vmatprep.subr.mxu1 %v794_v27  ;;  %2134 = vmatpush1.msra.mxu0 %v281_v32  ;;  %v650_v24 = vld [vmem:[#allocation5 + $0x1168] sm:$0xff]  ;;  %v649_v17 = vld [vmem:[#allocation5 + $0x1160] sm:$0xff] }
 0x1de   :  { %2211 = vmatpush1.msra.mxu1 %v793_v33  ;;  %2135 = vmatprep.subr.mxu0 %v266_v39  ;;  %v122_v27 = vld [vmem:[#allocation5 + $0xe8] sm:$0xff]  ;;  %v121_v33 = vld [vmem:[#allocation5 + $0xe0] sm:$0xff] }
 0x1df   :  { %2212 = vmatprep.subr.mxu1 %v778_v40  ;;  %2136 = vmatpush1.msra.mxu0 %v265_v41  ;;  %v634_v32 = vld [vmem:[#allocation5 + $0x10e8] sm:$0xff]  ;;  %v633_v39 = vld [vmem:[#allocation5 + $0x10e0] sm:$0xff] }
 0x1e0   :  { %2213 = vmatpush1.msra.mxu1 %v777_v42  ;;  %2137 = vmatprep.subr.mxu0 %v250_v43  ;;  %v106_v40 = vld [vmem:[#allocation5 + $0x68] sm:$0xff]  ;;  %v105_v42 = vld [vmem:[#allocation5 + $0x60] sm:$0xff] }
 0x1e1   :  { %2214 = vmatprep.subr.mxu1 %v762_v44  ;;  %2138 = vmatpush1.msra.mxu0 %v249_v45  ;;  %v618_v41 = vld [vmem:[#allocation5 + $0x1068] sm:$0xff]  ;;  %v617_v43 = vld [vmem:[#allocation5 + $0x1060] sm:$0xff] }
 0x1e2   :  { %2215 = vmatpush1.msra.mxu1 %v761_v11  ;;  %2139 = vmatprep.subr.mxu0 %v234_v46  ;;  %v602_v44 = vld [vmem:[#allocation5 + $0xfe8] sm:$0xff]  ;;  %v601_v11 = vld [vmem:[#allocation5 + $0xfe0] sm:$0xff] }
 0x1e3   :  { %2216 = vmatprep.subr.mxu1 %v746_v47  ;;  %2140 = vmatpush1.msra.mxu0 %v233_v48  ;;  %v1114_v45 = vld [vmem:[#allocation5 + $0x1fe8] sm:$0xff]  ;;  %v1113_v46 = vld [vmem:[#allocation5 + $0x1fe0] sm:$0xff] }
 0x1e4   :  { %2217 = vmatpush1.msra.mxu1 %v745_v50  ;;  %2141 = vmatprep.subr.mxu0 %v218_v51  ;;  %v586_v47 = vld [vmem:[#allocation5 + $0xf68] sm:$0xff]  ;;  %v585_v50 = vld [vmem:[#allocation5 + $0xf60] sm:$0xff] }
 0x1e5   :  { %2218 = vmatprep.subr.mxu1 %v730_v53  ;;  %2142 = vmatpush1.msra.mxu0 %v217_v2  ;;  %v1098_v48 = vld [vmem:[#allocation5 + $0x1f68] sm:$0xff]  ;;  %v1097_v51 = vld [vmem:[#allocation5 + $0x1f60] sm:$0xff] }
 0x1e6   :  { %2219 = vmatpush1.msra.mxu1 %v729_v56  ;;  %2143 = vmatprep.subr.mxu0 %v202_v57  ;;  %v570_v53 = vld [vmem:[#allocation5 + $0xee8] sm:$0xff]  ;;  %v569_v56 = vld [vmem:[#allocation5 + $0xee0] sm:$0xff] }
 0x1e7   :  { %2220 = vmatprep.subr.mxu1 %v714_v61  ;;  %2144 = vmatpush1.msra.mxu0 %v201_v62  ;;  %v1082_v2 = vld [vmem:[#allocation5 + $0x1ee8] sm:$0xff]  ;;  %v1081_v57 = vld [vmem:[#allocation5 + $0x1ee0] sm:$0xff] }
 0x1e8   :  { %2221 = vmatpush1.msra.mxu1 %v713_v4  ;;  %2145 = vmatprep.subr.mxu0 %v186_v8  ;;  %v554_v61 = vld [vmem:[#allocation5 + $0xe68] sm:$0xff]  ;;  %v553_v4 = vld [vmem:[#allocation5 + $0xe60] sm:$0xff] }
 0x1e9   :  { %2222 = vmatprep.subr.mxu1 %v698_v29  ;;  %2146 = vmatpush1.msra.mxu0 %v185_v31  ;;  %v1066_v62 = vld [vmem:[#allocation5 + $0x1e68] sm:$0xff]  ;;  %v1065_v8 = vld [vmem:[#allocation5 + $0x1e60] sm:$0xff] }
 0x1ea   :  { %2223 = vmatpush1.msra.mxu1 %v697_v12  ;;  %2147 = vmatprep.subr.mxu0 %v170_v13  ;;  %v538_v29 = vld [vmem:[#allocation5 + $0xde8] sm:$0xff]  ;;  %v537_v12 = vld [vmem:[#allocation5 + $0xde0] sm:$0xff] }
 0x1eb   :  { %2224 = vmatprep.subr.mxu1 %v682_v19  ;;  %2148 = vmatpush1.msra.mxu0 %v169_v20  ;;  %v1050_v31 = vld [vmem:[#allocation5 + $0x1de8] sm:$0xff]  ;;  %v1049_v13 = vld [vmem:[#allocation5 + $0x1de0] sm:$0xff] }
 0x1ec   :  { %2225 = vmatpush1.msra.mxu1 %v681_v21  ;;  %2149 = vmatprep.subr.mxu0 %v154_v10  ;;  %v522_v19 = vld [vmem:[#allocation5 + $0xd68] sm:$0xff]  ;;  %v521_v21 = vld [vmem:[#allocation5 + $0xd60] sm:$0xff] }
 0x1ed   :  { %2226 = vmatprep.subr.mxu1 %v666_v22  ;;  %2150 = vmatpush1.msra.mxu0 %v153_v35  ;;  %v1034_v20 = vld [vmem:[#allocation5 + $0x1d68] sm:$0xff]  ;;  %v1033_v10 = vld [vmem:[#allocation5 + $0x1d60] sm:$0xff] }
 0x1ee   :  { %2227 = vmatpush1.msra.mxu1 %v665_v60  ;;  %2151 = vmatprep.subr.mxu0 %v138_v14  ;;  %v506_v22 = vld [vmem:[#allocation5 + $0xce8] sm:$0xff]  ;;  %v505_v60 = vld [vmem:[#allocation5 + $0xce0] sm:$0xff] }
 0x1ef   :  { %2228 = vmatprep.subr.mxu1 %v650_v24  ;;  %2152 = vmatpush1.msra.mxu0 %v137_v26  ;;  %v1018_v35 = vld [vmem:[#allocation5 + $0x1ce8] sm:$0xff]  ;;  %v1017_v14 = vld [vmem:[#allocation5 + $0x1ce0] sm:$0xff] }
 0x1f0   :  { %2229 = vmatpush1.msra.mxu1 %v649_v17  ;;  %2153 = vmatprep.subr.mxu0 %v122_v27  ;;  %v490_v24 = vld [vmem:[#allocation5 + $0xc68] sm:$0xff]  ;;  %v1143_v17 = vsub.s32 5, %v5042_v55  ;;  %v489_v27 = vld [vmem:[#allocation5 + $0xc60] sm:$0xff] }
 0x1f1   :  { %2230 = vmatprep.subr.mxu1 %v634_v32  ;;  %2154 = vmatpush1.msra.mxu0 %v121_v33  ;;  %v1002_v26 = vld [vmem:[#allocation5 + $0x1c68] sm:$0xff]  ;;  %v1001_v32 = vld [vmem:[#allocation5 + $0x1c60] sm:$0xff]  ;;  %v5149_v33 = vpop.f32.mrf.mxu0 }
 0x1f2   :  { %2231 = vmatpush1.msra.mxu1 %v633_v39  ;;  %2155 = vmatprep.subr.mxu0 %v106_v40  ;;  %v474_v39 = vld [vmem:[#allocation5 + $0xbe8] sm:$0xff] }
 0x1f3   :  { %2232 = vmatprep.subr.mxu1 %v618_v41  ;;  %2156 = vmatpush1.msra.mxu0 %v105_v42  ;;  %v986_v40 = vld [vmem:[#allocation5 + $0x1be8] sm:$0xff]  ;;  %v473_v41 = vld [vmem:[#allocation5 + $0xbe0] sm:$0xff] }
 0x1f4   :  { %2233 = vmatpush1.msra.mxu1 %v617_v43  ;;  %2157 = vmatprep.subr.mxu0 %v602_v44  ;;  %v985_v42 = vld [vmem:[#allocation5 + $0x1be0] sm:$0xff]  ;;  %v458_v43 = vld [vmem:[#allocation5 + $0xb68] sm:$0xff] }
 0x1f5   :  { %2234 = vmatprep.subr.mxu1 %v1114_v45  ;;  %2158 = vmatpush2.msra.mxu0 %v601_v11  ;;  %v970_v44 = vld [vmem:[#allocation5 + $0x1b68] sm:$0xff]  ;;  %v5154_v11 = vrot.slane %v5120_v28, %v1143_v17 }
 0x1f6   :  { %2235 = vmatpush2.msra.mxu1 %v1113_v46  ;;  %2159 = vmatprep.subr.mxu0 %v586_v47  ;;  %v5156_v46 = vpop.f32.mrf.mxu1  ;;  %v457_v47 = vld [vmem:[#allocation5 + $0xb60] sm:$0xff] }
 0x1f7   :  { %2236 = vmatprep.subr.mxu1 %v1098_v48  ;;  %2160 = vmatpush2.msra.mxu0 %v585_v50  ;;  %v969_v48 = vld [vmem:[#allocation5 + $0x1b60] sm:$0xff] }
 0x1f8   :  { %2237 = vmatpush2.msra.mxu1 %v1097_v51  ;;  %2161 = vmatprep.subr.mxu0 %v570_v53  ;;  %v442_v51 = vld [vmem:[#allocation5 + $0xae8] sm:$0xff] }
 0x1f9   :  { %2238 = vmatprep.subr.mxu1 %v1082_v2  ;;  %2162 = vmatpush2.msra.mxu0 %v569_v56  ;;  %v954_v53 = vld [vmem:[#allocation5 + $0x1ae8] sm:$0xff]  ;;  %v441_v56 = vld [vmem:[#allocation5 + $0xae0] sm:$0xff] }
 0x1fa   :  { %2239 = vmatpush2.msra.mxu1 %v1081_v57  ;;  %2163 = vmatprep.subr.mxu0 %v554_v61  ;;  %v953_v57 = vld [vmem:[#allocation5 + $0x1ae0] sm:$0xff] }
 0x1fb   :  { %2240 = vmatprep.subr.mxu1 %v1066_v62  ;;  %2164 = vmatpush2.msra.mxu0 %v553_v4  ;;  %v426_v62 = vld [vmem:[#allocation5 + $0xa68] sm:$0xff] }
 0x1fc   :  { %2241 = vmatpush2.msra.mxu1 %v1065_v8  ;;  %2165 = vmatprep.subr.mxu0 %v538_v29  ;;  %v938_v4 = vld [vmem:[#allocation5 + $0x1a68] sm:$0xff]  ;;  %v937_v29 = vld [vmem:[#allocation5 + $0x1a60] sm:$0xff] }
 0x1fd   :  { %2242 = vmatprep.subr.mxu1 %v1050_v31  ;;  %2166 = vmatpush2.msra.mxu0 %v537_v12  ;;  %v410_v12 = vld [vmem:[#allocation5 + $0x9e8] sm:$0xff] }
 0x1fe   :  { %2243 = vmatpush2.msra.mxu1 %v1049_v13  ;;  %2167 = vmatprep.subr.mxu0 %v522_v19  ;;  %v922_v13 = vld [vmem:[#allocation5 + $0x19e8] sm:$0xff] }
 0x1ff   :  { %2244 = vmatprep.subr.mxu1 %v1034_v20  ;;  %2168 = vmatpush2.msra.mxu0 %v521_v21  ;;  %v409_v20 = vld [vmem:[#allocation5 + $0x9e0] sm:$0xff] }
 0x200   :  { %2245 = vmatpush2.msra.mxu1 %v1033_v10  ;;  %2169 = vmatprep.subr.mxu0 %v506_v22  ;;  %v921_v21 = vld [vmem:[#allocation5 + $0x19e0] sm:$0xff]  ;;  %v394_v10 = vld [vmem:[#allocation5 + $0x968] sm:$0xff] }
 0x201   :  { %2246 = vmatprep.subr.mxu1 %v1018_v35  ;;  %2170 = vmatpush2.msra.mxu0 %v505_v60  ;;  %v906_v22 = vld [vmem:[#allocation5 + $0x1968] sm:$0xff]  ;;  %v393_v35 = vld [vmem:[#allocation5 + $0x960] sm:$0xff] }
 0x202   :  { %2247 = vmatpush2.msra.mxu1 %v1017_v14  ;;  %2171 = vmatprep.subr.mxu0 %v490_v24  ;;  %v905_v60 = vld [vmem:[#allocation5 + $0x1960] sm:$0xff]  ;;  %v378_v14 = vld [vmem:[#allocation5 + $0x8e8] sm:$0xff] }
 0x203   :  { %2248 = vmatprep.subr.mxu1 %v1002_v26  ;;  %2172 = vmatpush2.msra.mxu0 %v489_v27  ;;  %v890_v24 = vld [vmem:[#allocation5 + $0x18e8] sm:$0xff]  ;;  %v377_v26 = vld [vmem:[#allocation5 + $0x8e0] sm:$0xff] }
 0x204   :  { %2249 = vmatpush2.msra.mxu1 %v1001_v32  ;;  %v1581_v45 = vpop.f32.mrf.mxu0  ;;  %2173 = vmatprep.subr.mxu0 %v474_v39  ;;  %v889_v27 = vld [vmem:[#allocation5 + $0x18e0] sm:$0xff]  ;;  %v362_v32 = vld [vmem:[#allocation5 + $0x868] sm:$0xff] }
 0x205   :  { %2250 = vmatprep.subr.mxu1 %v986_v40  ;;  %v1582_v50 = vadd.f32 %v1581_v45, %v5125_v30  ;;  %2174 = vmatpush2.msra.mxu0 %v473_v41  ;;  %v425_v30 = vld [vmem:[#allocation5 + $0xa60] sm:$0xff]  ;;  %v874_v39 = vld [vmem:[#allocation5 + $0x1868] sm:$0xff]  ;;  %v332_v45 = vld [vmem:[#allocation5 + $0x778] sm:$0xff] }
 0x206   :  { %2251 = vmatpush2.msra.mxu1 %v985_v42  ;;  %v1583_v2 = vpop.f32.mrf.mxu0  ;;  %2175 = vmatprep.subr.mxu0 %v458_v43  ;;  %v361_v40 = vld [vmem:[#allocation5 + $0x860] sm:$0xff]  ;;  %v5168_v41 = vld [vmem:[#allocation2 + $0x8] sm:$0xff]  ;;  %v860_v42 = vld [vmem:[#allocation5 + $0x17f8] sm:$0xff] }
 0x207   :  { %2252 = vmatprep.subr.mxu1 %v970_v44  ;;  %v1584_v28 = vadd.f32 %v1583_v2, %v5154_v11  ;;  %v1658_v61 = vpop.f32.mrf.mxu1  ;;  %2176 = vmatpush2.msra.mxu0 %v457_v47  ;;  %v347_v43 = vld [vmem:[#allocation5 + $0x7f0] sm:$0xff]  ;;  %v5174_v44 = vld [vmem:[#allocation2 + $0x18] sm:$0xff] }
 0x208   :  { %2253 = vmatpush2.msra.mxu1 %v969_v48  ;;  %v5160_v8 = vadd.f32 %v1658_v61, %v1582_v50  ;;  %2177 = vmatprep.subr.mxu0 %v442_v51  ;;  %v844_v47 = vld [vmem:[#allocation5 + $0x1778] sm:$0xff]  ;;  %v5177_v48 = vld [vmem:[#allocation2 + $0x10] sm:$0xff] }
 0x209   :  { %2254 = vmatprep.subr.mxu1 %v954_v53  ;;  %v1660_v31 = vpop.f32.mrf.mxu1  ;;  %2178 = vmatpush2.msra.mxu0 %v441_v56  ;;  %v331_v50 = vld [vmem:[#allocation5 + $0x770] sm:$0xff]  ;;  %v316_v53 = vld [vmem:[#allocation5 + $0x6f8] sm:$0xff] }
 0x20a   :  { %2255 = vmatpush2.msra.mxu1 %v953_v57  ;;  %v5162_v19 = vadd.f32 %v1660_v31, %v1584_v28  ;;  %2179 = vmatprep.subr.mxu0 %v426_v62  ;;  %v843_v51 = vld [vmem:[#allocation5 + $0x1770] sm:$0xff]  ;;  %v828_v2 = vld [vmem:[#allocation5 + $0x16f8] sm:$0xff] }
 0x20b   :  { %2256 = vmatprep.subr.mxu1 %v938_v4  ;;  %2180 = vmatpush2.msra.mxu0 %v425_v30  ;;  %v315_v56 = vld [vmem:[#allocation5 + $0x6f0] sm:$0xff]  ;;  %v300_v28 = vld [vmem:[#allocation5 + $0x678] sm:$0xff] }
 0x20c   :  { %2257 = vmatpush2.msra.mxu1 %v937_v29  ;;  %2181 = vmatprep.subr.mxu0 %v410_v12  ;;  %v827_v57 = vld [vmem:[#allocation5 + $0x16f0] sm:$0xff]  ;;  %v812_v61 = vld [vmem:[#allocation5 + $0x1678] sm:$0xff] }
 0x20d   :  { %2258 = vmatprep.subr.mxu1 %v922_v13  ;;  %2182 = vmatpush2.msra.mxu0 %v409_v20  ;;  %v299_v62 = vld [vmem:[#allocation5 + $0x670] sm:$0xff]  ;;  %v284_v30 = vld [vmem:[#allocation5 + $0x5f8] sm:$0xff] }
 0x20e   :  { %2259 = vmatpush2.msra.mxu1 %v921_v21  ;;  %2041 = vmatprep.mubr.f32.mxu0 %v5132_v23  ;;  %v873_v23 = vld [vmem:[#allocation5 + $0x1860] sm:$0xff]  ;;  %v811_v4 = vld [vmem:[#allocation5 + $0x1670] sm:$0xff]  ;;  %v796_v29 = vld [vmem:[#allocation5 + $0x15f8] sm:$0xff] }
 0x20f   :  { %2183 = vmatprep.subr.mxu0 %v394_v10  ;;  %2260 = vmatprep.subr.mxu1 %v906_v22  ;;  %v283_v31 = vld [vmem:[#allocation5 + $0x5f0] sm:$0xff]  ;;  %v268_v13 = vld [vmem:[#allocation5 + $0x578] sm:$0xff] }
 0x210   :  { %2042 = vmatmul.mubr.f32.gmra.mxu0 %v5135_v6  ;;  %2261 = vmatpush2.msra.mxu1 %v905_v60  ;;  %v348_v6 = vld [vmem:[#allocation5 + $0x7f8] sm:$0xff]  ;;  %v795_v12 = vld [vmem:[#allocation5 + $0x15f0] sm:$0xff] }
 0x211   :  { %2184 = vmatpush2.msra.mxu0 %v393_v35  ;;  %2118 = vmatprep.mubr.f32.mxu1 %v5138_v54  ;;  %v5171_v54 = vld [vmem:[#allocation2] sm:$0xff]  ;;  %v780_v20 = vld [vmem:[#allocation5 + $0x1578] sm:$0xff]  ;;  %v267_v21 = vld [vmem:[#allocation5 + $0x570] sm:$0xff] }
 0x212   :  { %2185 = vmatprep.subr.mxu0 %v378_v14  ;;  %2262 = vmatprep.subr.mxu1 %v890_v24  ;;  %v779_v10 = vld [vmem:[#allocation5 + $0x1570] sm:$0xff]  ;;  %v252_v22 = vld [vmem:[#allocation5 + $0x4f8] sm:$0xff] }
 0x213   :  { %2119 = vmatmul.mubr.f32.gmra.mxu1 %v5141_v58  ;;  %2186 = vmatpush2.msra.mxu0 %v377_v26  ;;  %v859_v58 = vld [vmem:[#allocation5 + $0x17f0] sm:$0xff]  ;;  %v764_v35 = vld [vmem:[#allocation5 + $0x14f8] sm:$0xff] }
 0x214   :  { %2263 = vmatpush2.msra.mxu1 %v889_v27  ;;  %2187 = vmatprep.subr.mxu0 %v362_v32  ;;  %v251_v60 = vld [vmem:[#allocation5 + $0x4f0] sm:$0xff]  ;;  %v236_v24 = vld [vmem:[#allocation5 + $0x478] sm:$0xff] }
 0x215   :  { %2264 = vmatprep.subr.mxu1 %v874_v39  ;;  %2188 = vmatpush2.msra.mxu0 %v361_v40  ;;  %v763_v14 = vld [vmem:[#allocation5 + $0x14f0] sm:$0xff]  ;;  %v748_v26 = vld [vmem:[#allocation5 + $0x1478] sm:$0xff] }
 0x216   :  { %2189 = vmatprep.mubr.f32.mxu0 %v5168_v41  ;;  %2265 = vmatpush2.msra.mxu1 %v873_v23  ;;  %v235_v27 = vld [vmem:[#allocation5 + $0x470] sm:$0xff]  ;;  %v220_v39 = vld [vmem:[#allocation5 + $0x3f8] sm:$0xff] }
 0x217   :  { %2190 = vmatmul.mubr.f32.vlgmr.msra.gmra.mxu0 %v5171_v54  ;;  %2266 = vmatprep.mubr.f32.mxu1 %v5174_v44  ;;  %v747_v32 = vld [vmem:[#allocation5 + $0x1470] sm:$0xff]  ;;  %v732_v40 = vld [vmem:[#allocation5 + $0x13f8] sm:$0xff] }
 0x218   :  { %2279 = vmatprep.subr.mxu0 %v348_v6  ;;  %2356 = vmatprep.subr.mxu1 %v860_v42  ;;  %v219_v23 = vld [vmem:[#allocation5 + $0x3f0] sm:$0xff]  ;;  %v204_v42 = vld [vmem:[#allocation5 + $0x378] sm:$0xff] }
 0x219   :  { %2267 = vmatmul.mubr.f32.vlgmr.msra.gmra.mxu1 %v5177_v48  ;;  %2280 = vmatpush1.msra.mxu0 %v347_v43  ;;  %v731_v6 = vld [vmem:[#allocation5 + $0x13f0] sm:$0xff]  ;;  %v716_v43 = vld [vmem:[#allocation5 + $0x1378] sm:$0xff] }
 0x21a   :  { %2357 = vmatpush1.msra.mxu1 %v859_v58  ;;  %2281 = vmatprep.subr.mxu0 %v332_v45  ;;  %v203_v58 = vld [vmem:[#allocation5 + $0x370] sm:$0xff] }
 0x21b   :  { %2358 = vmatprep.subr.mxu1 %v844_v47  ;;  %2282 = vmatpush1.msra.mxu0 %v331_v50  ;;  %v715_v45 = vld [vmem:[#allocation5 + $0x1370] sm:$0xff]  ;;  %v188_v47 = vld [vmem:[#allocation5 + $0x2f8] sm:$0xff] }
 0x21c   :  { %2359 = vmatpush1.msra.mxu1 %v843_v51  ;;  %2283 = vmatprep.subr.mxu0 %v316_v53  ;;  %v700_v50 = vld [vmem:[#allocation5 + $0x12f8] sm:$0xff]  ;;  %v187_v51 = vld [vmem:[#allocation5 + $0x2f0] sm:$0xff] }
 0x21d   :  { %2360 = vmatprep.subr.mxu1 %v828_v2  ;;  %2284 = vmatpush1.msra.mxu0 %v315_v56  ;;  %v699_v53 = vld [vmem:[#allocation5 + $0x12f0] sm:$0xff]  ;;  %v172_v2 = vld [vmem:[#allocation5 + $0x278] sm:$0xff] }
 0x21e   :  { %2361 = vmatpush1.msra.mxu1 %v827_v57  ;;  %2285 = vmatprep.subr.mxu0 %v300_v28  ;;  %v684_v56 = vld [vmem:[#allocation5 + $0x1278] sm:$0xff]  ;;  %v171_v57 = vld [vmem:[#allocation5 + $0x270] sm:$0xff] }
 0x21f   :  { %2362 = vmatprep.subr.mxu1 %v812_v61  ;;  %2286 = vmatpush1.msra.mxu0 %v299_v62  ;;  %v683_v28 = vld [vmem:[#allocation5 + $0x1270] sm:$0xff]  ;;  %v156_v61 = vld [vmem:[#allocation5 + $0x1f8] sm:$0xff] }
 0x220   :  { %2363 = vmatpush1.msra.mxu1 %v811_v4  ;;  %2287 = vmatprep.subr.mxu0 %v284_v30  ;;  %v668_v62 = vld [vmem:[#allocation5 + $0x11f8] sm:$0xff]  ;;  %v155_v4 = vld [vmem:[#allocation5 + $0x1f0] sm:$0xff] }
 0x221   :  { %2364 = vmatprep.subr.mxu1 %v796_v29  ;;  %2288 = vmatpush1.msra.mxu0 %v283_v31  ;;  %v667_v30 = vld [vmem:[#allocation5 + $0x11f0] sm:$0xff]  ;;  %v140_v29 = vld [vmem:[#allocation5 + $0x178] sm:$0xff] }
 0x222   :  { %2365 = vmatpush1.msra.mxu1 %v795_v12  ;;  %2289 = vmatprep.subr.mxu0 %v268_v13  ;;  %v652_v31 = vld [vmem:[#allocation5 + $0x1178] sm:$0xff]  ;;  %v139_v12 = vld [vmem:[#allocation5 + $0x170] sm:$0xff] }
 0x223   :  { %2366 = vmatprep.subr.mxu1 %v780_v20  ;;  %2290 = vmatpush1.msra.mxu0 %v267_v21  ;;  %v651_v13 = vld [vmem:[#allocation5 + $0x1170] sm:$0xff]  ;;  %v124_v20 = vld [vmem:[#allocation5 + $0xf8] sm:$0xff] }
 0x224   :  { %2367 = vmatpush1.msra.mxu1 %v779_v10  ;;  %2291 = vmatprep.subr.mxu0 %v252_v22  ;;  %v636_v21 = vld [vmem:[#allocation5 + $0x10f8] sm:$0xff]  ;;  %v123_v10 = vld [vmem:[#allocation5 + $0xf0] sm:$0xff] }
 0x225   :  { %2368 = vmatprep.subr.mxu1 %v764_v35  ;;  %2292 = vmatpush1.msra.mxu0 %v251_v60  ;;  %v635_v22 = vld [vmem:[#allocation5 + $0x10f0] sm:$0xff]  ;;  %v108_v35 = vld [vmem:[#allocation5 + $0x78] sm:$0xff] }
 0x226   :  { %2369 = vmatpush1.msra.mxu1 %v763_v14  ;;  %2293 = vmatprep.subr.mxu0 %v236_v24  ;;  %v620_v60 = vld [vmem:[#allocation5 + $0x1078] sm:$0xff]  ;;  %v107_v14 = vld [vmem:[#allocation5 + $0x70] sm:$0xff] }
 0x227   :  { %2370 = vmatprep.subr.mxu1 %v748_v26  ;;  %2294 = vmatpush1.msra.mxu0 %v235_v27  ;;  %v619_v24 = vld [vmem:[#allocation5 + $0x1070] sm:$0xff]  ;;  %v604_v26 = vld [vmem:[#allocation5 + $0xff8] sm:$0xff] }
 0x228   :  { %2371 = vmatpush1.msra.mxu1 %v747_v32  ;;  %2295 = vmatprep.subr.mxu0 %v220_v39  ;;  %v1116_v27 = vld [vmem:[#allocation5 + $0x1ff8] sm:$0xff]  ;;  %v603_v32 = vld [vmem:[#allocation5 + $0xff0] sm:$0xff] }
 0x229   :  { %2372 = vmatprep.subr.mxu1 %v732_v40  ;;  %2296 = vmatpush1.msra.mxu0 %v219_v23  ;;  %v1115_v39 = vld [vmem:[#allocation5 + $0x1ff0] sm:$0xff]  ;;  %v588_v40 = vld [vmem:[#allocation5 + $0xf78] sm:$0xff] }
 0x22a   :  { %2373 = vmatpush1.msra.mxu1 %v731_v6  ;;  %2297 = vmatprep.subr.mxu0 %v204_v42  ;;  %v1100_v23 = vld [vmem:[#allocation5 + $0x1f78] sm:$0xff]  ;;  %v587_v6 = vld [vmem:[#allocation5 + $0xf70] sm:$0xff] }
 0x22b   :  { %2374 = vmatprep.subr.mxu1 %v716_v43  ;;  %2298 = vmatpush1.msra.mxu0 %v203_v58  ;;  %v1099_v42 = vld [vmem:[#allocation5 + $0x1f70] sm:$0xff]  ;;  %v572_v43 = vld [vmem:[#allocation5 + $0xef8] sm:$0xff] }
 0x22c   :  { %2375 = vmatpush1.msra.mxu1 %v715_v45  ;;  %2299 = vmatprep.subr.mxu0 %v188_v47  ;;  %v1084_v58 = vld [vmem:[#allocation5 + $0x1ef8] sm:$0xff]  ;;  %v571_v45 = vld [vmem:[#allocation5 + $0xef0] sm:$0xff] }
 0x22d   :  { %2376 = vmatprep.subr.mxu1 %v700_v50  ;;  %2300 = vmatpush1.msra.mxu0 %v187_v51  ;;  %v1083_v47 = vld [vmem:[#allocation5 + $0x1ef0] sm:$0xff]  ;;  %v556_v50 = vld [vmem:[#allocation5 + $0xe78] sm:$0xff] }
 0x22e   :  { %2377 = vmatpush1.msra.mxu1 %v699_v53  ;;  %2301 = vmatprep.subr.mxu0 %v172_v2  ;;  %v1068_v51 = vld [vmem:[#allocation5 + $0x1e78] sm:$0xff]  ;;  %v555_v53 = vld [vmem:[#allocation5 + $0xe70] sm:$0xff] }
 0x22f   :  { %2378 = vmatprep.subr.mxu1 %v684_v56  ;;  %2302 = vmatpush1.msra.mxu0 %v171_v57  ;;  %v1067_v2 = vld [vmem:[#allocation5 + $0x1e70] sm:$0xff]  ;;  %v540_v56 = vld [vmem:[#allocation5 + $0xdf8] sm:$0xff] }
 0x230   :  { %2379 = vmatpush1.msra.mxu1 %v683_v28  ;;  %2303 = vmatprep.subr.mxu0 %v156_v61  ;;  %v1052_v57 = vld [vmem:[#allocation5 + $0x1df8] sm:$0xff]  ;;  %v539_v28 = vld [vmem:[#allocation5 + $0xdf0] sm:$0xff] }
 0x231   :  { %2380 = vmatprep.subr.mxu1 %v668_v62  ;;  %2304 = vmatpush1.msra.mxu0 %v155_v4  ;;  %v1051_v61 = vld [vmem:[#allocation5 + $0x1df0] sm:$0xff]  ;;  %v524_v62 = vld [vmem:[#allocation5 + $0xd78] sm:$0xff] }
 0x232   :  { %2381 = vmatpush1.msra.mxu1 %v667_v30  ;;  %2305 = vmatprep.subr.mxu0 %v140_v29  ;;  %v1036_v4 = vld [vmem:[#allocation5 + $0x1d78] sm:$0xff]  ;;  %v523_v30 = vld [vmem:[#allocation5 + $0xd70] sm:$0xff] }
 0x233   :  { %2382 = vmatprep.subr.mxu1 %v652_v31  ;;  %2306 = vmatpush1.msra.mxu0 %v139_v12  ;;  %v1035_v29 = vld [vmem:[#allocation5 + $0x1d70] sm:$0xff]  ;;  %v5180_v31 = vpop.f32.mrf.mxu0  ;;  %v508_v12 = vld [vmem:[#allocation5 + $0xcf8] sm:$0xff] }
 0x234   :  { %2383 = vmatpush1.msra.mxu1 %v651_v13  ;;  %2307 = vmatprep.subr.mxu0 %v124_v20  ;;  %v1020_v13 = vld [vmem:[#allocation5 + $0x1cf8] sm:$0xff]  ;;  %v507_v20 = vld [vmem:[#allocation5 + $0xcf0] sm:$0xff] }
 0x235   :  { %2384 = vmatprep.subr.mxu1 %v636_v21  ;;  %2308 = vmatpush1.msra.mxu0 %v123_v10  ;;  %v1019_v21 = vld [vmem:[#allocation5 + $0x1cf0] sm:$0xff]  ;;  %v492_v10 = vld [vmem:[#allocation5 + $0xc78] sm:$0xff] }
 0x236   :  { %2385 = vmatpush1.msra.mxu1 %v635_v22  ;;  %2309 = vmatprep.subr.mxu0 %v108_v35  ;;  %v1004_v22 = vld [vmem:[#allocation5 + $0x1c78] sm:$0xff]  ;;  %v5182_v35 = vpop.f32.mrf.mxu1 }
 0x237   :  { %2386 = vmatprep.subr.mxu1 %v620_v60  ;;  %2310 = vmatpush1.msra.mxu0 %v107_v14  ;;  %v491_v60 = vld [vmem:[#allocation5 + $0xc70] sm:$0xff] }
 0x238   :  { %2387 = vmatpush1.msra.mxu1 %v619_v24  ;;  %2311 = vmatprep.subr.mxu0 %v604_v26  ;;  %v1003_v14 = vld [vmem:[#allocation5 + $0x1c70] sm:$0xff]  ;;  %v5184_v24 = vpop.f32.mrf.mxu0  ;;  %v476_v26 = vld [vmem:[#allocation5 + $0xbf8] sm:$0xff] }
 0x239   :  { %2388 = vmatprep.subr.mxu1 %v1116_v27  ;;  %2312 = vmatpush2.msra.mxu0 %v603_v32  ;;  %v988_v27 = vld [vmem:[#allocation5 + $0x1bf8] sm:$0xff]  ;;  %v475_v32 = vld [vmem:[#allocation5 + $0xbf0] sm:$0xff] }
 0x23a   :  { %2389 = vmatpush2.msra.mxu1 %v1115_v39  ;;  %2313 = vmatprep.subr.mxu0 %v588_v40  ;;  %v987_v39 = vld [vmem:[#allocation5 + $0x1bf0] sm:$0xff]  ;;  %v460_v40 = vld [vmem:[#allocation5 + $0xb78] sm:$0xff] }
 0x23b   :  { %2390 = vmatprep.subr.mxu1 %v1100_v23  ;;  %2314 = vmatpush2.msra.mxu0 %v587_v6  ;;  %v972_v23 = vld [vmem:[#allocation5 + $0x1b78] sm:$0xff] }
 0x23c   :  { %2391 = vmatpush2.msra.mxu1 %v1099_v42  ;;  %2315 = vmatprep.subr.mxu0 %v572_v43  ;;  %v5188_v42 = vpop.f32.mrf.mxu1  ;;  %v459_v43 = vld [vmem:[#allocation5 + $0xb70] sm:$0xff] }
 0x23d   :  { %2392 = vmatprep.subr.mxu1 %v1084_v58  ;;  %2316 = vmatpush2.msra.mxu0 %v571_v45  ;;  %v971_v58 = vld [vmem:[#allocation5 + $0x1b70] sm:$0xff]  ;;  %v5190_v45 = vld [vmem:[#allocation7 + $0x8] sm:$0xff] }
 0x23e   :  { %2393 = vmatpush2.msra.mxu1 %v1083_v47  ;;  %2317 = vmatprep.subr.mxu0 %v556_v50  ;;  %v444_v47 = vld [vmem:[#allocation5 + $0xaf8] sm:$0xff] }
 0x23f   :  { %2394 = vmatprep.subr.mxu1 %v1068_v51  ;;  %2318 = vmatpush2.msra.mxu0 %v555_v53  ;;  %v956_v50 = vld [vmem:[#allocation5 + $0x1af8] sm:$0xff]  ;;  %v443_v51 = vld [vmem:[#allocation5 + $0xaf0] sm:$0xff] }
 0x240   :  { %2395 = vmatpush2.msra.mxu1 %v1067_v2  ;;  %2319 = vmatprep.subr.mxu0 %v540_v56  ;;  %v955_v53 = vld [vmem:[#allocation5 + $0x1af0] sm:$0xff] }
 0x241   :  { %2396 = vmatprep.subr.mxu1 %v1052_v57  ;;  %2320 = vmatpush2.msra.mxu0 %v539_v28  ;;  %v428_v57 = vld [vmem:[#allocation5 + $0xa78] sm:$0xff] }
 0x242   :  { %2397 = vmatpush2.msra.mxu1 %v1051_v61  ;;  %2321 = vmatprep.subr.mxu0 %v524_v62  ;;  %v940_v28 = vld [vmem:[#allocation5 + $0x1a78] sm:$0xff]  ;;  %v5198_v61 = vrot.slane %v5190_v45, %v5045_v7  ;;  %v427_v62 = vld [vmem:[#allocation5 + $0xa70] sm:$0xff] }
 0x243   :  { %2398 = vmatprep.subr.mxu1 %v1036_v4  ;;  %2322 = vmatpush2.msra.mxu0 %v523_v30  ;;  %v939_v4 = vld [vmem:[#allocation5 + $0x1a70] sm:$0xff] }
 0x244   :  { %2399 = vmatpush2.msra.mxu1 %v1035_v29  ;;  %2323 = vmatprep.subr.mxu0 %v508_v12  ;;  %v412_v29 = vld [vmem:[#allocation5 + $0x9f8] sm:$0xff] }
 0x245   :  { %2400 = vmatprep.subr.mxu1 %v1020_v13  ;;  %2324 = vmatpush2.msra.mxu0 %v507_v20  ;;  %v924_v12 = vld [vmem:[#allocation5 + $0x19f8] sm:$0xff]  ;;  %v411_v13 = vld [vmem:[#allocation5 + $0x9f0] sm:$0xff] }
 0x246   :  { %2401 = vmatpush2.msra.mxu1 %v1019_v21  ;;  %2325 = vmatprep.subr.mxu0 %v492_v10  ;;  %v923_v20 = vld [vmem:[#allocation5 + $0x19f0] sm:$0xff]  ;;  %v396_v10 = vld [vmem:[#allocation5 + $0x978] sm:$0xff] }
 0x247   :  { %2402 = vmatprep.subr.mxu1 %v1004_v22  ;;  %2326 = vmatpush2.msra.mxu0 %v491_v60  ;;  %v908_v60 = vld [vmem:[#allocation5 + $0x1978] sm:$0xff] }
 0x248   :  { %2403 = vmatpush2.msra.mxu1 %v1003_v14  ;;  %v5186_v6 = vpop.f32.mrf.mxu0  ;;  %2327 = vmatprep.subr.mxu0 %v476_v26  ;;  %v395_v26 = vld [vmem:[#allocation5 + $0x970] sm:$0xff] }
 0x249   :  { %2404 = vmatprep.subr.mxu1 %v988_v27  ;;  %2328 = vmatpush2.msra.mxu0 %v475_v32  ;;  %v5206_v32 = vsub.s32 3, %v5042_v55 }
 0x24a   :  { %2405 = vmatpush2.msra.mxu1 %v987_v39  ;;  %2329 = vmatprep.subr.mxu0 %v460_v40  ;;  %v5192_v2 = vpop.f32.mrf.mxu0  ;;  %v4801_v39 = vld [vmem:[#allocation2 + $0x28] sm:$0xff]  ;;  %v907_v40 = vld [vmem:[#allocation5 + $0x1970] sm:$0xff] }
 0x24b   :  { %2406 = vmatprep.subr.mxu1 %v972_v23  ;;  %v5194_v56 = vpop.f32.mrf.mxu1  ;;  %2330 = vmatpush2.msra.mxu0 %v459_v43  ;;  %v380_v23 = vld [vmem:[#allocation5 + $0x8f8] sm:$0xff]  ;;  %v4802_v43 = vld [vmem:[#allocation2 + $0x20] sm:$0xff] }
 0x24c   :  { %2407 = vmatpush2.msra.mxu1 %v971_v58  ;;  %2331 = vmatprep.subr.mxu0 %v444_v47  ;;  %v892_v58 = vld [vmem:[#allocation5 + $0x18f8] sm:$0xff] }
 0x24d   :  { %2408 = vmatprep.subr.mxu1 %v956_v50  ;;  %v5200_v30 = vpop.f32.mrf.mxu1  ;;  %2332 = vmatpush2.msra.mxu0 %v443_v51  ;;  %v4803_v47 = vld [vmem:[#allocation2 + $0x38] sm:$0xff]  ;;  %v379_v50 = vld [vmem:[#allocation5 + $0x8f0] sm:$0xff] }
 0x24e   :  { %2409 = vmatpush2.msra.mxu1 %v955_v53  ;;  %2333 = vmatprep.subr.mxu0 %v428_v57  ;;  %v891_v51 = vld [vmem:[#allocation5 + $0x18f0] sm:$0xff]  ;;  %v364_v53 = vld [vmem:[#allocation5 + $0x878] sm:$0xff] }
 0x24f   :  { %2410 = vmatprep.subr.mxu1 %v940_v28  ;;  %v1883_v21 = vpop.f32.mrf.mxu0  ;;  %2334 = vmatpush2.msra.mxu0 %v427_v62  ;;  %v876_v57 = vld [vmem:[#allocation5 + $0x1878] sm:$0xff]  ;;  %v5208_v28 = vld [vmem:[#allocation7] sm:$0xff] }
 0x250   :  { %2411 = vmatpush2.msra.mxu1 %v939_v4  ;;  %v1884_v22 = vadd.f32 %v1883_v21, %v5198_v61  ;;  %2335 = vmatprep.subr.mxu0 %v412_v29  ;;  %v5212_v62 = vrot.slane %v5208_v28, %v5206_v32  ;;  %v4805_v4 = vld [vmem:[#allocation2 + $0x30] sm:$0xff]  ;;  %v2654_v21 = vld [vmem:[#allocation8 + $0x5e8] sm:$0xff] }
 0x251   :  { %2412 = vmatprep.subr.mxu1 %v924_v12  ;;  %v1960_v14 = vpop.f32.mrf.mxu1  ;;  %2336 = vmatpush2.msra.mxu0 %v411_v13  ;;  %v363_v29 = vld [vmem:[#allocation5 + $0x870] sm:$0xff]  ;;  %v1270_v13 = vadd.f32 %v5075_v9, %v5079_v34 }
 0x252   :  { %2413 = vmatpush2.msra.mxu1 %v923_v20  ;;  %v5203_v27 = vadd.f32 %v1960_v14, %v1884_v22  ;;  %2195 = vmatprep.mubr.f32.mxu0 %v4801_v39  ;;  %v875_v12 = vld [vmem:[#allocation5 + $0x1870] sm:$0xff]  ;;  %v2526_v20 = vld [vmem:[#allocation8 + $0x1e8] sm:$0xff] }
 0x253   :  { %2337 = vmatprep.subr.mxu0 %v396_v10  ;;  %2414 = vmatprep.subr.mxu1 %v908_v60  ;;  %v1424_v10 = vadd.f32 %v5109_v3, %v5212_v62  ;;  %v2525_v22 = vld [vmem:[#allocation8 + $0x1e0] sm:$0xff]  ;;  %v2522_v14 = vld [vmem:[#allocation8 + $0x1c8] sm:$0xff]  ;;  %v5223_v9 = vadd.f32 %v5081_v36, %v1270_v13 }
 0x254   :  { %2196 = vmatmul.mubr.f32.gmra.mxu0 %v4802_v43  ;;  %2272 = vmatprep.mubr.f32.mxu1 %v4803_v47  ;;  %v2653_v60 = vld [vmem:[#allocation8 + $0x5e0] sm:$0xff]  ;;  %v2502_v13 = vld [vmem:[#allocation8 + $0x128] sm:$0xff] }
 0x255   :  { %2338 = vmatpush2.msra.mxu0 %v395_v26  ;;  %2415 = vmatpush2.msra.mxu1 %v907_v40  ;;  %v2650_v26 = vld [vmem:[#allocation8 + $0x5c8] sm:$0xff]  ;;  %v2521_v34 = vld [vmem:[#allocation8 + $0x1c0] sm:$0xff]  ;;  %v2434_v40 = vmax.f32 %v5223_v9, 0.0  ;;  %v2507_v9 = vld [vmem:[#allocation8 + $0x150] sm:$0xff] }
 0x256   :  { %2339 = vmatprep.subr.mxu0 %v380_v23  ;;  %2273 = vmatmul.mubr.f32.gmra.mxu1 %v4805_v4  ;;  %v2649_v3 = vld [vmem:[#allocation8 + $0x5c0] sm:$0xff] }
 0x257   :  { %2416 = vmatprep.subr.mxu1 %v892_v58  ;;  %2340 = vmatpush2.msra.mxu0 %v379_v50  ;;  %v2645_v36 = vld [vmem:[#allocation8 + $0x5a0] sm:$0xff]  ;;  %v2642_v58 = vld [vmem:[#allocation8 + $0x588] sm:$0xff] }
 0x258   :  { %2417 = vmatpush2.msra.mxu1 %v891_v51  ;;  %2341 = vmatprep.subr.mxu0 %v364_v53  ;;  %v2510_v50 = vld [vmem:[#allocation8 + $0x168] sm:$0xff]  ;;  %v2509_v51 = vld [vmem:[#allocation8 + $0x160] sm:$0xff] }
 0x259   :  { %2418 = vmatprep.subr.mxu1 %v876_v57  ;;  %2342 = vmatpush2.msra.mxu0 %v363_v29  ;;  %v2637_v53 = vld [vmem:[#allocation8 + $0x560] sm:$0xff]  ;;  %v2506_v57 = vld [vmem:[#allocation8 + $0x148] sm:$0xff] }
 0x25a   :  { %2343 = vmatprep.mubr.f32.mxu0 %v5168_v41  ;;  %2419 = vmatpush2.msra.mxu1 %v875_v12  ;;  %v5226_v41 = vadd.f32 %v5114_v16, %v1424_v10  ;;  %v2514_v16 = vld [vmem:[#allocation8 + $0x188] sm:$0xff]  ;;  %v2505_v29 = vld [vmem:[#allocation8 + $0x140] sm:$0xff] }
 0x25b   :  { %2420 = vmatprep.mubr.f32.mxu1 %v5174_v44  ;;  %2344 = vmatmul.mubr.f32.vlgmr.msra.gmra.mxu0 %v5171_v54  ;;  %v2518_v54 = vld [vmem:[#allocation8 + $0x1a8] sm:$0xff]  ;;  %v2633_v12 = vld [vmem:[#allocation8 + $0x540] sm:$0xff] }
 0x25c   :  { %2421 = vmatmul.mubr.f32.vlgmr.msra.gmra.mxu1 %v5177_v48  ;;  %3511 = vmatprep.subr.mxu0 %v2526_v20  ;;  %v2646_v44 = vld [vmem:[#allocation8 + $0x5a8] sm:$0xff]  ;;  %v2517_v48 = vld [vmem:[#allocation8 + $0x1a0] sm:$0xff]  ;;  %v2436_v23 = vmax.f32 %v5226_v41, 0.0  ;;  %v2503_v41 = vld [vmem:[#allocation8 + $0x130] sm:$0xff] }
 0x25d   :  { %3588 = vmatprep.subr.mxu1 %v2654_v21  ;;  %3512 = vmatpush1.msra.mxu0 %v2525_v22  ;;  %v2630_v20 = vld [vmem:[#allocation8 + $0x528] sm:$0xff]  ;;  %v2501_v21 = vld [vmem:[#allocation8 + $0x120] sm:$0xff] }
 0x25e   :  { %3589 = vmatpush1.msra.mxu1 %v2653_v60  ;;  %3513 = vmatprep.subr.mxu0 %v2522_v14  ;;  %v2629_v10 = vld [vmem:[#allocation8 + $0x520] sm:$0xff]  ;;  %v2498_v22 = vld [vmem:[#allocation8 + $0x108] sm:$0xff] }
 0x25f   :  { %3590 = vmatprep.subr.mxu1 %v2650_v26  ;;  %2349 = vmatprep.mubr.f32.mxu0 %v4801_v39  ;;  %v2513_v39 = vld [vmem:[#allocation8 + $0x180] sm:$0xff]  ;;  %v2626_v60 = vld [vmem:[#allocation8 + $0x508] sm:$0xff] }
 0x260   :  { %2426 = vmatprep.mubr.f32.mxu1 %v4803_v47  ;;  %3514 = vmatpush1.msra.mxu0 %v2521_v34  ;;  %v2641_v47 = vld [vmem:[#allocation8 + $0x580] sm:$0xff]  ;;  %v2494_v34 = vld [vmem:[#allocation8 + $0xe8] sm:$0xff] }
 0x261   :  { %3591 = vmatpush1.msra.mxu1 %v2649_v3  ;;  %2350 = vmatmul.mubr.f32.gmra.mxu0 %v4802_v43  ;;  %v2638_v43 = vld [vmem:[#allocation8 + $0x568] sm:$0xff]  ;;  %v2497_v14 = vld [vmem:[#allocation8 + $0x100] sm:$0xff] }
 0x262   :  { %2427 = vmatmul.mubr.f32.gmra.mxu1 %v4805_v4  ;;  %3515 = vmatprep.subr.mxu0 %v2518_v54  ;;  %v2634_v4 = vld [vmem:[#allocation8 + $0x548] sm:$0xff]  ;;  %v2625_v26 = vld [vmem:[#allocation8 + $0x500] sm:$0xff] }
 0x263   :  { %3592 = vmatprep.subr.mxu1 %v2646_v44  ;;  %3516 = vmatpush1.msra.mxu0 %v2517_v48  ;;  %v2622_v3 = vld [vmem:[#allocation8 + $0x4e8] sm:$0xff]  ;;  %v2493_v54 = vld [vmem:[#allocation8 + $0xe0] sm:$0xff] }
 0x264   :  { %3575 = vmatprep.mubr.f32.mxu0 %v2434_v40  ;;  %3593 = vmatpush1.msra.mxu1 %v2645_v36  ;;  %v2621_v44 = vld [vmem:[#allocation8 + $0x4e0] sm:$0xff]  ;;  %v2490_v48 = vld [vmem:[#allocation8 + $0xc8] sm:$0xff] }
 0x265   :  { %3652 = vmatprep.mubr.f32.mxu1 %v2436_v23  ;;  %3517 = vmatprep.subr.mxu0 %v2514_v16  ;;  %v2618_v36 = vld [vmem:[#allocation8 + $0x4c8] sm:$0xff]  ;;  %v2489_v16 = vld [vmem:[#allocation8 + $0xc0] sm:$0xff] }
 0x266   :  { %3594 = vmatprep.subr.mxu1 %v2642_v58  ;;  %3518 = vmatpush1.msra.mxu0 %v2513_v39  ;;  %v2617_v58 = vld [vmem:[#allocation8 + $0x4c0] sm:$0xff]  ;;  %v2486_v39 = vld [vmem:[#allocation8 + $0xa8] sm:$0xff] }
 0x267   :  { %3595 = vmatpush1.msra.mxu1 %v2641_v47  ;;  %3519 = vmatprep.subr.mxu0 %v2510_v50  ;;  %v2614_v47 = vld [vmem:[#allocation8 + $0x4a8] sm:$0xff]  ;;  %v2485_v50 = vld [vmem:[#allocation8 + $0xa0] sm:$0xff] }
 0x268   :  { %3596 = vmatprep.subr.mxu1 %v2638_v43  ;;  %3520 = vmatpush1.msra.mxu0 %v2509_v51  ;;  %v2613_v43 = vld [vmem:[#allocation8 + $0x4a0] sm:$0xff]  ;;  %v2482_v51 = vld [vmem:[#allocation8 + $0x88] sm:$0xff] }
 0x269   :  { %3597 = vmatpush1.msra.mxu1 %v2637_v53  ;;  %3521 = vmatprep.subr.mxu0 %v2506_v57  ;;  %v2610_v53 = vld [vmem:[#allocation8 + $0x488] sm:$0xff]  ;;  %v2481_v57 = vld [vmem:[#allocation8 + $0x80] sm:$0xff] }
 0x26a   :  { %3598 = vmatprep.subr.mxu1 %v2634_v4  ;;  %3522 = vmatpush1.msra.mxu0 %v2505_v29  ;;  %v2609_v4 = vld [vmem:[#allocation8 + $0x480] sm:$0xff]  ;;  %v2478_v29 = vld [vmem:[#allocation8 + $0x68] sm:$0xff] }
 0x26b   :  { %3599 = vmatpush1.msra.mxu1 %v2633_v12  ;;  %3523 = vmatprep.subr.mxu0 %v2502_v13  ;;  %v2606_v12 = vld [vmem:[#allocation8 + $0x468] sm:$0xff]  ;;  %v2477_v13 = vld [vmem:[#allocation8 + $0x60] sm:$0xff] }
 0x26c   :  { %3600 = vmatprep.subr.mxu1 %v2630_v20  ;;  %3524 = vmatpush1.msra.mxu0 %v2501_v21  ;;  %v2605_v20 = vld [vmem:[#allocation8 + $0x460] sm:$0xff]  ;;  %v2474_v21 = vld [vmem:[#allocation8 + $0x48] sm:$0xff] }
 0x26d   :  { %3601 = vmatpush1.msra.mxu1 %v2629_v10  ;;  %3525 = vmatprep.subr.mxu0 %v2498_v22  ;;  %v2602_v10 = vld [vmem:[#allocation8 + $0x448] sm:$0xff]  ;;  %v2473_v22 = vld [vmem:[#allocation8 + $0x40] sm:$0xff] }
 0x26e   :  { %3602 = vmatprep.subr.mxu1 %v2626_v60  ;;  %3526 = vmatpush1.msra.mxu0 %v2497_v14  ;;  %v2601_v60 = vld [vmem:[#allocation8 + $0x440] sm:$0xff]  ;;  %v2470_v14 = vld [vmem:[#allocation8 + $0x28] sm:$0xff] }
 0x26f   :  { %3603 = vmatpush1.msra.mxu1 %v2625_v26  ;;  %3527 = vmatprep.subr.mxu0 %v2494_v34  ;;  %v2598_v26 = vld [vmem:[#allocation8 + $0x428] sm:$0xff]  ;;  %v2469_v34 = vld [vmem:[#allocation8 + $0x20] sm:$0xff] }
 0x270   :  { %3604 = vmatprep.subr.mxu1 %v2622_v3  ;;  %3528 = vmatpush1.msra.mxu0 %v2493_v54  ;;  %v2597_v3 = vld [vmem:[#allocation8 + $0x420] sm:$0xff]  ;;  %v2466_v54 = vld [vmem:[#allocation8 + $0x8] sm:$0xff] }
 0x271   :  { %3605 = vmatpush1.msra.mxu1 %v2621_v44  ;;  %3529 = vmatprep.subr.mxu0 %v2490_v48  ;;  %v2594_v44 = vld [vmem:[#allocation8 + $0x408] sm:$0xff]  ;;  %v2465_v48 = vld [vmem:[#allocation8] sm:$0xff] }
 0x272   :  { %3606 = vmatprep.subr.mxu1 %v2618_v36  ;;  %3530 = vmatpush1.msra.mxu0 %v2489_v16  ;;  %v2593_v36 = vld [vmem:[#allocation8 + $0x400] sm:$0xff]  ;;  %v2590_v16 = vld [vmem:[#allocation8 + $0x3e8] sm:$0xff] }
 0x273   :  { %3607 = vmatpush1.msra.mxu1 %v2617_v58  ;;  %3531 = vmatprep.subr.mxu0 %v2486_v39  ;;  %v2718_v58 = vld [vmem:[#allocation8 + $0x7e8] sm:$0xff]  ;;  %v2589_v39 = vld [vmem:[#allocation8 + $0x3e0] sm:$0xff] }
 0x274   :  { %3608 = vmatprep.subr.mxu1 %v2614_v47  ;;  %3532 = vmatpush1.msra.mxu0 %v2485_v50  ;;  %v2717_v47 = vld [vmem:[#allocation8 + $0x7e0] sm:$0xff]  ;;  %v2586_v50 = vld [vmem:[#allocation8 + $0x3c8] sm:$0xff] }
 0x275   :  { %3609 = vmatpush1.msra.mxu1 %v2613_v43  ;;  %3533 = vmatprep.subr.mxu0 %v2482_v51  ;;  %v2714_v43 = vld [vmem:[#allocation8 + $0x7c8] sm:$0xff]  ;;  %v2585_v51 = vld [vmem:[#allocation8 + $0x3c0] sm:$0xff] }
 0x276   :  { %3610 = vmatprep.subr.mxu1 %v2610_v53  ;;  %3534 = vmatpush1.msra.mxu0 %v2481_v57  ;;  %v2713_v53 = vld [vmem:[#allocation8 + $0x7c0] sm:$0xff]  ;;  %v2582_v57 = vld [vmem:[#allocation8 + $0x3a8] sm:$0xff] }
 0x277   :  { %3611 = vmatpush1.msra.mxu1 %v2609_v4  ;;  %3535 = vmatprep.subr.mxu0 %v2478_v29  ;;  %v2710_v4 = vld [vmem:[#allocation8 + $0x7a8] sm:$0xff]  ;;  %v2581_v29 = vld [vmem:[#allocation8 + $0x3a0] sm:$0xff] }
 0x278   :  { %3612 = vmatprep.subr.mxu1 %v2606_v12  ;;  %3536 = vmatpush1.msra.mxu0 %v2477_v13  ;;  %v2709_v12 = vld [vmem:[#allocation8 + $0x7a0] sm:$0xff]  ;;  %v2578_v13 = vld [vmem:[#allocation8 + $0x388] sm:$0xff] }
 0x279   :  { %3613 = vmatpush1.msra.mxu1 %v2605_v20  ;;  %3537 = vmatprep.subr.mxu0 %v2474_v21  ;;  %v2706_v20 = vld [vmem:[#allocation8 + $0x788] sm:$0xff]  ;;  %v2577_v21 = vld [vmem:[#allocation8 + $0x380] sm:$0xff] }
 0x27a   :  { %3614 = vmatprep.subr.mxu1 %v2602_v10  ;;  %3538 = vmatpush1.msra.mxu0 %v2473_v22  ;;  %v2705_v10 = vld [vmem:[#allocation8 + $0x780] sm:$0xff]  ;;  %v2574_v22 = vld [vmem:[#allocation8 + $0x368] sm:$0xff] }
 0x27b   :  { %3615 = vmatpush1.msra.mxu1 %v2601_v60  ;;  %3539 = vmatprep.subr.mxu0 %v2470_v14  ;;  %v2702_v60 = vld [vmem:[#allocation8 + $0x768] sm:$0xff]  ;;  %v2573_v14 = vld [vmem:[#allocation8 + $0x360] sm:$0xff] }
 0x27c   :  { %3616 = vmatprep.subr.mxu1 %v2598_v26  ;;  %3540 = vmatpush1.msra.mxu0 %v2469_v34  ;;  %v2701_v26 = vld [vmem:[#allocation8 + $0x760] sm:$0xff]  ;;  %v2570_v34 = vld [vmem:[#allocation8 + $0x348] sm:$0xff] }
 0x27d   :  { %3617 = vmatpush1.msra.mxu1 %v2597_v3  ;;  %3541 = vmatprep.subr.mxu0 %v2466_v54  ;;  %v2698_v3 = vld [vmem:[#allocation8 + $0x748] sm:$0xff]  ;;  %v2569_v54 = vld [vmem:[#allocation8 + $0x340] sm:$0xff] }
 0x27e   :  { %3618 = vmatprep.subr.mxu1 %v2594_v44  ;;  %3542 = vmatpush1.msra.mxu0 %v2465_v48  ;;  %v2697_v44 = vld [vmem:[#allocation8 + $0x740] sm:$0xff]  ;;  %v2566_v48 = vld [vmem:[#allocation8 + $0x328] sm:$0xff] }
 0x27f   :  { %3619 = vmatpush1.msra.mxu1 %v2593_v36  ;;  %3543 = vmatprep.subr.mxu0 %v2590_v16  ;;  %v2694_v36 = vld [vmem:[#allocation8 + $0x728] sm:$0xff]  ;;  %v5234_v16 = vpop.f32.mrf.mxu0 }
 0x280   :  { %3620 = vmatprep.subr.mxu1 %v2718_v58  ;;  %3544 = vmatpush2.msra.mxu0 %v2589_v39  ;;  %v2565_v58 = vld [vmem:[#allocation8 + $0x320] sm:$0xff] }
 0x281   :  { %3621 = vmatpush2.msra.mxu1 %v2717_v47  ;;  %3545 = vmatprep.subr.mxu0 %v2586_v50  ;;  %v2693_v39 = vld [vmem:[#allocation8 + $0x720] sm:$0xff]  ;;  %v2562_v47 = vld [vmem:[#allocation8 + $0x308] sm:$0xff] }
 0x282   :  { %3622 = vmatprep.subr.mxu1 %v2714_v43  ;;  %3546 = vmatpush2.msra.mxu0 %v2585_v51  ;;  %v2690_v50 = vld [vmem:[#allocation8 + $0x708] sm:$0xff]  ;;  %v2561_v43 = vld [vmem:[#allocation8 + $0x300] sm:$0xff] }
 0x283   :  { %3623 = vmatpush2.msra.mxu1 %v2713_v53  ;;  %3547 = vmatprep.subr.mxu0 %v2582_v57  ;;  %v2689_v51 = vld [vmem:[#allocation8 + $0x700] sm:$0xff]  ;;  %v5238_v57 = vrot.slane %v5190_v45, %v5073_v0  ;;  %v2554_v45 = vld [vmem:[#allocation8 + $0x2c8] sm:$0xff] }
 0x284   :  { %3624 = vmatprep.subr.mxu1 %v2710_v4  ;;  %3548 = vmatpush2.msra.mxu0 %v2581_v29  ;;  %v5240_v4 = vpop.f32.mrf.mxu1  ;;  %v2558_v29 = vld [vmem:[#allocation8 + $0x2e8] sm:$0xff] }
 0x285   :  { %3625 = vmatpush2.msra.mxu1 %v2709_v12  ;;  %3549 = vmatprep.subr.mxu0 %v2578_v13  ;;  %v2686_v12 = vld [vmem:[#allocation8 + $0x6e8] sm:$0xff] }
 0x286   :  { %3626 = vmatprep.subr.mxu1 %v2706_v20  ;;  %3550 = vmatpush2.msra.mxu0 %v2577_v21  ;;  %v5244_v20 = vsub.s32 2, %v5042_v55  ;;  %v2557_v21 = vld [vmem:[#allocation8 + $0x2e0] sm:$0xff] }
 0x287   :  { %3627 = vmatpush2.msra.mxu1 %v2705_v10  ;;  %3551 = vmatprep.subr.mxu0 %v2574_v22  ;;  %v2685_v10 = vld [vmem:[#allocation8 + $0x6e0] sm:$0xff] }
 0x288   :  { %3628 = vmatprep.subr.mxu1 %v2702_v60  ;;  %3552 = vmatpush2.msra.mxu0 %v2573_v14  ;;  %v2682_v60 = vld [vmem:[#allocation8 + $0x6c8] sm:$0xff] }
 0x289   :  { %3629 = vmatpush2.msra.mxu1 %v2701_v26  ;;  %3553 = vmatprep.subr.mxu0 %v2570_v34  ;;  %v2553_v34 = vld [vmem:[#allocation8 + $0x2c0] sm:$0xff] }
 0x28a   :  { %3630 = vmatprep.subr.mxu1 %v2698_v3  ;;  %3554 = vmatpush2.msra.mxu0 %v2569_v54  ;;  %v2681_v3 = vld [vmem:[#allocation8 + $0x6c0] sm:$0xff]  ;;  %v2550_v54 = vld [vmem:[#allocation8 + $0x2a8] sm:$0xff] }
 0x28b   :  { %3631 = vmatpush2.msra.mxu1 %v2697_v44  ;;  %3555 = vmatprep.subr.mxu0 %v2566_v48  ;;  %v2678_v44 = vld [vmem:[#allocation8 + $0x6a8] sm:$0xff] }
 0x28c   :  { %3632 = vmatprep.subr.mxu1 %v2694_v36  ;;  %v1889_v53 = vpop.f32.mrf.mxu0  ;;  %3556 = vmatpush2.msra.mxu0 %v2565_v58  ;;  %v1132_v36 = vrot.slane %v5208_v28, %v5244_v20  ;;  %v2549_v58 = vld [vmem:[#allocation8 + $0x2a0] sm:$0xff] }
 0x28d   :  { %3633 = vmatpush2.msra.mxu1 %v2693_v39  ;;  %v1890_v13 = vadd.f32 %v1889_v53, %v5198_v61  ;;  %3557 = vmatprep.subr.mxu0 %v2562_v47  ;;  %v2677_v39 = vld [vmem:[#allocation8 + $0x6a0] sm:$0xff] }
 0x28e   :  { %3634 = vmatprep.subr.mxu1 %v2690_v50  ;;  %v1891_v22 = vpop.f32.mrf.mxu0  ;;  %3558 = vmatpush2.msra.mxu0 %v2561_v43  ;;  %v2546_v50 = vld [vmem:[#allocation8 + $0x288] sm:$0xff]  ;;  %v2673_v53 = vld [vmem:[#allocation8 + $0x680] sm:$0xff] }
 0x28f   :  { %3635 = vmatpush2.msra.mxu1 %v2689_v51  ;;  %v1892_v14 = vadd.f32 %v1891_v22, %v5238_v57  ;;  %v1966_v26 = vpop.f32.mrf.mxu1  ;;  %3559 = vmatprep.subr.mxu0 %v2558_v29  ;;  %v2674_v43 = vld [vmem:[#allocation8 + $0x688] sm:$0xff]  ;;  %v2545_v51 = vld [vmem:[#allocation8 + $0x280] sm:$0xff]  ;;  %v1151_v22 = vsub.s32 7, %v5042_v55 }
 0x290   :  { %3636 = vmatprep.subr.mxu1 %v2686_v12  ;;  %v5247_v61 = vadd.f32 %v1966_v26, %v1890_v13  ;;  %3560 = vmatpush2.msra.mxu0 %v2557_v21  ;;  %v2542_v29 = vld [vmem:[#allocation8 + $0x268] sm:$0xff]  ;;  %v1422_v13 = vadd.f32 %v5105_v52, %v1132_v36  ;;  %v2541_v21 = vld [vmem:[#allocation8 + $0x260] sm:$0xff] }
 0x291   :  { %3637 = vmatpush2.msra.mxu1 %v2685_v10  ;;  %v1968_v48 = vpop.f32.mrf.mxu1  ;;  %3561 = vmatprep.subr.mxu0 %v2554_v45  ;;  %v2670_v12 = vld [vmem:[#allocation8 + $0x668] sm:$0xff]  ;;  %v2669_v10 = vld [vmem:[#allocation8 + $0x660] sm:$0xff] }
 0x292   :  { %3638 = vmatprep.subr.mxu1 %v2682_v60  ;;  %v5251_v47 = vadd.f32 %v1968_v48, %v1892_v14  ;;  %3562 = vmatpush2.msra.mxu0 %v2553_v34  ;;  %v2538_v45 = vld [vmem:[#allocation8 + $0x248] sm:$0xff]  ;;  %v1430_v14 = vadd.f32 %v5116_v63, %v5212_v62  ;;  %v2537_v26 = vld [vmem:[#allocation8 + $0x240] sm:$0xff] }
 0x293   :  { %3639 = vmatpush2.msra.mxu1 %v2681_v3  ;;  %3563 = vmatprep.subr.mxu0 %v2550_v54  ;;  %v2666_v60 = vld [vmem:[#allocation8 + $0x648] sm:$0xff]  ;;  %v2665_v34 = vld [vmem:[#allocation8 + $0x640] sm:$0xff]  ;;  %v5258_v54 = vadd.f32 %v5107_v59, %v1422_v13 }
 0x294   :  { %3640 = vmatprep.subr.mxu1 %v2678_v44  ;;  %3564 = vmatpush2.msra.mxu0 %v2549_v58  ;;  %v2534_v52 = vld [vmem:[#allocation8 + $0x228] sm:$0xff]  ;;  %v2533_v44 = vld [vmem:[#allocation8 + $0x220] sm:$0xff]  ;;  %v5263_v58 = vrot.slane %v5208_v28, %v1151_v22 }
 0x295   :  { %3641 = vmatpush2.msra.mxu1 %v2677_v39  ;;  %3565 = vmatprep.subr.mxu0 %v2546_v50  ;;  %v2662_v3 = vld [vmem:[#allocation8 + $0x628] sm:$0xff]  ;;  %v2661_v48 = vld [vmem:[#allocation8 + $0x620] sm:$0xff]  ;;  %v1428_v39 = vadd.f32 %v5111_v38, %v1132_v36  ;;  %v5267_v50 = vadd.f32 %v5127_v37, %v1430_v14  ;;  %v5641_v28 = vmax.f32 %v5258_v54, 0.0  ;;  %v5640_v36 = vmax.f32 %v5087_v25, 0.0 }
 0x296   :  { %3642 = vmatprep.subr.mxu1 %v2674_v43  ;;  %3566 = vmatpush2.msra.mxu0 %v2545_v51  ;;  %v2530_v63 = vld [vmem:[#allocation8 + $0x208] sm:$0xff]  ;;  %v2529_v59 = vld [vmem:[#allocation8 + $0x200] sm:$0xff]  ;;  %v5642_v51 = vmax.f32 %v5054_v5, 0.0  ;;  %v1732_v37 = vadd.f32 %v5184_v24, %v5263_v58  ;;  %v5638_v14 = vmax.f32 %v5085_v49, 0.0 }
 0x297   :  { %3643 = vmatpush2.msra.mxu1 %v2673_v53  ;;  %3567 = vmatprep.subr.mxu0 %v2542_v29  ;;  %v2658_v62 = vld [vmem:[#allocation8 + $0x608] sm:$0xff]  ;;  %v2657_v43 = vld [vmem:[#allocation8 + $0x600] sm:$0xff]  ;;  %v1578_v53 = vadd.f32 %v5149_v33, %v5154_v11  ;;  %v5639_v13 = vmax.f32 %v5267_v50, 0.0 }
 0x298   :  { %3644 = vmatprep.subr.mxu1 %v2670_v12  ;;  %3568 = vmatpush2.msra.mxu0 %v2541_v21  ;;  %v2782_v29 = vld [vmem:[#allocation8 + $0x9e8] sm:$0xff]  ;;  %v5277_v12 = vadd.f32 %v5118_v1, %v1428_v39  ;;  %v2781_v33 = vld [vmem:[#allocation8 + $0x9e0] sm:$0xff] }
 0x299   :  { %3645 = vmatpush2.msra.mxu1 %v2669_v10  ;;  %3569 = vmatprep.subr.mxu0 %v2538_v45  ;;  %v2910_v38 = vld [vmem:[#allocation8 + $0xde8] sm:$0xff]  ;;  %v2909_v11 = vld [vmem:[#allocation8 + $0xde0] sm:$0xff]  ;;  %v5285_v10 = vadd.f32 %v5156_v46, %v1578_v53 }
 0x29a   :  { %3646 = vmatprep.subr.mxu1 %v2666_v60  ;;  %3570 = vmatpush2.msra.mxu0 %v2537_v26  ;;  %v2778_v24 = vld [vmem:[#allocation8 + $0x9c8] sm:$0xff]  ;;  %v2777_v1 = vld [vmem:[#allocation8 + $0x9c0] sm:$0xff]  ;;  %v5292_v60 = vadd.f32 %v5188_v42, %v1732_v37  ;;  %v5637_v26 = vmax.f32 %v5277_v12, 0.0 }
 0x29b   :  { %3647 = vmatpush2.msra.mxu1 %v2665_v34  ;;  %3571 = vmatprep.subr.mxu0 %v2534_v52  ;;  %v2906_v21 = vld [vmem:[#allocation8 + $0xdc8] sm:$0xff]  ;;  %v2905_v45 = vld [vmem:[#allocation8 + $0xdc0] sm:$0xff] }
 0x29c   :  { %3648 = vmatprep.subr.mxu1 %v2662_v3  ;;  %3572 = vmatpush2.msra.mxu0 %v2533_v44  ;;  %v2774_v46 = vld [vmem:[#allocation8 + $0x9a8] sm:$0xff]  ;;  %v2773_v52 = vld [vmem:[#allocation8 + $0x9a0] sm:$0xff]  ;;  %v5636_v3 = vmax.f32 %v5285_v10, 0.0  ;;  %v5635_v44 = vmax.f32 %v5292_v60, 0.0 }
 0x29d   :  { %3649 = vmatpush2.msra.mxu1 %v2661_v48  ;;  %3573 = vmatprep.subr.mxu0 %v2530_v63  ;;  %v2902_v34 = vld [vmem:[#allocation8 + $0xda8] sm:$0xff]  ;;  %v2901_v42 = vld [vmem:[#allocation8 + $0xda0] sm:$0xff] }
 0x29e   :  { %3650 = vmatprep.subr.mxu1 %v2658_v62  ;;  %3574 = vmatpush2.msra.mxu0 %v2529_v59  ;;  %v2770_v48 = vld [vmem:[#allocation8 + $0x988] sm:$0xff]  ;;  %v2769_v62 = vld [vmem:[#allocation8 + $0x980] sm:$0xff] }
 0x29f   :  { %3651 = vmatpush2.msra.mxu1 %v2657_v43  ;;  %3576 = vmatmul.mubr.f32.vlgmr.msra.gmra.mxu0 %v5642_v51  ;;  %v2898_v63 = vld [vmem:[#allocation8 + $0xd88] sm:$0xff]  ;;  %v2897_v39 = vld [vmem:[#allocation8 + $0xd80] sm:$0xff] }
 0x2a0   :  { %3653 = vmatmul.mubr.f32.vlgmr.msra.gmra.mxu1 %v5641_v28  ;;  %3665 = vmatprep.subr.mxu0 %v2782_v29  ;;  %v2766_v59 = vld [vmem:[#allocation8 + $0x968] sm:$0xff]  ;;  %v2765_v53 = vld [vmem:[#allocation8 + $0x960] sm:$0xff] }
 0x2a1   :  { %3742 = vmatprep.subr.mxu1 %v2910_v38  ;;  %3581 = vmatprep.mubr.f32.mxu0 %v5640_v36  ;;  %v2894_v43 = vld [vmem:[#allocation8 + $0xd68] sm:$0xff]  ;;  %v2893_v29 = vld [vmem:[#allocation8 + $0xd60] sm:$0xff] }
 0x2a2   :  { %3658 = vmatprep.mubr.f32.mxu1 %v5639_v13  ;;  %3666 = vmatpush1.msra.mxu0 %v2781_v33  ;;  %v2762_v38 = vld [vmem:[#allocation8 + $0x948] sm:$0xff]  ;;  %v2761_v33 = vld [vmem:[#allocation8 + $0x940] sm:$0xff] }
 0x2a3   :  { %3743 = vmatpush1.msra.mxu1 %v2909_v11  ;;  %3667 = vmatprep.subr.mxu0 %v2778_v24  ;;  %v2890_v37 = vld [vmem:[#allocation8 + $0xd48] sm:$0xff]  ;;  %v2889_v11 = vld [vmem:[#allocation8 + $0xd40] sm:$0xff] }
 0x2a4   :  { %3744 = vmatprep.subr.mxu1 %v2906_v21  ;;  %3668 = vmatpush1.msra.mxu0 %v2777_v1  ;;  %v2758_v24 = vld [vmem:[#allocation8 + $0x928] sm:$0xff]  ;;  %v2757_v1 = vld [vmem:[#allocation8 + $0x920] sm:$0xff] }
 0x2a5   :  { %3745 = vmatpush1.msra.mxu1 %v2905_v45  ;;  %3582 = vmatmul.mubr.f32.gmra.mxu0 %v5638_v14  ;;  %v2886_v21 = vld [vmem:[#allocation8 + $0xd28] sm:$0xff]  ;;  %v2885_v45 = vld [vmem:[#allocation8 + $0xd20] sm:$0xff] }
 0x2a6   :  { %3659 = vmatmul.mubr.f32.gmra.mxu1 %v5637_v26  ;;  %3669 = vmatprep.subr.mxu0 %v2774_v46  ;;  %v2754_v46 = vld [vmem:[#allocation8 + $0x908] sm:$0xff]  ;;  %v2933_v26 = vld [vmem:[#allocation8 + $0xea0] sm:$0xff] }
 0x2a7   :  { %3746 = vmatprep.subr.mxu1 %v2902_v34  ;;  %3670 = vmatpush1.msra.mxu0 %v2773_v52  ;;  %v2882_v34 = vld [vmem:[#allocation8 + $0xd08] sm:$0xff]  ;;  %v2753_v52 = vld [vmem:[#allocation8 + $0x900] sm:$0xff] }
 0x2a8   :  { %3729 = vmatprep.mubr.f32.mxu0 %v5636_v3  ;;  %3747 = vmatpush1.msra.mxu1 %v2901_v42  ;;  %v2881_v42 = vld [vmem:[#allocation8 + $0xd00] sm:$0xff]  ;;  %v4807_v3 = vld [vmem:[#allocation7] sm:$0xff]  ;;  %v2802_v14 = vld [vmem:[#allocation8 + $0xa88] sm:$0xff] }
 0x2a9   :  { %3806 = vmatprep.mubr.f32.mxu1 %v5635_v44  ;;  %3671 = vmatprep.subr.mxu0 %v2770_v48  ;;  %v2750_v48 = vld [vmem:[#allocation8 + $0x8e8] sm:$0xff]  ;;  %v5321_v44 = vld [vmem:[#allocation7 + $0x8] sm:$0xff] }
 0x2aa   :  { %3748 = vmatprep.subr.mxu1 %v2898_v63  ;;  %3672 = vmatpush1.msra.mxu0 %v2769_v62  ;;  %v2878_v63 = vld [vmem:[#allocation8 + $0xce8] sm:$0xff]  ;;  %v2749_v62 = vld [vmem:[#allocation8 + $0x8e0] sm:$0xff] }
 0x2ab   :  { %3749 = vmatpush1.msra.mxu1 %v2897_v39  ;;  %3673 = vmatprep.subr.mxu0 %v2766_v59  ;;  %v2877_v39 = vld [vmem:[#allocation8 + $0xce0] sm:$0xff]  ;;  %v2746_v59 = vld [vmem:[#allocation8 + $0x8c8] sm:$0xff] }
 0x2ac   :  { %3750 = vmatprep.subr.mxu1 %v2894_v43  ;;  %3674 = vmatpush1.msra.mxu0 %v2765_v53  ;;  %v2874_v43 = vld [vmem:[#allocation8 + $0xcc8] sm:$0xff]  ;;  %v2745_v53 = vld [vmem:[#allocation8 + $0x8c0] sm:$0xff] }
 0x2ad   :  { %3751 = vmatpush1.msra.mxu1 %v2893_v29  ;;  %3675 = vmatprep.subr.mxu0 %v2762_v38  ;;  %v2873_v29 = vld [vmem:[#allocation8 + $0xcc0] sm:$0xff]  ;;  %v2742_v38 = vld [vmem:[#allocation8 + $0x8a8] sm:$0xff] }
 0x2ae   :  { %3752 = vmatprep.subr.mxu1 %v2890_v37  ;;  %3676 = vmatpush1.msra.mxu0 %v2761_v33  ;;  %v2870_v37 = vld [vmem:[#allocation8 + $0xca8] sm:$0xff]  ;;  %v2741_v33 = vld [vmem:[#allocation8 + $0x8a0] sm:$0xff] }
 0x2af   :  { %3753 = vmatpush1.msra.mxu1 %v2889_v11  ;;  %3677 = vmatprep.subr.mxu0 %v2758_v24  ;;  %v2869_v11 = vld [vmem:[#allocation8 + $0xca0] sm:$0xff]  ;;  %v2738_v24 = vld [vmem:[#allocation8 + $0x888] sm:$0xff] }
 0x2b0   :  { %3754 = vmatprep.subr.mxu1 %v2886_v21  ;;  %3678 = vmatpush1.msra.mxu0 %v2757_v1  ;;  %v2866_v21 = vld [vmem:[#allocation8 + $0xc88] sm:$0xff]  ;;  %v2737_v1 = vld [vmem:[#allocation8 + $0x880] sm:$0xff] }
 0x2b1   :  { %3755 = vmatpush1.msra.mxu1 %v2885_v45  ;;  %3679 = vmatprep.subr.mxu0 %v2754_v46  ;;  %v2865_v45 = vld [vmem:[#allocation8 + $0xc80] sm:$0xff]  ;;  %v2734_v46 = vld [vmem:[#allocation8 + $0x868] sm:$0xff] }
 0x2b2   :  { %3756 = vmatprep.subr.mxu1 %v2882_v34  ;;  %3680 = vmatpush1.msra.mxu0 %v2753_v52  ;;  %v2862_v34 = vld [vmem:[#allocation8 + $0xc68] sm:$0xff]  ;;  %v2733_v52 = vld [vmem:[#allocation8 + $0x860] sm:$0xff] }
 0x2b3   :  { %3757 = vmatpush1.msra.mxu1 %v2881_v42  ;;  %3681 = vmatprep.subr.mxu0 %v2750_v48  ;;  %v2861_v42 = vld [vmem:[#allocation8 + $0xc60] sm:$0xff]  ;;  %v2730_v48 = vld [vmem:[#allocation8 + $0x848] sm:$0xff] }
 0x2b4   :  { %3758 = vmatprep.subr.mxu1 %v2878_v63  ;;  %3682 = vmatpush1.msra.mxu0 %v2749_v62  ;;  %v2858_v63 = vld [vmem:[#allocation8 + $0xc48] sm:$0xff]  ;;  %v2729_v62 = vld [vmem:[#allocation8 + $0x840] sm:$0xff] }
 0x2b5   :  { %3759 = vmatpush1.msra.mxu1 %v2877_v39  ;;  %3683 = vmatprep.subr.mxu0 %v2746_v59  ;;  %v2857_v39 = vld [vmem:[#allocation8 + $0xc40] sm:$0xff]  ;;  %v2726_v59 = vld [vmem:[#allocation8 + $0x828] sm:$0xff] }
 0x2b6   :  { %3760 = vmatprep.subr.mxu1 %v2874_v43  ;;  %3684 = vmatpush1.msra.mxu0 %v2745_v53  ;;  %v2854_v43 = vld [vmem:[#allocation8 + $0xc28] sm:$0xff]  ;;  %v2725_v53 = vld [vmem:[#allocation8 + $0x820] sm:$0xff] }
 0x2b7   :  { %3761 = vmatpush1.msra.mxu1 %v2873_v29  ;;  %3685 = vmatprep.subr.mxu0 %v2742_v38  ;;  %v2853_v29 = vld [vmem:[#allocation8 + $0xc20] sm:$0xff]  ;;  %v2722_v38 = vld [vmem:[#allocation8 + $0x808] sm:$0xff] }
 0x2b8   :  { %3762 = vmatprep.subr.mxu1 %v2870_v37  ;;  %3686 = vmatpush1.msra.mxu0 %v2741_v33  ;;  %v2850_v37 = vld [vmem:[#allocation8 + $0xc08] sm:$0xff]  ;;  %v2721_v33 = vld [vmem:[#allocation8 + $0x800] sm:$0xff] }
 0x2b9   :  { %3763 = vmatpush1.msra.mxu1 %v2869_v11  ;;  %3687 = vmatprep.subr.mxu0 %v2738_v24  ;;  %v2849_v11 = vld [vmem:[#allocation8 + $0xc00] sm:$0xff]  ;;  %v2846_v24 = vld [vmem:[#allocation8 + $0xbe8] sm:$0xff] }
 0x2ba   :  { %3764 = vmatprep.subr.mxu1 %v2866_v21  ;;  %3688 = vmatpush1.msra.mxu0 %v2737_v1  ;;  %v2974_v21 = vld [vmem:[#allocation8 + $0xfe8] sm:$0xff]  ;;  %v2845_v1 = vld [vmem:[#allocation8 + $0xbe0] sm:$0xff] }
 0x2bb   :  { %3765 = vmatpush1.msra.mxu1 %v2865_v45  ;;  %3689 = vmatprep.subr.mxu0 %v2734_v46  ;;  %v2973_v45 = vld [vmem:[#allocation8 + $0xfe0] sm:$0xff]  ;;  %v2842_v46 = vld [vmem:[#allocation8 + $0xbc8] sm:$0xff] }
 0x2bc   :  { %3766 = vmatprep.subr.mxu1 %v2862_v34  ;;  %3690 = vmatpush1.msra.mxu0 %v2733_v52  ;;  %v2970_v34 = vld [vmem:[#allocation8 + $0xfc8] sm:$0xff]  ;;  %v2841_v52 = vld [vmem:[#allocation8 + $0xbc0] sm:$0xff] }
 0x2bd   :  { %3767 = vmatpush1.msra.mxu1 %v2861_v42  ;;  %3691 = vmatprep.subr.mxu0 %v2730_v48  ;;  %v2969_v42 = vld [vmem:[#allocation8 + $0xfc0] sm:$0xff]  ;;  %v2838_v48 = vld [vmem:[#allocation8 + $0xba8] sm:$0xff] }
 0x2be   :  { %3768 = vmatprep.subr.mxu1 %v2858_v63  ;;  %3692 = vmatpush1.msra.mxu0 %v2729_v62  ;;  %v2966_v63 = vld [vmem:[#allocation8 + $0xfa8] sm:$0xff]  ;;  %v2837_v62 = vld [vmem:[#allocation8 + $0xba0] sm:$0xff] }
 0x2bf   :  { %3769 = vmatpush1.msra.mxu1 %v2857_v39  ;;  %3693 = vmatprep.subr.mxu0 %v2726_v59  ;;  %v2965_v39 = vld [vmem:[#allocation8 + $0xfa0] sm:$0xff]  ;;  %v2834_v59 = vld [vmem:[#allocation8 + $0xb88] sm:$0xff] }
 0x2c0   :  { %3770 = vmatprep.subr.mxu1 %v2854_v43  ;;  %3694 = vmatpush1.msra.mxu0 %v2725_v53  ;;  %v2962_v43 = vld [vmem:[#allocation8 + $0xf88] sm:$0xff]  ;;  %v2833_v53 = vld [vmem:[#allocation8 + $0xb80] sm:$0xff] }
 0x2c1   :  { %3771 = vmatpush1.msra.mxu1 %v2853_v29  ;;  %3695 = vmatprep.subr.mxu0 %v2722_v38  ;;  %v2961_v29 = vld [vmem:[#allocation8 + $0xf80] sm:$0xff]  ;;  %v2830_v38 = vld [vmem:[#allocation8 + $0xb68] sm:$0xff] }
 0x2c2   :  { %3772 = vmatprep.subr.mxu1 %v2850_v37  ;;  %3696 = vmatpush1.msra.mxu0 %v2721_v33  ;;  %v2958_v37 = vld [vmem:[#allocation8 + $0xf68] sm:$0xff]  ;;  %v5306_v33 = vpop.f32.mrf.mxu0 }
 0x2c3   :  { %3773 = vmatpush1.msra.mxu1 %v2849_v11  ;;  %3697 = vmatprep.subr.mxu0 %v2846_v24  ;;  %v2829_v11 = vld [vmem:[#allocation8 + $0xb60] sm:$0xff]  ;;  %v2930_v13 = vld [vmem:[#allocation8 + $0xe88] sm:$0xff] }
 0x2c4   :  { %3774 = vmatprep.subr.mxu1 %v2974_v21  ;;  %3698 = vmatpush2.msra.mxu0 %v2845_v1  ;;  %v2957_v24 = vld [vmem:[#allocation8 + $0xf60] sm:$0xff]  ;;  %v2826_v21 = vld [vmem:[#allocation8 + $0xb48] sm:$0xff] }
 0x2c5   :  { %3775 = vmatpush2.msra.mxu1 %v2973_v45  ;;  %3699 = vmatprep.subr.mxu0 %v2842_v46  ;;  %v2954_v1 = vld [vmem:[#allocation8 + $0xf48] sm:$0xff]  ;;  %v2825_v45 = vld [vmem:[#allocation8 + $0xb40] sm:$0xff] }
 0x2c6   :  { %3776 = vmatprep.subr.mxu1 %v2970_v34  ;;  %3700 = vmatpush2.msra.mxu0 %v2841_v52  ;;  %v2953_v46 = vld [vmem:[#allocation8 + $0xf40] sm:$0xff]  ;;  %v5308_v34 = vpop.f32.mrf.mxu1  ;;  %v2822_v52 = vld [vmem:[#allocation8 + $0xb28] sm:$0xff] }
 0x2c7   :  { %3777 = vmatpush2.msra.mxu1 %v2969_v42  ;;  %3701 = vmatprep.subr.mxu0 %v2838_v48  ;;  %v2950_v42 = vld [vmem:[#allocation8 + $0xf28] sm:$0xff]  ;;  %v5310_v48 = vpop.f32.mrf.mxu0 }
 0x2c8   :  { %3778 = vmatprep.subr.mxu1 %v2966_v63  ;;  %3702 = vmatpush2.msra.mxu0 %v2837_v62  ;;  %v2821_v63 = vld [vmem:[#allocation8 + $0xb20] sm:$0xff]  ;;  %v2798_v28 = vld [vmem:[#allocation8 + $0xa68] sm:$0xff] }
 0x2c9   :  { %3779 = vmatpush2.msra.mxu1 %v2965_v39  ;;  %3703 = vmatprep.subr.mxu0 %v2834_v59  ;;  %v2949_v62 = vld [vmem:[#allocation8 + $0xf20] sm:$0xff]  ;;  %v2818_v39 = vld [vmem:[#allocation8 + $0xb08] sm:$0xff] }
 0x2ca   :  { %3780 = vmatprep.subr.mxu1 %v2962_v43  ;;  %3704 = vmatpush2.msra.mxu0 %v2833_v53  ;;  %v2946_v59 = vld [vmem:[#allocation8 + $0xf08] sm:$0xff]  ;;  %v2817_v43 = vld [vmem:[#allocation8 + $0xb00] sm:$0xff] }
 0x2cb   :  { %3781 = vmatpush2.msra.mxu1 %v2961_v29  ;;  %3705 = vmatprep.subr.mxu0 %v2830_v38  ;;  %v2945_v53 = vld [vmem:[#allocation8 + $0xf00] sm:$0xff]  ;;  %v5314_v38 = vpop.f32.mrf.mxu1  ;;  %v2926_v51 = vld [vmem:[#allocation8 + $0xe68] sm:$0xff] }
 0x2cc   :  { %3782 = vmatprep.subr.mxu1 %v2958_v37  ;;  %3706 = vmatpush2.msra.mxu0 %v2829_v11  ;;  %v2814_v37 = vld [vmem:[#allocation8 + $0xae8] sm:$0xff] }
 0x2cd   :  { %3783 = vmatpush2.msra.mxu1 %v2957_v24  ;;  %3707 = vmatprep.subr.mxu0 %v2826_v21  ;;  %v2942_v11 = vld [vmem:[#allocation8 + $0xee8] sm:$0xff]  ;;  %v1147_v24 = vsub.s32 6, %v5042_v55  ;;  %v2813_v21 = vld [vmem:[#allocation8 + $0xae0] sm:$0xff] }
 0x2ce   :  { %3784 = vmatprep.subr.mxu1 %v2954_v1  ;;  %3708 = vmatpush2.msra.mxu0 %v2825_v45  ;;  %v2941_v1 = vld [vmem:[#allocation8 + $0xee0] sm:$0xff]  ;;  %v2810_v45 = vld [vmem:[#allocation8 + $0xac8] sm:$0xff] }
 0x2cf   :  { %3785 = vmatpush2.msra.mxu1 %v2953_v46  ;;  %3709 = vmatprep.subr.mxu0 %v2822_v52  ;;  %v2938_v46 = vld [vmem:[#allocation8 + $0xec8] sm:$0xff] }
 0x2d0   :  { %3786 = vmatprep.subr.mxu1 %v2950_v42  ;;  %v5312_v29 = vpop.f32.mrf.mxu0  ;;  %3710 = vmatpush2.msra.mxu0 %v2821_v63  ;;  %v2809_v63 = vld [vmem:[#allocation8 + $0xac0] sm:$0xff] }
 0x2d1   :  { %3787 = vmatpush2.msra.mxu1 %v2949_v62  ;;  %3711 = vmatprep.subr.mxu0 %v2818_v39  ;;  %v2937_v62 = vld [vmem:[#allocation8 + $0xec0] sm:$0xff]  ;;  %v5326_v39 = vrot.slane %v5321_v44, %v1139_v15 }
 0x2d2   :  { %3788 = vmatprep.subr.mxu1 %v2946_v59  ;;  %3712 = vmatpush2.msra.mxu0 %v2817_v43  ;;  %v5317_v52 = vpop.f32.mrf.mxu0  ;;  %v2806_v59 = vld [vmem:[#allocation8 + $0xaa8] sm:$0xff] }
 0x2d3   :  { %3789 = vmatpush2.msra.mxu1 %v2945_v53  ;;  %v5319_v42 = vpop.f32.mrf.mxu1  ;;  %3713 = vmatprep.subr.mxu0 %v2814_v37  ;;  %v2934_v43 = vld [vmem:[#allocation8 + $0xea8] sm:$0xff]  ;;  %v1148_v37 = vrot.slane %v4807_v3, %v1147_v24 }
 0x2d4   :  { %3790 = vmatprep.subr.mxu1 %v2942_v11  ;;  %3714 = vmatpush2.msra.mxu0 %v2813_v21  ;;  %v2805_v11 = vld [vmem:[#allocation8 + $0xaa0] sm:$0xff] }
 0x2d5   :  { %3791 = vmatpush2.msra.mxu1 %v2941_v1  ;;  %v5328_v53 = vpop.f32.mrf.mxu1  ;;  %3715 = vmatprep.subr.mxu0 %v2810_v45  ;;  %v2801_v21 = vld [vmem:[#allocation8 + $0xa80] sm:$0xff]  ;;  %v1730_v45 = vadd.f32 %v5180_v31, %v1148_v37  ;;  %v2790_v31 = vld [vmem:[#allocation8 + $0xa28] sm:$0xff] }
 0x2d6   :  { %3792 = vmatprep.subr.mxu1 %v2938_v46  ;;  %3716 = vmatpush2.msra.mxu0 %v2809_v63  ;;  %v2929_v1 = vld [vmem:[#allocation8 + $0xe80] sm:$0xff] }
 0x2d7   :  { %3793 = vmatpush2.msra.mxu1 %v2937_v62  ;;  %v2191_v15 = vpop.f32.mrf.mxu0  ;;  %3717 = vmatprep.subr.mxu0 %v2806_v59  ;;  %v2797_v46 = vld [vmem:[#allocation8 + $0xa60] sm:$0xff]  ;;  %v2794_v59 = vld [vmem:[#allocation8 + $0xa48] sm:$0xff] }
 0x2d8   :  { %3794 = vmatprep.subr.mxu1 %v2934_v43  ;;  %v2192_v36 = vadd.f32 %v2191_v15, %v5326_v39  ;;  %3718 = vmatpush2.msra.mxu0 %v2805_v11  ;;  %v2925_v63 = vld [vmem:[#allocation8 + $0xe60] sm:$0xff]  ;;  %v2922_v43 = vld [vmem:[#allocation8 + $0xe48] sm:$0xff]  ;;  %v1738_v15 = vadd.f32 %v5192_v2, %v5263_v58 }
 0x2d9   :  { %3795 = vmatpush2.msra.mxu1 %v2933_v26  ;;  %v2268_v3 = vpop.f32.mrf.mxu1  ;;  %3719 = vmatprep.subr.mxu0 %v2802_v14  ;;  %v2793_v26 = vld [vmem:[#allocation8 + $0xa40] sm:$0xff]  ;;  %v2918_v14 = vld [vmem:[#allocation8 + $0xe28] sm:$0xff] }
 0x2da   :  { %3796 = vmatprep.subr.mxu1 %v2930_v13  ;;  %v5334_v62 = vadd.f32 %v2268_v3, %v2192_v36  ;;  %3720 = vmatpush2.msra.mxu0 %v2801_v21  ;;  %v2921_v11 = vld [vmem:[#allocation8 + $0xe40] sm:$0xff]  ;;  %v5339_v13 = vadd.f32 %v5182_v35, %v1730_v45  ;;  %v2786_v2 = vld [vmem:[#allocation8 + $0xa08] sm:$0xff]  ;;  %v2437_v45 = vmax.f32 %v5130_v18, 0.0  ;;  %v3032_v18 = vld [vmem:[#allocation8 + $0x11b8] sm:$0xff] }
 0x2db   :  { %3797 = vmatpush2.msra.mxu1 %v2929_v1  ;;  %3721 = vmatprep.subr.mxu0 %v2798_v28  ;;  %v2789_v36 = vld [vmem:[#allocation8 + $0xa20] sm:$0xff]  ;;  %v5343_v1 = vrot.slane %v5321_v44, %v5206_v32  ;;  %v2914_v58 = vld [vmem:[#allocation8 + $0xe08] sm:$0xff]  ;;  %v5347_v28 = vadd.f32 %v5200_v30, %v1738_v15 }
 0x2dc   :  { %3798 = vmatprep.subr.mxu1 %v2926_v51  ;;  %3722 = vmatpush2.msra.mxu0 %v2797_v46  ;;  %v2917_v21 = vld [vmem:[#allocation8 + $0xe20] sm:$0xff]  ;;  %v1736_v51 = vadd.f32 %v5186_v6, %v1148_v37  ;;  %v2439_v46 = vmax.f32 %v5339_v13, 0.0  ;;  %v3166_v6 = vld [vmem:[#allocation8 + $0x15e8] sm:$0xff]  ;;  %v2454_v37 = vmax.f32 %v5162_v19, 0.0  ;;  %v3160_v13 = vld [vmem:[#allocation8 + $0x15b8] sm:$0xff] }
 0x2dd   :  { %3799 = vmatpush2.msra.mxu1 %v2925_v63  ;;  %3723 = vmatprep.subr.mxu0 %v2794_v59  ;;  %v2785_v35 = vld [vmem:[#allocation8 + $0xa00] sm:$0xff]  ;;  %v1886_v63 = vadd.f32 %v5234_v16, %v5238_v57  ;;  %v3038_v59 = vld [vmem:[#allocation8 + $0x11e8] sm:$0xff]  ;;  %v2040_v30 = vadd.f32 %v5310_v48, %v5343_v1  ;;  %v5647_v15 = vmax.f32 %v5347_v28, 0.0 }
 0x2de   :  { %3800 = vmatprep.subr.mxu1 %v2922_v43  ;;  %3724 = vmatpush2.msra.mxu0 %v2793_v26  ;;  %v2913_v3 = vld [vmem:[#allocation8 + $0xe00] sm:$0xff]  ;;  %v5357_v43 = vadd.f32 %v5194_v56, %v1736_v51  ;;  %v3034_v48 = vld [vmem:[#allocation8 + $0x11c8] sm:$0xff] }
 0x2df   :  { %3801 = vmatpush2.msra.mxu1 %v2921_v11  ;;  %3725 = vmatprep.subr.mxu0 %v2790_v31  ;;  %v3037_v16 = vld [vmem:[#allocation8 + $0x11e0] sm:$0xff]  ;;  %v3162_v26 = vld [vmem:[#allocation8 + $0x15c8] sm:$0xff]  ;;  %v5365_v11 = vadd.f32 %v5240_v4, %v1886_v63 }
 0x2e0   :  { %3802 = vmatprep.subr.mxu1 %v2918_v14  ;;  %3726 = vmatpush2.msra.mxu0 %v2789_v36  ;;  %v3165_v57 = vld [vmem:[#allocation8 + $0x15e0] sm:$0xff]  ;;  %v5372_v14 = vadd.f32 %v5314_v38, %v2040_v30  ;;  %v5646_v36 = vmax.f32 %v5160_v8, 0.0  ;;  %v3030_v4 = vld [vmem:[#allocation8 + $0x11a8] sm:$0xff]  ;;  %v5666_v19 = vmax.f32 %v5357_v43, 0.0 }
 0x2e1   :  { %3803 = vmatpush2.msra.mxu1 %v2917_v21  ;;  %3727 = vmatprep.subr.mxu0 %v2786_v2  ;;  %v3033_v56 = vld [vmem:[#allocation8 + $0x11c0] sm:$0xff]  ;;  %v5645_v21 = vmax.f32 %v5357_v43, 0.0  ;;  %v3158_v2 = vld [vmem:[#allocation8 + $0x15a8] sm:$0xff]  ;;  %v5644_v51 = vmax.f32 %v5365_v11, 0.0  ;;  %v3023_v43 = vld [vmem:[#allocation8 + $0x1170] sm:$0xff] }
 0x2e2   :  { %3804 = vmatprep.subr.mxu1 %v2914_v58  ;;  %3728 = vmatpush2.msra.mxu0 %v2785_v35  ;;  %v3161_v31 = vld [vmem:[#allocation8 + $0x15c0] sm:$0xff]  ;;  %v5643_v35 = vmax.f32 %v5372_v14, 0.0  ;;  %v3154_v63 = vld [vmem:[#allocation8 + $0x1588] sm:$0xff] }
 0x2e3   :  { %3805 = vmatpush2.msra.mxu1 %v2913_v3  ;;  %3730 = vmatmul.mubr.f32.vlgmr.msra.gmra.mxu0 %v2437_v45  ;;  %v3029_v58 = vld [vmem:[#allocation8 + $0x11a0] sm:$0xff]  ;;  %v3026_v3 = vld [vmem:[#allocation8 + $0x1188] sm:$0xff] }
 0x2e4   :  { %3807 = vmatmul.mubr.f32.vlgmr.msra.gmra.mxu1 %v2439_v46  ;;  %3819 = vmatprep.subr.mxu0 %v3038_v59  ;;  %v3157_v38 = vld [vmem:[#allocation8 + $0x15a0] sm:$0xff]  ;;  %v3022_v30 = vld [vmem:[#allocation8 + $0x1168] sm:$0xff] }
 0x2e5   :  { %3896 = vmatprep.subr.mxu1 %v3166_v6  ;;  %3735 = vmatprep.mubr.f32.mxu0 %v2454_v37  ;;  %v3025_v59 = vld [vmem:[#allocation8 + $0x1180] sm:$0xff] }
 0x2e6   :  { %3812 = vmatprep.mubr.f32.mxu1 %v5647_v15  ;;  %3820 = vmatpush1.msra.mxu0 %v3037_v16  ;;  %v3153_v6 = vld [vmem:[#allocation8 + $0x1580] sm:$0xff]  ;;  %v3150_v16 = vld [vmem:[#allocation8 + $0x1568] sm:$0xff] }
 0x2e7   :  { %3897 = vmatpush1.msra.mxu1 %v3165_v57  ;;  %3821 = vmatprep.subr.mxu0 %v3034_v48  ;;  %v3021_v57 = vld [vmem:[#allocation8 + $0x1160] sm:$0xff] }
 0x2e8   :  { %3898 = vmatprep.subr.mxu1 %v3162_v26  ;;  %3822 = vmatpush1.msra.mxu0 %v3033_v56  ;;  %v3149_v48 = vld [vmem:[#allocation8 + $0x1560] sm:$0xff]  ;;  %v3018_v26 = vld [vmem:[#allocation8 + $0x1148] sm:$0xff] }
 0x2e9   :  { %3899 = vmatpush1.msra.mxu1 %v3161_v31  ;;  %3736 = vmatmul.mubr.f32.gmra.mxu0 %v5646_v36  ;;  %v3146_v56 = vld [vmem:[#allocation8 + $0x1548] sm:$0xff]  ;;  %v3017_v31 = vld [vmem:[#allocation8 + $0x1140] sm:$0xff] }
 0x2ea   :  { %3813 = vmatmul.mubr.f32.gmra.mxu1 %v5645_v21  ;;  %3823 = vmatprep.subr.mxu0 %v3030_v4  ;;  %v3145_v4 = vld [vmem:[#allocation8 + $0x1540] sm:$0xff] }
 0x2eb   :  { %3900 = vmatprep.subr.mxu1 %v3158_v2  ;;  %3824 = vmatpush1.msra.mxu0 %v3029_v58  ;;  %v3014_v2 = vld [vmem:[#allocation8 + $0x1128] sm:$0xff]  ;;  %v3065_v21 = vld [vmem:[#allocation8 + $0x12c0] sm:$0xff] }
 0x2ec   :  { %3883 = vmatprep.mubr.f32.mxu0 %v5644_v51  ;;  %3901 = vmatpush1.msra.mxu1 %v3157_v38  ;;  %v3142_v58 = vld [vmem:[#allocation8 + $0x1528] sm:$0xff]  ;;  %v3013_v38 = vld [vmem:[#allocation8 + $0x1120] sm:$0xff]  ;;  %v5388_v51 = vpop.f32.mrf.mxu1 }
 0x2ed   :  { %3960 = vmatprep.mubr.f32.mxu1 %v5643_v35  ;;  %3825 = vmatprep.subr.mxu0 %v3026_v3  ;;  %v3141_v35 = vld [vmem:[#allocation8 + $0x1520] sm:$0xff]  ;;  %v3010_v3 = vld [vmem:[#allocation8 + $0x1108] sm:$0xff] }
 0x2ee   :  { %3902 = vmatprep.subr.mxu1 %v3154_v63  ;;  %3826 = vmatpush1.msra.mxu0 %v3025_v59  ;;  %v3138_v63 = vld [vmem:[#allocation8 + $0x1508] sm:$0xff]  ;;  %v3009_v59 = vld [vmem:[#allocation8 + $0x1100] sm:$0xff] }
 0x2ef   :  { %3903 = vmatpush1.msra.mxu1 %v3153_v6  ;;  %3827 = vmatprep.subr.mxu0 %v3022_v30  ;;  %v3137_v6 = vld [vmem:[#allocation8 + $0x1500] sm:$0xff]  ;;  %v3006_v30 = vld [vmem:[#allocation8 + $0x10e8] sm:$0xff] }
 0x2f0   :  { %3904 = vmatprep.subr.mxu1 %v3150_v16  ;;  %3828 = vmatpush1.msra.mxu0 %v3021_v57  ;;  %v3134_v16 = vld [vmem:[#allocation8 + $0x14e8] sm:$0xff]  ;;  %v3005_v57 = vld [vmem:[#allocation8 + $0x10e0] sm:$0xff] }
 0x2f1   :  { %3905 = vmatpush1.msra.mxu1 %v3149_v48  ;;  %3829 = vmatprep.subr.mxu0 %v3018_v26  ;;  %v3133_v48 = vld [vmem:[#allocation8 + $0x14e0] sm:$0xff]  ;;  %v3002_v26 = vld [vmem:[#allocation8 + $0x10c8] sm:$0xff] }
 0x2f2   :  { %3906 = vmatprep.subr.mxu1 %v3146_v56  ;;  %3830 = vmatpush1.msra.mxu0 %v3017_v31  ;;  %v3130_v56 = vld [vmem:[#allocation8 + $0x14c8] sm:$0xff]  ;;  %v3001_v31 = vld [vmem:[#allocation8 + $0x10c0] sm:$0xff] }
 0x2f3   :  { %3907 = vmatpush1.msra.mxu1 %v3145_v4  ;;  %3831 = vmatprep.subr.mxu0 %v3014_v2  ;;  %v3129_v4 = vld [vmem:[#allocation8 + $0x14c0] sm:$0xff]  ;;  %v2998_v2 = vld [vmem:[#allocation8 + $0x10a8] sm:$0xff] }
 0x2f4   :  { %3908 = vmatprep.subr.mxu1 %v3142_v58  ;;  %3832 = vmatpush1.msra.mxu0 %v3013_v38  ;;  %v3126_v58 = vld [vmem:[#allocation8 + $0x14a8] sm:$0xff]  ;;  %v3125_v38 = vld [vmem:[#allocation8 + $0x14a0] sm:$0xff] }
 0x2f5   :  { %3909 = vmatpush1.msra.mxu1 %v3141_v35  ;;  %3833 = vmatprep.subr.mxu0 %v3010_v3  ;;  %v2997_v35 = vld [vmem:[#allocation8 + $0x10a0] sm:$0xff]  ;;  %v2994_v3 = vld [vmem:[#allocation8 + $0x1088] sm:$0xff] }
 0x2f6   :  { %3910 = vmatprep.subr.mxu1 %v3138_v63  ;;  %3834 = vmatpush1.msra.mxu0 %v3009_v59  ;;  %v3122_v63 = vld [vmem:[#allocation8 + $0x1488] sm:$0xff]  ;;  %v2993_v59 = vld [vmem:[#allocation8 + $0x1080] sm:$0xff] }
 0x2f7   :  { %3911 = vmatpush1.msra.mxu1 %v3137_v6  ;;  %3835 = vmatprep.subr.mxu0 %v3006_v30  ;;  %v3121_v6 = vld [vmem:[#allocation8 + $0x1480] sm:$0xff]  ;;  %v2990_v30 = vld [vmem:[#allocation8 + $0x1068] sm:$0xff] }
 0x2f8   :  { %3912 = vmatprep.subr.mxu1 %v3134_v16  ;;  %3836 = vmatpush1.msra.mxu0 %v3005_v57  ;;  %v3118_v16 = vld [vmem:[#allocation8 + $0x1468] sm:$0xff]  ;;  %v2989_v57 = vld [vmem:[#allocation8 + $0x1060] sm:$0xff] }
 0x2f9   :  { %3913 = vmatpush1.msra.mxu1 %v3133_v48  ;;  %3837 = vmatprep.subr.mxu0 %v3002_v26  ;;  %v3117_v48 = vld [vmem:[#allocation8 + $0x1460] sm:$0xff]  ;;  %v2986_v26 = vld [vmem:[#allocation8 + $0x1048] sm:$0xff] }
 0x2fa   :  { %3914 = vmatprep.subr.mxu1 %v3130_v56  ;;  %3838 = vmatpush1.msra.mxu0 %v3001_v31  ;;  %v3114_v56 = vld [vmem:[#allocation8 + $0x1448] sm:$0xff]  ;;  %v2985_v31 = vld [vmem:[#allocation8 + $0x1040] sm:$0xff] }
 0x2fb   :  { %3915 = vmatpush1.msra.mxu1 %v3129_v4  ;;  %3839 = vmatprep.subr.mxu0 %v2998_v2  ;;  %v3113_v4 = vld [vmem:[#allocation8 + $0x1440] sm:$0xff]  ;;  %v2982_v2 = vld [vmem:[#allocation8 + $0x1028] sm:$0xff] }
 0x2fc   :  { %3916 = vmatprep.subr.mxu1 %v3126_v58  ;;  %3840 = vmatpush1.msra.mxu0 %v2997_v35  ;;  %v3110_v58 = vld [vmem:[#allocation8 + $0x1428] sm:$0xff]  ;;  %v2981_v35 = vld [vmem:[#allocation8 + $0x1020] sm:$0xff] }
 0x2fd   :  { %3917 = vmatpush1.msra.mxu1 %v3125_v38  ;;  %3841 = vmatprep.subr.mxu0 %v2994_v3  ;;  %v3109_v38 = vld [vmem:[#allocation8 + $0x1420] sm:$0xff]  ;;  %v2978_v3 = vld [vmem:[#allocation8 + $0x1008] sm:$0xff] }
 0x2fe   :  { %3918 = vmatprep.subr.mxu1 %v3122_v63  ;;  %3842 = vmatpush1.msra.mxu0 %v2993_v59  ;;  %v3106_v63 = vld [vmem:[#allocation8 + $0x1408] sm:$0xff]  ;;  %v2977_v59 = vld [vmem:[#allocation8 + $0x1000] sm:$0xff] }
 0x2ff   :  { %3919 = vmatpush1.msra.mxu1 %v3121_v6  ;;  %3843 = vmatprep.subr.mxu0 %v2990_v30  ;;  %v3105_v6 = vld [vmem:[#allocation8 + $0x1400] sm:$0xff]  ;;  %v3102_v30 = vld [vmem:[#allocation8 + $0x13e8] sm:$0xff] }
 0x300   :  { %3920 = vmatprep.subr.mxu1 %v3118_v16  ;;  %3844 = vmatpush1.msra.mxu0 %v2989_v57  ;;  %v3230_v16 = vld [vmem:[#allocation8 + $0x17e8] sm:$0xff]  ;;  %v3101_v57 = vld [vmem:[#allocation8 + $0x13e0] sm:$0xff] }
 0x301   :  { %3921 = vmatpush1.msra.mxu1 %v3117_v48  ;;  %3845 = vmatprep.subr.mxu0 %v2986_v26  ;;  %v3229_v48 = vld [vmem:[#allocation8 + $0x17e0] sm:$0xff]  ;;  %v3098_v26 = vld [vmem:[#allocation8 + $0x13c8] sm:$0xff] }
 0x302   :  { %3922 = vmatprep.subr.mxu1 %v3114_v56  ;;  %3846 = vmatpush1.msra.mxu0 %v2985_v31  ;;  %v3226_v56 = vld [vmem:[#allocation8 + $0x17c8] sm:$0xff]  ;;  %v3097_v31 = vld [vmem:[#allocation8 + $0x13c0] sm:$0xff] }
 0x303   :  { %3923 = vmatpush1.msra.mxu1 %v3113_v4  ;;  %3847 = vmatprep.subr.mxu0 %v2982_v2  ;;  %v3225_v4 = vld [vmem:[#allocation8 + $0x17c0] sm:$0xff]  ;;  %v3094_v2 = vld [vmem:[#allocation8 + $0x13a8] sm:$0xff] }
 0x304   :  { %3924 = vmatprep.subr.mxu1 %v3110_v58  ;;  %3848 = vmatpush1.msra.mxu0 %v2981_v35  ;;  %v3222_v58 = vld [vmem:[#allocation8 + $0x17a8] sm:$0xff]  ;;  %v3093_v35 = vld [vmem:[#allocation8 + $0x13a0] sm:$0xff] }
 0x305   :  { %3925 = vmatpush1.msra.mxu1 %v3109_v38  ;;  %3849 = vmatprep.subr.mxu0 %v2978_v3  ;;  %v3221_v38 = vld [vmem:[#allocation8 + $0x17a0] sm:$0xff]  ;;  %v3090_v3 = vld [vmem:[#allocation8 + $0x1388] sm:$0xff] }
 0x306   :  { %3926 = vmatprep.subr.mxu1 %v3106_v63  ;;  %3850 = vmatpush1.msra.mxu0 %v2977_v59  ;;  %v3218_v63 = vld [vmem:[#allocation8 + $0x1788] sm:$0xff]  ;;  %v3089_v59 = vld [vmem:[#allocation8 + $0x1380] sm:$0xff] }
 0x307   :  { %3927 = vmatpush1.msra.mxu1 %v3105_v6  ;;  %3851 = vmatprep.subr.mxu0 %v3102_v30  ;;  %v3217_v6 = vld [vmem:[#allocation8 + $0x1780] sm:$0xff]  ;;  %v3086_v30 = vld [vmem:[#allocation8 + $0x1368] sm:$0xff] }
 0x308   :  { %3928 = vmatprep.subr.mxu1 %v3230_v16  ;;  %3852 = vmatpush2.msra.mxu0 %v3101_v57  ;;  %v3214_v16 = vld [vmem:[#allocation8 + $0x1768] sm:$0xff]  ;;  %v3085_v57 = vld [vmem:[#allocation8 + $0x1360] sm:$0xff] }
 0x309   :  { %3929 = vmatpush2.msra.mxu1 %v3229_v48  ;;  %3853 = vmatprep.subr.mxu0 %v3098_v26  ;;  %v3213_v48 = vld [vmem:[#allocation8 + $0x1760] sm:$0xff]  ;;  %v3082_v26 = vld [vmem:[#allocation8 + $0x1348] sm:$0xff] }
 0x30a   :  { %3930 = vmatprep.subr.mxu1 %v3226_v56  ;;  %3854 = vmatpush2.msra.mxu0 %v3097_v31  ;;  %v3210_v56 = vld [vmem:[#allocation8 + $0x1748] sm:$0xff]  ;;  %v3081_v31 = vld [vmem:[#allocation8 + $0x1340] sm:$0xff] }
 0x30b   :  { %3931 = vmatpush2.msra.mxu1 %v3225_v4  ;;  %3855 = vmatprep.subr.mxu0 %v3094_v2  ;;  %v3209_v4 = vld [vmem:[#allocation8 + $0x1740] sm:$0xff]  ;;  %v3078_v2 = vld [vmem:[#allocation8 + $0x1328] sm:$0xff] }
 0x30c   :  { %3932 = vmatprep.subr.mxu1 %v3222_v58  ;;  %3856 = vmatpush2.msra.mxu0 %v3093_v35  ;;  %v3206_v58 = vld [vmem:[#allocation8 + $0x1728] sm:$0xff]  ;;  %v5386_v35 = vpop.f32.mrf.mxu0  ;;  %v3193_v36 = vld [vmem:[#allocation8 + $0x16c0] sm:$0xff] }
 0x30d   :  { %3933 = vmatpush2.msra.mxu1 %v3221_v38  ;;  %3857 = vmatprep.subr.mxu0 %v3090_v3  ;;  %v3077_v38 = vld [vmem:[#allocation8 + $0x1320] sm:$0xff] }
 0x30e   :  { %3934 = vmatprep.subr.mxu1 %v3218_v63  ;;  %3858 = vmatpush2.msra.mxu0 %v3089_v59  ;;  %v3205_v3 = vld [vmem:[#allocation8 + $0x1720] sm:$0xff]  ;;  %v3074_v63 = vld [vmem:[#allocation8 + $0x1308] sm:$0xff] }
 0x30f   :  { %3935 = vmatpush2.msra.mxu1 %v3217_v6  ;;  %3859 = vmatprep.subr.mxu0 %v3086_v30  ;;  %v3202_v59 = vld [vmem:[#allocation8 + $0x1708] sm:$0xff]  ;;  %v3073_v6 = vld [vmem:[#allocation8 + $0x1300] sm:$0xff] }
 0x310   :  { %3936 = vmatprep.subr.mxu1 %v3214_v16  ;;  %3860 = vmatpush2.msra.mxu0 %v3085_v57  ;;  %v3201_v30 = vld [vmem:[#allocation8 + $0x1700] sm:$0xff]  ;;  %v3070_v57 = vld [vmem:[#allocation8 + $0x12e8] sm:$0xff] }
 0x311   :  { %3937 = vmatpush2.msra.mxu1 %v3213_v48  ;;  %3861 = vmatprep.subr.mxu0 %v3082_v26  ;;  %v3198_v48 = vld [vmem:[#allocation8 + $0x16e8] sm:$0xff] }
 0x312   :  { %3938 = vmatprep.subr.mxu1 %v3210_v56  ;;  %3862 = vmatpush2.msra.mxu0 %v3081_v31  ;;  %v3069_v56 = vld [vmem:[#allocation8 + $0x12e0] sm:$0xff] }
 0x313   :  { %3939 = vmatpush2.msra.mxu1 %v3209_v4  ;;  %3863 = vmatprep.subr.mxu0 %v3078_v2  ;;  %v3197_v31 = vld [vmem:[#allocation8 + $0x16e0] sm:$0xff]  ;;  %v3066_v4 = vld [vmem:[#allocation8 + $0x12c8] sm:$0xff] }
 0x314   :  { %3940 = vmatprep.subr.mxu1 %v3206_v58  ;;  %v2197_v16 = vpop.f32.mrf.mxu0  ;;  %3864 = vmatpush2.msra.mxu0 %v3077_v38  ;;  %v3194_v2 = vld [vmem:[#allocation8 + $0x16c8] sm:$0xff] }
 0x315   :  { %3941 = vmatpush2.msra.mxu1 %v3205_v3  ;;  %v2198_v26 = vadd.f32 %v2197_v16, %v5326_v39  ;;  %3865 = vmatprep.subr.mxu0 %v3074_v63  ;;  %v3062_v38 = vld [vmem:[#allocation8 + $0x12a8] sm:$0xff]  ;;  %v1164_v39 = vrot.slane %v5321_v44, %v5244_v20  ;;  %v3061_v63 = vld [vmem:[#allocation8 + $0x12a0] sm:$0xff] }
 0x316   :  { %3942 = vmatprep.subr.mxu1 %v3202_v59  ;;  %3866 = vmatpush2.msra.mxu0 %v3073_v6  ;;  %v2274_v58 = vpop.f32.mrf.mxu1  ;;  %v3190_v3 = vld [vmem:[#allocation8 + $0x16a8] sm:$0xff]  ;;  %v3189_v59 = vld [vmem:[#allocation8 + $0x16a0] sm:$0xff] }
 0x317   :  { %3943 = vmatpush2.msra.mxu1 %v3201_v30  ;;  %3867 = vmatprep.subr.mxu0 %v3070_v57  ;;  %v5391_v15 = vadd.f32 %v2274_v58, %v2198_v26  ;;  %v3058_v6 = vld [vmem:[#allocation8 + $0x1288] sm:$0xff]  ;;  %v3057_v16 = vld [vmem:[#allocation8 + $0x1280] sm:$0xff]  ;;  %v2046_v58 = vadd.f32 %v5317_v52, %v5343_v1 }
 0x318   :  { %3944 = vmatprep.subr.mxu1 %v3198_v48  ;;  %3868 = vmatpush2.msra.mxu0 %v3069_v56  ;;  %v3186_v30 = vld [vmem:[#allocation8 + $0x1688] sm:$0xff]  ;;  %v3185_v57 = vld [vmem:[#allocation8 + $0x1680] sm:$0xff]  ;;  %v2038_v56 = vadd.f32 %v5306_v33, %v1164_v39  ;;  %v5408_v1 = vpop.f32.mrf.mxu1 }
 0x319   :  { %3945 = vmatpush2.msra.mxu1 %v3197_v31  ;;  %3869 = vmatprep.subr.mxu0 %v3066_v4  ;;  %v3054_v48 = vld [vmem:[#allocation8 + $0x1268] sm:$0xff]  ;;  %v3053_v31 = vld [vmem:[#allocation8 + $0x1260] sm:$0xff] }
 0x31a   :  { %3946 = vmatprep.subr.mxu1 %v3194_v2  ;;  %3870 = vmatpush2.msra.mxu0 %v3065_v21  ;;  %v3182_v26 = vld [vmem:[#allocation8 + $0x1668] sm:$0xff]  ;;  %v3181_v4 = vld [vmem:[#allocation8 + $0x1660] sm:$0xff]  ;;  %v5396_v2 = vpop.f32.mrf.mxu0 }
 0x31b   :  { %3947 = vmatpush2.msra.mxu1 %v3193_v36  ;;  %3871 = vmatprep.subr.mxu0 %v3062_v38  ;;  %v3050_v36 = vld [vmem:[#allocation8 + $0x1248] sm:$0xff]  ;;  %v3049_v38 = vld [vmem:[#allocation8 + $0x1240] sm:$0xff] }
 0x31c   :  { %3948 = vmatprep.subr.mxu1 %v3190_v3  ;;  %3872 = vmatpush2.msra.mxu0 %v3061_v63  ;;  %v3178_v21 = vld [vmem:[#allocation8 + $0x1648] sm:$0xff]  ;;  %v3177_v3 = vld [vmem:[#allocation8 + $0x1640] sm:$0xff] }
 0x31d   :  { %3949 = vmatpush2.msra.mxu1 %v3189_v59  ;;  %3873 = vmatprep.subr.mxu0 %v3058_v6  ;;  %v3046_v33 = vld [vmem:[#allocation8 + $0x1228] sm:$0xff]  ;;  %v5401_v59 = vadd.f32 %v5308_v34, %v2038_v56  ;;  %v5406_v6 = vrot.slane %v5321_v44, %v1143_v17  ;;  %v3173_v52 = vld [vmem:[#allocation8 + $0x1620] sm:$0xff]  ;;  %v2044_v34 = vadd.f32 %v5312_v29, %v1164_v39 }
 0x31e   :  { %3950 = vmatprep.subr.mxu1 %v3186_v30  ;;  %3874 = vmatpush2.msra.mxu0 %v3057_v16  ;;  %v3174_v63 = vld [vmem:[#allocation8 + $0x1628] sm:$0xff]  ;;  %v3045_v30 = vld [vmem:[#allocation8 + $0x1220] sm:$0xff]  ;;  %v5410_v16 = vpop.f32.mrf.mxu0 }
 0x31f   :  { %3951 = vmatpush2.msra.mxu1 %v3185_v57  ;;  %3875 = vmatprep.subr.mxu0 %v3054_v48  ;;  %v3042_v57 = vld [vmem:[#allocation8 + $0x1208] sm:$0xff]  ;;  %v3041_v17 = vld [vmem:[#allocation8 + $0x1200] sm:$0xff]  ;;  %v2194_v29 = vadd.f32 %v5386_v35, %v5406_v6 }
 0x320   :  { %3952 = vmatprep.subr.mxu1 %v3182_v26  ;;  %3876 = vmatpush2.msra.mxu0 %v3053_v31  ;;  %v3170_v48 = vld [vmem:[#allocation8 + $0x1608] sm:$0xff]  ;;  %v5414_v26 = vadd.f32 %v5328_v53, %v2046_v58  ;;  %v3169_v56 = vld [vmem:[#allocation8 + $0x1600] sm:$0xff]  ;;  %v5419_v31 = vrot.slane %v5321_v44, %v1151_v22  ;;  %v2347_v58 = vpop.f32.mrf.mxu0  ;;  %v5429_v22 = vadd.f32 %v5319_v42, %v2044_v34  ;;  %v5649_v34 = vmax.f32 %v5247_v61, 0.0 }
 0x321   :  { %3953 = vmatpush2.msra.mxu1 %v3181_v4  ;;  %3877 = vmatprep.subr.mxu0 %v3050_v36  ;;  %v5655_v4 = vmax.f32 %v5203_v27, 0.0  ;;  %v5654_v36 = vmax.f32 %v5401_v59, 0.0  ;;  %v3294_v53 = vld [vmem:[#allocation8 + $0x19e8] sm:$0xff]  ;;  %v3293_v35 = vld [vmem:[#allocation8 + $0x19e0] sm:$0xff] }
 0x322   :  { %3954 = vmatprep.subr.mxu1 %v3178_v21  ;;  %3878 = vmatpush2.msra.mxu0 %v3049_v38  ;;  %v3422_v39 = vld [vmem:[#allocation8 + $0x1de8] sm:$0xff]  ;;  %v5425_v21 = vpop.f32.mrf.mxu1  ;;  %v5653_v38 = vmax.f32 %v5251_v47, 0.0  ;;  %v5652_v44 = vmax.f32 %v5414_v26, 0.0 }
 0x323   :  { %3955 = vmatpush2.msra.mxu1 %v3177_v3  ;;  %3879 = vmatprep.subr.mxu0 %v3046_v33  ;;  %v3421_v3 = vld [vmem:[#allocation8 + $0x1de0] sm:$0xff]  ;;  %v2348_v33 = vadd.f32 %v2347_v58, %v5419_v31 }
 0x324   :  { %3956 = vmatprep.subr.mxu1 %v3174_v63  ;;  %3880 = vmatpush2.msra.mxu0 %v3045_v30  ;;  %v3290_v63 = vld [vmem:[#allocation8 + $0x19c8] sm:$0xff]  ;;  %v2424_v42 = vpop.f32.mrf.mxu1  ;;  %v3413_v58 = vld [vmem:[#allocation8 + $0x1da0] sm:$0xff] }
 0x325   :  { %3957 = vmatpush2.msra.mxu1 %v3173_v52  ;;  %3881 = vmatprep.subr.mxu0 %v3042_v57  ;;  %v3418_v30 = vld [vmem:[#allocation8 + $0x1dc8] sm:$0xff]  ;;  %v5438_v52 = vadd.f32 %v5388_v51, %v2194_v29  ;;  %v3289_v57 = vld [vmem:[#allocation8 + $0x19c0] sm:$0xff]  ;;  %v5446_v29 = vadd.f32 %v2424_v42, %v2348_v33 }
 0x326   :  { %3958 = vmatprep.subr.mxu1 %v3170_v48  ;;  %3882 = vmatpush2.msra.mxu0 %v3041_v17  ;;  %v3417_v48 = vld [vmem:[#allocation8 + $0x1dc0] sm:$0xff]  ;;  %v5648_v17 = vmax.f32 %v5429_v22, 0.0  ;;  %v3414_v51 = vld [vmem:[#allocation8 + $0x1da8] sm:$0xff] }
 0x327   :  { %3959 = vmatpush2.msra.mxu1 %v3169_v56  ;;  %3884 = vmatmul.mubr.f32.vlgmr.msra.gmra.mxu0 %v5655_v4  ;;  %v3286_v56 = vld [vmem:[#allocation8 + $0x19a8] sm:$0xff]  ;;  %v3409_v33 = vld [vmem:[#allocation8 + $0x1d80] sm:$0xff]  ;;  %v5651_v42 = vmax.f32 %v5446_v29, 0.0  ;;  %v2428_v4 = vpop.f32.mrf.mxu1 }
 0x328   :  { %3961 = vmatmul.mubr.f32.vlgmr.msra.gmra.mxu1 %v5654_v36  ;;  %3973 = vmatprep.subr.mxu0 %v3294_v53  ;;  %v3285_v53 = vld [vmem:[#allocation8 + $0x19a0] sm:$0xff] }
 0x329   :  { %4050 = vmatprep.subr.mxu1 %v3422_v39  ;;  %3889 = vmatprep.mubr.f32.mxu0 %v5653_v38  ;;  %v5650_v39 = vmax.f32 %v5438_v52, 0.0  ;;  %v3438_v38 = vld [vmem:[#allocation8 + $0x1e68] sm:$0xff] }
 0x32a   :  { %3966 = vmatprep.mubr.f32.mxu1 %v5652_v44  ;;  %3974 = vmatpush1.msra.mxu0 %v3293_v35  ;;  %v3282_v35 = vld [vmem:[#allocation8 + $0x1988] sm:$0xff]  ;;  %v3389_v44 = vld [vmem:[#allocation8 + $0x1ce0] sm:$0xff] }
 0x32b   :  { %4051 = vmatpush1.msra.mxu1 %v3421_v3  ;;  %3975 = vmatprep.subr.mxu0 %v3290_v63  ;;  %v3410_v3 = vld [vmem:[#allocation8 + $0x1d88] sm:$0xff]  ;;  %v3281_v63 = vld [vmem:[#allocation8 + $0x1980] sm:$0xff] }
 0x32c   :  { %4052 = vmatprep.subr.mxu1 %v3418_v30  ;;  %3976 = vmatpush1.msra.mxu0 %v3289_v57  ;;  %v3278_v30 = vld [vmem:[#allocation8 + $0x1968] sm:$0xff] }
 0x32d   :  { %4053 = vmatpush1.msra.mxu1 %v3417_v48  ;;  %3890 = vmatmul.mubr.f32.gmra.mxu0 %v5649_v34  ;;  %v3406_v57 = vld [vmem:[#allocation8 + $0x1d68] sm:$0xff]  ;;  %v3277_v48 = vld [vmem:[#allocation8 + $0x1960] sm:$0xff] }
 0x32e   :  { %3967 = vmatmul.mubr.f32.gmra.mxu1 %v5648_v17  ;;  %3977 = vmatprep.subr.mxu0 %v3286_v56  ;;  %v3405_v17 = vld [vmem:[#allocation8 + $0x1d60] sm:$0xff]  ;;  %v3274_v56 = vld [vmem:[#allocation8 + $0x1948] sm:$0xff] }
 0x32f   :  { %4054 = vmatprep.subr.mxu1 %v3414_v51  ;;  %3978 = vmatpush1.msra.mxu0 %v3285_v53  ;;  %v3402_v51 = vld [vmem:[#allocation8 + $0x1d48] sm:$0xff]  ;;  %v3273_v53 = vld [vmem:[#allocation8 + $0x1940] sm:$0xff] }
 0x330   :  { %4037 = vmatprep.mubr.f32.mxu0 %v5650_v39  ;;  %4055 = vmatpush1.msra.mxu1 %v3413_v58  ;;  %v3401_v34 = vld [vmem:[#allocation8 + $0x1d40] sm:$0xff]  ;;  %v3270_v39 = vld [vmem:[#allocation8 + $0x1928] sm:$0xff] }
 0x331   :  { %3979 = vmatprep.subr.mxu0 %v3282_v35  ;;  %4056 = vmatprep.subr.mxu1 %v3410_v3  ;;  %v3398_v58 = vld [vmem:[#allocation8 + $0x1d28] sm:$0xff]  ;;  %v3269_v35 = vld [vmem:[#allocation8 + $0x1920] sm:$0xff] }
 0x332   :  { %3980 = vmatpush1.msra.mxu0 %v3281_v63  ;;  %4057 = vmatpush1.msra.mxu1 %v3409_v33  ;;  %v3397_v3 = vld [vmem:[#allocation8 + $0x1d20] sm:$0xff]  ;;  %v3266_v63 = vld [vmem:[#allocation8 + $0x1908] sm:$0xff] }
 0x333   :  { %3981 = vmatprep.subr.mxu0 %v3278_v30  ;;  %4058 = vmatprep.subr.mxu1 %v3406_v57  ;;  %v3394_v33 = vld [vmem:[#allocation8 + $0x1d08] sm:$0xff]  ;;  %v3265_v30 = vld [vmem:[#allocation8 + $0x1900] sm:$0xff] }
 0x334   :  { %3982 = vmatpush1.msra.mxu0 %v3277_v48  ;;  %4059 = vmatpush1.msra.mxu1 %v3405_v17  ;;  %v3393_v57 = vld [vmem:[#allocation8 + $0x1d00] sm:$0xff]  ;;  %v3262_v17 = vld [vmem:[#allocation8 + $0x18e8] sm:$0xff] }
 0x335   :  { %4114 = vmatprep.mubr.f32.mxu1 %v5651_v42  ;;  %3983 = vmatprep.subr.mxu0 %v3274_v56  ;;  %v3390_v48 = vld [vmem:[#allocation8 + $0x1ce8] sm:$0xff]  ;;  %v3261_v42 = vld [vmem:[#allocation8 + $0x18e0] sm:$0xff] }
 0x336   :  { %4060 = vmatprep.subr.mxu1 %v3402_v51  ;;  %3984 = vmatpush1.msra.mxu0 %v3273_v53  ;;  %v3258_v56 = vld [vmem:[#allocation8 + $0x18c8] sm:$0xff]  ;;  %v3385_v53 = vld [vmem:[#allocation8 + $0x1cc0] sm:$0xff] }
 0x337   :  { %4061 = vmatpush1.msra.mxu1 %v3401_v34  ;;  %3985 = vmatprep.subr.mxu0 %v3270_v39  ;;  %v3386_v51 = vld [vmem:[#allocation8 + $0x1cc8] sm:$0xff]  ;;  %v3257_v34 = vld [vmem:[#allocation8 + $0x18c0] sm:$0xff] }
 0x338   :  { %4062 = vmatprep.subr.mxu1 %v3398_v58  ;;  %3986 = vmatpush1.msra.mxu0 %v3269_v35  ;;  %v3254_v39 = vld [vmem:[#allocation8 + $0x18a8] sm:$0xff]  ;;  %v3253_v35 = vld [vmem:[#allocation8 + $0x18a0] sm:$0xff] }
 0x339   :  { %4063 = vmatpush1.msra.mxu1 %v3397_v3  ;;  %3987 = vmatprep.subr.mxu0 %v3266_v63  ;;  %v3382_v58 = vld [vmem:[#allocation8 + $0x1ca8] sm:$0xff]  ;;  %v3381_v3 = vld [vmem:[#allocation8 + $0x1ca0] sm:$0xff] }
 0x33a   :  { %4064 = vmatprep.subr.mxu1 %v3394_v33  ;;  %3988 = vmatpush1.msra.mxu0 %v3265_v30  ;;  %v3250_v63 = vld [vmem:[#allocation8 + $0x1888] sm:$0xff]  ;;  %v3249_v30 = vld [vmem:[#allocation8 + $0x1880] sm:$0xff] }
 0x33b   :  { %4065 = vmatpush1.msra.mxu1 %v3393_v57  ;;  %3989 = vmatprep.subr.mxu0 %v3262_v17  ;;  %v3378_v33 = vld [vmem:[#allocation8 + $0x1c88] sm:$0xff]  ;;  %v3377_v57 = vld [vmem:[#allocation8 + $0x1c80] sm:$0xff] }
 0x33c   :  { %4066 = vmatprep.subr.mxu1 %v3390_v48  ;;  %3990 = vmatpush1.msra.mxu0 %v3261_v42  ;;  %v3246_v17 = vld [vmem:[#allocation8 + $0x1868] sm:$0xff]  ;;  %v3373_v42 = vld [vmem:[#allocation8 + $0x1c60] sm:$0xff] }
 0x33d   :  { %4067 = vmatpush1.msra.mxu1 %v3389_v44  ;;  %3991 = vmatprep.subr.mxu0 %v3258_v56  ;;  %v3374_v48 = vld [vmem:[#allocation8 + $0x1c68] sm:$0xff]  ;;  %v3245_v44 = vld [vmem:[#allocation8 + $0x1860] sm:$0xff] }
 0x33e   :  { %4068 = vmatprep.subr.mxu1 %v3386_v51  ;;  %3992 = vmatpush1.msra.mxu0 %v3257_v34  ;;  %v3242_v56 = vld [vmem:[#allocation8 + $0x1848] sm:$0xff]  ;;  %v3241_v34 = vld [vmem:[#allocation8 + $0x1840] sm:$0xff] }
 0x33f   :  { %4069 = vmatpush1.msra.mxu1 %v3385_v53  ;;  %3993 = vmatprep.subr.mxu0 %v3254_v39  ;;  %v3370_v51 = vld [vmem:[#allocation8 + $0x1c48] sm:$0xff]  ;;  %v3369_v53 = vld [vmem:[#allocation8 + $0x1c40] sm:$0xff] }
 0x340   :  { %4070 = vmatprep.subr.mxu1 %v3382_v58  ;;  %3994 = vmatpush1.msra.mxu0 %v3253_v35  ;;  %v3238_v39 = vld [vmem:[#allocation8 + $0x1828] sm:$0xff]  ;;  %v3237_v35 = vld [vmem:[#allocation8 + $0x1820] sm:$0xff] }
 0x341   :  { %4071 = vmatpush1.msra.mxu1 %v3381_v3  ;;  %3995 = vmatprep.subr.mxu0 %v3250_v63  ;;  %v3366_v58 = vld [vmem:[#allocation8 + $0x1c28] sm:$0xff]  ;;  %v3365_v3 = vld [vmem:[#allocation8 + $0x1c20] sm:$0xff] }
 0x342   :  { %4072 = vmatprep.subr.mxu1 %v3378_v33  ;;  %3996 = vmatpush1.msra.mxu0 %v3249_v30  ;;  %v3234_v63 = vld [vmem:[#allocation8 + $0x1808] sm:$0xff]  ;;  %v3233_v30 = vld [vmem:[#allocation8 + $0x1800] sm:$0xff] }
 0x343   :  { %4073 = vmatpush1.msra.mxu1 %v3377_v57  ;;  %3997 = vmatprep.subr.mxu0 %v3246_v17  ;;  %v3362_v33 = vld [vmem:[#allocation8 + $0x1c08] sm:$0xff]  ;;  %v3361_v57 = vld [vmem:[#allocation8 + $0x1c00] sm:$0xff] }
 0x344   :  { %4074 = vmatprep.subr.mxu1 %v3374_v48  ;;  %3998 = vmatpush1.msra.mxu0 %v3245_v44  ;;  %v3358_v17 = vld [vmem:[#allocation8 + $0x1be8] sm:$0xff]  ;;  %v3357_v44 = vld [vmem:[#allocation8 + $0x1be0] sm:$0xff] }
 0x345   :  { %4075 = vmatpush1.msra.mxu1 %v3373_v42  ;;  %3999 = vmatprep.subr.mxu0 %v3242_v56  ;;  %v3486_v48 = vld [vmem:[#allocation8 + $0x1fe8] sm:$0xff]  ;;  %v3485_v42 = vld [vmem:[#allocation8 + $0x1fe0] sm:$0xff] }
 0x346   :  { %4076 = vmatprep.subr.mxu1 %v3370_v51  ;;  %4000 = vmatpush1.msra.mxu0 %v3241_v34  ;;  %v3354_v56 = vld [vmem:[#allocation8 + $0x1bc8] sm:$0xff]  ;;  %v3353_v34 = vld [vmem:[#allocation8 + $0x1bc0] sm:$0xff] }
 0x347   :  { %4077 = vmatpush1.msra.mxu1 %v3369_v53  ;;  %4001 = vmatprep.subr.mxu0 %v3238_v39  ;;  %v3482_v51 = vld [vmem:[#allocation8 + $0x1fc8] sm:$0xff]  ;;  %v3481_v53 = vld [vmem:[#allocation8 + $0x1fc0] sm:$0xff] }
 0x348   :  { %4078 = vmatprep.subr.mxu1 %v3366_v58  ;;  %4002 = vmatpush1.msra.mxu0 %v3237_v35  ;;  %v3350_v39 = vld [vmem:[#allocation8 + $0x1ba8] sm:$0xff]  ;;  %v3349_v35 = vld [vmem:[#allocation8 + $0x1ba0] sm:$0xff] }
 0x349   :  { %4079 = vmatpush1.msra.mxu1 %v3365_v3  ;;  %4003 = vmatprep.subr.mxu0 %v3234_v63  ;;  %v3478_v58 = vld [vmem:[#allocation8 + $0x1fa8] sm:$0xff]  ;;  %v3477_v3 = vld [vmem:[#allocation8 + $0x1fa0] sm:$0xff] }
 0x34a   :  { %4080 = vmatprep.subr.mxu1 %v3362_v33  ;;  %4004 = vmatpush1.msra.mxu0 %v3233_v30  ;;  %v3346_v63 = vld [vmem:[#allocation8 + $0x1b88] sm:$0xff]  ;;  %v3345_v30 = vld [vmem:[#allocation8 + $0x1b80] sm:$0xff] }
 0x34b   :  { %4081 = vmatpush1.msra.mxu1 %v3361_v57  ;;  %4005 = vmatprep.subr.mxu0 %v3358_v17  ;;  %v3474_v33 = vld [vmem:[#allocation8 + $0x1f88] sm:$0xff]  ;;  %v3473_v57 = vld [vmem:[#allocation8 + $0x1f80] sm:$0xff] }
 0x34c   :  { %4082 = vmatprep.subr.mxu1 %v3486_v48  ;;  %4006 = vmatpush2.msra.mxu0 %v3357_v44  ;;  %v3342_v17 = vld [vmem:[#allocation8 + $0x1b68] sm:$0xff]  ;;  %v3341_v44 = vld [vmem:[#allocation8 + $0x1b60] sm:$0xff] }
 0x34d   :  { %4083 = vmatpush2.msra.mxu1 %v3485_v42  ;;  %4007 = vmatprep.subr.mxu0 %v3354_v56  ;;  %v3470_v48 = vld [vmem:[#allocation8 + $0x1f68] sm:$0xff]  ;;  %v3469_v42 = vld [vmem:[#allocation8 + $0x1f60] sm:$0xff] }
 0x34e   :  { %4084 = vmatprep.subr.mxu1 %v3482_v51  ;;  %4008 = vmatpush2.msra.mxu0 %v3353_v34  ;;  %v3338_v56 = vld [vmem:[#allocation8 + $0x1b48] sm:$0xff]  ;;  %v3337_v34 = vld [vmem:[#allocation8 + $0x1b40] sm:$0xff] }
 0x34f   :  { %4085 = vmatpush2.msra.mxu1 %v3481_v53  ;;  %4009 = vmatprep.subr.mxu0 %v3350_v39  ;;  %v3466_v51 = vld [vmem:[#allocation8 + $0x1f48] sm:$0xff]  ;;  %v3465_v53 = vld [vmem:[#allocation8 + $0x1f40] sm:$0xff] }
 0x350   :  { %4086 = vmatprep.subr.mxu1 %v3478_v58  ;;  %4010 = vmatpush2.msra.mxu0 %v3349_v35  ;;  %v3334_v39 = vld [vmem:[#allocation8 + $0x1b28] sm:$0xff]  ;;  %v3333_v35 = vld [vmem:[#allocation8 + $0x1b20] sm:$0xff] }
 0x351   :  { %4087 = vmatpush2.msra.mxu1 %v3477_v3  ;;  %4011 = vmatprep.subr.mxu0 %v3346_v63  ;;  %v3462_v58 = vld [vmem:[#allocation8 + $0x1f28] sm:$0xff]  ;;  %v3461_v3 = vld [vmem:[#allocation8 + $0x1f20] sm:$0xff] }
 0x352   :  { %4088 = vmatprep.subr.mxu1 %v3474_v33  ;;  %4012 = vmatpush2.msra.mxu0 %v3345_v30  ;;  %v3330_v63 = vld [vmem:[#allocation8 + $0x1b08] sm:$0xff]  ;;  %v3329_v30 = vld [vmem:[#allocation8 + $0x1b00] sm:$0xff] }
 0x353   :  { %4089 = vmatpush2.msra.mxu1 %v3473_v57  ;;  %4013 = vmatprep.subr.mxu0 %v3342_v17  ;;  %v3458_v33 = vld [vmem:[#allocation8 + $0x1f08] sm:$0xff]  ;;  %v3457_v57 = vld [vmem:[#allocation8 + $0x1f00] sm:$0xff] }
 0x354   :  { %4090 = vmatprep.subr.mxu1 %v3470_v48  ;;  %4014 = vmatpush2.msra.mxu0 %v3341_v44  ;;  %v3326_v17 = vld [vmem:[#allocation8 + $0x1ae8] sm:$0xff]  ;;  %v3325_v44 = vld [vmem:[#allocation8 + $0x1ae0] sm:$0xff] }
 0x355   :  { %4091 = vmatpush2.msra.mxu1 %v3469_v42  ;;  %4015 = vmatprep.subr.mxu0 %v3338_v56  ;;  %v3454_v48 = vld [vmem:[#allocation8 + $0x1ee8] sm:$0xff]  ;;  %v3453_v42 = vld [vmem:[#allocation8 + $0x1ee0] sm:$0xff] }
 0x356   :  { %4092 = vmatprep.subr.mxu1 %v3466_v51  ;;  %4016 = vmatpush2.msra.mxu0 %v3337_v34  ;;  %v3322_v56 = vld [vmem:[#allocation8 + $0x1ac8] sm:$0xff]  ;;  %v3321_v34 = vld [vmem:[#allocation8 + $0x1ac0] sm:$0xff] }
 0x357   :  { %4093 = vmatpush2.msra.mxu1 %v3465_v53  ;;  %4017 = vmatprep.subr.mxu0 %v3334_v39  ;;  %v3450_v51 = vld [vmem:[#allocation8 + $0x1ec8] sm:$0xff]  ;;  %v3449_v53 = vld [vmem:[#allocation8 + $0x1ec0] sm:$0xff] }
 0x358   :  { %4094 = vmatprep.subr.mxu1 %v3462_v58  ;;  %4018 = vmatpush2.msra.mxu0 %v3333_v35  ;;  %v3318_v39 = vld [vmem:[#allocation8 + $0x1aa8] sm:$0xff]  ;;  %v2351_v35 = vpop.f32.mrf.mxu0 }
 0x359   :  { %4095 = vmatpush2.msra.mxu1 %v3461_v3  ;;  %4019 = vmatprep.subr.mxu0 %v3330_v63  ;;  %v3446_v58 = vld [vmem:[#allocation8 + $0x1ea8] sm:$0xff]  ;;  %v4808_v3 = vld [vmem:[#allocation7 + $0x8] sm:$0xff] }
 0x35a   :  { %4096 = vmatprep.subr.mxu1 %v3458_v33  ;;  %4020 = vmatpush2.msra.mxu0 %v3329_v30  ;;  %v1180_v63 = vrot.slane %v4808_v3, %v1147_v24  ;;  %v3317_v33 = vld [vmem:[#allocation8 + $0x1aa0] sm:$0xff]  ;;  %v2353_v36 = vpop.f32.mrf.mxu0 }
 0x35b   :  { %4097 = vmatpush2.msra.mxu1 %v3457_v57  ;;  %4021 = vmatprep.subr.mxu0 %v3326_v17  ;;  %v3445_v30 = vld [vmem:[#allocation8 + $0x1ea0] sm:$0xff]  ;;  %v3314_v57 = vld [vmem:[#allocation8 + $0x1a88] sm:$0xff]  ;;  %v2354_v3 = vadd.f32 %v2353_v36, %v5419_v31 }
 0x35c   :  { %4098 = vmatprep.subr.mxu1 %v3454_v48  ;;  %4022 = vmatpush2.msra.mxu0 %v3325_v44  ;;  %v3442_v17 = vld [vmem:[#allocation8 + $0x1e88] sm:$0xff]  ;;  %v3313_v48 = vld [vmem:[#allocation8 + $0x1a80] sm:$0xff]  ;;  %v2346_v55 = vadd.f32 %v5410_v16, %v1180_v63 }
 0x35d   :  { %4099 = vmatpush2.msra.mxu1 %v3453_v42  ;;  %4023 = vmatprep.subr.mxu0 %v3322_v56  ;;  %v3441_v44 = vld [vmem:[#allocation8 + $0x1e80] sm:$0xff]  ;;  %v3310_v42 = vld [vmem:[#allocation8 + $0x1a68] sm:$0xff] }
 0x35e   :  { %4100 = vmatprep.subr.mxu1 %v3450_v51  ;;  %4024 = vmatpush2.msra.mxu0 %v3321_v34  ;;  %v3309_v24 = vld [vmem:[#allocation8 + $0x1a60] sm:$0xff]  ;;  %v3306_v51 = vld [vmem:[#allocation8 + $0x1a48] sm:$0xff] }
 0x35f   :  { %4101 = vmatpush2.msra.mxu1 %v3449_v53  ;;  %4025 = vmatprep.subr.mxu0 %v3318_v39  ;;  %v3437_v56 = vld [vmem:[#allocation8 + $0x1e60] sm:$0xff]  ;;  %v3434_v34 = vld [vmem:[#allocation8 + $0x1e48] sm:$0xff]  ;;  %v2200_v53 = vadd.f32 %v5396_v2, %v5406_v6 }
 0x360   :  { %4102 = vmatprep.subr.mxu1 %v3446_v58  ;;  %4026 = vmatpush2.msra.mxu0 %v3317_v33  ;;  %v3305_v39 = vld [vmem:[#allocation8 + $0x1a40] sm:$0xff]  ;;  %v3302_v16 = vld [vmem:[#allocation8 + $0x1a28] sm:$0xff] }
 0x361   :  { %4103 = vmatpush2.msra.mxu1 %v3445_v30  ;;  %4027 = vmatprep.subr.mxu0 %v3314_v57  ;;  %v3433_v58 = vld [vmem:[#allocation8 + $0x1e40] sm:$0xff]  ;;  %v3430_v33 = vld [vmem:[#allocation8 + $0x1e28] sm:$0xff]  ;;  %v2430_v30 = vpop.f32.mrf.mxu1  ;;  %v5465_v57 = vadd.f32 %v5425_v21, %v2346_v55  ;;  %v2445_v21 = vmax.f32 %v5334_v62, 0.0  ;;  %v2528_v55 = vld [vmem:[#allocation8 + $0x1f8] sm:$0xff] }
 0x362   :  { %4104 = vmatprep.subr.mxu1 %v3442_v17  ;;  %4028 = vmatpush2.msra.mxu0 %v3313_v48  ;;  %v2352_v17 = vadd.f32 %v2351_v35, %v1180_v63  ;;  %v3301_v48 = vld [vmem:[#allocation8 + $0x1a20] sm:$0xff]  ;;  %v3298_v2 = vld [vmem:[#allocation8 + $0x1a08] sm:$0xff]  ;;  %v5470_v31 = vadd.f32 %v2430_v30, %v2354_v3  ;;  %v2651_v3 = vld [vmem:[#allocation8 + $0x5d0] sm:$0xff] }
 0x363   :  { %4105 = vmatpush2.msra.mxu1 %v3441_v44  ;;  %4029 = vmatprep.subr.mxu0 %v3310_v42  ;;  %v3429_v44 = vld [vmem:[#allocation8 + $0x1e20] sm:$0xff]  ;;  %v3426_v6 = vld [vmem:[#allocation8 + $0x1e08] sm:$0xff]  ;;  %v2447_v35 = vmax.f32 %v5465_v57, 0.0  ;;  %v2648_v30 = vld [vmem:[#allocation8 + $0x5b8] sm:$0xff] }
 0x364   :  { %4106 = vmatprep.subr.mxu1 %v3438_v38  ;;  %4030 = vmatpush2.msra.mxu0 %v3309_v24  ;;  %v5468_v38 = vadd.f32 %v5408_v1, %v2200_v53  ;;  %v3297_v36 = vld [vmem:[#allocation8 + $0x1a00] sm:$0xff]  ;;  %v5474_v63 = vadd.f32 %v2428_v4, %v2352_v17  ;;  %v2656_v24 = vld [vmem:[#allocation8 + $0x5f8] sm:$0xff]  ;;  %v2527_v1 = vld [vmem:[#allocation8 + $0x1f0] sm:$0xff] }
 0x365   :  { %4107 = vmatpush2.msra.mxu1 %v3437_v56  ;;  %4031 = vmatprep.subr.mxu0 %v3306_v51  ;;  %v3425_v42 = vld [vmem:[#allocation8 + $0x1e00] sm:$0xff]  ;;  %v2464_v51 = vmax.f32 %v5470_v31, 0.0  ;;  %v2524_v4 = vld [vmem:[#allocation8 + $0x1d8] sm:$0xff]  ;;  %v2519_v17 = vld [vmem:[#allocation8 + $0x1b0] sm:$0xff] }
 0x366   :  { %4108 = vmatprep.subr.mxu1 %v3434_v34  ;;  %4032 = vmatpush2.msra.mxu0 %v3305_v39  ;;  %v2462_v56 = vmax.f32 %v5468_v38, 0.0  ;;  %v2655_v34 = vld [vmem:[#allocation8 + $0x5f0] sm:$0xff]  ;;  %v2652_v53 = vld [vmem:[#allocation8 + $0x5d8] sm:$0xff]  ;;  %v2463_v39 = vmax.f32 %v5474_v63, 0.0 }
 0x367   :  { %4109 = vmatpush2.msra.mxu1 %v3433_v58  ;;  %4033 = vmatprep.subr.mxu0 %v3302_v16  ;;  %v2523_v58 = vld [vmem:[#allocation8 + $0x1d0] sm:$0xff]  ;;  %v2461_v16 = vmax.f32 %v5391_v15, 0.0 }
 0x368   :  { %4110 = vmatprep.subr.mxu1 %v3430_v33  ;;  %4034 = vmatpush2.msra.mxu0 %v3301_v48  ;;  %v2520_v33 = vld [vmem:[#allocation8 + $0x1b8] sm:$0xff]  ;;  %v2647_v48 = vld [vmem:[#allocation8 + $0x5b0] sm:$0xff] }
 0x369   :  { %4111 = vmatpush2.msra.mxu1 %v3429_v44  ;;  %4035 = vmatprep.subr.mxu0 %v3298_v2  ;;  %v2516_v44 = vld [vmem:[#allocation8 + $0x198] sm:$0xff] }
 0x36a   :  { %4112 = vmatprep.subr.mxu1 %v3426_v6  ;;  %4036 = vmatpush2.msra.mxu0 %v3297_v36  ;;  %v2644_v2 = vld [vmem:[#allocation8 + $0x598] sm:$0xff]  ;;  %v2515_v6 = vld [vmem:[#allocation8 + $0x190] sm:$0xff] }
 0x36b   :  { %4113 = vmatpush2.msra.mxu1 %v3425_v42  ;;  %4038 = vmatmul.mubr.f32.vlgmr.msra.gmra.mxu0 %v2445_v21  ;;  %v2643_v36 = vld [vmem:[#allocation8 + $0x590] sm:$0xff]  ;;  %v2512_v42 = vld [vmem:[#allocation8 + $0x178] sm:$0xff] }
 0x36c   :  { %4115 = vmatmul.mubr.f32.vlgmr.msra.gmra.mxu1 %v2447_v35  ;;  %4127 = vmatprep.subr.mxu0 %v2528_v55  ;;  %v2640_v55 = vld [vmem:[#allocation8 + $0x578] sm:$0xff] }
 0x36d   :  { %4204 = vmatprep.subr.mxu1 %v2656_v24  ;;  %4043 = vmatprep.mubr.f32.mxu0 %v2462_v56  ;;  %v2511_v24 = vld [vmem:[#allocation8 + $0x170] sm:$0xff] }
 0x36e   :  { %4128 = vmatpush1.msra.mxu0 %v2527_v1  ;;  %4205 = vmatpush1.msra.mxu1 %v2655_v34  ;;  %v2639_v1 = vld [vmem:[#allocation8 + $0x570] sm:$0xff]  ;;  %v2508_v34 = vld [vmem:[#allocation8 + $0x158] sm:$0xff] }
 0x36f   :  { %4129 = vmatprep.subr.mxu0 %v2524_v4  ;;  %4206 = vmatprep.subr.mxu1 %v2652_v53  ;;  %v2636_v4 = vld [vmem:[#allocation8 + $0x558] sm:$0xff] }
 0x370   :  { %4120 = vmatprep.mubr.f32.mxu1 %v2464_v51  ;;  %4130 = vmatpush1.msra.mxu0 %v2523_v58  ;;  %v2504_v53 = vld [vmem:[#allocation8 + $0x138] sm:$0xff] }
 0x371   :  { %4207 = vmatpush1.msra.mxu1 %v2651_v3  ;;  %4044 = vmatmul.mubr.f32.gmra.mxu0 %v2461_v16  ;;  %v2632_v58 = vld [vmem:[#allocation8 + $0x538] sm:$0xff] }
 0x372   :  { %4121 = vmatmul.mubr.f32.gmra.mxu1 %v2463_v39  ;;  %4131 = vmatprep.subr.mxu0 %v2520_v33  ;;  %v2500_v3 = vld [vmem:[#allocation8 + $0x118] sm:$0xff] }
 0x373   :  { %4208 = vmatprep.subr.mxu1 %v2648_v30  ;;  %4132 = vmatpush1.msra.mxu0 %v2519_v17  ;;  %v2628_v33 = vld [vmem:[#allocation8 + $0x518] sm:$0xff]  ;;  %v2499_v30 = vld [vmem:[#allocation8 + $0x110] sm:$0xff] }
 0x374   :  { %4191 = vmatprep.mubr.f32.mxu0 %v2434_v40  ;;  %4209 = vmatpush1.msra.mxu1 %v2647_v48  ;;  %v2635_v40 = vld [vmem:[#allocation8 + $0x550] sm:$0xff]  ;;  %v2496_v48 = vld [vmem:[#allocation8 + $0xf8] sm:$0xff] }
 0x375   :  { %4268 = vmatprep.mubr.f32.mxu1 %v2436_v23  ;;  %4133 = vmatprep.subr.mxu0 %v2516_v44  ;;  %v2631_v23 = vld [vmem:[#allocation8 + $0x530] sm:$0xff]  ;;  %v2624_v44 = vld [vmem:[#allocation8 + $0x4f8] sm:$0xff] }
 0x376   :  { %4210 = vmatprep.subr.mxu1 %v2644_v2  ;;  %4134 = vmatpush1.msra.mxu0 %v2515_v6  ;;  %v2627_v17 = vld [vmem:[#allocation8 + $0x510] sm:$0xff] }
 0x377   :  { %4211 = vmatpush1.msra.mxu1 %v2643_v36  ;;  %4135 = vmatprep.subr.mxu0 %v2512_v42  ;;  %v2495_v2 = vld [vmem:[#allocation8 + $0xf0] sm:$0xff]  ;;  %v2492_v36 = vld [vmem:[#allocation8 + $0xd8] sm:$0xff] }
 0x378   :  { %4212 = vmatprep.subr.mxu1 %v2640_v55  ;;  %4136 = vmatpush1.msra.mxu0 %v2511_v24  ;;  %v2623_v6 = vld [vmem:[#allocation8 + $0x4f0] sm:$0xff]  ;;  %v2620_v42 = vld [vmem:[#allocation8 + $0x4d8] sm:$0xff] }
 0x379   :  { %4213 = vmatpush1.msra.mxu1 %v2639_v1  ;;  %4137 = vmatprep.subr.mxu0 %v2508_v34  ;;  %v2491_v55 = vld [vmem:[#allocation8 + $0xd0] sm:$0xff]  ;;  %v2488_v1 = vld [vmem:[#allocation8 + $0xb8] sm:$0xff] }
 0x37a   :  { %4214 = vmatprep.subr.mxu1 %v2636_v4  ;;  %4138 = vmatpush1.msra.mxu0 %v2507_v9  ;;  %v2619_v24 = vld [vmem:[#allocation8 + $0x4d0] sm:$0xff]  ;;  %v2616_v34 = vld [vmem:[#allocation8 + $0x4b8] sm:$0xff] }
 0x37b   :  { %4215 = vmatpush1.msra.mxu1 %v2635_v40  ;;  %4139 = vmatprep.subr.mxu0 %v2504_v53  ;;  %v2487_v4 = vld [vmem:[#allocation8 + $0xb0] sm:$0xff]  ;;  %v2484_v40 = vld [vmem:[#allocation8 + $0x98] sm:$0xff] }
 0x37c   :  { %4216 = vmatprep.subr.mxu1 %v2632_v58  ;;  %4140 = vmatpush1.msra.mxu0 %v2503_v41  ;;  %v2615_v9 = vld [vmem:[#allocation8 + $0x4b0] sm:$0xff]  ;;  %v2612_v53 = vld [vmem:[#allocation8 + $0x498] sm:$0xff] }
 0x37d   :  { %4217 = vmatpush1.msra.mxu1 %v2631_v23  ;;  %4141 = vmatprep.subr.mxu0 %v2500_v3  ;;  %v2483_v58 = vld [vmem:[#allocation8 + $0x90] sm:$0xff]  ;;  %v2480_v23 = vld [vmem:[#allocation8 + $0x78] sm:$0xff] }
 0x37e   :  { %4218 = vmatprep.subr.mxu1 %v2628_v33  ;;  %4142 = vmatpush1.msra.mxu0 %v2499_v30  ;;  %v2611_v41 = vld [vmem:[#allocation8 + $0x490] sm:$0xff]  ;;  %v2608_v3 = vld [vmem:[#allocation8 + $0x478] sm:$0xff] }
 0x37f   :  { %4219 = vmatpush1.msra.mxu1 %v2627_v17  ;;  %4143 = vmatprep.subr.mxu0 %v2496_v48  ;;  %v2479_v33 = vld [vmem:[#allocation8 + $0x70] sm:$0xff]  ;;  %v2476_v17 = vld [vmem:[#allocation8 + $0x58] sm:$0xff] }
 0x380   :  { %4220 = vmatprep.subr.mxu1 %v2624_v44  ;;  %4144 = vmatpush1.msra.mxu0 %v2495_v2  ;;  %v2607_v30 = vld [vmem:[#allocation8 + $0x470] sm:$0xff]  ;;  %v2604_v48 = vld [vmem:[#allocation8 + $0x458] sm:$0xff] }
 0x381   :  { %4221 = vmatpush1.msra.mxu1 %v2623_v6  ;;  %4145 = vmatprep.subr.mxu0 %v2492_v36  ;;  %v2475_v44 = vld [vmem:[#allocation8 + $0x50] sm:$0xff]  ;;  %v2472_v6 = vld [vmem:[#allocation8 + $0x38] sm:$0xff] }
 0x382   :  { %4222 = vmatprep.subr.mxu1 %v2620_v42  ;;  %4146 = vmatpush1.msra.mxu0 %v2491_v55  ;;  %v2603_v2 = vld [vmem:[#allocation8 + $0x450] sm:$0xff]  ;;  %v2600_v36 = vld [vmem:[#allocation8 + $0x438] sm:$0xff] }
 0x383   :  { %4223 = vmatpush1.msra.mxu1 %v2619_v24  ;;  %4147 = vmatprep.subr.mxu0 %v2488_v1  ;;  %v2471_v42 = vld [vmem:[#allocation8 + $0x30] sm:$0xff]  ;;  %v2468_v24 = vld [vmem:[#allocation8 + $0x18] sm:$0xff] }
 0x384   :  { %4224 = vmatprep.subr.mxu1 %v2616_v34  ;;  %4148 = vmatpush1.msra.mxu0 %v2487_v4  ;;  %v2599_v55 = vld [vmem:[#allocation8 + $0x430] sm:$0xff]  ;;  %v2596_v1 = vld [vmem:[#allocation8 + $0x418] sm:$0xff] }
 0x385   :  { %4225 = vmatpush1.msra.mxu1 %v2615_v9  ;;  %4149 = vmatprep.subr.mxu0 %v2484_v40  ;;  %v2467_v34 = vld [vmem:[#allocation8 + $0x10] sm:$0xff]  ;;  %v2592_v9 = vld [vmem:[#allocation8 + $0x3f8] sm:$0xff] }
 0x386   :  { %4226 = vmatprep.subr.mxu1 %v2612_v53  ;;  %4150 = vmatpush1.msra.mxu0 %v2483_v58  ;;  %v2595_v4 = vld [vmem:[#allocation8 + $0x410] sm:$0xff]  ;;  %v2720_v40 = vld [vmem:[#allocation8 + $0x7f8] sm:$0xff] }
 0x387   :  { %4227 = vmatpush1.msra.mxu1 %v2611_v41  ;;  %4151 = vmatprep.subr.mxu0 %v2480_v23  ;;  %v2591_v53 = vld [vmem:[#allocation8 + $0x3f0] sm:$0xff]  ;;  %v2588_v41 = vld [vmem:[#allocation8 + $0x3d8] sm:$0xff] }
 0x388   :  { %4228 = vmatprep.subr.mxu1 %v2608_v3  ;;  %4152 = vmatpush1.msra.mxu0 %v2479_v33  ;;  %v2719_v58 = vld [vmem:[#allocation8 + $0x7f0] sm:$0xff]  ;;  %v2716_v23 = vld [vmem:[#allocation8 + $0x7d8] sm:$0xff] }
 0x389   :  { %4229 = vmatpush1.msra.mxu1 %v2607_v30  ;;  %4153 = vmatprep.subr.mxu0 %v2476_v17  ;;  %v2587_v3 = vld [vmem:[#allocation8 + $0x3d0] sm:$0xff]  ;;  %v2584_v30 = vld [vmem:[#allocation8 + $0x3b8] sm:$0xff] }
 0x38a   :  { %4230 = vmatprep.subr.mxu1 %v2604_v48  ;;  %4154 = vmatpush1.msra.mxu0 %v2475_v44  ;;  %v2715_v33 = vld [vmem:[#allocation8 + $0x7d0] sm:$0xff]  ;;  %v2712_v17 = vld [vmem:[#allocation8 + $0x7b8] sm:$0xff] }
 0x38b   :  { %4231 = vmatpush1.msra.mxu1 %v2603_v2  ;;  %4155 = vmatprep.subr.mxu0 %v2472_v6  ;;  %v2583_v48 = vld [vmem:[#allocation8 + $0x3b0] sm:$0xff]  ;;  %v2580_v2 = vld [vmem:[#allocation8 + $0x398] sm:$0xff] }
 0x38c   :  { %4232 = vmatprep.subr.mxu1 %v2600_v36  ;;  %4156 = vmatpush1.msra.mxu0 %v2471_v42  ;;  %v2711_v44 = vld [vmem:[#allocation8 + $0x7b0] sm:$0xff]  ;;  %v2708_v6 = vld [vmem:[#allocation8 + $0x798] sm:$0xff] }
 0x38d   :  { %4233 = vmatpush1.msra.mxu1 %v2599_v55  ;;  %4157 = vmatprep.subr.mxu0 %v2468_v24  ;;  %v2579_v36 = vld [vmem:[#allocation8 + $0x390] sm:$0xff]  ;;  %v2576_v55 = vld [vmem:[#allocation8 + $0x378] sm:$0xff] }
 0x38e   :  { %4234 = vmatprep.subr.mxu1 %v2596_v1  ;;  %4158 = vmatpush1.msra.mxu0 %v2467_v34  ;;  %v2707_v42 = vld [vmem:[#allocation8 + $0x790] sm:$0xff]  ;;  %v2704_v24 = vld [vmem:[#allocation8 + $0x778] sm:$0xff] }
 0x38f   :  { %4235 = vmatpush1.msra.mxu1 %v2595_v4  ;;  %4159 = vmatprep.subr.mxu0 %v2592_v9  ;;  %v2575_v1 = vld [vmem:[#allocation8 + $0x370] sm:$0xff]  ;;  %v2572_v4 = vld [vmem:[#allocation8 + $0x358] sm:$0xff] }
 0x390   :  { %4236 = vmatprep.subr.mxu1 %v2720_v40  ;;  %4160 = vmatpush2.msra.mxu0 %v2591_v53  ;;  %v2703_v34 = vld [vmem:[#allocation8 + $0x770] sm:$0xff]  ;;  %v2700_v9 = vld [vmem:[#allocation8 + $0x758] sm:$0xff] }
 0x391   :  { %4237 = vmatpush2.msra.mxu1 %v2719_v58  ;;  %4161 = vmatprep.subr.mxu0 %v2588_v41  ;;  %v2571_v40 = vld [vmem:[#allocation8 + $0x350] sm:$0xff]  ;;  %v2568_v58 = vld [vmem:[#allocation8 + $0x338] sm:$0xff] }
 0x392   :  { %4238 = vmatprep.subr.mxu1 %v2716_v23  ;;  %4162 = vmatpush2.msra.mxu0 %v2587_v3  ;;  %v2699_v53 = vld [vmem:[#allocation8 + $0x750] sm:$0xff]  ;;  %v2696_v41 = vld [vmem:[#allocation8 + $0x738] sm:$0xff] }
 0x393   :  { %4239 = vmatpush2.msra.mxu1 %v2715_v33  ;;  %4163 = vmatprep.subr.mxu0 %v2584_v30  ;;  %v2567_v23 = vld [vmem:[#allocation8 + $0x330] sm:$0xff]  ;;  %v2564_v33 = vld [vmem:[#allocation8 + $0x318] sm:$0xff] }
 0x394   :  { %4240 = vmatprep.subr.mxu1 %v2712_v17  ;;  %4164 = vmatpush2.msra.mxu0 %v2583_v48  ;;  %v2695_v3 = vld [vmem:[#allocation8 + $0x730] sm:$0xff]  ;;  %v2692_v30 = vld [vmem:[#allocation8 + $0x718] sm:$0xff] }
 0x395   :  { %4241 = vmatpush2.msra.mxu1 %v2711_v44  ;;  %4165 = vmatprep.subr.mxu0 %v2580_v2  ;;  %v2563_v17 = vld [vmem:[#allocation8 + $0x310] sm:$0xff]  ;;  %v2560_v44 = vld [vmem:[#allocation8 + $0x2f8] sm:$0xff] }
 0x396   :  { %4242 = vmatprep.subr.mxu1 %v2708_v6  ;;  %4166 = vmatpush2.msra.mxu0 %v2579_v36  ;;  %v2691_v48 = vld [vmem:[#allocation8 + $0x710] sm:$0xff]  ;;  %v2688_v2 = vld [vmem:[#allocation8 + $0x6f8] sm:$0xff] }
 0x397   :  { %4243 = vmatpush2.msra.mxu1 %v2707_v42  ;;  %4167 = vmatprep.subr.mxu0 %v2576_v55  ;;  %v2559_v6 = vld [vmem:[#allocation8 + $0x2f0] sm:$0xff]  ;;  %v2556_v42 = vld [vmem:[#allocation8 + $0x2d8] sm:$0xff] }
 0x398   :  { %4244 = vmatprep.subr.mxu1 %v2704_v24  ;;  %4168 = vmatpush2.msra.mxu0 %v2575_v1  ;;  %v2687_v36 = vld [vmem:[#allocation8 + $0x6f0] sm:$0xff]  ;;  %v2684_v55 = vld [vmem:[#allocation8 + $0x6d8] sm:$0xff] }
 0x399   :  { %4245 = vmatpush2.msra.mxu1 %v2703_v34  ;;  %4169 = vmatprep.subr.mxu0 %v2572_v4  ;;  %v2555_v24 = vld [vmem:[#allocation8 + $0x2d0] sm:$0xff]  ;;  %v2552_v34 = vld [vmem:[#allocation8 + $0x2b8] sm:$0xff] }
 0x39a   :  { %4246 = vmatprep.subr.mxu1 %v2700_v9  ;;  %4170 = vmatpush2.msra.mxu0 %v2571_v40  ;;  %v2683_v1 = vld [vmem:[#allocation8 + $0x6d0] sm:$0xff]  ;;  %v2680_v4 = vld [vmem:[#allocation8 + $0x6b8] sm:$0xff] }
 0x39b   :  { %4247 = vmatpush2.msra.mxu1 %v2699_v53  ;;  %4171 = vmatprep.subr.mxu0 %v2568_v58  ;;  %v2551_v9 = vld [vmem:[#allocation8 + $0x2b0] sm:$0xff]  ;;  %v2548_v53 = vld [vmem:[#allocation8 + $0x298] sm:$0xff] }
 0x39c   :  { %4248 = vmatprep.subr.mxu1 %v2696_v41  ;;  %4172 = vmatpush2.msra.mxu0 %v2567_v23  ;;  %v2679_v40 = vld [vmem:[#allocation8 + $0x6b0] sm:$0xff]  ;;  %v2676_v58 = vld [vmem:[#allocation8 + $0x698] sm:$0xff] }
 0x39d   :  { %4249 = vmatpush2.msra.mxu1 %v2695_v3  ;;  %4173 = vmatprep.subr.mxu0 %v2564_v33  ;;  %v2547_v41 = vld [vmem:[#allocation8 + $0x290] sm:$0xff]  ;;  %v2544_v3 = vld [vmem:[#allocation8 + $0x278] sm:$0xff] }
 0x39e   :  { %4250 = vmatprep.subr.mxu1 %v2692_v30  ;;  %4174 = vmatpush2.msra.mxu0 %v2563_v17  ;;  %v2675_v23 = vld [vmem:[#allocation8 + $0x690] sm:$0xff]  ;;  %v2672_v33 = vld [vmem:[#allocation8 + $0x678] sm:$0xff] }
 0x39f   :  { %4251 = vmatpush2.msra.mxu1 %v2691_v48  ;;  %4175 = vmatprep.subr.mxu0 %v2560_v44  ;;  %v2543_v30 = vld [vmem:[#allocation8 + $0x270] sm:$0xff]  ;;  %v2540_v48 = vld [vmem:[#allocation8 + $0x258] sm:$0xff] }
 0x3a0   :  { %4252 = vmatprep.subr.mxu1 %v2688_v2  ;;  %4176 = vmatpush2.msra.mxu0 %v2559_v6  ;;  %v2671_v17 = vld [vmem:[#allocation8 + $0x670] sm:$0xff]  ;;  %v2668_v44 = vld [vmem:[#allocation8 + $0x658] sm:$0xff] }
 0x3a1   :  { %4253 = vmatpush2.msra.mxu1 %v2687_v36  ;;  %4177 = vmatprep.subr.mxu0 %v2556_v42  ;;  %v2539_v2 = vld [vmem:[#allocation8 + $0x250] sm:$0xff]  ;;  %v2536_v36 = vld [vmem:[#allocation8 + $0x238] sm:$0xff] }
 0x3a2   :  { %4254 = vmatprep.subr.mxu1 %v2684_v55  ;;  %4178 = vmatpush2.msra.mxu0 %v2555_v24  ;;  %v2667_v6 = vld [vmem:[#allocation8 + $0x650] sm:$0xff]  ;;  %v2664_v42 = vld [vmem:[#allocation8 + $0x638] sm:$0xff] }
 0x3a3   :  { %4255 = vmatpush2.msra.mxu1 %v2683_v1  ;;  %4179 = vmatprep.subr.mxu0 %v2552_v34  ;;  %v2535_v55 = vld [vmem:[#allocation8 + $0x230] sm:$0xff]  ;;  %v2532_v1 = vld [vmem:[#allocation8 + $0x218] sm:$0xff] }
 0x3a4   :  { %4256 = vmatprep.subr.mxu1 %v2680_v4  ;;  %4180 = vmatpush2.msra.mxu0 %v2551_v9  ;;  %v2663_v24 = vld [vmem:[#allocation8 + $0x630] sm:$0xff]  ;;  %v2660_v34 = vld [vmem:[#allocation8 + $0x618] sm:$0xff] }
 0x3a5   :  { %4257 = vmatpush2.msra.mxu1 %v2679_v40  ;;  %4181 = vmatprep.subr.mxu0 %v2548_v53  ;;  %v2531_v4 = vld [vmem:[#allocation8 + $0x210] sm:$0xff]  ;;  %v2784_v40 = vld [vmem:[#allocation8 + $0x9f8] sm:$0xff] }
 0x3a6   :  { %4258 = vmatprep.subr.mxu1 %v2676_v58  ;;  %4182 = vmatpush2.msra.mxu0 %v2547_v41  ;;  %v2659_v9 = vld [vmem:[#allocation8 + $0x610] sm:$0xff]  ;;  %v2912_v53 = vld [vmem:[#allocation8 + $0xdf8] sm:$0xff]  ;;  %v5656_v58 = vmax.f32 %v5054_v5, 0.0  ;;  %v5657_v41 = vmax.f32 %v5258_v54, 0.0 }
 0x3a7   :  { %4259 = vmatpush2.msra.mxu1 %v2675_v23  ;;  %4183 = vmatprep.subr.mxu0 %v2544_v3  ;;  %v2783_v23 = vld [vmem:[#allocation8 + $0x9f0] sm:$0xff]  ;;  %v2776_v5 = vld [vmem:[#allocation8 + $0x9b8] sm:$0xff] }
 0x3a8   :  { %4260 = vmatprep.subr.mxu1 %v2672_v33  ;;  %4184 = vmatpush2.msra.mxu0 %v2543_v30  ;;  %v2911_v3 = vld [vmem:[#allocation8 + $0xdf0] sm:$0xff]  ;;  %v2780_v33 = vld [vmem:[#allocation8 + $0x9d8] sm:$0xff] }
 0x3a9   :  { %4261 = vmatpush2.msra.mxu1 %v2671_v17  ;;  %4185 = vmatprep.subr.mxu0 %v2540_v48  ;;  %v2908_v30 = vld [vmem:[#allocation8 + $0xdd8] sm:$0xff]  ;;  %v5658_v17 = vmax.f32 %v5087_v25, 0.0  ;;  %v5659_v48 = vmax.f32 %v5267_v50, 0.0  ;;  %v5661_v25 = vmax.f32 %v5277_v12, 0.0  ;;  %v2767_v12 = vld [vmem:[#allocation8 + $0x970] sm:$0xff] }
 0x3aa   :  { %4262 = vmatprep.subr.mxu1 %v2668_v44  ;;  %4186 = vmatpush2.msra.mxu0 %v2539_v2  ;;  %v2779_v44 = vld [vmem:[#allocation8 + $0x9d0] sm:$0xff]  ;;  %v2904_v54 = vld [vmem:[#allocation8 + $0xdb8] sm:$0xff] }
 0x3ab   :  { %4263 = vmatpush2.msra.mxu1 %v2667_v6  ;;  %4187 = vmatprep.subr.mxu0 %v2536_v36  ;;  %v2907_v2 = vld [vmem:[#allocation8 + $0xdd0] sm:$0xff]  ;;  %v5660_v36 = vmax.f32 %v5085_v49, 0.0  ;;  %v2772_v50 = vld [vmem:[#allocation8 + $0x998] sm:$0xff] }
 0x3ac   :  { %4264 = vmatprep.subr.mxu1 %v2664_v42  ;;  %4188 = vmatpush2.msra.mxu0 %v2535_v55  ;;  %v2775_v6 = vld [vmem:[#allocation8 + $0x9b0] sm:$0xff]  ;;  %v2900_v55 = vld [vmem:[#allocation8 + $0xd98] sm:$0xff] }
 0x3ad   :  { %4265 = vmatpush2.msra.mxu1 %v2663_v24  ;;  %4189 = vmatprep.subr.mxu0 %v2532_v1  ;;  %v2903_v42 = vld [vmem:[#allocation8 + $0xdb0] sm:$0xff]  ;;  %v5662_v24 = vmax.f32 %v5285_v10, 0.0  ;;  %v2768_v49 = vld [vmem:[#allocation8 + $0x978] sm:$0xff] }
 0x3ae   :  { %4266 = vmatprep.subr.mxu1 %v2660_v34  ;;  %4190 = vmatpush2.msra.mxu0 %v2531_v4  ;;  %v2771_v1 = vld [vmem:[#allocation8 + $0x990] sm:$0xff]  ;;  %v5663_v4 = vmax.f32 %v5292_v60, 0.0 }
 0x3af   :  { %4267 = vmatpush2.msra.mxu1 %v2659_v9  ;;  %4192 = vmatmul.mubr.f32.vlgmr.msra.gmra.mxu0 %v5656_v58  ;;  %v2899_v34 = vld [vmem:[#allocation8 + $0xd90] sm:$0xff]  ;;  %v2896_v9 = vld [vmem:[#allocation8 + $0xd78] sm:$0xff] }
 0x3b0   :  { %4269 = vmatmul.mubr.f32.vlgmr.msra.gmra.mxu1 %v5657_v41  ;;  %4281 = vmatprep.subr.mxu0 %v2784_v40  ;;  %v2895_v40 = vld [vmem:[#allocation8 + $0xd70] sm:$0xff]  ;;  %v2892_v58 = vld [vmem:[#allocation8 + $0xd58] sm:$0xff] }
 0x3b1   :  { %4358 = vmatprep.subr.mxu1 %v2912_v53  ;;  %4197 = vmatprep.mubr.f32.mxu0 %v5658_v17  ;;  %v2764_v53 = vld [vmem:[#allocation8 + $0x958] sm:$0xff]  ;;  %v2763_v10 = vld [vmem:[#allocation8 + $0x950] sm:$0xff] }
 0x3b2   :  { %4274 = vmatprep.mubr.f32.mxu1 %v5659_v48  ;;  %4282 = vmatpush1.msra.mxu0 %v2783_v23  ;;  %v2891_v41 = vld [vmem:[#allocation8 + $0xd50] sm:$0xff]  ;;  %v2760_v23 = vld [vmem:[#allocation8 + $0x938] sm:$0xff] }
 0x3b3   :  { %4359 = vmatpush1.msra.mxu1 %v2911_v3  ;;  %4283 = vmatprep.subr.mxu0 %v2780_v33  ;;  %v2888_v3 = vld [vmem:[#allocation8 + $0xd38] sm:$0xff]  ;;  %v2759_v60 = vld [vmem:[#allocation8 + $0x930] sm:$0xff] }
 0x3b4   :  { %4360 = vmatprep.subr.mxu1 %v2908_v30  ;;  %4284 = vmatpush1.msra.mxu0 %v2779_v44  ;;  %v2887_v33 = vld [vmem:[#allocation8 + $0xd30] sm:$0xff]  ;;  %v2756_v30 = vld [vmem:[#allocation8 + $0x918] sm:$0xff] }
 0x3b5   :  { %4361 = vmatpush1.msra.mxu1 %v2907_v2  ;;  %4198 = vmatmul.mubr.f32.gmra.mxu0 %v5660_v36  ;;  %v2884_v17 = vld [vmem:[#allocation8 + $0xd18] sm:$0xff]  ;;  %v2755_v48 = vld [vmem:[#allocation8 + $0x910] sm:$0xff] }
 0x3b6   :  { %4275 = vmatmul.mubr.f32.gmra.mxu1 %v5661_v25  ;;  %4285 = vmatprep.subr.mxu0 %v2776_v5  ;;  %v2883_v44 = vld [vmem:[#allocation8 + $0xd10] sm:$0xff]  ;;  %v2752_v2 = vld [vmem:[#allocation8 + $0x8f8] sm:$0xff] }
 0x3b7   :  { %4362 = vmatprep.subr.mxu1 %v2904_v54  ;;  %4286 = vmatpush1.msra.mxu0 %v2775_v6  ;;  %v2880_v5 = vld [vmem:[#allocation8 + $0xcf8] sm:$0xff]  ;;  %v2751_v54 = vld [vmem:[#allocation8 + $0x8f0] sm:$0xff] }
 0x3b8   :  { %4345 = vmatprep.mubr.f32.mxu0 %v5662_v24  ;;  %4363 = vmatpush1.msra.mxu1 %v2903_v42  ;;  %v2879_v6 = vld [vmem:[#allocation8 + $0xcf0] sm:$0xff]  ;;  %v2748_v36 = vld [vmem:[#allocation8 + $0x8d8] sm:$0xff] }
 0x3b9   :  { %4422 = vmatprep.mubr.f32.mxu1 %v5663_v4  ;;  %4287 = vmatprep.subr.mxu0 %v2772_v50  ;;  %v2876_v25 = vld [vmem:[#allocation8 + $0xcd8] sm:$0xff]  ;;  %v2747_v42 = vld [vmem:[#allocation8 + $0x8d0] sm:$0xff] }
 0x3ba   :  { %4364 = vmatprep.subr.mxu1 %v2900_v55  ;;  %4288 = vmatpush1.msra.mxu0 %v2771_v1  ;;  %v2875_v50 = vld [vmem:[#allocation8 + $0xcd0] sm:$0xff]  ;;  %v2744_v55 = vld [vmem:[#allocation8 + $0x8b8] sm:$0xff] }
 0x3bb   :  { %4365 = vmatpush1.msra.mxu1 %v2899_v34  ;;  %4289 = vmatprep.subr.mxu0 %v2768_v49  ;;  %v2872_v24 = vld [vmem:[#allocation8 + $0xcb8] sm:$0xff]  ;;  %v2743_v1 = vld [vmem:[#allocation8 + $0x8b0] sm:$0xff] }
 0x3bc   :  { %4366 = vmatprep.subr.mxu1 %v2896_v9  ;;  %4290 = vmatpush1.msra.mxu0 %v2767_v12  ;;  %v2871_v34 = vld [vmem:[#allocation8 + $0xcb0] sm:$0xff]  ;;  %v2740_v4 = vld [vmem:[#allocation8 + $0x898] sm:$0xff] }
 0x3bd   :  { %4367 = vmatpush1.msra.mxu1 %v2895_v40  ;;  %4291 = vmatprep.subr.mxu0 %v2764_v53  ;;  %v2868_v49 = vld [vmem:[#allocation8 + $0xc98] sm:$0xff]  ;;  %v2739_v9 = vld [vmem:[#allocation8 + $0x890] sm:$0xff] }
 0x3be   :  { %4368 = vmatprep.subr.mxu1 %v2892_v58  ;;  %4292 = vmatpush1.msra.mxu0 %v2763_v10  ;;  %v2867_v12 = vld [vmem:[#allocation8 + $0xc90] sm:$0xff]  ;;  %v2736_v40 = vld [vmem:[#allocation8 + $0x878] sm:$0xff] }
 0x3bf   :  { %4369 = vmatpush1.msra.mxu1 %v2891_v41  ;;  %4293 = vmatprep.subr.mxu0 %v2760_v23  ;;  %v2864_v53 = vld [vmem:[#allocation8 + $0xc78] sm:$0xff]  ;;  %v2735_v58 = vld [vmem:[#allocation8 + $0x870] sm:$0xff] }
 0x3c0   :  { %4370 = vmatprep.subr.mxu1 %v2888_v3  ;;  %4294 = vmatpush1.msra.mxu0 %v2759_v60  ;;  %v2863_v10 = vld [vmem:[#allocation8 + $0xc70] sm:$0xff]  ;;  %v2732_v41 = vld [vmem:[#allocation8 + $0x858] sm:$0xff] }
 0x3c1   :  { %4371 = vmatpush1.msra.mxu1 %v2887_v33  ;;  %4295 = vmatprep.subr.mxu0 %v2756_v30  ;;  %v2860_v23 = vld [vmem:[#allocation8 + $0xc58] sm:$0xff]  ;;  %v2731_v3 = vld [vmem:[#allocation8 + $0x850] sm:$0xff] }
 0x3c2   :  { %4372 = vmatprep.subr.mxu1 %v2884_v17  ;;  %4296 = vmatpush1.msra.mxu0 %v2755_v48  ;;  %v2859_v60 = vld [vmem:[#allocation8 + $0xc50] sm:$0xff]  ;;  %v2728_v33 = vld [vmem:[#allocation8 + $0x838] sm:$0xff] }
 0x3c3   :  { %4373 = vmatpush1.msra.mxu1 %v2883_v44  ;;  %4297 = vmatprep.subr.mxu0 %v2752_v2  ;;  %v2856_v30 = vld [vmem:[#allocation8 + $0xc38] sm:$0xff]  ;;  %v2727_v17 = vld [vmem:[#allocation8 + $0x830] sm:$0xff] }
 0x3c4   :  { %4374 = vmatprep.subr.mxu1 %v2880_v5  ;;  %4298 = vmatpush1.msra.mxu0 %v2751_v54  ;;  %v2855_v48 = vld [vmem:[#allocation8 + $0xc30] sm:$0xff]  ;;  %v2724_v44 = vld [vmem:[#allocation8 + $0x818] sm:$0xff] }
 0x3c5   :  { %4375 = vmatpush1.msra.mxu1 %v2879_v6  ;;  %4299 = vmatprep.subr.mxu0 %v2748_v36  ;;  %v2852_v2 = vld [vmem:[#allocation8 + $0xc18] sm:$0xff]  ;;  %v2723_v5 = vld [vmem:[#allocation8 + $0x810] sm:$0xff] }
 0x3c6   :  { %4376 = vmatprep.subr.mxu1 %v2876_v25  ;;  %4300 = vmatpush1.msra.mxu0 %v2747_v42  ;;  %v2851_v54 = vld [vmem:[#allocation8 + $0xc10] sm:$0xff]  ;;  %v2848_v6 = vld [vmem:[#allocation8 + $0xbf8] sm:$0xff] }
 0x3c7   :  { %4377 = vmatpush1.msra.mxu1 %v2875_v50  ;;  %4301 = vmatprep.subr.mxu0 %v2744_v55  ;;  %v2976_v36 = vld [vmem:[#allocation8 + $0xff8] sm:$0xff]  ;;  %v2847_v25 = vld [vmem:[#allocation8 + $0xbf0] sm:$0xff] }
 0x3c8   :  { %4378 = vmatprep.subr.mxu1 %v2872_v24  ;;  %4302 = vmatpush1.msra.mxu0 %v2743_v1  ;;  %v2975_v42 = vld [vmem:[#allocation8 + $0xff0] sm:$0xff]  ;;  %v2844_v50 = vld [vmem:[#allocation8 + $0xbd8] sm:$0xff] }
 0x3c9   :  { %4379 = vmatpush1.msra.mxu1 %v2871_v34  ;;  %4303 = vmatprep.subr.mxu0 %v2740_v4  ;;  %v2972_v55 = vld [vmem:[#allocation8 + $0xfd8] sm:$0xff]  ;;  %v2843_v24 = vld [vmem:[#allocation8 + $0xbd0] sm:$0xff] }
 0x3ca   :  { %4380 = vmatprep.subr.mxu1 %v2868_v49  ;;  %4304 = vmatpush1.msra.mxu0 %v2739_v9  ;;  %v2971_v1 = vld [vmem:[#allocation8 + $0xfd0] sm:$0xff]  ;;  %v2840_v34 = vld [vmem:[#allocation8 + $0xbb8] sm:$0xff] }
 0x3cb   :  { %4381 = vmatpush1.msra.mxu1 %v2867_v12  ;;  %4305 = vmatprep.subr.mxu0 %v2736_v40  ;;  %v2968_v4 = vld [vmem:[#allocation8 + $0xfb8] sm:$0xff]  ;;  %v2839_v49 = vld [vmem:[#allocation8 + $0xbb0] sm:$0xff] }
 0x3cc   :  { %4382 = vmatprep.subr.mxu1 %v2864_v53  ;;  %4306 = vmatpush1.msra.mxu0 %v2735_v58  ;;  %v2967_v9 = vld [vmem:[#allocation8 + $0xfb0] sm:$0xff]  ;;  %v2836_v12 = vld [vmem:[#allocation8 + $0xb98] sm:$0xff] }
 0x3cd   :  { %4383 = vmatpush1.msra.mxu1 %v2863_v10  ;;  %4307 = vmatprep.subr.mxu0 %v2732_v41  ;;  %v2964_v40 = vld [vmem:[#allocation8 + $0xf98] sm:$0xff]  ;;  %v2835_v53 = vld [vmem:[#allocation8 + $0xb90] sm:$0xff] }
 0x3ce   :  { %4384 = vmatprep.subr.mxu1 %v2860_v23  ;;  %4308 = vmatpush1.msra.mxu0 %v2731_v3  ;;  %v2963_v58 = vld [vmem:[#allocation8 + $0xf90] sm:$0xff]  ;;  %v2832_v10 = vld [vmem:[#allocation8 + $0xb78] sm:$0xff] }
 0x3cf   :  { %4385 = vmatpush1.msra.mxu1 %v2859_v60  ;;  %4309 = vmatprep.subr.mxu0 %v2728_v33  ;;  %v2960_v41 = vld [vmem:[#allocation8 + $0xf78] sm:$0xff]  ;;  %v2831_v23 = vld [vmem:[#allocation8 + $0xb70] sm:$0xff] }
 0x3d0   :  { %4386 = vmatprep.subr.mxu1 %v2856_v30  ;;  %4310 = vmatpush1.msra.mxu0 %v2727_v17  ;;  %v2959_v3 = vld [vmem:[#allocation8 + $0xf70] sm:$0xff]  ;;  %v2828_v60 = vld [vmem:[#allocation8 + $0xb58] sm:$0xff] }
 0x3d1   :  { %4387 = vmatpush1.msra.mxu1 %v2855_v48  ;;  %4311 = vmatprep.subr.mxu0 %v2724_v44  ;;  %v2956_v33 = vld [vmem:[#allocation8 + $0xf58] sm:$0xff]  ;;  %v2827_v30 = vld [vmem:[#allocation8 + $0xb50] sm:$0xff] }
 0x3d2   :  { %4388 = vmatprep.subr.mxu1 %v2852_v2  ;;  %4312 = vmatpush1.msra.mxu0 %v2723_v5  ;;  %v2955_v17 = vld [vmem:[#allocation8 + $0xf50] sm:$0xff]  ;;  %v2824_v48 = vld [vmem:[#allocation8 + $0xb38] sm:$0xff] }
 0x3d3   :  { %4389 = vmatpush1.msra.mxu1 %v2851_v54  ;;  %4313 = vmatprep.subr.mxu0 %v2848_v6  ;;  %v2952_v44 = vld [vmem:[#allocation8 + $0xf38] sm:$0xff]  ;;  %v2823_v2 = vld [vmem:[#allocation8 + $0xb30] sm:$0xff] }
 0x3d4   :  { %4390 = vmatprep.subr.mxu1 %v2976_v36  ;;  %4314 = vmatpush2.msra.mxu0 %v2847_v25  ;;  %v2951_v5 = vld [vmem:[#allocation8 + $0xf30] sm:$0xff]  ;;  %v2820_v54 = vld [vmem:[#allocation8 + $0xb18] sm:$0xff] }
 0x3d5   :  { %4391 = vmatpush2.msra.mxu1 %v2975_v42  ;;  %4315 = vmatprep.subr.mxu0 %v2844_v50  ;;  %v2948_v6 = vld [vmem:[#allocation8 + $0xf18] sm:$0xff]  ;;  %v2819_v36 = vld [vmem:[#allocation8 + $0xb10] sm:$0xff] }
 0x3d6   :  { %4392 = vmatprep.subr.mxu1 %v2972_v55  ;;  %4316 = vmatpush2.msra.mxu0 %v2843_v24  ;;  %v2947_v25 = vld [vmem:[#allocation8 + $0xf10] sm:$0xff]  ;;  %v2816_v42 = vld [vmem:[#allocation8 + $0xaf8] sm:$0xff] }
 0x3d7   :  { %4393 = vmatpush2.msra.mxu1 %v2971_v1  ;;  %4317 = vmatprep.subr.mxu0 %v2840_v34  ;;  %v2944_v50 = vld [vmem:[#allocation8 + $0xef8] sm:$0xff]  ;;  %v2815_v55 = vld [vmem:[#allocation8 + $0xaf0] sm:$0xff] }
 0x3d8   :  { %4394 = vmatprep.subr.mxu1 %v2968_v4  ;;  %4318 = vmatpush2.msra.mxu0 %v2839_v49  ;;  %v2943_v24 = vld [vmem:[#allocation8 + $0xef0] sm:$0xff]  ;;  %v2812_v1 = vld [vmem:[#allocation8 + $0xad8] sm:$0xff] }
 0x3d9   :  { %4395 = vmatpush2.msra.mxu1 %v2967_v9  ;;  %4319 = vmatprep.subr.mxu0 %v2836_v12  ;;  %v2940_v34 = vld [vmem:[#allocation8 + $0xed8] sm:$0xff]  ;;  %v2811_v4 = vld [vmem:[#allocation8 + $0xad0] sm:$0xff] }
 0x3da   :  { %4396 = vmatprep.subr.mxu1 %v2964_v40  ;;  %4320 = vmatpush2.msra.mxu0 %v2835_v53  ;;  %v2939_v49 = vld [vmem:[#allocation8 + $0xed0] sm:$0xff]  ;;  %v2808_v9 = vld [vmem:[#allocation8 + $0xab8] sm:$0xff] }
 0x3db   :  { %4397 = vmatpush2.msra.mxu1 %v2963_v58  ;;  %4321 = vmatprep.subr.mxu0 %v2832_v10  ;;  %v2936_v12 = vld [vmem:[#allocation8 + $0xeb8] sm:$0xff]  ;;  %v2807_v40 = vld [vmem:[#allocation8 + $0xab0] sm:$0xff] }
 0x3dc   :  { %4398 = vmatprep.subr.mxu1 %v2960_v41  ;;  %4322 = vmatpush2.msra.mxu0 %v2831_v23  ;;  %v2935_v53 = vld [vmem:[#allocation8 + $0xeb0] sm:$0xff]  ;;  %v2804_v58 = vld [vmem:[#allocation8 + $0xa98] sm:$0xff] }
 0x3dd   :  { %4399 = vmatpush2.msra.mxu1 %v2959_v3  ;;  %4323 = vmatprep.subr.mxu0 %v2828_v60  ;;  %v2932_v10 = vld [vmem:[#allocation8 + $0xe98] sm:$0xff]  ;;  %v2803_v41 = vld [vmem:[#allocation8 + $0xa90] sm:$0xff] }
 0x3de   :  { %4400 = vmatprep.subr.mxu1 %v2956_v33  ;;  %4324 = vmatpush2.msra.mxu0 %v2827_v30  ;;  %v2931_v23 = vld [vmem:[#allocation8 + $0xe90] sm:$0xff]  ;;  %v2800_v3 = vld [vmem:[#allocation8 + $0xa78] sm:$0xff] }
 0x3df   :  { %4401 = vmatpush2.msra.mxu1 %v2955_v17  ;;  %4325 = vmatprep.subr.mxu0 %v2824_v48  ;;  %v2928_v60 = vld [vmem:[#allocation8 + $0xe78] sm:$0xff]  ;;  %v2799_v33 = vld [vmem:[#allocation8 + $0xa70] sm:$0xff] }
 0x3e0   :  { %4402 = vmatprep.subr.mxu1 %v2952_v44  ;;  %4326 = vmatpush2.msra.mxu0 %v2823_v2  ;;  %v2927_v30 = vld [vmem:[#allocation8 + $0xe70] sm:$0xff]  ;;  %v2796_v17 = vld [vmem:[#allocation8 + $0xa58] sm:$0xff] }
 0x3e1   :  { %4403 = vmatpush2.msra.mxu1 %v2951_v5  ;;  %4327 = vmatprep.subr.mxu0 %v2820_v54  ;;  %v2924_v48 = vld [vmem:[#allocation8 + $0xe58] sm:$0xff]  ;;  %v2795_v44 = vld [vmem:[#allocation8 + $0xa50] sm:$0xff] }
 0x3e2   :  { %4404 = vmatprep.subr.mxu1 %v2948_v6  ;;  %4328 = vmatpush2.msra.mxu0 %v2819_v36  ;;  %v2923_v2 = vld [vmem:[#allocation8 + $0xe50] sm:$0xff]  ;;  %v2792_v5 = vld [vmem:[#allocation8 + $0xa38] sm:$0xff] }
 0x3e3   :  { %4405 = vmatpush2.msra.mxu1 %v2947_v25  ;;  %4329 = vmatprep.subr.mxu0 %v2816_v42  ;;  %v2920_v54 = vld [vmem:[#allocation8 + $0xe38] sm:$0xff]  ;;  %v2791_v6 = vld [vmem:[#allocation8 + $0xa30] sm:$0xff] }
 0x3e4   :  { %4406 = vmatprep.subr.mxu1 %v2944_v50  ;;  %4330 = vmatpush2.msra.mxu0 %v2815_v55  ;;  %v2919_v36 = vld [vmem:[#allocation8 + $0xe30] sm:$0xff]  ;;  %v2788_v25 = vld [vmem:[#allocation8 + $0xa18] sm:$0xff] }
 0x3e5   :  { %4407 = vmatpush2.msra.mxu1 %v2943_v24  ;;  %4331 = vmatprep.subr.mxu0 %v2812_v1  ;;  %v2916_v42 = vld [vmem:[#allocation8 + $0xe18] sm:$0xff]  ;;  %v2787_v50 = vld [vmem:[#allocation8 + $0xa10] sm:$0xff] }
 0x3e6   :  { %4408 = vmatprep.subr.mxu1 %v2940_v34  ;;  %4332 = vmatpush2.msra.mxu0 %v2811_v4  ;;  %v2915_v55 = vld [vmem:[#allocation8 + $0xe10] sm:$0xff]  ;;  %v3040_v24 = vld [vmem:[#allocation8 + $0x11f8] sm:$0xff] }
 0x3e7   :  { %4409 = vmatpush2.msra.mxu1 %v2939_v49  ;;  %4333 = vmatprep.subr.mxu0 %v2808_v9  ;;  %v3168_v1 = vld [vmem:[#allocation8 + $0x15f8] sm:$0xff]  ;;  %v3039_v34 = vld [vmem:[#allocation8 + $0x11f0] sm:$0xff] }
 0x3e8   :  { %4410 = vmatprep.subr.mxu1 %v2936_v12  ;;  %4334 = vmatpush2.msra.mxu0 %v2807_v40  ;;  %v3167_v4 = vld [vmem:[#allocation8 + $0x15f0] sm:$0xff]  ;;  %v3036_v49 = vld [vmem:[#allocation8 + $0x11d8] sm:$0xff]  ;;  %v5664_v12 = vmax.f32 %v5347_v28, 0.0 }
 0x3e9   :  { %4411 = vmatpush2.msra.mxu1 %v2935_v53  ;;  %4335 = vmatprep.subr.mxu0 %v2804_v58  ;;  %v3164_v9 = vld [vmem:[#allocation8 + $0x15d8] sm:$0xff]  ;;  %v3035_v40 = vld [vmem:[#allocation8 + $0x11d0] sm:$0xff] }
 0x3ea   :  { %4412 = vmatprep.subr.mxu1 %v2932_v10  ;;  %4336 = vmatpush2.msra.mxu0 %v2803_v41  ;;  %v3163_v53 = vld [vmem:[#allocation8 + $0x15d0] sm:$0xff]  ;;  %v3028_v28 = vld [vmem:[#allocation8 + $0x1198] sm:$0xff]  ;;  %v5667_v10 = vmax.f32 %v5365_v11, 0.0 }
 0x3eb   :  { %4413 = vmatpush2.msra.mxu1 %v2931_v23  ;;  %4337 = vmatprep.subr.mxu0 %v2800_v3  ;;  %v3156_v58 = vld [vmem:[#allocation8 + $0x1598] sm:$0xff]  ;;  %v3027_v41 = vld [vmem:[#allocation8 + $0x1190] sm:$0xff]  ;;  %v5668_v3 = vmax.f32 %v5372_v14, 0.0  ;;  %v5528_v14 = vpop.f32.mrf.mxu0 }
 0x3ec   :  { %4414 = vmatprep.subr.mxu1 %v2928_v60  ;;  %4338 = vmatpush2.msra.mxu0 %v2799_v33  ;;  %v3155_v23 = vld [vmem:[#allocation8 + $0x1590] sm:$0xff]  ;;  %v3152_v60 = vld [vmem:[#allocation8 + $0x1578] sm:$0xff] }
 0x3ed   :  { %4415 = vmatpush2.msra.mxu1 %v2927_v30  ;;  %4339 = vmatprep.subr.mxu0 %v2796_v17  ;;  %v3151_v33 = vld [vmem:[#allocation8 + $0x1570] sm:$0xff]  ;;  %v3020_v30 = vld [vmem:[#allocation8 + $0x1158] sm:$0xff] }
 0x3ee   :  { %4416 = vmatprep.subr.mxu1 %v2924_v48  ;;  %4340 = vmatpush2.msra.mxu0 %v2795_v44  ;;  %v3148_v17 = vld [vmem:[#allocation8 + $0x1558] sm:$0xff]  ;;  %v3019_v11 = vld [vmem:[#allocation8 + $0x1150] sm:$0xff] }
 0x3ef   :  { %4417 = vmatpush2.msra.mxu1 %v2923_v2  ;;  %4341 = vmatprep.subr.mxu0 %v2792_v5  ;;  %v3147_v48 = vld [vmem:[#allocation8 + $0x1550] sm:$0xff]  ;;  %v3016_v44 = vld [vmem:[#allocation8 + $0x1138] sm:$0xff]  ;;  %v5530_v5 = vpop.f32.mrf.mxu1 }
 0x3f0   :  { %4418 = vmatprep.subr.mxu1 %v2920_v54  ;;  %4342 = vmatpush2.msra.mxu0 %v2791_v6  ;;  %v3144_v2 = vld [vmem:[#allocation8 + $0x1538] sm:$0xff]  ;;  %v3015_v54 = vld [vmem:[#allocation8 + $0x1130] sm:$0xff] }
 0x3f1   :  { %4419 = vmatpush2.msra.mxu1 %v2919_v36  ;;  %4343 = vmatprep.subr.mxu0 %v2788_v25  ;;  %v3143_v6 = vld [vmem:[#allocation8 + $0x1530] sm:$0xff]  ;;  %v3012_v36 = vld [vmem:[#allocation8 + $0x1118] sm:$0xff] }
 0x3f2   :  { %4420 = vmatprep.subr.mxu1 %v2916_v42  ;;  %4344 = vmatpush2.msra.mxu0 %v2787_v50  ;;  %v3140_v25 = vld [vmem:[#allocation8 + $0x1518] sm:$0xff]  ;;  %v3011_v42 = vld [vmem:[#allocation8 + $0x1110] sm:$0xff] }
 0x3f3   :  { %4421 = vmatpush2.msra.mxu1 %v2915_v55  ;;  %4346 = vmatmul.mubr.f32.vlgmr.msra.gmra.mxu0 %v2437_v45  ;;  %v3031_v45 = vld [vmem:[#allocation8 + $0x11b0] sm:$0xff]  ;;  %v3008_v55 = vld [vmem:[#allocation8 + $0x10f8] sm:$0xff] }
 0x3f4   :  { %4423 = vmatmul.mubr.f32.vlgmr.msra.gmra.mxu1 %v2439_v46  ;;  %4435 = vmatprep.subr.mxu0 %v3040_v24  ;;  %v5665_v46 = vmax.f32 %v5160_v8, 0.0  ;;  %v3024_v8 = vld [vmem:[#allocation8 + $0x1178] sm:$0xff]  ;;  %v3139_v50 = vld [vmem:[#allocation8 + $0x1510] sm:$0xff] }
 0x3f5   :  { %4512 = vmatprep.subr.mxu1 %v3168_v1  ;;  %4351 = vmatprep.mubr.f32.mxu0 %v2454_v37  ;;  %v3159_v37 = vld [vmem:[#allocation8 + $0x15b0] sm:$0xff]  ;;  %v3136_v24 = vld [vmem:[#allocation8 + $0x14f8] sm:$0xff]  ;;  %v5532_v1 = vpop.f32.mrf.mxu0 }
 0x3f6   :  { %4428 = vmatprep.mubr.f32.mxu1 %v5664_v12  ;;  %4436 = vmatpush1.msra.mxu0 %v3039_v34  ;;  %v5534_v34 = vpop.f32.mrf.mxu1  ;;  %v3132_v12 = vld [vmem:[#allocation8 + $0x14d8] sm:$0xff] }
 0x3f7   :  { %4513 = vmatpush1.msra.mxu1 %v3167_v4  ;;  %4437 = vmatprep.subr.mxu0 %v3036_v49  ;;  %v3007_v4 = vld [vmem:[#allocation8 + $0x10f0] sm:$0xff] }
 0x3f8   :  { %4514 = vmatprep.subr.mxu1 %v3164_v9  ;;  %4438 = vmatpush1.msra.mxu0 %v3035_v40  ;;  %v3135_v49 = vld [vmem:[#allocation8 + $0x14f0] sm:$0xff]  ;;  %v3004_v9 = vld [vmem:[#allocation8 + $0x10d8] sm:$0xff] }
 0x3f9   :  { %4515 = vmatpush1.msra.mxu1 %v3163_v53  ;;  %4352 = vmatmul.mubr.f32.gmra.mxu0 %v5665_v46  ;;  %v3003_v40 = vld [vmem:[#allocation8 + $0x10d0] sm:$0xff]  ;;  %v5538_v46 = vpop.f32.mrf.mxu1 }
 0x3fa   :  { %4429 = vmatmul.mubr.f32.gmra.mxu1 %v5666_v19  ;;  %4439 = vmatprep.subr.mxu0 %v3032_v18  ;;  %v3131_v53 = vld [vmem:[#allocation8 + $0x14d0] sm:$0xff]  ;;  %v3000_v18 = vld [vmem:[#allocation8 + $0x10b8] sm:$0xff] }
 0x3fb   :  { %4516 = vmatprep.subr.mxu1 %v3160_v13  ;;  %4440 = vmatpush1.msra.mxu0 %v3031_v45  ;;  %v3128_v13 = vld [vmem:[#allocation8 + $0x14b8] sm:$0xff]  ;;  %v5536_v45 = vpop.f32.mrf.mxu0  ;;  %v2999_v19 = vld [vmem:[#allocation8 + $0x10b0] sm:$0xff] }
 0x3fc   :  { %4499 = vmatprep.mubr.f32.mxu0 %v5667_v10  ;;  %4517 = vmatpush1.msra.mxu1 %v3159_v37  ;;  %v3127_v37 = vld [vmem:[#allocation8 + $0x14b0] sm:$0xff] }
 0x3fd   :  { %4576 = vmatprep.mubr.f32.mxu1 %v5668_v3  ;;  %4441 = vmatprep.subr.mxu0 %v3028_v28  ;;  %v2996_v28 = vld [vmem:[#allocation8 + $0x1098] sm:$0xff]  ;;  %v2995_v10 = vld [vmem:[#allocation8 + $0x1090] sm:$0xff] }
 0x3fe   :  { %4518 = vmatprep.subr.mxu1 %v3156_v58  ;;  %4442 = vmatpush1.msra.mxu0 %v3027_v41  ;;  %v3124_v58 = vld [vmem:[#allocation8 + $0x1498] sm:$0xff]  ;;  %v3123_v41 = vld [vmem:[#allocation8 + $0x1490] sm:$0xff] }
 0x3ff   :  { %4519 = vmatpush1.msra.mxu1 %v3155_v23  ;;  %4443 = vmatprep.subr.mxu0 %v3024_v8  ;;  %v2992_v23 = vld [vmem:[#allocation8 + $0x1078] sm:$0xff]  ;;  %v5540_v8 = vpop.f32.mrf.mxu0 }
 0x400   :  { %4520 = vmatprep.subr.mxu1 %v3152_v60  ;;  %4444 = vmatpush1.msra.mxu0 %v3023_v43  ;;  %v3120_v3 = vld [vmem:[#allocation8 + $0x1478] sm:$0xff]  ;;  %v5542_v60 = vpop.f32.mrf.mxu1  ;;  %v2991_v43 = vld [vmem:[#allocation8 + $0x1070] sm:$0xff] }
 0x401   :  { %4521 = vmatpush1.msra.mxu1 %v3151_v33  ;;  %4445 = vmatprep.subr.mxu0 %v3020_v30  ;;  %v3119_v33 = vld [vmem:[#allocation8 + $0x1470] sm:$0xff]  ;;  %v2988_v30 = vld [vmem:[#allocation8 + $0x1058] sm:$0xff] }
 0x402   :  { %4522 = vmatprep.subr.mxu1 %v3148_v17  ;;  %4446 = vmatpush1.msra.mxu0 %v3019_v11  ;;  %v3116_v17 = vld [vmem:[#allocation8 + $0x1458] sm:$0xff]  ;;  %v5544_v11 = vpop.f32.mrf.mxu0 }
 0x403   :  { %4523 = vmatpush1.msra.mxu1 %v3147_v48  ;;  %4447 = vmatprep.subr.mxu0 %v3016_v44  ;;  %v5546_v48 = vpop.f32.mrf.mxu1  ;;  %v2987_v44 = vld [vmem:[#allocation8 + $0x1050] sm:$0xff] }
 0x404   :  { %4524 = vmatprep.subr.mxu1 %v3144_v2  ;;  %4448 = vmatpush1.msra.mxu0 %v3015_v54  ;;  %v3115_v2 = vld [vmem:[#allocation8 + $0x1450] sm:$0xff]  ;;  %v2984_v54 = vld [vmem:[#allocation8 + $0x1038] sm:$0xff] }
 0x405   :  { %4525 = vmatpush1.msra.mxu1 %v3143_v6  ;;  %4449 = vmatprep.subr.mxu0 %v3012_v36  ;;  %v3112_v6 = vld [vmem:[#allocation8 + $0x1438] sm:$0xff]  ;;  %v2983_v36 = vld [vmem:[#allocation8 + $0x1030] sm:$0xff] }
 0x406   :  { %4526 = vmatprep.subr.mxu1 %v3140_v25  ;;  %4450 = vmatpush1.msra.mxu0 %v3011_v42  ;;  %v3111_v25 = vld [vmem:[#allocation8 + $0x1430] sm:$0xff]  ;;  %v2980_v42 = vld [vmem:[#allocation8 + $0x1018] sm:$0xff] }
 0x407   :  { %4527 = vmatpush1.msra.mxu1 %v3139_v50  ;;  %4451 = vmatprep.subr.mxu0 %v3008_v55  ;;  %v3108_v50 = vld [vmem:[#allocation8 + $0x1418] sm:$0xff]  ;;  %v5548_v55 = vld [vmem:[#allocation10] sm:$0xf] }
 0x408   :  { %4528 = vmatprep.subr.mxu1 %v3136_v24  ;;  %4452 = vmatpush1.msra.mxu0 %v3007_v4  ;;  %v5550_v24 = vpop.f32.mrf.mxu0  ;;  %v5552_v4 = vpop.f32.mrf.mxu1  ;;  %v3502_v31 = vrot.slane %v5548_v55, %v5244_v20  ;;  %v3506_v63 = vrot.slane %v5548_v55, %v5206_v32 }
 0x409   :  { %4529 = vmatpush1.msra.mxu1 %v3135_v49  ;;  %4453 = vmatprep.subr.mxu0 %v3004_v9  ;;  %v2979_v49 = vld [vmem:[#allocation8 + $0x1010] sm:$0xff] }
 0x40a   :  { %4530 = vmatprep.subr.mxu1 %v3132_v12  ;;  %4454 = vmatpush1.msra.mxu0 %v3003_v40  ;;  %v3107_v9 = vld [vmem:[#allocation8 + $0x1410] sm:$0xff]  ;;  %v3104_v12 = vld [vmem:[#allocation8 + $0x13f8] sm:$0xff] }
 0x40b   :  { %4531 = vmatpush1.msra.mxu1 %v3131_v53  ;;  %4455 = vmatprep.subr.mxu0 %v3000_v18  ;;  %v3232_v40 = vld [vmem:[#allocation8 + $0x17f8] sm:$0xff]  ;;  %v3103_v53 = vld [vmem:[#allocation8 + $0x13f0] sm:$0xff] }
 0x40c   :  { %4532 = vmatprep.subr.mxu1 %v3128_v13  ;;  %4456 = vmatpush1.msra.mxu0 %v2999_v19  ;;  %v3231_v18 = vld [vmem:[#allocation8 + $0x17f0] sm:$0xff]  ;;  %v3494_v13 = vrot.slane %v5548_v55, %v5045_v7  ;;  %v3100_v19 = vld [vmem:[#allocation8 + $0x13d8] sm:$0xff] }
 0x40d   :  { %4533 = vmatpush1.msra.mxu1 %v3127_v37  ;;  %4457 = vmatprep.subr.mxu0 %v2996_v28  ;;  %v3228_v37 = vld [vmem:[#allocation8 + $0x17d8] sm:$0xff]  ;;  %v5556_v28 = vpop.f32.mrf.mxu0  ;;  %v3095_v7 = vld [vmem:[#allocation8 + $0x13b0] sm:$0xff] }
 0x40e   :  { %4534 = vmatprep.subr.mxu1 %v3124_v58  ;;  %4458 = vmatpush1.msra.mxu0 %v2995_v10  ;;  %v5558_v58 = vpop.f32.mrf.mxu1  ;;  %v3099_v10 = vld [vmem:[#allocation8 + $0x13d0] sm:$0xff] }
 0x40f   :  { %4535 = vmatpush1.msra.mxu1 %v3123_v41  ;;  %4459 = vmatprep.subr.mxu0 %v2992_v23  ;;  %v3227_v41 = vld [vmem:[#allocation8 + $0x17d0] sm:$0xff]  ;;  %v3498_v23 = vrot.slane %v5548_v55, %v5073_v0 }
 0x410   :  { %4536 = vmatprep.subr.mxu1 %v3120_v3  ;;  %4460 = vmatpush1.msra.mxu0 %v2991_v43  ;;  %v3096_v3 = vld [vmem:[#allocation8 + $0x13b8] sm:$0xff]  ;;  %v3091_v0 = vld [vmem:[#allocation8 + $0x1390] sm:$0xff] }
 0x411   :  { %4537 = vmatpush1.msra.mxu1 %v3119_v33  ;;  %4461 = vmatprep.subr.mxu0 %v2988_v30  ;;  %v3224_v43 = vld [vmem:[#allocation8 + $0x17b8] sm:$0xff]  ;;  %v3223_v33 = vld [vmem:[#allocation8 + $0x17b0] sm:$0xff]  ;;  %v3578_v30 = vadd.f32 %v5528_v14, %v3494_v13 }
 0x412   :  { %4538 = vmatprep.subr.mxu1 %v3116_v17  ;;  %4462 = vmatpush1.msra.mxu0 %v2987_v44  ;;  %v3092_v17 = vld [vmem:[#allocation8 + $0x1398] sm:$0xff] }
 0x413   :  { %4539 = vmatpush1.msra.mxu1 %v3115_v2  ;;  %4463 = vmatprep.subr.mxu0 %v2984_v54  ;;  %v3220_v44 = vld [vmem:[#allocation8 + $0x1798] sm:$0xff]  ;;  %v5563_v2 = vpop.f32.mrf.mxu0  ;;  %v5565_v54 = vpop.f32.mrf.mxu1 }
 0x414   :  { %4540 = vmatprep.subr.mxu1 %v3112_v6  ;;  %4464 = vmatpush1.msra.mxu0 %v2983_v36  ;;  %v3219_v6 = vld [vmem:[#allocation8 + $0x1790] sm:$0xff]  ;;  %v3580_v36 = vadd.f32 %v5532_v1, %v3498_v23 }
 0x415   :  { %4541 = vmatpush1.msra.mxu1 %v3111_v25  ;;  %4465 = vmatprep.subr.mxu0 %v2980_v42  ;;  %v3088_v25 = vld [vmem:[#allocation8 + $0x1378] sm:$0xff]  ;;  %v5568_v14 = vpop.f32.mrf.mxu1  ;;  %v3083_v1 = vld [vmem:[#allocation8 + $0x1350] sm:$0xff] }
 0x416   :  { %4542 = vmatprep.subr.mxu1 %v3108_v50  ;;  %4466 = vmatpush1.msra.mxu0 %v2979_v49  ;;  %v3216_v42 = vld [vmem:[#allocation8 + $0x1778] sm:$0xff]  ;;  %v3885_v50 = vpop.f32.mrf.mxu0  ;;  %v3087_v49 = vld [vmem:[#allocation8 + $0x1370] sm:$0xff] }
 0x417   :  { %4543 = vmatpush1.msra.mxu1 %v3107_v9  ;;  %4467 = vmatprep.subr.mxu0 %v3104_v12  ;;  %v3215_v9 = vld [vmem:[#allocation8 + $0x1770] sm:$0xff]  ;;  %v3655_v12 = vadd.f32 %v5530_v5, %v3578_v30  ;;  %v3586_v5 = vadd.f32 %v5540_v8, %v3498_v23  ;;  %v3072_v23 = vld [vmem:[#allocation8 + $0x12f8] sm:$0xff] }
 0x418   :  { %4544 = vmatprep.subr.mxu1 %v3232_v40  ;;  %4468 = vmatpush2.msra.mxu0 %v3103_v53  ;;  %v3084_v40 = vld [vmem:[#allocation8 + $0x1358] sm:$0xff]  ;;  %v3207_v30 = vld [vmem:[#allocation8 + $0x1730] sm:$0xff] }
 0x419   :  { %4545 = vmatpush2.msra.mxu1 %v3231_v18  ;;  %4469 = vmatprep.subr.mxu0 %v3100_v19  ;;  %v3212_v53 = vld [vmem:[#allocation8 + $0x1758] sm:$0xff]  ;;  %v3211_v18 = vld [vmem:[#allocation8 + $0x1750] sm:$0xff]  ;;  %v3657_v19 = vadd.f32 %v5534_v34, %v3580_v36 }
 0x41a   :  { %4546 = vmatprep.subr.mxu1 %v3228_v37  ;;  %4470 = vmatpush2.msra.mxu0 %v3099_v10  ;;  %v3584_v37 = vadd.f32 %v5536_v45, %v3494_v13  ;;  %v3732_v10 = vadd.f32 %v5544_v11, %v3655_v12  ;;  %v3076_v34 = vld [vmem:[#allocation8 + $0x1318] sm:$0xff]  ;;  %v3075_v11 = vld [vmem:[#allocation8 + $0x1310] sm:$0xff] }
 0x41b   :  { %4547 = vmatpush2.msra.mxu1 %v3227_v41  ;;  %4471 = vmatprep.subr.mxu0 %v3096_v3  ;;  %v3080_v41 = vld [vmem:[#allocation8 + $0x1338] sm:$0xff]  ;;  %v3203_v13 = vld [vmem:[#allocation8 + $0x1710] sm:$0xff] }
 0x41c   :  { %4548 = vmatprep.subr.mxu1 %v3224_v43  ;;  %4472 = vmatpush2.msra.mxu0 %v3095_v7  ;;  %v3208_v3 = vld [vmem:[#allocation8 + $0x1738] sm:$0xff]  ;;  %v3887_v43 = vpop.f32.mrf.mxu0  ;;  %v5575_v7 = vpop.f32.mrf.mxu1  ;;  %v3809_v8 = vadd.f32 %v5546_v48, %v3732_v10 }
 0x41d   :  { %4549 = vmatpush2.msra.mxu1 %v3223_v33  ;;  %4473 = vmatprep.subr.mxu0 %v3092_v17  ;;  %v3079_v33 = vld [vmem:[#allocation8 + $0x1330] sm:$0xff]  ;;  %v3734_v17 = vadd.f32 %v5550_v24, %v3657_v19  ;;  %v3204_v45 = vld [vmem:[#allocation8 + $0x1718] sm:$0xff] }
 0x41e   :  { %4550 = vmatprep.subr.mxu1 %v3220_v44  ;;  %4474 = vmatpush2.msra.mxu0 %v3091_v0  ;;  %v3661_v44 = vadd.f32 %v5538_v46, %v3584_v37  ;;  %v3200_v0 = vld [vmem:[#allocation8 + $0x16f8] sm:$0xff]  ;;  %v3891_v36 = vpop.f32.mrf.mxu0  ;;  %v5581_v24 = vpop.f32.mrf.mxu1  ;;  %v3886_v46 = vadd.f32 %v3885_v50, %v3809_v8  ;;  %v3191_v50 = vld [vmem:[#allocation8 + $0x16b0] sm:$0xff] }
 0x41f   :  { %4551 = vmatpush2.msra.mxu1 %v3219_v6  ;;  %4475 = vmatprep.subr.mxu0 %v3088_v25  ;;  %v3663_v6 = vadd.f32 %v5542_v60, %v3586_v5  ;;  %v3071_v25 = vld [vmem:[#allocation8 + $0x12f0] sm:$0xff]  ;;  %v3068_v48 = vld [vmem:[#allocation8 + $0x12d8] sm:$0xff] }
 0x420   :  { %4552 = vmatprep.subr.mxu1 %v3216_v42  ;;  %4476 = vmatpush2.msra.mxu0 %v3087_v49  ;;  %v3199_v42 = vld [vmem:[#allocation8 + $0x16f0] sm:$0xff]  ;;  %v3811_v49 = vadd.f32 %v5552_v4, %v3734_v17  ;;  %v3196_v12 = vld [vmem:[#allocation8 + $0x16d8] sm:$0xff]  ;;  %v3893_v37 = vpop.f32.mrf.mxu0  ;;  %v3970_v4 = vpop.f32.mrf.mxu1 }
 0x421   :  { %4553 = vmatpush2.msra.mxu1 %v3215_v9  ;;  %4477 = vmatprep.subr.mxu0 %v3084_v40  ;;  %v3738_v9 = vadd.f32 %v5556_v28, %v3661_v44  ;;  %v3740_v40 = vadd.f32 %v5563_v2, %v3663_v6  ;;  %v3067_v60 = vld [vmem:[#allocation8 + $0x12d0] sm:$0xff]  ;;  %v3192_v19 = vld [vmem:[#allocation8 + $0x16b8] sm:$0xff] }
 0x422   :  { %4554 = vmatprep.subr.mxu1 %v3212_v53  ;;  %4478 = vmatpush2.msra.mxu0 %v3083_v1  ;;  %v3195_v53 = vld [vmem:[#allocation8 + $0x16d0] sm:$0xff]  ;;  %v3888_v1 = vadd.f32 %v3887_v43, %v3811_v49  ;;  %v3060_v2 = vld [vmem:[#allocation8 + $0x1298] sm:$0xff] }
 0x423   :  { %4555 = vmatpush2.msra.mxu1 %v3211_v18  ;;  %4479 = vmatprep.subr.mxu0 %v3080_v41  ;;  %v3064_v18 = vld [vmem:[#allocation8 + $0x12b8] sm:$0xff]  ;;  %v3063_v28 = vld [vmem:[#allocation8 + $0x12b0] sm:$0xff]  ;;  %v3815_v10 = vadd.f32 %v5558_v58, %v3738_v9  ;;  %v3963_v41 = vadd.f32 %v5568_v14, %v3886_v46  ;;  %v3817_v5 = vadd.f32 %v5565_v54, %v3740_v40 }
 0x424   :  { %4556 = vmatprep.subr.mxu1 %v3208_v3  ;;  %4480 = vmatpush2.msra.mxu0 %v3079_v33  ;;  %v3188_v3 = vld [vmem:[#allocation8 + $0x1698] sm:$0xff]  ;;  %v3059_v43 = vld [vmem:[#allocation8 + $0x1290] sm:$0xff] }
 0x425   :  { %4557 = vmatpush2.msra.mxu1 %v3207_v30  ;;  %4481 = vmatprep.subr.mxu0 %v3076_v34  ;;  %v3187_v33 = vld [vmem:[#allocation8 + $0x1690] sm:$0xff]  ;;  %v3965_v34 = vadd.f32 %v5575_v7, %v3888_v1  ;;  %v3056_v58 = vld [vmem:[#allocation8 + $0x1278] sm:$0xff] }
 0x426   :  { %4558 = vmatprep.subr.mxu1 %v3204_v45  ;;  %4482 = vmatpush2.msra.mxu0 %v3075_v11  ;;  %v3892_v45 = vadd.f32 %v3891_v36, %v3815_v10  ;;  %v3184_v11 = vld [vmem:[#allocation8 + $0x1678] sm:$0xff]  ;;  %v3183_v44 = vld [vmem:[#allocation8 + $0x1670] sm:$0xff] }
 0x427   :  { %4559 = vmatpush2.msra.mxu1 %v3203_v13  ;;  %4483 = vmatprep.subr.mxu0 %v3072_v23  ;;  %v3055_v13 = vld [vmem:[#allocation8 + $0x1270] sm:$0xff]  ;;  %v3894_v23 = vadd.f32 %v3893_v37, %v3817_v5  ;;  %v3180_v6 = vld [vmem:[#allocation8 + $0x1658] sm:$0xff] }
 0x428   :  { %4560 = vmatprep.subr.mxu1 %v3200_v0  ;;  %4484 = vmatpush2.msra.mxu0 %v3071_v25  ;;  %v3052_v0 = vld [vmem:[#allocation8 + $0x1258] sm:$0xff]  ;;  %v3051_v7 = vld [vmem:[#allocation8 + $0x1250] sm:$0xff]  ;;  %v3969_v49 = vadd.f32 %v5581_v24, %v3892_v45 }
 0x429   :  { %4561 = vmatpush2.msra.mxu1 %v3199_v42  ;;  %4485 = vmatprep.subr.mxu0 %v3068_v48  ;;  %v3179_v36 = vld [vmem:[#allocation8 + $0x1650] sm:$0xff]  ;;  %v3048_v9 = vld [vmem:[#allocation8 + $0x1238] sm:$0xff]  ;;  %v3971_v1 = vadd.f32 %v3970_v4, %v3894_v23 }
 0x42a   :  { %4562 = vmatprep.subr.mxu1 %v3196_v12  ;;  %4486 = vmatpush2.msra.mxu0 %v3067_v60  ;;  %v3176_v46 = vld [vmem:[#allocation8 + $0x1638] sm:$0xff]  ;;  %v3047_v12 = vld [vmem:[#allocation8 + $0x1230] sm:$0xff] }
 0x42b   :  { %4563 = vmatpush2.msra.mxu1 %v3195_v53  ;;  %4487 = vmatprep.subr.mxu0 %v3064_v18  ;;  %v4039_v30 = vpop.f32.mrf.mxu0  ;;  %v3175_v40 = vld [vmem:[#allocation8 + $0x1630] sm:$0xff]  ;;  %v3044_v18 = vld [vmem:[#allocation8 + $0x1218] sm:$0xff] }
 0x42c   :  { %4564 = vmatprep.subr.mxu1 %v3192_v19  ;;  %v4116_v17 = vpop.f32.mrf.mxu1  ;;  %4488 = vmatpush2.msra.mxu0 %v3063_v28  ;;  %v4040_v14 = vadd.f32 %v4039_v30, %v3963_v41  ;;  %v3172_v19 = vld [vmem:[#allocation8 + $0x1618] sm:$0xff]  ;;  %v3043_v24 = vld [vmem:[#allocation8 + $0x1210] sm:$0xff] }
 0x42d   :  { %4565 = vmatpush2.msra.mxu1 %v3191_v50  ;;  %4489 = vmatprep.subr.mxu0 %v3060_v2  ;;  %v4041_v8 = vpop.f32.mrf.mxu0  ;;  %v3171_v28 = vld [vmem:[#allocation8 + $0x1610] sm:$0xff]  ;;  %v3296_v2 = vld [vmem:[#allocation8 + $0x19f8] sm:$0xff] }
 0x42e   :  { %4566 = vmatprep.subr.mxu1 %v3188_v3  ;;  %v4118_v54 = vpop.f32.mrf.mxu1  ;;  %4490 = vmatpush2.msra.mxu0 %v3059_v43  ;;  %v4117_v25 = vadd.f32 %v4116_v17, %v4040_v14  ;;  %v4042_v42 = vadd.f32 %v4041_v8, %v3965_v34  ;;  %v3424_v3 = vld [vmem:[#allocation8 + $0x1df8] sm:$0xff]  ;;  %v5669_v43 = vmax.f32 %v5203_v27, 0.0  ;;  %v3295_v30 = vld [vmem:[#allocation8 + $0x19f0] sm:$0xff]  ;;  %v5673_v8 = vmax.f32 %v5247_v61, 0.0 }
 0x42f   :  { %4567 = vmatpush2.msra.mxu1 %v3187_v33  ;;  %4491 = vmatprep.subr.mxu0 %v3056_v58  ;;  %v5670_v33 = vmax.f32 %v5401_v59, 0.0  ;;  %v3423_v17 = vld [vmem:[#allocation8 + $0x1df0] sm:$0xff]  ;;  %v3292_v34 = vld [vmem:[#allocation8 + $0x19d8] sm:$0xff]  ;;  %v5671_v58 = vmax.f32 %v5251_v47, 0.0  ;;  %v5674_v47 = vmax.f32 %v5429_v22, 0.0 }
 0x430   :  { %4568 = vmatprep.subr.mxu1 %v3184_v11  ;;  %4492 = vmatpush2.msra.mxu0 %v3055_v13  ;;  %4743 = vst [vmem:[#allocation11] sm:$0xff] %v4117_v25  ;;  %v4119_v48 = vadd.f32 %v4118_v54, %v4042_v42  ;;  %v3420_v45 = vld [vmem:[#allocation8 + $0x1dd8] sm:$0xff]  ;;  %v5672_v11 = vmax.f32 %v5414_v26, 0.0  ;;  %v3291_v14 = vld [vmem:[#allocation8 + $0x19d0] sm:$0xff]  ;;  %v5676_v42 = vmax.f32 %v5446_v29, 0.0 }
 0x431   :  { %4569 = vmatpush2.msra.mxu1 %v3183_v44  ;;  %4493 = vmatprep.subr.mxu0 %v3052_v0  ;;  %v4045_v60 = vpop.f32.mrf.mxu0  ;;  %v3419_v13 = vld [vmem:[#allocation8 + $0x1dd0] sm:$0xff]  ;;  %v3288_v27 = vld [vmem:[#allocation8 + $0x19b8] sm:$0xff]  ;;  %v5675_v0 = vmax.f32 %v5438_v52, 0.0 }
 0x432   :  { %4570 = vmatprep.subr.mxu1 %v3180_v6  ;;  %v4122_v53 = vpop.f32.mrf.mxu1  ;;  %4494 = vmatpush2.msra.mxu0 %v3051_v7  ;;  %4744 = vst [vmem:[#allocation11 + $0x8] sm:$0xff] %v4119_v48  ;;  %v4046_v37 = vadd.f32 %v4045_v60, %v3969_v49  ;;  %v3416_v59 = vld [vmem:[#allocation8 + $0x1db8] sm:$0xff]  ;;  %v3287_v44 = vld [vmem:[#allocation8 + $0x19b0] sm:$0xff] }
 0x433   :  { %4571 = vmatpush2.msra.mxu1 %v3179_v36  ;;  %4495 = vmatprep.subr.mxu0 %v3048_v9  ;;  %v4047_v50 = vpop.f32.mrf.mxu0  ;;  %v3415_v54 = vld [vmem:[#allocation8 + $0x1db0] sm:$0xff]  ;;  %v3284_v26 = vld [vmem:[#allocation8 + $0x1998] sm:$0xff] }
 0x434   :  { %4572 = vmatprep.subr.mxu1 %v3176_v46  ;;  %4496 = vmatpush2.msra.mxu0 %v3047_v12  ;;  %v4123_v10 = vadd.f32 %v4122_v53, %v4046_v37  ;;  %v4048_v41 = vadd.f32 %v4047_v50, %v3971_v1  ;;  %v4124_v4 = vpop.f32.mrf.mxu1  ;;  %v3412_v23 = vld [vmem:[#allocation8 + $0x1d98] sm:$0xff]  ;;  %v3283_v6 = vld [vmem:[#allocation8 + $0x1990] sm:$0xff] }
 0x435   :  { %4573 = vmatpush2.msra.mxu1 %v3175_v40  ;;  %4497 = vmatprep.subr.mxu0 %v3044_v18  ;;  %v3411_v25 = vld [vmem:[#allocation8 + $0x1d90] sm:$0xff]  ;;  %v3280_v61 = vld [vmem:[#allocation8 + $0x1978] sm:$0xff] }
 0x436   :  { %4574 = vmatprep.subr.mxu1 %v3172_v19  ;;  %4498 = vmatpush2.msra.mxu0 %v3043_v24  ;;  %4747 = vst [vmem:[#allocation11 + $0x20] sm:$0xff] %v4123_v10  ;;  %v4125_v5 = vadd.f32 %v4124_v4, %v4048_v41  ;;  %v3408_v7 = vld [vmem:[#allocation8 + $0x1d78] sm:$0xff]  ;;  %v3279_v22 = vld [vmem:[#allocation8 + $0x1970] sm:$0xff] }
 0x437   :  { %4575 = vmatpush2.msra.mxu1 %v3171_v28  ;;  %4500 = vmatmul.mubr.f32.vlgmr.msra.gmra.mxu0 %v5669_v43  ;;  %v3407_v36 = vld [vmem:[#allocation8 + $0x1d70] sm:$0xff]  ;;  %v3276_v49 = vld [vmem:[#allocation8 + $0x1958] sm:$0xff] }
 0x438   :  { %4577 = vmatmul.mubr.f32.vlgmr.msra.gmra.mxu1 %v5670_v33  ;;  %4589 = vmatprep.subr.mxu0 %v3296_v2  ;;  %4748 = vst [vmem:[#allocation11 + $0x28] sm:$0xff] %v4125_v5  ;;  %v3404_v9 = vld [vmem:[#allocation8 + $0x1d58] sm:$0xff]  ;;  %v3275_v52 = vld [vmem:[#allocation8 + $0x1950] sm:$0xff] }
 0x439   :  { %4666 = vmatprep.subr.mxu1 %v3424_v3  ;;  %4505 = vmatprep.mubr.f32.mxu0 %v5671_v58  ;;  %v3403_v46 = vld [vmem:[#allocation8 + $0x1d50] sm:$0xff]  ;;  %v3272_v48 = vld [vmem:[#allocation8 + $0x1938] sm:$0xff] }
 0x43a   :  { %4582 = vmatprep.mubr.f32.mxu1 %v5672_v11  ;;  %4590 = vmatpush1.msra.mxu0 %v3295_v30  ;;  %v3400_v12 = vld [vmem:[#allocation8 + $0x1d38] sm:$0xff]  ;;  %v3271_v29 = vld [vmem:[#allocation8 + $0x1930] sm:$0xff] }
 0x43b   :  { %4667 = vmatpush1.msra.mxu1 %v3423_v17  ;;  %4591 = vmatprep.subr.mxu0 %v3292_v34  ;;  %v3399_v40 = vld [vmem:[#allocation8 + $0x1d30] sm:$0xff]  ;;  %v3268_v60 = vld [vmem:[#allocation8 + $0x1918] sm:$0xff] }
 0x43c   :  { %4668 = vmatprep.subr.mxu1 %v3420_v45  ;;  %4592 = vmatpush1.msra.mxu0 %v3291_v14  ;;  %v3396_v53 = vld [vmem:[#allocation8 + $0x1d18] sm:$0xff]  ;;  %v3267_v1 = vld [vmem:[#allocation8 + $0x1910] sm:$0xff] }
 0x43d   :  { %4669 = vmatpush1.msra.mxu1 %v3419_v13  ;;  %4506 = vmatmul.mubr.f32.gmra.mxu0 %v5673_v8  ;;  %v3395_v18 = vld [vmem:[#allocation8 + $0x1d10] sm:$0xff]  ;;  %v3264_v19 = vld [vmem:[#allocation8 + $0x18f8] sm:$0xff] }
 0x43e   :  { %4583 = vmatmul.mubr.f32.gmra.mxu1 %v5674_v47  ;;  %4593 = vmatprep.subr.mxu0 %v3288_v27  ;;  %v3392_v37 = vld [vmem:[#allocation8 + $0x1cf8] sm:$0xff]  ;;  %v3263_v24 = vld [vmem:[#allocation8 + $0x18f0] sm:$0xff] }
 0x43f   :  { %4670 = vmatprep.subr.mxu1 %v3416_v59  ;;  %4594 = vmatpush1.msra.mxu0 %v3287_v44  ;;  %v3391_v28 = vld [vmem:[#allocation8 + $0x1cf0] sm:$0xff]  ;;  %v3260_v50 = vld [vmem:[#allocation8 + $0x18d8] sm:$0xff] }
 0x440   :  { %4653 = vmatprep.mubr.f32.mxu0 %v5675_v0  ;;  %4671 = vmatpush1.msra.mxu1 %v3415_v54  ;;  %v3388_v10 = vld [vmem:[#allocation8 + $0x1cd8] sm:$0xff]  ;;  %v3259_v41 = vld [vmem:[#allocation8 + $0x18d0] sm:$0xff] }
 0x441   :  { %4730 = vmatprep.mubr.f32.mxu1 %v5676_v42  ;;  %4595 = vmatprep.subr.mxu0 %v3284_v26  ;;  %v3387_v2 = vld [vmem:[#allocation8 + $0x1cd0] sm:$0xff]  ;;  %v3256_v3 = vld [vmem:[#allocation8 + $0x18b8] sm:$0xff] }
 0x442   :  { %4672 = vmatprep.subr.mxu1 %v3412_v23  ;;  %4596 = vmatpush1.msra.mxu0 %v3283_v6  ;;  %v3384_v4 = vld [vmem:[#allocation8 + $0x1cb8] sm:$0xff]  ;;  %v3255_v5 = vld [vmem:[#allocation8 + $0x18b0] sm:$0xff] }
 0x443   :  { %4673 = vmatpush1.msra.mxu1 %v3411_v25  ;;  %4597 = vmatprep.subr.mxu0 %v3280_v61  ;;  %v3383_v43 = vld [vmem:[#allocation8 + $0x1cb0] sm:$0xff]  ;;  %v3252_v33 = vld [vmem:[#allocation8 + $0x1898] sm:$0xff] }
 0x444   :  { %4674 = vmatprep.subr.mxu1 %v3408_v7  ;;  %4598 = vmatpush1.msra.mxu0 %v3279_v22  ;;  %v3380_v30 = vld [vmem:[#allocation8 + $0x1c98] sm:$0xff]  ;;  %v3251_v17 = vld [vmem:[#allocation8 + $0x1890] sm:$0xff] }
 0x445   :  { %4675 = vmatpush1.msra.mxu1 %v3407_v36  ;;  %4599 = vmatprep.subr.mxu0 %v3276_v49  ;;  %v3379_v34 = vld [vmem:[#allocation8 + $0x1c90] sm:$0xff]  ;;  %v3248_v45 = vld [vmem:[#allocation8 + $0x1878] sm:$0xff] }
 0x446   :  { %4676 = vmatprep.subr.mxu1 %v3404_v9  ;;  %4600 = vmatpush1.msra.mxu0 %v3275_v52  ;;  %v3376_v58 = vld [vmem:[#allocation8 + $0x1c78] sm:$0xff]  ;;  %v3247_v11 = vld [vmem:[#allocation8 + $0x1870] sm:$0xff] }
 0x447   :  { %4677 = vmatpush1.msra.mxu1 %v3403_v46  ;;  %4601 = vmatprep.subr.mxu0 %v3272_v48  ;;  %v3375_v14 = vld [vmem:[#allocation8 + $0x1c70] sm:$0xff]  ;;  %v3244_v13 = vld [vmem:[#allocation8 + $0x1858] sm:$0xff] }
 0x448   :  { %4678 = vmatprep.subr.mxu1 %v3400_v12  ;;  %4602 = vmatpush1.msra.mxu0 %v3271_v29  ;;  %v3372_v27 = vld [vmem:[#allocation8 + $0x1c58] sm:$0xff]  ;;  %v3243_v59 = vld [vmem:[#allocation8 + $0x1850] sm:$0xff] }
 0x449   :  { %4679 = vmatpush1.msra.mxu1 %v3399_v40  ;;  %4603 = vmatprep.subr.mxu0 %v3268_v60  ;;  %v3371_v44 = vld [vmem:[#allocation8 + $0x1c50] sm:$0xff]  ;;  %v3240_v8 = vld [vmem:[#allocation8 + $0x1838] sm:$0xff] }
 0x44a   :  { %4680 = vmatprep.subr.mxu1 %v3396_v53  ;;  %4604 = vmatpush1.msra.mxu0 %v3267_v1  ;;  %v3368_v47 = vld [vmem:[#allocation8 + $0x1c38] sm:$0xff]  ;;  %v3239_v54 = vld [vmem:[#allocation8 + $0x1830] sm:$0xff] }
 0x44b   :  { %4681 = vmatpush1.msra.mxu1 %v3395_v18  ;;  %4605 = vmatprep.subr.mxu0 %v3264_v19  ;;  %v3367_v26 = vld [vmem:[#allocation8 + $0x1c30] sm:$0xff]  ;;  %v3236_v23 = vld [vmem:[#allocation8 + $0x1818] sm:$0xff] }
 0x44c   :  { %4682 = vmatprep.subr.mxu1 %v3392_v37  ;;  %4606 = vmatpush1.msra.mxu0 %v3263_v24  ;;  %v3364_v0 = vld [vmem:[#allocation8 + $0x1c18] sm:$0xff]  ;;  %v3235_v6 = vld [vmem:[#allocation8 + $0x1810] sm:$0xff] }
 0x44d   :  { %4683 = vmatpush1.msra.mxu1 %v3391_v28  ;;  %4607 = vmatprep.subr.mxu0 %v3260_v50  ;;  %v3363_v25 = vld [vmem:[#allocation8 + $0x1c10] sm:$0xff]  ;;  %v3360_v42 = vld [vmem:[#allocation8 + $0x1bf8] sm:$0xff] }
 0x44e   :  { %4684 = vmatprep.subr.mxu1 %v3388_v10  ;;  %4608 = vmatpush1.msra.mxu0 %v3259_v41  ;;  %v3488_v61 = vld [vmem:[#allocation8 + $0x1ff8] sm:$0xff]  ;;  %v3359_v7 = vld [vmem:[#allocation8 + $0x1bf0] sm:$0xff] }
 0x44f   :  { %4685 = vmatpush1.msra.mxu1 %v3387_v2  ;;  %4609 = vmatprep.subr.mxu0 %v3256_v3  ;;  %v3487_v22 = vld [vmem:[#allocation8 + $0x1ff0] sm:$0xff]  ;;  %v3356_v36 = vld [vmem:[#allocation8 + $0x1bd8] sm:$0xff] }
 0x450   :  { %4686 = vmatprep.subr.mxu1 %v3384_v4  ;;  %4610 = vmatpush1.msra.mxu0 %v3255_v5  ;;  %v3484_v49 = vld [vmem:[#allocation8 + $0x1fd8] sm:$0xff]  ;;  %v3355_v9 = vld [vmem:[#allocation8 + $0x1bd0] sm:$0xff] }
 0x451   :  { %4687 = vmatpush1.msra.mxu1 %v3383_v43  ;;  %4611 = vmatprep.subr.mxu0 %v3252_v33  ;;  %v3483_v52 = vld [vmem:[#allocation8 + $0x1fd0] sm:$0xff]  ;;  %v3352_v46 = vld [vmem:[#allocation8 + $0x1bb8] sm:$0xff] }
 0x452   :  { %4688 = vmatprep.subr.mxu1 %v3380_v30  ;;  %4612 = vmatpush1.msra.mxu0 %v3251_v17  ;;  %v3480_v48 = vld [vmem:[#allocation8 + $0x1fb8] sm:$0xff]  ;;  %v3351_v12 = vld [vmem:[#allocation8 + $0x1bb0] sm:$0xff] }
 0x453   :  { %4689 = vmatpush1.msra.mxu1 %v3379_v34  ;;  %4613 = vmatprep.subr.mxu0 %v3248_v45  ;;  %v3479_v29 = vld [vmem:[#allocation8 + $0x1fb0] sm:$0xff]  ;;  %v3348_v40 = vld [vmem:[#allocation8 + $0x1b98] sm:$0xff] }
 0x454   :  { %4690 = vmatprep.subr.mxu1 %v3376_v58  ;;  %4614 = vmatpush1.msra.mxu0 %v3247_v11  ;;  %v3476_v60 = vld [vmem:[#allocation8 + $0x1f98] sm:$0xff]  ;;  %v3347_v53 = vld [vmem:[#allocation8 + $0x1b90] sm:$0xff] }
 0x455   :  { %4691 = vmatpush1.msra.mxu1 %v3375_v14  ;;  %4615 = vmatprep.subr.mxu0 %v3244_v13  ;;  %v3475_v1 = vld [vmem:[#allocation8 + $0x1f90] sm:$0xff]  ;;  %v3344_v18 = vld [vmem:[#allocation8 + $0x1b78] sm:$0xff] }
 0x456   :  { %4692 = vmatprep.subr.mxu1 %v3372_v27  ;;  %4616 = vmatpush1.msra.mxu0 %v3243_v59  ;;  %v3472_v19 = vld [vmem:[#allocation8 + $0x1f78] sm:$0xff]  ;;  %v3343_v37 = vld [vmem:[#allocation8 + $0x1b70] sm:$0xff] }
 0x457   :  { %4693 = vmatpush1.msra.mxu1 %v3371_v44  ;;  %4617 = vmatprep.subr.mxu0 %v3240_v8  ;;  %v3471_v24 = vld [vmem:[#allocation8 + $0x1f70] sm:$0xff]  ;;  %v3340_v28 = vld [vmem:[#allocation8 + $0x1b58] sm:$0xff] }
 0x458   :  { %4694 = vmatprep.subr.mxu1 %v3368_v47  ;;  %4618 = vmatpush1.msra.mxu0 %v3239_v54  ;;  %v3468_v50 = vld [vmem:[#allocation8 + $0x1f58] sm:$0xff]  ;;  %v3339_v10 = vld [vmem:[#allocation8 + $0x1b50] sm:$0xff] }
 0x459   :  { %4695 = vmatpush1.msra.mxu1 %v3367_v26  ;;  %4619 = vmatprep.subr.mxu0 %v3236_v23  ;;  %v3467_v41 = vld [vmem:[#allocation8 + $0x1f50] sm:$0xff]  ;;  %v3336_v2 = vld [vmem:[#allocation8 + $0x1b38] sm:$0xff] }
 0x45a   :  { %4696 = vmatprep.subr.mxu1 %v3364_v0  ;;  %4620 = vmatpush1.msra.mxu0 %v3235_v6  ;;  %v3464_v3 = vld [vmem:[#allocation8 + $0x1f38] sm:$0xff]  ;;  %v3335_v4 = vld [vmem:[#allocation8 + $0x1b30] sm:$0xff] }
 0x45b   :  { %4697 = vmatpush1.msra.mxu1 %v3363_v25  ;;  %4621 = vmatprep.subr.mxu0 %v3360_v42  ;;  %v3463_v5 = vld [vmem:[#allocation8 + $0x1f30] sm:$0xff]  ;;  %v3332_v43 = vld [vmem:[#allocation8 + $0x1b18] sm:$0xff] }
 0x45c   :  { %4698 = vmatprep.subr.mxu1 %v3488_v61  ;;  %4622 = vmatpush2.msra.mxu0 %v3359_v7  ;;  %v3460_v33 = vld [vmem:[#allocation8 + $0x1f18] sm:$0xff]  ;;  %v3331_v30 = vld [vmem:[#allocation8 + $0x1b10] sm:$0xff] }
 0x45d   :  { %4699 = vmatpush2.msra.mxu1 %v3487_v22  ;;  %4623 = vmatprep.subr.mxu0 %v3356_v36  ;;  %v3459_v17 = vld [vmem:[#allocation8 + $0x1f10] sm:$0xff]  ;;  %v3328_v34 = vld [vmem:[#allocation8 + $0x1af8] sm:$0xff] }
 0x45e   :  { %4700 = vmatprep.subr.mxu1 %v3484_v49  ;;  %4624 = vmatpush2.msra.mxu0 %v3355_v9  ;;  %v3456_v45 = vld [vmem:[#allocation8 + $0x1ef8] sm:$0xff]  ;;  %v3327_v58 = vld [vmem:[#allocation8 + $0x1af0] sm:$0xff] }
 0x45f   :  { %4701 = vmatpush2.msra.mxu1 %v3483_v52  ;;  %4625 = vmatprep.subr.mxu0 %v3352_v46  ;;  %v3455_v11 = vld [vmem:[#allocation8 + $0x1ef0] sm:$0xff]  ;;  %v3324_v14 = vld [vmem:[#allocation8 + $0x1ad8] sm:$0xff] }
 0x460   :  { %4702 = vmatprep.subr.mxu1 %v3480_v48  ;;  %4626 = vmatpush2.msra.mxu0 %v3351_v12  ;;  %v3452_v13 = vld [vmem:[#allocation8 + $0x1ed8] sm:$0xff]  ;;  %v3323_v27 = vld [vmem:[#allocation8 + $0x1ad0] sm:$0xff] }
 0x461   :  { %4703 = vmatpush2.msra.mxu1 %v3479_v29  ;;  %4627 = vmatprep.subr.mxu0 %v3348_v40  ;;  %v3451_v59 = vld [vmem:[#allocation8 + $0x1ed0] sm:$0xff]  ;;  %v3320_v44 = vld [vmem:[#allocation8 + $0x1ab8] sm:$0xff] }
 0x462   :  { %4704 = vmatprep.subr.mxu1 %v3476_v60  ;;  %4628 = vmatpush2.msra.mxu0 %v3347_v53  ;;  %v3448_v8 = vld [vmem:[#allocation8 + $0x1eb8] sm:$0xff]  ;;  %v3319_v47 = vld [vmem:[#allocation8 + $0x1ab0] sm:$0xff] }
 0x463   :  { %4705 = vmatpush2.msra.mxu1 %v3475_v1  ;;  %4629 = vmatprep.subr.mxu0 %v3344_v18  ;;  %v3447_v54 = vld [vmem:[#allocation8 + $0x1eb0] sm:$0xff]  ;;  %v3316_v26 = vld [vmem:[#allocation8 + $0x1a98] sm:$0xff] }
 0x464   :  { %4706 = vmatprep.subr.mxu1 %v3472_v19  ;;  %4630 = vmatpush2.msra.mxu0 %v3343_v37  ;;  %v3444_v23 = vld [vmem:[#allocation8 + $0x1e98] sm:$0xff]  ;;  %v3315_v0 = vld [vmem:[#allocation8 + $0x1a90] sm:$0xff] }
 0x465   :  { %4707 = vmatpush2.msra.mxu1 %v3471_v24  ;;  %4631 = vmatprep.subr.mxu0 %v3340_v28  ;;  %v3443_v6 = vld [vmem:[#allocation8 + $0x1e90] sm:$0xff]  ;;  %v3312_v25 = vld [vmem:[#allocation8 + $0x1a78] sm:$0xff] }
 0x466   :  { %4708 = vmatprep.subr.mxu1 %v3468_v50  ;;  %4632 = vmatpush2.msra.mxu0 %v3339_v10  ;;  %v3440_v42 = vld [vmem:[#allocation8 + $0x1e78] sm:$0xff]  ;;  %v3311_v61 = vld [vmem:[#allocation8 + $0x1a70] sm:$0xff] }
 0x467   :  { %4709 = vmatpush2.msra.mxu1 %v3467_v41  ;;  %4633 = vmatprep.subr.mxu0 %v3336_v2  ;;  %v3439_v7 = vld [vmem:[#allocation8 + $0x1e70] sm:$0xff]  ;;  %v3308_v22 = vld [vmem:[#allocation8 + $0x1a58] sm:$0xff] }
 0x468   :  { %4710 = vmatprep.subr.mxu1 %v3464_v3  ;;  %4634 = vmatpush2.msra.mxu0 %v3335_v4  ;;  %v3436_v36 = vld [vmem:[#allocation8 + $0x1e58] sm:$0xff]  ;;  %v3307_v49 = vld [vmem:[#allocation8 + $0x1a50] sm:$0xff] }
 0x469   :  { %4711 = vmatpush2.msra.mxu1 %v3463_v5  ;;  %4635 = vmatprep.subr.mxu0 %v3332_v43  ;;  %v3435_v9 = vld [vmem:[#allocation8 + $0x1e50] sm:$0xff]  ;;  %v3304_v52 = vld [vmem:[#allocation8 + $0x1a38] sm:$0xff] }
 0x46a   :  { %4712 = vmatprep.subr.mxu1 %v3460_v33  ;;  %4636 = vmatpush2.msra.mxu0 %v3331_v30  ;;  %v3432_v46 = vld [vmem:[#allocation8 + $0x1e38] sm:$0xff]  ;;  %v3303_v48 = vld [vmem:[#allocation8 + $0x1a30] sm:$0xff] }
 0x46b   :  { %4713 = vmatpush2.msra.mxu1 %v3459_v17  ;;  %4637 = vmatprep.subr.mxu0 %v3328_v34  ;;  %v3431_v12 = vld [vmem:[#allocation8 + $0x1e30] sm:$0xff]  ;;  %v3300_v29 = vld [vmem:[#allocation8 + $0x1a18] sm:$0xff] }
 0x46c   :  { %4714 = vmatprep.subr.mxu1 %v3456_v45  ;;  %4638 = vmatpush2.msra.mxu0 %v3327_v58  ;;  %v3428_v40 = vld [vmem:[#allocation8 + $0x1e18] sm:$0xff]  ;;  %v3299_v60 = vld [vmem:[#allocation8 + $0x1a10] sm:$0xff] }
 0x46d   :  { %4715 = vmatpush2.msra.mxu1 %v3455_v11  ;;  %4639 = vmatprep.subr.mxu0 %v3324_v14  ;;  %v3427_v53 = vld [vmem:[#allocation8 + $0x1e10] sm:$0xff] }
 0x46e   :  { %4716 = vmatprep.subr.mxu1 %v3452_v13  ;;  %4640 = vmatpush2.msra.mxu0 %v3323_v27 }
 0x46f   :  { %4717 = vmatpush2.msra.mxu1 %v3451_v59  ;;  %4641 = vmatprep.subr.mxu0 %v3320_v44  ;;  %v4193_v1 = vpop.f32.mrf.mxu0 }
 0x470   :  { %4718 = vmatprep.subr.mxu1 %v3448_v8  ;;  %4642 = vmatpush2.msra.mxu0 %v3319_v47  ;;  %v4270_v18 = vpop.f32.mrf.mxu1 }
 0x471   :  { %4719 = vmatpush2.msra.mxu1 %v3447_v54  ;;  %4643 = vmatprep.subr.mxu0 %v3316_v26  ;;  %v4195_v19 = vpop.f32.mrf.mxu0 }
 0x472   :  { %4720 = vmatprep.subr.mxu1 %v3444_v23  ;;  %4644 = vmatpush2.msra.mxu0 %v3315_v0  ;;  %v4272_v62 = vpop.f32.mrf.mxu1  ;;  %v4196_v10 = vadd.f32 %v4195_v19, %v3506_v63 }
 0x473   :  { %4721 = vmatpush2.msra.mxu1 %v3443_v6  ;;  %4645 = vmatprep.subr.mxu0 %v3312_v25 }
 0x474   :  { %4722 = vmatprep.subr.mxu1 %v3440_v42  ;;  %4646 = vmatpush2.msra.mxu0 %v3311_v61  ;;  %v4273_v5 = vadd.f32 %v4272_v62, %v4196_v10 }
 0x475   :  { %4723 = vmatpush2.msra.mxu1 %v3439_v7  ;;  %4647 = vmatprep.subr.mxu0 %v3308_v22 }
 0x476   :  { %4724 = vmatprep.subr.mxu1 %v3436_v36  ;;  %4648 = vmatpush2.msra.mxu0 %v3307_v49  ;;  %v4276_v37 = vpop.f32.mrf.mxu1 }
 0x477   :  { %4725 = vmatpush2.msra.mxu1 %v3435_v9  ;;  %4649 = vmatprep.subr.mxu0 %v3304_v52 }
 0x478   :  { %4726 = vmatprep.subr.mxu1 %v3432_v46  ;;  %4650 = vmatpush2.msra.mxu0 %v3303_v48 }
 0x479   :  { %4727 = vmatpush2.msra.mxu1 %v3431_v12  ;;  %4651 = vmatprep.subr.mxu0 %v3300_v29 }
 0x47a   :  { %4728 = vmatprep.subr.mxu1 %v3428_v40  ;;  %4652 = vmatpush2.msra.mxu0 %v3299_v60 }
 0x47b   :  { %4729 = vmatpush2.msra.mxu1 %v3427_v53  ;;  %4654 = vmatmul.mubr.f32.vlgmr.msra.gmra.mxu0 %v2445_v21  ;;  %v4199_v21 = vpop.f32.mrf.mxu0 }
 0x47c   :  { %4731 = vmatmul.mubr.f32.vlgmr.msra.gmra.mxu1 %v2447_v35  ;;  %4659 = vmatprep.mubr.f32.mxu0 %v2462_v56  ;;  %v4278_v35 = vpop.f32.mrf.mxu1  ;;  %v4200_v4 = vadd.f32 %v4199_v21, %v3502_v31 }
 0x47d   :  { %4736 = vmatprep.mubr.f32.mxu1 %v2464_v51  ;;  %v4201_v57 = vpop.f32.mrf.mxu0 }
 0x47e   :  { %v4202_v43 = vadd.f32 %v4201_v57, %v3506_v63  ;;  %v4277_v34 = vadd.f32 %v4276_v37, %v4200_v4 }
 0x47f   :  { %4660 = vmatmul.mubr.f32.gmra.mxu0 %v2461_v16 }
 0x480   :  { %4737 = vmatmul.mubr.f32.gmra.mxu1 %v2463_v39  ;;  %v4194_v39 = vadd.f32 %v4193_v1, %v3502_v31  ;;  %v4279_v45 = vadd.f32 %v4278_v35, %v4202_v43 }
 0x482   :  { %v4271_v3 = vadd.f32 %v4270_v18, %v4194_v39 }
 0x4b3   :  { %v4347_v24 = vpop.f32.mrf.mxu0 }
 0x4b4   :  { %v4424_v38 = vpop.f32.mrf.mxu1  ;;  %v4348_v33 = vadd.f32 %v4347_v24, %v4271_v3 }
 0x4b5   :  { %v4349_v56 = vpop.f32.mrf.mxu0 }
 0x4b6   :  { %v4426_v28 = vpop.f32.mrf.mxu1  ;;  %v4350_v20 = vadd.f32 %v4349_v56, %v4273_v5  ;;  %v4425_v58 = vadd.f32 %v4424_v38, %v4348_v33 }
 0x4b8   :  { %v4427_v55 = vadd.f32 %v4426_v28, %v4350_v20 }
 0x4b9   :  { %v4353_v15 = vpop.f32.mrf.mxu0 }
 0x4ba   :  { %v4430_v51 = vpop.f32.mrf.mxu1  ;;  %v4354_v11 = vadd.f32 %v4353_v15, %v4277_v34 }
 0x4bb   :  { %v4355_v16 = vpop.f32.mrf.mxu0 }
 0x4bc   :  { %v4432_v50 = vpop.f32.mrf.mxu1  ;;  %v4356_v13 = vadd.f32 %v4355_v16, %v4279_v45  ;;  %v4431_v59 = vadd.f32 %v4430_v51, %v4354_v11 }
 0x4be   :  { %v4433_v54 = vadd.f32 %v4432_v50, %v4356_v13 }
 0x4f7   :  { %v4501_v41 = vpop.f32.mrf.mxu0 }
 0x4f8   :  { %v4578_v2 = vpop.f32.mrf.mxu1  ;;  %v4502_v27 = vadd.f32 %v4501_v41, %v4425_v58 }
 0x4f9   :  { %v4503_v30 = vpop.f32.mrf.mxu0 }
 0x4fa   :  { %v4580_v17 = vpop.f32.mrf.mxu1  ;;  %v4504_v44 = vadd.f32 %v4503_v30, %v4427_v55  ;;  %v4579_v26 = vadd.f32 %v4578_v2, %v4502_v27 }
 0x4fc   :  { %v4581_v25 = vadd.f32 %v4580_v17, %v4504_v44 }
 0x4fd   :  { %v4507_v14 = vpop.f32.mrf.mxu0 }
 0x4fe   :  { %v4584_v32 = vpop.f32.mrf.mxu1  ;;  %v4508_v23 = vadd.f32 %v4507_v14, %v4431_v59 }
 0x4ff   :  { %v4509_v8 = vpop.f32.mrf.mxu0 }
 0x500   :  { %v4586_v47 = vpop.f32.mrf.mxu1  ;;  %v4510_v42 = vadd.f32 %v4509_v8, %v4433_v54  ;;  %v4585_v36 = vadd.f32 %v4584_v32, %v4508_v23 }
 0x502   :  { %v4587_v48 = vadd.f32 %v4586_v47, %v4510_v42 }
 0x53b   :  { %v4655_v0 = vpop.f32.mrf.mxu0 }
 0x53c   :  { %v4732_v6 = vpop.f32.mrf.mxu1  ;;  %v4656_v61 = vadd.f32 %v4655_v0, %v4579_v26 }
 0x53d   :  { %v4657_v7 = vpop.f32.mrf.mxu0 }
 0x53e   :  { %v4734_v22 = vpop.f32.mrf.mxu1  ;;  %v4733_v49 = vadd.f32 %v4732_v6, %v4656_v61  ;;  %v4658_v9 = vadd.f32 %v4657_v7, %v4581_v25 }
 0x53f   :  { %v4661_v52 = vpop.f32.mrf.mxu0 }
 0x540   :  { %v4738_v46 = vpop.f32.mrf.mxu1  ;;  %4745 = vst [vmem:[#allocation11 + $0x10] sm:$0xff] %v4733_v49  ;;  %v4735_v12 = vadd.f32 %v4734_v22, %v4658_v9  ;;  %v4662_v29 = vadd.f32 %v4661_v52, %v4585_v36 }
 0x541   :  { %v4663_v40 = vpop.f32.mrf.mxu0 }
 0x542   :  { %4746 = vst [vmem:[#allocation11 + $0x18] sm:$0xff] %v4735_v12  ;;  %v4739_v60 = vadd.f32 %v4738_v46, %v4662_v29  ;;  %v4664_v53 = vadd.f32 %v4663_v40, %v4587_v48  ;;  %v4740_v1 = vpop.f32.mrf.mxu1 }
 0x544   :  { %4749 = vst [vmem:[#allocation11 + $0x30] sm:$0xff] %v4739_v60  ;;  %v4741_v18 = vadd.f32 %v4740_v1, %v4664_v53 }
 0x546   :  { %4750 = vst [vmem:[#allocation11 + $0x38] sm:$0xff] %v4741_v18 }
 0x547   :  { %4920 = shalt.err (!%p4917_p1)
}
 0x548   :  { %4762 = dma.vmem_to_hbm [thread:$0]  %s4757_s4, 1024, %s5634_s5, [#allocation4], %s4942_s30, %s4942_s30, %s4943_s6  }
 0x549   :  { %4935 = dma.done.wait [#allocation4], 1024  }
 0x54a   :  { %4936 = vsyncadd [#allocation4], 4294966272 }
 0x54b   :  { %4766 = vsyncpa [#allocation3], 1 }
 0x54c   :  { %4767 = vsyncpa [#allocation6], 1 }
 0x54d   :  { %4768 = vsyncpa [#allocation9], 1 }
 0x54e   :  { %4769 = vsyncpa [#allocation4], 1 }

</bundles_post_ra>
